<compile_context>
chip_gen: v7x
topology: tpu7x:2x2x1
jax: 0.10.0
libtpu: 0.0.40
codegen_flags: <defaults>
</compile_context>

<pallas_src>
import functools

import jax
import jax.numpy as jnp
from jax.experimental import pallas as pl
from jax.experimental.pallas import tpu as pltpu

LN_EPS = 1e-5
MXU_DTYPE = jnp.bfloat16     # MXU operand dtype; accumulation is always f32.
ACT_DTYPE = jnp.bfloat16     # inter-layer activation carry dtype.
ROW_ALIGN = 16               # sublane alignment for bf16 activation blocks.
NEG_INF = -1e30

_WEIGHT_BUFFERING = pl.Buffered(1)   # grid-invariant: DMA once, single buffer.


# ---------------------------------------------------------------------------
# In-kernel helpers
# ---------------------------------------------------------------------------
def _layernorm(x, g, b, eps):
    """LayerNorm over the last axis; g/b are (1, D) rows. Stats in f32."""
    mu = jnp.mean(x, axis=-1, keepdims=True)
    xc = x - mu
    var = jnp.mean(xc * xc, axis=-1, keepdims=True)
    return xc * jax.lax.rsqrt(var + eps) * g + b


def _gelu_tanh(x):
    # TODO(synk): torch nn.GELU defaults to the exact erf form; Mosaic has no
    # guaranteed erf lowering, so the tanh approximation is used in-kernel.
    c = 0.7978845608028654  # sqrt(2/pi)
    return 0.5 * x * (1.0 + jnp.tanh(c * (x + 0.044715 * x * x * x)))


# ---------------------------------------------------------------------------
# Kernels
# ---------------------------------------------------------------------------
def linear_kernel(x_ref, w_ref, b_ref, o_ref):
    """Row-tiled y = x @ W + b (patch embedding)."""
    o_ref[...] = (jnp.dot(x_ref[...].astype(w_ref.dtype), w_ref[...],
                          preferred_element_type=jnp.float32)
                  + b_ref[...]).astype(o_ref.dtype)


def fused_layer_kernel(*refs, heads, dim_head, eps, n_pad, n_valid, tb,
                       has_final_norm):
    """One full Transformer layer on a (tb*n_pad, dim) row block:
       x = x + Wout(MHA(LN(x)));  x = x + FF(LN(x));  [x = LN_final(x)]."""
    if has_final_norm:
        (x_ref, ag_ref, ab_ref, wqkv_ref, wout_ref, bout_ref,
         fg_ref, fb_ref, w1_ref, b1_ref, w2_ref, b2_ref,
         ng_ref, nb_ref, o_ref) = refs
    else:
        (x_ref, ag_ref, ab_ref, wqkv_ref, wout_ref, bout_ref,
         fg_ref, fb_ref, w1_ref, b1_ref, w2_ref, b2_ref, o_ref) = refs
        ng_ref = nb_ref = None

    inner = heads * dim_head
    x = x_ref[...].astype(jnp.float32)                     # (tb*n_pad, dim)

    # ---------------- PreNorm -> multi-head attention -> +residual ---------
    xn = _layernorm(x, ag_ref[...], ab_ref[...], eps)
    # Single lane-dense QKV matmul, MXU M = tb*n_pad (row-batched). The softmax
    # scale is pre-folded into the Q columns of wqkv at host-side prep.
    qkv = jnp.dot(xn.astype(wqkv_ref.dtype), wqkv_ref[...],
                  preferred_element_type=jnp.float32)      # (rows, 3*inner)

    wout = wout_ref[...]                                   # (heads, dh, dim)

    key_bias = None
    if n_valid < n_pad:                                    # mask padded keys
        col = jax.lax.broadcasted_iota(jnp.int32, (n_pad, n_pad), 1)
        key_bias = jnp.where(col < n_valid, 0.0, NEG_INF).astype(
            jnp.float32)[None]

    # Attention core, statically unrolled over the tb sequences in the block;
    # every contraction is a supported head-batched (single leading batch dim)
    # einsum.
    # TODO(synk): Mosaic's dot_general does not lower the rank-2 x rank-3
    # head-major form 'md,gdk->gmk', so heads are split with static slices of
    # the flat MXU result + one stack per tensor; revisit when supported.
    attn_rows = []
    for b in range(tb):
        r0 = b * n_pad

        def head_stack(base, r0=r0):
            return jnp.stack(
                [qkv[r0:r0 + n_pad,
                     base + h * dim_head: base + (h + 1) * dim_head]
                 for h in range(heads)], axis=0)           # (heads, n, dh)

        q = head_stack(0).astype(MXU_DTYPE)                # Q already scaled
        k = head_stack(inner).astype(MXU_DTYPE)
        v = head_stack(2 * inner).astype(MXU_DTYPE)

        dots = jnp.einsum('hid,hjd->hij', q, k,
                          preferred_element_type=jnp.float32)   # (h, n, n)
        if key_bias is not None:
            dots = dots + key_bias

        m = jnp.max(dots, axis=-1, keepdims=True)
        e = jnp.exp(dots - m)
        p = e * pl.reciprocal(jnp.sum(e, axis=-1, keepdims=True), approx=True)

        ctx = jnp.einsum('hij,hjd->hid', p.astype(MXU_DTYPE), v,
                         preferred_element_type=jnp.float32)    # (h, n, dh)

        # Head-batched output projection; result stays lane-dense (n, dim).
        # TODO(synk): a single 'hnd,hdo->no' contraction (head reduction in the
        # MXU accumulator) is not a supported dot_general form in Mosaic; the
        # head sum stays as (heads-1) cheap VPU tile adds.
        yh = jnp.einsum('hnd,hdo->hno', ctx.astype(MXU_DTYPE), wout,
                        preferred_element_type=jnp.float32)     # (h, n, dim)
        yb = yh[0]
        for h in range(1, heads):
            yb = yb + yh[h]
        attn_rows.append(yb)

    attn_out = jnp.concatenate(attn_rows, axis=0)          # (rows, dim)
    x = x + attn_out + bout_ref[...]

    # ---------------- PreNorm -> FeedForward -> +residual -------------------
    xn2 = _layernorm(x, fg_ref[...], fb_ref[...], eps)
    h1 = jnp.dot(xn2.astype(w1_ref.dtype), w1_ref[...],
                 preferred_element_type=jnp.float32) + b1_ref[...]
    h1 = _gelu_tanh(h1)
    y2 = jnp.dot(h1.astype(w2_ref.dtype), w2_ref[...],
                 preferred_element_type=jnp.float32) + b2_ref[...]
    x = x + y2

    if has_final_norm:                                     # folded stack LN
        x = _layernorm(x, ng_ref[...], nb_ref[...], eps)
    o_ref[...] = x.astype(o_ref.dtype)


def mlp_head_kernel(x_ref, g_ref, b_ref, w_ref, bo_ref, o_ref, *, eps):
    xn = _layernorm(x_ref[...].astype(jnp.float32), g_ref[...], b_ref[...], eps)
    o_ref[...] = (jnp.dot(xn.astype(w_ref.dtype), w_ref[...],
                          preferred_element_type=jnp.float32)
                  + bo_ref[...]).astype(o_ref.dtype)


# ---------------------------------------------------------------------------
# pallas_call wrappers
# ---------------------------------------------------------------------------
def _round_up(x, m):
    return (x + m - 1) // m * m


@functools.lru_cache(maxsize=None)
def _vmem_limit_bytes():
    """Per-generation scoped VMEM limit: ~100 MiB on 128-MiB chips (v5e/v6e),
    ~48 MiB on v7x's 64 MiB; falls back to 48 MiB if the query fails."""
    try:
        cap = int(pltpu.get_tpu_info().vmem_capacity_bytes)
    except Exception:
        cap = 64 << 20
    return int(min(max(cap - (16 << 20), 32 << 20), 100 << 20))


def _compiler_params():
    return pltpu.CompilerParams(dimension_semantics=("parallel",),
                                vmem_limit_bytes=_vmem_limit_bytes())


def _weight_spec(shape):
    """Grid-invariant weight/bias: constant block index, single VMEM buffer."""
    nd = len(shape)
    return pl.BlockSpec(shape, lambda *_: (0,) * nd,
                        pipeline_mode=_WEIGHT_BUFFERING)


def _pick_tb(num_seqs, n_pad, target_rows=256):
    """Sequences per block: row count ROW_ALIGN-aligned, <= target MXU-M rows,
    >=2 grid points (2 TCs on v7x) when possible; else full batch (block ==
    full array, always legal)."""
    cap = num_seqs // 2 if num_seqs >= 2 else 1
    best = None
    for cand in range(1, cap + 1):
        if num_seqs % cand:
            continue
        rows = cand * n_pad
        if rows % ROW_ALIGN:
            continue
        if rows > target_rows and best is not None:
            break
        best = cand
    return best if best is not None else num_seqs


def _pick_row_tile(rows, target=256):
    tr = min(target, _round_up(max(rows, 8), 8))
    if rows >= 16 and _round_up(rows, tr) // tr < 2:
        tr = _round_up((rows + 1) // 2, 8)          # keep >=2 grid points
    return tr


def pallas_linear_rows(x2d, w, b):
    """Row-tiled patch embedding: (R, patch_dim) @ (patch_dim, dim) + b."""
    rows, din = x2d.shape
    dout = w.shape[1]
    tr = _pick_row_tile(rows)
    rows_p = _round_up(rows, tr)
    if rows_p != rows:
        x2d = jnp.pad(x2d, ((0, rows_p - rows), (0, 0)))
    out = pl.pallas_call(
        linear_kernel,
        out_shape=jax.ShapeDtypeStruct((rows_p, dout), jnp.float32),
        grid=(rows_p // tr,),
        in_specs=[pl.BlockSpec((tr, din), lambda i: (i, 0)),
                  _weight_spec(w.shape), _weight_spec(b.shape)],
        out_specs=pl.BlockSpec((tr, dout), lambda i: (i, 0)),
        compiler_params=_compiler_params(),
    )(x2d, w, b)
    return out[:rows]


def pallas_fused_layer(x2d, layer, *, heads, dim_head, n_pad, n_valid, tb,
                       final_norm=None):
    rows, dim = x2d.shape
    blk_rows = tb * n_pad
    a, f = layer['attn'], layer['ff']
    ops = [x2d, a['ln_g'], a['ln_b'], a['wqkv'], a['wout'], a['bout'],
           f['ln_g'], f['ln_b'], f['w1'], f['b1'], f['w2'], f['b2']]
    if final_norm is not None:
        ops += [final_norm[0], final_norm[1]]
    kern = functools.partial(
        fused_layer_kernel, heads=heads, dim_head=dim_head, eps=LN_EPS,
        n_pad=n_pad, n_valid=n_valid, tb=tb,
        has_final_norm=final_norm is not None)
    in_specs = ([pl.BlockSpec((blk_rows, dim), lambda i: (i, 0))]
                + [_weight_spec(o.shape) for o in ops[1:]])
    return pl.pallas_call(
        kern,
        out_shape=jax.ShapeDtypeStruct((rows, dim), ACT_DTYPE),
        grid=(rows // blk_rows,),
        in_specs=in_specs,
        out_specs=pl.BlockSpec((blk_rows, dim), lambda i: (i, 0)),
        compiler_params=_compiler_params(),
    )(*ops)


def pallas_transformer(x, tp, *, heads, dim_head):
    """x: (num_seqs, n, dim).  Whole depth-layer stack (final LayerNorm folded
    into the last fused layer) on a zero-padded, row-flattened bf16 stream."""
    num_seqs, n, dim = x.shape
    n_pad = _round_up(n, 8)
    if n_pad != n:
        x = jnp.pad(x, ((0, 0), (0, n_pad - n), (0, 0)))
    x2d = x.reshape(num_seqs * n_pad, dim).astype(ACT_DTYPE)
    tb = _pick_tb(num_seqs, n_pad)
    layers = tp['layers']
    for li, layer in enumerate(layers):
        fin = (tp['norm_g'], tp['norm_b']) if li == len(layers) - 1 else None
        x2d = pallas_fused_layer(x2d, layer, heads=heads, dim_head=dim_head,
                                 n_pad=n_pad, n_valid=n, tb=tb, final_norm=fin)
    return x2d.reshape(num_seqs, n_pad, dim)[:, :n]


def pallas_mlp_head(x, p):
    b, dim = x.shape
    ncls = p['w'].shape[1]
    kern = functools.partial(mlp_head_kernel, eps=LN_EPS)
    # TODO(synk): grid=(1,) leaves one v7x TensorCore idle; add a row-tile axis
    # once the batch is large enough to split along 8-row sublane tiles.
    return pl.pallas_call(
        kern,
        out_shape=jax.ShapeDtypeStruct((b, ncls), jnp.float32),
        grid=(1,),
        in_specs=[pl.BlockSpec((b, dim), lambda i: (0, 0)),
                  _weight_spec(p['ln_g'].shape), _weight_spec(p['ln_b'].shape),
                  _weight_spec(p['w'].shape), _weight_spec(p['b'].shape)],
        out_specs=pl.BlockSpec((b, ncls), lambda i: (0, 0)),
        compiler_params=_compiler_params(),
    )(x, p['ln_g'], p['ln_b'], p['w'], p['b'])


# ---------------------------------------------------------------------------
# Full ViViT forward (Pallas kernels for compute; pure-layout glue in XLA)
# ---------------------------------------------------------------------------
def vivit_forward(video, params, cfg):
    b, t, c, H, W = video.shape
    ps, dim = cfg['patch_size'], cfg['dim']
    hh, ww = H // ps, W // ps
    n_p = hh * ww

    # Rearrange 'b t c (h p1) (w p2) -> (b t h w) (p1 p2 c)'  (layout glue).
    xp = video.reshape(b, t, c, hh, ps, ww, ps)
    xp = xp.transpose(0, 1, 3, 5, 4, 6, 2).reshape(b * t * n_p, ps * ps * c)

    # Patch embedding (row-tiled Pallas matmul).
    x = pallas_linear_rows(xp, params['w_pe'], params['b_pe'])
    x = x.reshape(b, t, n_p, dim)

    # Spatial cls token + positional embedding (glue); emb dropout p=0 -> id.
    cls_s = jnp.broadcast_to(params['space_token'], (b, t, 1, dim))
    x = jnp.concatenate([cls_s, x], axis=2)
    x = x + params['pos_embedding'][:, :, :n_p + 1]

    # Space transformer over the (b*t) flattened frame batch.
    x = x.reshape(b * t, n_p + 1, dim)
    x = pallas_transformer(x, params['space'],
                           heads=cfg['heads'], dim_head=cfg['dim_head'])

    # Per-frame spatial cls token -> temporal sequence with temporal cls token.
    x = x[:, 0].reshape(b, t, dim)
    cls_t = jnp.broadcast_to(params['temporal_token'], (b, 1, dim)).astype(x.dtype)
    x = jnp.concatenate([cls_t, x], axis=1)
    x = pallas_transformer(x, params['temporal'],
                           heads=cfg['heads'], dim_head=cfg['dim_head'])

    # pool='cls'
    x = x[:, 0]
    return pallas_mlp_head(x, params['head'])


# ---------------------------------------------------------------------------
# Parameters
# ---------------------------------------------------------------------------
def init_raw_params(key, cfg):
    dim, heads, dim_head = cfg['dim'], cfg['heads'], cfg['dim_head']
    depth = cfg['depth']
    mlp_dim = cfg['dim'] * cfg['scale_dim']
    inner = heads * dim_head
    patch_dim = cfg['in_channels'] * cfg['patch_size'] ** 2
    n_p = (cfg['image_size'] // cfg['patch_size']) ** 2

    keys = iter(jax.random.split(key, 256))
    nrm = lambda shape, s=0.05: s * jax.random.normal(next(keys), shape, jnp.float32)

    def transformer_params():
        layers = []
        for _ in range(depth):
            layers.append(dict(
                attn=dict(ln_g=jnp.ones((dim,), jnp.float32),
                          ln_b=jnp.zeros((dim,), jnp.float32),
                          wqkv=nrm((dim, 3 * inner)),
                          wout=nrm((inner, dim)), bout=nrm((dim,))),
                ff=dict(ln_g=jnp.ones((dim,), jnp.float32),
                        ln_b=jnp.zeros((dim,), jnp.float32),
                        w1=nrm((dim, mlp_dim)), b1=nrm((mlp_dim,)),
                        w2=nrm((mlp_dim, dim)), b2=nrm((dim,))),
            ))
        return dict(layers=layers,
                    norm_g=jnp.ones((dim,), jnp.float32),
                    norm_b=jnp.zeros((dim,), jnp.float32))

    return dict(
        w_pe=nrm((patch_dim, dim)), b_pe=nrm((dim,)),
        pos_embedding=nrm((1, cfg['num_frames'], n_p + 1, dim), 1.0),
        space_token=nrm((1, 1, dim), 1.0),
        temporal_token=nrm((1, 1, dim), 1.0),
        space=transformer_params(),
        temporal=transformer_params(),
        head=dict(ln_g=jnp.ones((dim,), jnp.float32),
                  ln_b=jnp.zeros((dim,), jnp.float32),
                  w=nrm((dim, cfg['num_classes'])), b=nrm((cfg['num_classes'],))),
    )


def prepare_params(raw, cfg):
    """One-time host-side prep: fold the softmax scale into the Q columns of
    W_qkv, reshape W_out to (heads, dim_head, dim), reshape bias / LN vectors
    to (1, D) rows, and cast MXU weights to bf16."""
    dim, heads, dim_head = cfg['dim'], cfg['heads'], cfg['dim_head']
    inner = heads * dim_head
    scale = float(dim_head) ** -0.5
    row = lambda v: v.reshape(1, -1).astype(jnp.float32)
    col_scale = jnp.concatenate([jnp.full((inner,), scale, jnp.float32),
                                 jnp.ones((2 * inner,), jnp.float32)])

    def prep_transformer(tp):
        layers = []
        for layer in tp['layers']:
            a, f = layer['attn'], layer['ff']
            layers.append(dict(
                attn=dict(ln_g=row(a['ln_g']), ln_b=row(a['ln_b']),
                          wqkv=(a['wqkv'] * col_scale[None, :]).astype(MXU_DTYPE),
                          wout=a['wout'].reshape(heads, dim_head, dim).astype(MXU_DTYPE),
                          bout=row(a['bout'])),
                ff=dict(ln_g=row(f['ln_g']), ln_b=row(f['ln_b']),
                        w1=f['w1'].astype(MXU_DTYPE), b1=row(f['b1']),
                        w2=f['w2'].astype(MXU_DTYPE), b2=row(f['b2'])),
            ))
        return dict(layers=layers, norm_g=row(tp['norm_g']), norm_b=row(tp['norm_b']))

    return dict(
        w_pe=raw['w_pe'].astype(MXU_DTYPE), b_pe=row(raw['b_pe']),
        pos_embedding=raw['pos_embedding'],
        space_token=raw['space_token'], temporal_token=raw['temporal_token'],
        space=prep_transformer(raw['space']),
        temporal=prep_transformer(raw['temporal']),
        head=dict(ln_g=row(raw['head']['ln_g']), ln_b=row(raw['head']['ln_b']),
                  w=raw['head']['w'].astype(MXU_DTYPE), b=row(raw['head']['b'])),
    )


# ---------------------------------------------------------------------------
# Pure-JAX reference (mirrors the PyTorch module, f32 throughout)
# ---------------------------------------------------------------------------
def _layernorm_ref(x, g, b):
    mu = x.mean(-1, keepdims=True)
    var = ((x - mu) ** 2).mean(-1, keepdims=True)
    return (x - mu) / jnp.sqrt(var + LN_EPS) * g + b


def _attention_ref(x, p, heads, dim_head):
    b, n, _ = x.shape
    inner = heads * dim_head
    qkv = x @ p['wqkv']
    q, k, v = jnp.split(qkv, 3, axis=-1)
    to_h = lambda t: t.reshape(b, n, heads, dim_head).transpose(0, 2, 1, 3)
    q, k, v = map(to_h, (q, k, v))
    dots = jnp.einsum('bhid,bhjd->bhij', q, k) * (float(dim_head) ** -0.5)
    attn = jax.nn.softmax(dots, axis=-1)
    out = jnp.einsum('bhij,bhjd->bhid', attn, v)
    out = out.transpose(0, 2, 1, 3).reshape(b, n, inner)
    return out @ p['wout'] + p['bout']


def _ff_ref(x, p):
    h = jax.nn.gelu(x @ p['w1'] + p['b1'], approximate=False)  # torch nn.GELU (erf)
    return h @ p['w2'] + p['b2']


def _transformer_ref(x, tp, heads, dim_head):
    for layer in tp['layers']:
        a, f = layer['attn'], layer['ff']
        x = _attention_ref(_layernorm_ref(x, a['ln_g'], a['ln_b']), a,
                           heads, dim_head) + x
        x = _ff_ref(_layernorm_ref(x, f['ln_g'], f['ln_b']), f) + x
    return _layernorm_ref(x, tp['norm_g'], tp['norm_b'])


def vivit_reference(video, raw, cfg):
    b, t, c, H, W = video.shape
    ps, dim = cfg['patch_size'], cfg['dim']
    hh, ww = H // ps, W // ps
    n_p = hh * ww
    xp = video.reshape(b, t, c, hh, ps, ww, ps)
    xp = xp.transpose(0, 1, 3, 5, 4, 6, 2).reshape(b, t, n_p, ps * ps * c)
    x = xp @ raw['w_pe'] + raw['b_pe']
    cls_s = jnp.broadcast_to(raw['space_token'], (b, t, 1, dim))
    x = jnp.concatenate([cls_s, x], axis=2)
    x = x + raw['pos_embedding'][:, :, :n_p + 1]
    x = x.reshape(b * t, n_p + 1, dim)
    x = _transformer_ref(x, raw['space'], cfg['heads'], cfg['dim_head'])
    x = x[:, 0].reshape(b, t, dim)
    cls_t = jnp.broadcast_to(raw['temporal_token'], (b, 1, dim))
    x = jnp.concatenate([cls_t, x], axis=1)
    x = _transformer_ref(x, raw['temporal'], cfg['heads'], cfg['dim_head'])
    x = x[:, 0]
    h = raw['head']
    return _layernorm_ref(x, h['ln_g'], h['ln_b']) @ h['w'] + h['b']


# ---------------------------------------------------------------------------
if __name__ == "__main__":
    cfg = dict(image_size=16, patch_size=8, num_classes=8, num_frames=4,
               dim=32, depth=2, heads=4, dim_head=16, in_channels=3,
               scale_dim=4, pool='cls')

    key = jax.random.PRNGKey(0)
    k_video, k_params = jax.random.split(key)
    video = jax.random.normal(
        k_video,
        (2, cfg['num_frames'], cfg['in_channels'],
         cfg['image_size'], cfg['image_size']),
        jnp.float32)

    raw_params = init_raw_params(k_params, cfg)
    prep_params = prepare_params(raw_params, cfg)     # one-time weight prep

    forward = jax.jit(lambda v, p: vivit_forward(v, p, cfg))
    logits = forward(video, prep_params)
    jax.block_until_ready(logits)

    ref = vivit_reference(video, raw_params, cfg)
    assert logits.shape == (2, cfg['num_classes'])
    max_err = float(jnp.max(jnp.abs(logits - ref)))
    assert jnp.allclose(logits, ref, atol=5e-2, rtol=5e-2), \
        f"max abs err = {max_err}"
    print("KERNEL_OK")
</pallas_src>

<mosaic_0001>
module attributes {stable_mosaic.version = 11 : i64} {
  func.func @linear_kernel(%arg0: i32, %arg1: memref<16x192xf32, #tpu.memory_space<vmem>>, %arg2: memref<192x32xbf16, #tpu.memory_space<vmem>>, %arg3: memref<1x32xf32, #tpu.memory_space<vmem>>, %arg4: memref<16x32xf32, #tpu.memory_space<vmem>>) attributes {dimension_semantics = [#tpu.dimension_semantics<parallel>], iteration_bounds = array<i64: 2>, scalar_prefetch = 0 : i64, scratch_operands = 0 : i64, tpu.core_type = #tpu.core_type<tc>, window_params = [{transform_indices = @transform_0, window_bounds = array<i64: 16, 192>}, {pipeline_mode = #tpu.pipeline_mode<synchronous>, transform_indices = @transform_1, window_bounds = array<i64: 192, 32>}, {pipeline_mode = #tpu.pipeline_mode<synchronous>, transform_indices = @transform_2, window_bounds = array<i64: 1, 32>}, {transform_indices = @transform_3, window_bounds = array<i64: 16, 32>}]} {
    %c0 = arith.constant 0 : index
    %c0_0 = arith.constant 0 : index
    %0 = vector.load %arg1[%c0, %c0_0] : memref<16x192xf32, #tpu.memory_space<vmem>>, vector<16x192xf32>
    %1 = arith.truncf %0 : vector<16x192xf32> to vector<16x192xbf16>
    %c0_1 = arith.constant 0 : index
    %c0_2 = arith.constant 0 : index
    %2 = vector.load %arg2[%c0_1, %c0_2] : memref<192x32xbf16, #tpu.memory_space<vmem>>, vector<192x32xbf16>
    %cst = arith.constant dense<0.000000e+00> : vector<16x32xf32>
    %3 = tpu.matmul %1, %2, %cst {dimension_numbers = #tpu.dot_dimension_numbers<[1], [0], [0], [1], [0, 0, 1, 1], [], []>} : vector<16x192xbf16>, vector<192x32xbf16>, vector<16x32xf32> -> vector<16x32xf32>
    %c0_3 = arith.constant 0 : index
    %c0_4 = arith.constant 0 : index
    %4 = vector.load %arg3[%c0_3, %c0_4] : memref<1x32xf32, #tpu.memory_space<vmem>>, vector<1x32xf32>
    %5 = vector.broadcast %4 : vector<1x32xf32> to vector<16x32xf32>
    %6 = arith.addf %3, %5 : vector<16x32xf32>
    %c0_5 = arith.constant 0 : index
    %c0_6 = arith.constant 0 : index
    %7 = vector.load %arg4[%c0_5, %c0_6] : memref<16x32xf32, #tpu.memory_space<vmem>>, vector<16x32xf32>
    tpu.vector_store %arg4[%c0_5, %c0_6], %6 {strides = array<i32>} : memref<16x32xf32, #tpu.memory_space<vmem>>, vector<16x32xf32>,
    return
  }
  func.func @transform_0(%arg0: i32) -> (i32, i32) {
    %c0_i32 = arith.constant 0 : i32
    %c0_i32_0 = arith.constant 0 : i32
    return %arg0, %c0_i32 : i32, i32
  }
  func.func @transform_1(%arg0: i32) -> (i32, i32) {
    %c0_i32 = arith.constant 0 : i32
    %c0_i32_0 = arith.constant 0 : i32
    %c0_i32_1 = arith.constant 0 : i32
    return %c0_i32, %c0_i32_0 : i32, i32
  }
  func.func @transform_2(%arg0: i32) -> (i32, i32) {
    %c0_i32 = arith.constant 0 : i32
    %c0_i32_0 = arith.constant 0 : i32
    %c0_i32_1 = arith.constant 0 : i32
    return %c0_i32, %c0_i32_0 : i32, i32
  }
  func.func @transform_3(%arg0: i32) -> (i32, i32) {
    %c0_i32 = arith.constant 0 : i32
    %c0_i32_0 = arith.constant 0 : i32
    return %arg0, %c0_i32 : i32, i32
  }
}

module attributes {stable_mosaic.version = 11 : i64} {
  func.func @fused_layer_kernel(%arg0: i32, %arg1: memref<32x32xbf16, #tpu.memory_space<vmem>>, %arg2: memref<1x32xf32, #tpu.memory_space<vmem>>, %arg3: memref<1x32xf32, #tpu.memory_space<vmem>>, %arg4: memref<32x192xbf16, #tpu.memory_space<vmem>>, %arg5: memref<4x16x32xbf16, #tpu.memory_space<vmem>>, %arg6: memref<1x32xf32, #tpu.memory_space<vmem>>, %arg7: memref<1x32xf32, #tpu.memory_space<vmem>>, %arg8: memref<1x32xf32, #tpu.memory_space<vmem>>, %arg9: memref<32x128xbf16, #tpu.memory_space<vmem>>, %arg10: memref<1x128xf32, #tpu.memory_space<vmem>>, %arg11: memref<128x32xbf16, #tpu.memory_space<vmem>>, %arg12: memref<1x32xf32, #tpu.memory_space<vmem>>, %arg13: memref<32x32xbf16, #tpu.memory_space<vmem>>) attributes {dimension_semantics = [#tpu.dimension_semantics<parallel>], iteration_bounds = array<i64: 2>, scalar_prefetch = 0 : i64, scratch_operands = 0 : i64, tpu.core_type = #tpu.core_type<tc>, window_params = [{transform_indices = @transform_0, window_bounds = array<i64: 32, 32>}, {pipeline_mode = #tpu.pipeline_mode<synchronous>, transform_indices = @transform_1, window_bounds = array<i64: 1, 32>}, {pipeline_mode = #tpu.pipeline_mode<synchronous>, transform_indices = @transform_2, window_bounds = array<i64: 1, 32>}, {pipeline_mode = #tpu.pipeline_mode<synchronous>, transform_indices = @transform_3, window_bounds = array<i64: 32, 192>}, {pipeline_mode = #tpu.pipeline_mode<synchronous>, transform_indices = @transform_4, window_bounds = array<i64: 4, 16, 32>}, {pipeline_mode = #tpu.pipeline_mode<synchronous>, transform_indices = @transform_5, window_bounds = array<i64: 1, 32>}, {pipeline_mode = #tpu.pipeline_mode<synchronous>, transform_indices = @transform_6, window_bounds = array<i64: 1, 32>}, {pipeline_mode = #tpu.pipeline_mode<synchronous>, transform_indices = @transform_7, window_bounds = array<i64: 1, 32>}, {pipeline_mode = #tpu.pipeline_mode<synchronous>, transform_indices = @transform_8, window_bounds = array<i64: 32, 128>}, {pipeline_mode = #tpu.pipeline_mode<synchronous>, transform_indices = @transform_9, window_bounds = array<i64: 1, 128>}, {pipeline_mode = #tpu.pipeline_mode<synchronous>, transform_indices = @transform_10, window_bounds = array<i64: 128, 32>}, {pipeline_mode = #tpu.pipeline_mode<synchronous>, transform_indices = @transform_11, window_bounds = array<i64: 1, 32>}, {transform_indices = @transform_12, window_bounds = array<i64: 32, 32>}]} {
    %c0 = arith.constant 0 : index
    %c0_0 = arith.constant 0 : index
    %0 = vector.load %arg1[%c0, %c0_0] : memref<32x32xbf16, #tpu.memory_space<vmem>>, vector<32x32xbf16>
    %1 = arith.extf %0 : vector<32x32xbf16> to vector<32x32xf32>
    %c0_1 = arith.constant 0 : index
    %c0_2 = arith.constant 0 : index
    %2 = vector.load %arg2[%c0_1, %c0_2] : memref<1x32xf32, #tpu.memory_space<vmem>>, vector<1x32xf32>
    %c0_3 = arith.constant 0 : index
    %c0_4 = arith.constant 0 : index
    %3 = vector.load %arg3[%c0_3, %c0_4] : memref<1x32xf32, #tpu.memory_space<vmem>>, vector<1x32xf32>
    %cst = arith.constant dense<0.000000e+00> : vector<32xf32>
    %4 = vector.multi_reduction <add>, %1, %cst [1] : vector<32x32xf32> to vector<32xf32>
    %5 = vector.shape_cast %4 : vector<32xf32> to vector<32x1xf32>
    %cst_5 = arith.constant 3.200000e+01 : f32
    %6 = vector.broadcast %cst_5 : f32 to vector<32x1xf32>
    %7 = arith.divf %5, %6 : vector<32x1xf32>
    %8 = vector.broadcast %7 : vector<32x1xf32> to vector<32x32xf32>
    %9 = arith.subf %1, %8 : vector<32x32xf32>
    %10 = arith.mulf %9, %9 : vector<32x32xf32>
    %cst_6 = arith.constant dense<0.000000e+00> : vector<32xf32>
    %11 = vector.multi_reduction <add>, %10, %cst_6 [1] : vector<32x32xf32> to vector<32xf32>
    %12 = vector.shape_cast %11 : vector<32xf32> to vector<32x1xf32>
    %cst_7 = arith.constant 3.200000e+01 : f32
    %13 = vector.broadcast %cst_7 : f32 to vector<32x1xf32>
    %14 = arith.divf %12, %13 : vector<32x1xf32>
    %cst_8 = arith.constant 9.99999974E-6 : f32
    %15 = vector.broadcast %cst_8 : f32 to vector<32x1xf32>
    %16 = arith.addf %14, %15 : vector<32x1xf32>
    %17 = math.rsqrt %16 : vector<32x1xf32>
    %18 = vector.broadcast %17 : vector<32x1xf32> to vector<32x32xf32>
    %19 = arith.mulf %9, %18 : vector<32x32xf32>
    %20 = vector.broadcast %2 : vector<1x32xf32> to vector<32x32xf32>
    %21 = arith.mulf %19, %20 : vector<32x32xf32>
    %22 = vector.broadcast %3 : vector<1x32xf32> to vector<32x32xf32>
    %23 = arith.addf %21, %22 : vector<32x32xf32>
    %24 = arith.truncf %23 : vector<32x32xf32> to vector<32x32xbf16>
    %c0_9 = arith.constant 0 : index
    %c0_10 = arith.constant 0 : index
    %25 = vector.load %arg4[%c0_9, %c0_10] : memref<32x192xbf16, #tpu.memory_space<vmem>>, vector<32x192xbf16>
    %cst_11 = arith.constant dense<0.000000e+00> : vector<32x192xf32>
    %26 = tpu.matmul %24, %25, %cst_11 {dimension_numbers = #tpu.dot_dimension_numbers<[1], [0], [0], [1], [0, 0, 1, 1], [], []>} : vector<32x32xbf16>, vector<32x192xbf16>, vector<32x192xf32> -> vector<32x192xf32>
    %c0_12 = arith.constant 0 : index
    %c0_13 = arith.constant 0 : index
    %c0_14 = arith.constant 0 : index
    %27 = vector.load %arg5[%c0_12, %c0_13, %c0_14] : memref<4x16x32xbf16, #tpu.memory_space<vmem>>, vector<4x16x32xbf16>
    %28 = tpu.iota {dimensions = array<i32: 1>} : vector<8x8xi32>
    %c5_i32 = arith.constant 5 : i32
    %29 = vector.broadcast %c5_i32 : i32 to vector<8x8xi32>
    %30 = arith.cmpi slt, %28, %29 : vector<8x8xi32>
    %cst_15 = arith.constant 0.000000e+00 : f32
    %cst_16 = arith.constant -1.000000e+30 : f32
    %31 = vector.broadcast %cst_15 : f32 to vector<8x8xf32>
    %32 = vector.broadcast %cst_16 : f32 to vector<8x8xf32>
    %33 = arith.select %30, %31, %32 : vector<8x8xi1>, vector<8x8xf32>
    %34 = vector.shape_cast %33 : vector<8x8xf32> to vector<1x8x8xf32>
    %35 = vector.extract_strided_slice %26 {offsets = [0, 0], sizes = [8, 16], strides = [1, 1]} : vector<32x192xf32> to vector<8x16xf32>
    %36 = vector.extract_strided_slice %26 {offsets = [0, 16], sizes = [8, 16], strides = [1, 1]} : vector<32x192xf32> to vector<8x16xf32>
    %37 = vector.extract_strided_slice %26 {offsets = [0, 32], sizes = [8, 16], strides = [1, 1]} : vector<32x192xf32> to vector<8x16xf32>
    %38 = vector.extract_strided_slice %26 {offsets = [0, 48], sizes = [8, 16], strides = [1, 1]} : vector<32x192xf32> to vector<8x16xf32>
    %39 = vector.shape_cast %35 : vector<8x16xf32> to vector<1x8x16xf32>
    %40 = vector.shape_cast %36 : vector<8x16xf32> to vector<1x8x16xf32>
    %41 = vector.shape_cast %37 : vector<8x16xf32> to vector<1x8x16xf32>
    %42 = vector.shape_cast %38 : vector<8x16xf32> to vector<1x8x16xf32>
    %43 = tpu.concatenate %39, %40, %41, %42 in 0 : vector<1x8x16xf32>, vector<1x8x16xf32>, vector<1x8x16xf32>, vector<1x8x16xf32> -> vector<4x8x16xf32>
    %44 = arith.truncf %43 : vector<4x8x16xf32> to vector<4x8x16xbf16>
    %45 = vector.extract_strided_slice %26 {offsets = [0, 64], sizes = [8, 16], strides = [1, 1]} : vector<32x192xf32> to vector<8x16xf32>
    %46 = vector.extract_strided_slice %26 {offsets = [0, 80], sizes = [8, 16], strides = [1, 1]} : vector<32x192xf32> to vector<8x16xf32>
    %47 = vector.extract_strided_slice %26 {offsets = [0, 96], sizes = [8, 16], strides = [1, 1]} : vector<32x192xf32> to vector<8x16xf32>
    %48 = vector.extract_strided_slice %26 {offsets = [0, 112], sizes = [8, 16], strides = [1, 1]} : vector<32x192xf32> to vector<8x16xf32>
    %49 = vector.shape_cast %45 : vector<8x16xf32> to vector<1x8x16xf32>
    %50 = vector.shape_cast %46 : vector<8x16xf32> to vector<1x8x16xf32>
    %51 = vector.shape_cast %47 : vector<8x16xf32> to vector<1x8x16xf32>
    %52 = vector.shape_cast %48 : vector<8x16xf32> to vector<1x8x16xf32>
    %53 = tpu.concatenate %49, %50, %51, %52 in 0 : vector<1x8x16xf32>, vector<1x8x16xf32>, vector<1x8x16xf32>, vector<1x8x16xf32> -> vector<4x8x16xf32>
    %54 = arith.truncf %53 : vector<4x8x16xf32> to vector<4x8x16xbf16>
    %55 = vector.extract_strided_slice %26 {offsets = [0, 128], sizes = [8, 16], strides = [1, 1]} : vector<32x192xf32> to vector<8x16xf32>
    %56 = vector.extract_strided_slice %26 {offsets = [0, 144], sizes = [8, 16], strides = [1, 1]} : vector<32x192xf32> to vector<8x16xf32>
    %57 = vector.extract_strided_slice %26 {offsets = [0, 160], sizes = [8, 16], strides = [1, 1]} : vector<32x192xf32> to vector<8x16xf32>
    %58 = vector.extract_strided_slice %26 {offsets = [0, 176], sizes = [8, 16], strides = [1, 1]} : vector<32x192xf32> to vector<8x16xf32>
    %59 = vector.shape_cast %55 : vector<8x16xf32> to vector<1x8x16xf32>
    %60 = vector.shape_cast %56 : vector<8x16xf32> to vector<1x8x16xf32>
    %61 = vector.shape_cast %57 : vector<8x16xf32> to vector<1x8x16xf32>
    %62 = vector.shape_cast %58 : vector<8x16xf32> to vector<1x8x16xf32>
    %63 = tpu.concatenate %59, %60, %61, %62 in 0 : vector<1x8x16xf32>, vector<1x8x16xf32>, vector<1x8x16xf32>, vector<1x8x16xf32> -> vector<4x8x16xf32>
    %64 = arith.truncf %63 : vector<4x8x16xf32> to vector<4x8x16xbf16>
    "tpu.trace_start"() <{level = 10 : i32, message = "hid,hjd->hij"}> : () -> ()
    %cst_17 = arith.constant dense<0.000000e+00> : vector<4x8x8xf32>
    %65 = tpu.matmul %44, %54, %cst_17 {dimension_numbers = #tpu.dot_dimension_numbers<[2], [2], [1], [1], [0, 0, 0, 1, 1, 1], [0], [0]>} : vector<4x8x16xbf16>, vector<4x8x16xbf16>, vector<4x8x8xf32> -> vector<4x8x8xf32>
    "tpu.trace_stop"() : () -> ()
    %66 = vector.broadcast %34 : vector<1x8x8xf32> to vector<4x8x8xf32>
    %67 = arith.addf %65, %66 : vector<4x8x8xf32>
    %cst_18 = arith.constant dense<0xFF800000> : vector<4x8xf32>
    %68 = vector.multi_reduction <maximumf>, %67, %cst_18 [2] : vector<4x8x8xf32> to vector<4x8xf32>
    %69 = vector.shape_cast %68 : vector<4x8xf32> to vector<4x8x1xf32>
    %70 = vector.broadcast %69 : vector<4x8x1xf32> to vector<4x8x8xf32>
    %71 = arith.subf %67, %70 : vector<4x8x8xf32>
    %72 = math.exp %71 : vector<4x8x8xf32>
    %cst_19 = arith.constant dense<0.000000e+00> : vector<4x8xf32>
    %73 = vector.multi_reduction <add>, %72, %cst_19 [2] : vector<4x8x8xf32> to vector<4x8xf32>
    %74 = vector.shape_cast %73 : vector<4x8xf32> to vector<4x8x1xf32>
    %75 = tpu.reciprocal %74 {approx = true} : vector<4x8x1xf32> -> vector<4x8x1xf32>
    %76 = vector.broadcast %75 : vector<4x8x1xf32> to vector<4x8x8xf32>
    %77 = arith.mulf %72, %76 : vector<4x8x8xf32>
    %78 = arith.truncf %77 : vector<4x8x8xf32> to vector<4x8x8xbf16>
    "tpu.trace_start"() <{level = 10 : i32, message = "hij,hjd->hid"}> : () -> ()
    %cst_20 = arith.constant dense<0.000000e+00> : vector<4x8x16xf32>
    %79 = tpu.matmul %78, %64, %cst_20 {dimension_numbers = #tpu.dot_dimension_numbers<[2], [1], [1], [2], [0, 0, 0, 1, 1, 2], [0], [0]>} : vector<4x8x8xbf16>, vector<4x8x16xbf16>, vector<4x8x16xf32> -> vector<4x8x16xf32>
    "tpu.trace_stop"() : () -> ()
    %80 = arith.truncf %79 : vector<4x8x16xf32> to vector<4x8x16xbf16>
    "tpu.trace_start"() <{level = 10 : i32, message = "hnd,hdo->hno"}> : () -> ()
    %cst_21 = arith.constant dense<0.000000e+00> : vector<4x8x32xf32>
    %81 = tpu.matmul %80, %27, %cst_21 {dimension_numbers = #tpu.dot_dimension_numbers<[2], [1], [1], [2], [0, 0, 0, 1, 1, 2], [0], [0]>} : vector<4x8x16xbf16>, vector<4x16x32xbf16>, vector<4x8x32xf32> -> vector<4x8x32xf32>
    "tpu.trace_stop"() : () -> ()
    %82 = vector.extract_strided_slice %81 {offsets = [0, 0, 0], sizes = [1, 8, 32], strides = [1, 1, 1]} : vector<4x8x32xf32> to vector<1x8x32xf32>
    %83 = vector.shape_cast %82 : vector<1x8x32xf32> to vector<8x32xf32>
    %84 = vector.extract_strided_slice %81 {offsets = [1, 0, 0], sizes = [1, 8, 32], strides = [1, 1, 1]} : vector<4x8x32xf32> to vector<1x8x32xf32>
    %85 = vector.shape_cast %84 : vector<1x8x32xf32> to vector<8x32xf32>
    %86 = arith.addf %83, %85 : vector<8x32xf32>
    %87 = vector.extract_strided_slice %81 {offsets = [2, 0, 0], sizes = [1, 8, 32], strides = [1, 1, 1]} : vector<4x8x32xf32> to vector<1x8x32xf32>
    %88 = vector.shape_cast %87 : vector<1x8x32xf32> to vector<8x32xf32>
    %89 = arith.addf %86, %88 : vector<8x32xf32>
    %90 = vector.extract_strided_slice %81 {offsets = [3, 0, 0], sizes = [1, 8, 32], strides = [1, 1, 1]} : vector<4x8x32xf32> to vector<1x8x32xf32>
    %91 = vector.shape_cast %90 : vector<1x8x32xf32> to vector<8x32xf32>
    %92 = arith.addf %89, %91 : vector<8x32xf32>
    %93 = vector.extract_strided_slice %26 {offsets = [8, 0], sizes = [8, 16], strides = [1, 1]} : vector<32x192xf32> to vector<8x16xf32>
    %94 = vector.extract_strided_slice %26 {offsets = [8, 16], sizes = [8, 16], strides = [1, 1]} : vector<32x192xf32> to vector<8x16xf32>
    %95 = vector.extract_strided_slice %26 {offsets = [8, 32], sizes = [8, 16], strides = [1, 1]} : vector<32x192xf32> to vector<8x16xf32>
    %96 = vector.extract_strided_slice %26 {offsets = [8, 48], sizes = [8, 16], strides = [1, 1]} : vector<32x192xf32> to vector<8x16xf32>
    %97 = vector.shape_cast %93 : vector<8x16xf32> to vector<1x8x16xf32>
    %98 = vector.shape_cast %94 : vector<8x16xf32> to vector<1x8x16xf32>
    %99 = vector.shape_cast %95 : vector<8x16xf32> to vector<1x8x16xf32>
    %100 = vector.shape_cast %96 : vector<8x16xf32> to vector<1x8x16xf32>
    %101 = tpu.concatenate %97, %98, %99, %100 in 0 : vector<1x8x16xf32>, vector<1x8x16xf32>, vector<1x8x16xf32>, vector<1x8x16xf32> -> vector<4x8x16xf32>
    %102 = arith.truncf %101 : vector<4x8x16xf32> to vector<4x8x16xbf16>
    %103 = vector.extract_strided_slice %26 {offsets = [8, 64], sizes = [8, 16], strides = [1, 1]} : vector<32x192xf32> to vector<8x16xf32>
    %104 = vector.extract_strided_slice %26 {offsets = [8, 80], sizes = [8, 16], strides = [1, 1]} : vector<32x192xf32> to vector<8x16xf32>
    %105 = vector.extract_strided_slice %26 {offsets = [8, 96], sizes = [8, 16], strides = [1, 1]} : vector<32x192xf32> to vector<8x16xf32>
    %106 = vector.extract_strided_slice %26 {offsets = [8, 112], sizes = [8, 16], strides = [1, 1]} : vector<32x192xf32> to vector<8x16xf32>
    %107 = vector.shape_cast %103 : vector<8x16xf32> to vector<1x8x16xf32>
    %108 = vector.shape_cast %104 : vector<8x16xf32> to vector<1x8x16xf32>
    %109 = vector.shape_cast %105 : vector<8x16xf32> to vector<1x8x16xf32>
    %110 = vector.shape_cast %106 : vector<8x16xf32> to vector<1x8x16xf32>
    %111 = tpu.concatenate %107, %108, %109, %110 in 0 : vector<1x8x16xf32>, vector<1x8x16xf32>, vector<1x8x16xf32>, vector<1x8x16xf32> -> vector<4x8x16xf32>
    %112 = arith.truncf %111 : vector<4x8x16xf32> to vector<4x8x16xbf16>
    %113 = vector.extract_strided_slice %26 {offsets = [8, 128], sizes = [8, 16], strides = [1, 1]} : vector<32x192xf32> to vector<8x16xf32>
    %114 = vector.extract_strided_slice %26 {offsets = [8, 144], sizes = [8, 16], strides = [1, 1]} : vector<32x192xf32> to vector<8x16xf32>
    %115 = vector.extract_strided_slice %26 {offsets = [8, 160], sizes = [8, 16], strides = [1, 1]} : vector<32x192xf32> to vector<8x16xf32>
    %116 = vector.extract_strided_slice %26 {offsets = [8, 176], sizes = [8, 16], strides = [1, 1]} : vector<32x192xf32> to vector<8x16xf32>
    %117 = vector.shape_cast %113 : vector<8x16xf32> to vector<1x8x16xf32>
    %118 = vector.shape_cast %114 : vector<8x16xf32> to vector<1x8x16xf32>
    %119 = vector.shape_cast %115 : vector<8x16xf32> to vector<1x8x16xf32>
    %120 = vector.shape_cast %116 : vector<8x16xf32> to vector<1x8x16xf32>
    %121 = tpu.concatenate %117, %118, %119, %120 in 0 : vector<1x8x16xf32>, vector<1x8x16xf32>, vector<1x8x16xf32>, vector<1x8x16xf32> -> vector<4x8x16xf32>
    %122 = arith.truncf %121 : vector<4x8x16xf32> to vector<4x8x16xbf16>
    "tpu.trace_start"() <{level = 10 : i32, message = "hid,hjd->hij"}> : () -> ()
    %cst_22 = arith.constant dense<0.000000e+00> : vector<4x8x8xf32>
    %123 = tpu.matmul %102, %112, %cst_22 {dimension_numbers = #tpu.dot_dimension_numbers<[2], [2], [1], [1], [0, 0, 0, 1, 1, 1], [0], [0]>} : vector<4x8x16xbf16>, vector<4x8x16xbf16>, vector<4x8x8xf32> -> vector<4x8x8xf32>
    "tpu.trace_stop"() : () -> ()
    %124 = vector.broadcast %34 : vector<1x8x8xf32> to vector<4x8x8xf32>
    %125 = arith.addf %123, %124 : vector<4x8x8xf32>
    %cst_23 = arith.constant dense<0xFF800000> : vector<4x8xf32>
    %126 = vector.multi_reduction <maximumf>, %125, %cst_23 [2] : vector<4x8x8xf32> to vector<4x8xf32>
    %127 = vector.shape_cast %126 : vector<4x8xf32> to vector<4x8x1xf32>
    %128 = vector.broadcast %127 : vector<4x8x1xf32> to vector<4x8x8xf32>
    %129 = arith.subf %125, %128 : vector<4x8x8xf32>
    %130 = math.exp %129 : vector<4x8x8xf32>
    %cst_24 = arith.constant dense<0.000000e+00> : vector<4x8xf32>
    %131 = vector.multi_reduction <add>, %130, %cst_24 [2] : vector<4x8x8xf32> to vector<4x8xf32>
    %132 = vector.shape_cast %131 : vector<4x8xf32> to vector<4x8x1xf32>
    %133 = tpu.reciprocal %132 {approx = true} : vector<4x8x1xf32> -> vector<4x8x1xf32>
    %134 = vector.broadcast %133 : vector<4x8x1xf32> to vector<4x8x8xf32>
    %135 = arith.mulf %130, %134 : vector<4x8x8xf32>
    %136 = arith.truncf %135 : vector<4x8x8xf32> to vector<4x8x8xbf16>
    "tpu.trace_start"() <{level = 10 : i32, message = "hij,hjd->hid"}> : () -> ()
    %cst_25 = arith.constant dense<0.000000e+00> : vector<4x8x16xf32>
    %137 = tpu.matmul %136, %122, %cst_25 {dimension_numbers = #tpu.dot_dimension_numbers<[2], [1], [1], [2], [0, 0, 0, 1, 1, 2], [0], [0]>} : vector<4x8x8xbf16>, vector<4x8x16xbf16>, vector<4x8x16xf32> -> vector<4x8x16xf32>
    "tpu.trace_stop"() : () -> ()
    %138 = arith.truncf %137 : vector<4x8x16xf32> to vector<4x8x16xbf16>
    "tpu.trace_start"() <{level = 10 : i32, message = "hnd,hdo->hno"}> : () -> ()
    %cst_26 = arith.constant dense<0.000000e+00> : vector<4x8x32xf32>
    %139 = tpu.matmul %138, %27, %cst_26 {dimension_numbers = #tpu.dot_dimension_numbers<[2], [1], [1], [2], [0, 0, 0, 1, 1, 2], [0], [0]>} : vector<4x8x16xbf16>, vector<4x16x32xbf16>, vector<4x8x32xf32> -> vector<4x8x32xf32>
    "tpu.trace_stop"() : () -> ()
    %140 = vector.extract_strided_slice %139 {offsets = [0, 0, 0], sizes = [1, 8, 32], strides = [1, 1, 1]} : vector<4x8x32xf32> to vector<1x8x32xf32>
    %141 = vector.shape_cast %140 : vector<1x8x32xf32> to vector<8x32xf32>
    %142 = vector.extract_strided_slice %139 {offsets = [1, 0, 0], sizes = [1, 8, 32], strides = [1, 1, 1]} : vector<4x8x32xf32> to vector<1x8x32xf32>
    %143 = vector.shape_cast %142 : vector<1x8x32xf32> to vector<8x32xf32>
    %144 = arith.addf %141, %143 : vector<8x32xf32>
    %145 = vector.extract_strided_slice %139 {offsets = [2, 0, 0], sizes = [1, 8, 32], strides = [1, 1, 1]} : vector<4x8x32xf32> to vector<1x8x32xf32>
    %146 = vector.shape_cast %145 : vector<1x8x32xf32> to vector<8x32xf32>
    %147 = arith.addf %144, %146 : vector<8x32xf32>
    %148 = vector.extract_strided_slice %139 {offsets = [3, 0, 0], sizes = [1, 8, 32], strides = [1, 1, 1]} : vector<4x8x32xf32> to vector<1x8x32xf32>
    %149 = vector.shape_cast %148 : vector<1x8x32xf32> to vector<8x32xf32>
    %150 = arith.addf %147, %149 : vector<8x32xf32>
    %151 = vector.extract_strided_slice %26 {offsets = [16, 0], sizes = [8, 16], strides = [1, 1]} : vector<32x192xf32> to vector<8x16xf32>
    %152 = vector.extract_strided_slice %26 {offsets = [16, 16], sizes = [8, 16], strides = [1, 1]} : vector<32x192xf32> to vector<8x16xf32>
    %153 = vector.extract_strided_slice %26 {offsets = [16, 32], sizes = [8, 16], strides = [1, 1]} : vector<32x192xf32> to vector<8x16xf32>
    %154 = vector.extract_strided_slice %26 {offsets = [16, 48], sizes = [8, 16], strides = [1, 1]} : vector<32x192xf32> to vector<8x16xf32>
    %155 = vector.shape_cast %151 : vector<8x16xf32> to vector<1x8x16xf32>
    %156 = vector.shape_cast %152 : vector<8x16xf32> to vector<1x8x16xf32>
    %157 = vector.shape_cast %153 : vector<8x16xf32> to vector<1x8x16xf32>
    %158 = vector.shape_cast %154 : vector<8x16xf32> to vector<1x8x16xf32>
    %159 = tpu.concatenate %155, %156, %157, %158 in 0 : vector<1x8x16xf32>, vector<1x8x16xf32>, vector<1x8x16xf32>, vector<1x8x16xf32> -> vector<4x8x16xf32>
    %160 = arith.truncf %159 : vector<4x8x16xf32> to vector<4x8x16xbf16>
    %161 = vector.extract_strided_slice %26 {offsets = [16, 64], sizes = [8, 16], strides = [1, 1]} : vector<32x192xf32> to vector<8x16xf32>
    %162 = vector.extract_strided_slice %26 {offsets = [16, 80], sizes = [8, 16], strides = [1, 1]} : vector<32x192xf32> to vector<8x16xf32>
    %163 = vector.extract_strided_slice %26 {offsets = [16, 96], sizes = [8, 16], strides = [1, 1]} : vector<32x192xf32> to vector<8x16xf32>
    %164 = vector.extract_strided_slice %26 {offsets = [16, 112], sizes = [8, 16], strides = [1, 1]} : vector<32x192xf32> to vector<8x16xf32>
    %165 = vector.shape_cast %161 : vector<8x16xf32> to vector<1x8x16xf32>
    %166 = vector.shape_cast %162 : vector<8x16xf32> to vector<1x8x16xf32>
    %167 = vector.shape_cast %163 : vector<8x16xf32> to vector<1x8x16xf32>
    %168 = vector.shape_cast %164 : vector<8x16xf32> to vector<1x8x16xf32>
    %169 = tpu.concatenate %165, %166, %167, %168 in 0 : vector<1x8x16xf32>, vector<1x8x16xf32>, vector<1x8x16xf32>, vector<1x8x16xf32> -> vector<4x8x16xf32>
    %170 = arith.truncf %169 : vector<4x8x16xf32> to vector<4x8x16xbf16>
    %171 = vector.extract_strided_slice %26 {offsets = [16, 128], sizes = [8, 16], strides = [1, 1]} : vector<32x192xf32> to vector<8x16xf32>
    %172 = vector.extract_strided_slice %26 {offsets = [16, 144], sizes = [8, 16], strides = [1, 1]} : vector<32x192xf32> to vector<8x16xf32>
    %173 = vector.extract_strided_slice %26 {offsets = [16, 160], sizes = [8, 16], strides = [1, 1]} : vector<32x192xf32> to vector<8x16xf32>
    %174 = vector.extract_strided_slice %26 {offsets = [16, 176], sizes = [8, 16], strides = [1, 1]} : vector<32x192xf32> to vector<8x16xf32>
    %175 = vector.shape_cast %171 : vector<8x16xf32> to vector<1x8x16xf32>
    %176 = vector.shape_cast %172 : vector<8x16xf32> to vector<1x8x16xf32>
    %177 = vector.shape_cast %173 : vector<8x16xf32> to vector<1x8x16xf32>
    %178 = vector.shape_cast %174 : vector<8x16xf32> to vector<1x8x16xf32>
    %179 = tpu.concatenate %175, %176, %177, %178 in 0 : vector<1x8x16xf32>, vector<1x8x16xf32>, vector<1x8x16xf32>, vector<1x8x16xf32> -> vector<4x8x16xf32>
    %180 = arith.truncf %179 : vector<4x8x16xf32> to vector<4x8x16xbf16>
    "tpu.trace_start"() <{level = 10 : i32, message = "hid,hjd->hij"}> : () -> ()
    %cst_27 = arith.constant dense<0.000000e+00> : vector<4x8x8xf32>
    %181 = tpu.matmul %160, %170, %cst_27 {dimension_numbers = #tpu.dot_dimension_numbers<[2], [2], [1], [1], [0, 0, 0, 1, 1, 1], [0], [0]>} : vector<4x8x16xbf16>, vector<4x8x16xbf16>, vector<4x8x8xf32> -> vector<4x8x8xf32>
    "tpu.trace_stop"() : () -> ()
    %182 = vector.broadcast %34 : vector<1x8x8xf32> to vector<4x8x8xf32>
    %183 = arith.addf %181, %182 : vector<4x8x8xf32>
    %cst_28 = arith.constant dense<0xFF800000> : vector<4x8xf32>
    %184 = vector.multi_reduction <maximumf>, %183, %cst_28 [2] : vector<4x8x8xf32> to vector<4x8xf32>
    %185 = vector.shape_cast %184 : vector<4x8xf32> to vector<4x8x1xf32>
    %186 = vector.broadcast %185 : vector<4x8x1xf32> to vector<4x8x8xf32>
    %187 = arith.subf %183, %186 : vector<4x8x8xf32>
    %188 = math.exp %187 : vector<4x8x8xf32>
    %cst_29 = arith.constant dense<0.000000e+00> : vector<4x8xf32>
    %189 = vector.multi_reduction <add>, %188, %cst_29 [2] : vector<4x8x8xf32> to vector<4x8xf32>
    %190 = vector.shape_cast %189 : vector<4x8xf32> to vector<4x8x1xf32>
    %191 = tpu.reciprocal %190 {approx = true} : vector<4x8x1xf32> -> vector<4x8x1xf32>
    %192 = vector.broadcast %191 : vector<4x8x1xf32> to vector<4x8x8xf32>
    %193 = arith.mulf %188, %192 : vector<4x8x8xf32>
    %194 = arith.truncf %193 : vector<4x8x8xf32> to vector<4x8x8xbf16>
    "tpu.trace_start"() <{level = 10 : i32, message = "hij,hjd->hid"}> : () -> ()
    %cst_30 = arith.constant dense<0.000000e+00> : vector<4x8x16xf32>
    %195 = tpu.matmul %194, %180, %cst_30 {dimension_numbers = #tpu.dot_dimension_numbers<[2], [1], [1], [2], [0, 0, 0, 1, 1, 2], [0], [0]>} : vector<4x8x8xbf16>, vector<4x8x16xbf16>, vector<4x8x16xf32> -> vector<4x8x16xf32>
    "tpu.trace_stop"() : () -> ()
    %196 = arith.truncf %195 : vector<4x8x16xf32> to vector<4x8x16xbf16>
    "tpu.trace_start"() <{level = 10 : i32, message = "hnd,hdo->hno"}> : () -> ()
    %cst_31 = arith.constant dense<0.000000e+00> : vector<4x8x32xf32>
    %197 = tpu.matmul %196, %27, %cst_31 {dimension_numbers = #tpu.dot_dimension_numbers<[2], [1], [1], [2], [0, 0, 0, 1, 1, 2], [0], [0]>} : vector<4x8x16xbf16>, vector<4x16x32xbf16>, vector<4x8x32xf32> -> vector<4x8x32xf32>
    "tpu.trace_stop"() : () -> ()
    %198 = vector.extract_strided_slice %197 {offsets = [0, 0, 0], sizes = [1, 8, 32], strides = [1, 1, 1]} : vector<4x8x32xf32> to vector<1x8x32xf32>
    %199 = vector.shape_cast %198 : vector<1x8x32xf32> to vector<8x32xf32>
    %200 = vector.extract_strided_slice %197 {offsets = [1, 0, 0], sizes = [1, 8, 32], strides = [1, 1, 1]} : vector<4x8x32xf32> to vector<1x8x32xf32>
    %201 = vector.shape_cast %200 : vector<1x8x32xf32> to vector<8x32xf32>
    %202 = arith.addf %199, %201 : vector<8x32xf32>
    %203 = vector.extract_strided_slice %197 {offsets = [2, 0, 0], sizes = [1, 8, 32], strides = [1, 1, 1]} : vector<4x8x32xf32> to vector<1x8x32xf32>
    %204 = vector.shape_cast %203 : vector<1x8x32xf32> to vector<8x32xf32>
    %205 = arith.addf %202, %204 : vector<8x32xf32>
    %206 = vector.extract_strided_slice %197 {offsets = [3, 0, 0], sizes = [1, 8, 32], strides = [1, 1, 1]} : vector<4x8x32xf32> to vector<1x8x32xf32>
    %207 = vector.shape_cast %206 : vector<1x8x32xf32> to vector<8x32xf32>
    %208 = arith.addf %205, %207 : vector<8x32xf32>
    %209 = vector.extract_strided_slice %26 {offsets = [24, 0], sizes = [8, 16], strides = [1, 1]} : vector<32x192xf32> to vector<8x16xf32>
    %210 = vector.extract_strided_slice %26 {offsets = [24, 16], sizes = [8, 16], strides = [1, 1]} : vector<32x192xf32> to vector<8x16xf32>
    %211 = vector.extract_strided_slice %26 {offsets = [24, 32], sizes = [8, 16], strides = [1, 1]} : vector<32x192xf32> to vector<8x16xf32>
    %212 = vector.extract_strided_slice %26 {offsets = [24, 48], sizes = [8, 16], strides = [1, 1]} : vector<32x192xf32> to vector<8x16xf32>
    %213 = vector.shape_cast %209 : vector<8x16xf32> to vector<1x8x16xf32>
    %214 = vector.shape_cast %210 : vector<8x16xf32> to vector<1x8x16xf32>
    %215 = vector.shape_cast %211 : vector<8x16xf32> to vector<1x8x16xf32>
    %216 = vector.shape_cast %212 : vector<8x16xf32> to vector<1x8x16xf32>
    %217 = tpu.concatenate %213, %214, %215, %216 in 0 : vector<1x8x16xf32>, vector<1x8x16xf32>, vector<1x8x16xf32>, vector<1x8x16xf32> -> vector<4x8x16xf32>
    %218 = arith.truncf %217 : vector<4x8x16xf32> to vector<4x8x16xbf16>
    %219 = vector.extract_strided_slice %26 {offsets = [24, 64], sizes = [8, 16], strides = [1, 1]} : vector<32x192xf32> to vector<8x16xf32>
    %220 = vector.extract_strided_slice %26 {offsets = [24, 80], sizes = [8, 16], strides = [1, 1]} : vector<32x192xf32> to vector<8x16xf32>
    %221 = vector.extract_strided_slice %26 {offsets = [24, 96], sizes = [8, 16], strides = [1, 1]} : vector<32x192xf32> to vector<8x16xf32>
    %222 = vector.extract_strided_slice %26 {offsets = [24, 112], sizes = [8, 16], strides = [1, 1]} : vector<32x192xf32> to vector<8x16xf32>
    %223 = vector.shape_cast %219 : vector<8x16xf32> to vector<1x8x16xf32>
    %224 = vector.shape_cast %220 : vector<8x16xf32> to vector<1x8x16xf32>
    %225 = vector.shape_cast %221 : vector<8x16xf32> to vector<1x8x16xf32>
    %226 = vector.shape_cast %222 : vector<8x16xf32> to vector<1x8x16xf32>
    %227 = tpu.concatenate %223, %224, %225, %226 in 0 : vector<1x8x16xf32>, vector<1x8x16xf32>, vector<1x8x16xf32>, vector<1x8x16xf32> -> vector<4x8x16xf32>
    %228 = arith.truncf %227 : vector<4x8x16xf32> to vector<4x8x16xbf16>
    %229 = vector.extract_strided_slice %26 {offsets = [24, 128], sizes = [8, 16], strides = [1, 1]} : vector<32x192xf32> to vector<8x16xf32>
    %230 = vector.extract_strided_slice %26 {offsets = [24, 144], sizes = [8, 16], strides = [1, 1]} : vector<32x192xf32> to vector<8x16xf32>
    %231 = vector.extract_strided_slice %26 {offsets = [24, 160], sizes = [8, 16], strides = [1, 1]} : vector<32x192xf32> to vector<8x16xf32>
    %232 = vector.extract_strided_slice %26 {offsets = [24, 176], sizes = [8, 16], strides = [1, 1]} : vector<32x192xf32> to vector<8x16xf32>
    %233 = vector.shape_cast %229 : vector<8x16xf32> to vector<1x8x16xf32>
    %234 = vector.shape_cast %230 : vector<8x16xf32> to vector<1x8x16xf32>
    %235 = vector.shape_cast %231 : vector<8x16xf32> to vector<1x8x16xf32>
    %236 = vector.shape_cast %232 : vector<8x16xf32> to vector<1x8x16xf32>
    %237 = tpu.concatenate %233, %234, %235, %236 in 0 : vector<1x8x16xf32>, vector<1x8x16xf32>, vector<1x8x16xf32>, vector<1x8x16xf32> -> vector<4x8x16xf32>
    %238 = arith.truncf %237 : vector<4x8x16xf32> to vector<4x8x16xbf16>
    "tpu.trace_start"() <{level = 10 : i32, message = "hid,hjd->hij"}> : () -> ()
    %cst_32 = arith.constant dense<0.000000e+00> : vector<4x8x8xf32>
    %239 = tpu.matmul %218, %228, %cst_32 {dimension_numbers = #tpu.dot_dimension_numbers<[2], [2], [1], [1], [0, 0, 0, 1, 1, 1], [0], [0]>} : vector<4x8x16xbf16>, vector<4x8x16xbf16>, vector<4x8x8xf32> -> vector<4x8x8xf32>
    "tpu.trace_stop"() : () -> ()
    %240 = vector.broadcast %34 : vector<1x8x8xf32> to vector<4x8x8xf32>
    %241 = arith.addf %239, %240 : vector<4x8x8xf32>
    %cst_33 = arith.constant dense<0xFF800000> : vector<4x8xf32>
    %242 = vector.multi_reduction <maximumf>, %241, %cst_33 [2] : vector<4x8x8xf32> to vector<4x8xf32>
    %243 = vector.shape_cast %242 : vector<4x8xf32> to vector<4x8x1xf32>
    %244 = vector.broadcast %243 : vector<4x8x1xf32> to vector<4x8x8xf32>
    %245 = arith.subf %241, %244 : vector<4x8x8xf32>
    %246 = math.exp %245 : vector<4x8x8xf32>
    %cst_34 = arith.constant dense<0.000000e+00> : vector<4x8xf32>
    %247 = vector.multi_reduction <add>, %246, %cst_34 [2] : vector<4x8x8xf32> to vector<4x8xf32>
    %248 = vector.shape_cast %247 : vector<4x8xf32> to vector<4x8x1xf32>
    %249 = tpu.reciprocal %248 {approx = true} : vector<4x8x1xf32> -> vector<4x8x1xf32>
    %250 = vector.broadcast %249 : vector<4x8x1xf32> to vector<4x8x8xf32>
    %251 = arith.mulf %246, %250 : vector<4x8x8xf32>
    %252 = arith.truncf %251 : vector<4x8x8xf32> to vector<4x8x8xbf16>
    "tpu.trace_start"() <{level = 10 : i32, message = "hij,hjd->hid"}> : () -> ()
    %cst_35 = arith.constant dense<0.000000e+00> : vector<4x8x16xf32>
    %253 = tpu.matmul %252, %238, %cst_35 {dimension_numbers = #tpu.dot_dimension_numbers<[2], [1], [1], [2], [0, 0, 0, 1, 1, 2], [0], [0]>} : vector<4x8x8xbf16>, vector<4x8x16xbf16>, vector<4x8x16xf32> -> vector<4x8x16xf32>
    "tpu.trace_stop"() : () -> ()
    %254 = arith.truncf %253 : vector<4x8x16xf32> to vector<4x8x16xbf16>
    "tpu.trace_start"() <{level = 10 : i32, message = "hnd,hdo->hno"}> : () -> ()
    %cst_36 = arith.constant dense<0.000000e+00> : vector<4x8x32xf32>
    %255 = tpu.matmul %254, %27, %cst_36 {dimension_numbers = #tpu.dot_dimension_numbers<[2], [1], [1], [2], [0, 0, 0, 1, 1, 2], [0], [0]>} : vector<4x8x16xbf16>, vector<4x16x32xbf16>, vector<4x8x32xf32> -> vector<4x8x32xf32>
    "tpu.trace_stop"() : () -> ()
    %256 = vector.extract_strided_slice %255 {offsets = [0, 0, 0], sizes = [1, 8, 32], strides = [1, 1, 1]} : vector<4x8x32xf32> to vector<1x8x32xf32>
    %257 = vector.shape_cast %256 : vector<1x8x32xf32> to vector<8x32xf32>
    %258 = vector.extract_strided_slice %255 {offsets = [1, 0, 0], sizes = [1, 8, 32], strides = [1, 1, 1]} : vector<4x8x32xf32> to vector<1x8x32xf32>
    %259 = vector.shape_cast %258 : vector<1x8x32xf32> to vector<8x32xf32>
    %260 = arith.addf %257, %259 : vector<8x32xf32>
    %261 = vector.extract_strided_slice %255 {offsets = [2, 0, 0], sizes = [1, 8, 32], strides = [1, 1, 1]} : vector<4x8x32xf32> to vector<1x8x32xf32>
    %262 = vector.shape_cast %261 : vector<1x8x32xf32> to vector<8x32xf32>
    %263 = arith.addf %260, %262 : vector<8x32xf32>
    %264 = vector.extract_strided_slice %255 {offsets = [3, 0, 0], sizes = [1, 8, 32], strides = [1, 1, 1]} : vector<4x8x32xf32> to vector<1x8x32xf32>
    %265 = vector.shape_cast %264 : vector<1x8x32xf32> to vector<8x32xf32>
    %266 = arith.addf %263, %265 : vector<8x32xf32>
    %267 = tpu.concatenate %92, %150, %208, %266 in 0 : vector<8x32xf32>, vector<8x32xf32>, vector<8x32xf32>, vector<8x32xf32> -> vector<32x32xf32>
    %268 = arith.addf %1, %267 : vector<32x32xf32>
    %c0_37 = arith.constant 0 : index
    %c0_38 = arith.constant 0 : index
    %269 = vector.load %arg6[%c0_37, %c0_38] : memref<1x32xf32, #tpu.memory_space<vmem>>, vector<1x32xf32>
    %270 = vector.broadcast %269 : vector<1x32xf32> to vector<32x32xf32>
    %271 = arith.addf %268, %270 : vector<32x32xf32>
    %c0_39 = arith.constant 0 : index
    %c0_40 = arith.constant 0 : index
    %272 = vector.load %arg7[%c0_39, %c0_40] : memref<1x32xf32, #tpu.memory_space<vmem>>, vector<1x32xf32>
    %c0_41 = arith.constant 0 : index
    %c0_42 = arith.constant 0 : index
    %273 = vector.load %arg8[%c0_41, %c0_42] : memref<1x32xf32, #tpu.memory_space<vmem>>, vector<1x32xf32>
    %cst_43 = arith.constant dense<0.000000e+00> : vector<32xf32>
    %274 = vector.multi_reduction <add>, %271, %cst_43 [1] : vector<32x32xf32> to vector<32xf32>
    %275 = vector.shape_cast %274 : vector<32xf32> to vector<32x1xf32>
    %cst_44 = arith.constant 3.200000e+01 : f32
    %276 = vector.broadcast %cst_44 : f32 to vector<32x1xf32>
    %277 = arith.divf %275, %276 : vector<32x1xf32>
    %278 = vector.broadcast %277 : vector<32x1xf32> to vector<32x32xf32>
    %279 = arith.subf %271, %278 : vector<32x32xf32>
    %280 = arith.mulf %279, %279 : vector<32x32xf32>
    %cst_45 = arith.constant dense<0.000000e+00> : vector<32xf32>
    %281 = vector.multi_reduction <add>, %280, %cst_45 [1] : vector<32x32xf32> to vector<32xf32>
    %282 = vector.shape_cast %281 : vector<32xf32> to vector<32x1xf32>
    %cst_46 = arith.constant 3.200000e+01 : f32
    %283 = vector.broadcast %cst_46 : f32 to vector<32x1xf32>
    %284 = arith.divf %282, %283 : vector<32x1xf32>
    %cst_47 = arith.constant 9.99999974E-6 : f32
    %285 = vector.broadcast %cst_47 : f32 to vector<32x1xf32>
    %286 = arith.addf %284, %285 : vector<32x1xf32>
    %287 = math.rsqrt %286 : vector<32x1xf32>
    %288 = vector.broadcast %287 : vector<32x1xf32> to vector<32x32xf32>
    %289 = arith.mulf %279, %288 : vector<32x32xf32>
    %290 = vector.broadcast %272 : vector<1x32xf32> to vector<32x32xf32>
    %291 = arith.mulf %289, %290 : vector<32x32xf32>
    %292 = vector.broadcast %273 : vector<1x32xf32> to vector<32x32xf32>
    %293 = arith.addf %291, %292 : vector<32x32xf32>
    %294 = arith.truncf %293 : vector<32x32xf32> to vector<32x32xbf16>
    %c0_48 = arith.constant 0 : index
    %c0_49 = arith.constant 0 : index
    %295 = vector.load %arg9[%c0_48, %c0_49] : memref<32x128xbf16, #tpu.memory_space<vmem>>, vector<32x128xbf16>
    %cst_50 = arith.constant dense<0.000000e+00> : vector<32x128xf32>
    %296 = tpu.matmul %294, %295, %cst_50 {dimension_numbers = #tpu.dot_dimension_numbers<[1], [0], [0], [1], [0, 0, 1, 1], [], []>} : vector<32x32xbf16>, vector<32x128xbf16>, vector<32x128xf32> -> vector<32x128xf32>
    %c0_51 = arith.constant 0 : index
    %c0_52 = arith.constant 0 : index
    %297 = vector.load %arg10[%c0_51, %c0_52] : memref<1x128xf32, #tpu.memory_space<vmem>>, vector<1x128xf32>
    %298 = vector.broadcast %297 : vector<1x128xf32> to vector<32x128xf32>
    %299 = arith.addf %296, %298 : vector<32x128xf32>
    %cst_53 = arith.constant 5.000000e-01 : f32
    %300 = vector.broadcast %cst_53 : f32 to vector<32x128xf32>
    %301 = arith.mulf %300, %299 : vector<32x128xf32>
    %cst_54 = arith.constant 4.471500e-02 : f32
    %302 = vector.broadcast %cst_54 : f32 to vector<32x128xf32>
    %303 = arith.mulf %302, %299 : vector<32x128xf32>
    %304 = arith.mulf %303, %299 : vector<32x128xf32>
    %305 = arith.mulf %304, %299 : vector<32x128xf32>
    %306 = arith.addf %299, %305 : vector<32x128xf32>
    %cst_55 = arith.constant 0.797884583 : f32
    %307 = vector.broadcast %cst_55 : f32 to vector<32x128xf32>
    %308 = arith.mulf %307, %306 : vector<32x128xf32>
    %309 = math.tanh %308 : vector<32x128xf32>
    %cst_56 = arith.constant 1.000000e+00 : f32
    %310 = vector.broadcast %cst_56 : f32 to vector<32x128xf32>
    %311 = arith.addf %310, %309 : vector<32x128xf32>
    %312 = arith.mulf %301, %311 : vector<32x128xf32>
    %313 = arith.truncf %312 : vector<32x128xf32> to vector<32x128xbf16>
    %c0_57 = arith.constant 0 : index
    %c0_58 = arith.constant 0 : index
    %314 = vector.load %arg11[%c0_57, %c0_58] : memref<128x32xbf16, #tpu.memory_space<vmem>>, vector<128x32xbf16>
    %cst_59 = arith.constant dense<0.000000e+00> : vector<32x32xf32>
    %315 = tpu.matmul %313, %314, %cst_59 {dimension_numbers = #tpu.dot_dimension_numbers<[1], [0], [0], [1], [0, 0, 1, 1], [], []>} : vector<32x128xbf16>, vector<128x32xbf16>, vector<32x32xf32> -> vector<32x32xf32>
    %c0_60 = arith.constant 0 : index
    %c0_61 = arith.constant 0 : index
    %316 = vector.load %arg12[%c0_60, %c0_61] : memref<1x32xf32, #tpu.memory_space<vmem>>, vector<1x32xf32>
    %317 = vector.broadcast %316 : vector<1x32xf32> to vector<32x32xf32>
    %318 = arith.addf %315, %317 : vector<32x32xf32>
    %319 = arith.addf %271, %318 : vector<32x32xf32>
    %320 = arith.truncf %319 : vector<32x32xf32> to vector<32x32xbf16>
    %c0_62 = arith.constant 0 : index
    %c0_63 = arith.constant 0 : index
    %321 = vector.load %arg13[%c0_62, %c0_63] : memref<32x32xbf16, #tpu.memory_space<vmem>>, vector<32x32xbf16>
    tpu.vector_store %arg13[%c0_62, %c0_63], %320 {strides = array<i32>} : memref<32x32xbf16, #tpu.memory_space<vmem>>, vector<32x32xbf16>,
    return
  }
  func.func @transform_0(%arg0: i32) -> (i32, i32) {
    %c0_i32 = arith.constant 0 : i32
    %c0_i32_0 = arith.constant 0 : i32
    return %arg0, %c0_i32 : i32, i32
  }
  func.func @transform_1(%arg0: i32) -> (i32, i32) {
    %c0_i32 = arith.constant 0 : i32
    %c0_i32_0 = arith.constant 0 : i32
    %c0_i32_1 = arith.constant 0 : i32
    return %c0_i32, %c0_i32_0 : i32, i32
  }
  func.func @transform_2(%arg0: i32) -> (i32, i32) {
    %c0_i32 = arith.constant 0 : i32
    %c0_i32_0 = arith.constant 0 : i32
    %c0_i32_1 = arith.constant 0 : i32
    return %c0_i32, %c0_i32_0 : i32, i32
  }
  func.func @transform_3(%arg0: i32) -> (i32, i32) {
    %c0_i32 = arith.constant 0 : i32
    %c0_i32_0 = arith.constant 0 : i32
    %c0_i32_1 = arith.constant 0 : i32
    return %c0_i32, %c0_i32_0 : i32, i32
  }
  func.func @transform_4(%arg0: i32) -> (i32, i32, i32) {
    %c0_i32 = arith.constant 0 : i32
    %c0_i32_0 = arith.constant 0 : i32
    %c0_i32_1 = arith.constant 0 : i32
    %c0_i32_2 = arith.constant 0 : i32
    return %c0_i32, %c0_i32_0, %c0_i32_1 : i32, i32, i32
  }
  func.func @transform_5(%arg0: i32) -> (i32, i32) {
    %c0_i32 = arith.constant 0 : i32
    %c0_i32_0 = arith.constant 0 : i32
    %c0_i32_1 = arith.constant 0 : i32
    return %c0_i32, %c0_i32_0 : i32, i32
  }
  func.func @transform_6(%arg0: i32) -> (i32, i32) {
    %c0_i32 = arith.constant 0 : i32
    %c0_i32_0 = arith.constant 0 : i32
    %c0_i32_1 = arith.constant 0 : i32
    return %c0_i32, %c0_i32_0 : i32, i32
  }
  func.func @transform_7(%arg0: i32) -> (i32, i32) {
    %c0_i32 = arith.constant 0 : i32
    %c0_i32_0 = arith.constant 0 : i32
    %c0_i32_1 = arith.constant 0 : i32
    return %c0_i32, %c0_i32_0 : i32, i32
  }
  func.func @transform_8(%arg0: i32) -> (i32, i32) {
    %c0_i32 = arith.constant 0 : i32
    %c0_i32_0 = arith.constant 0 : i32
    %c0_i32_1 = arith.constant 0 : i32
    return %c0_i32, %c0_i32_0 : i32, i32
  }
  func.func @transform_9(%arg0: i32) -> (i32, i32) {
    %c0_i32 = arith.constant 0 : i32
    %c0_i32_0 = arith.constant 0 : i32
    %c0_i32_1 = arith.constant 0 : i32
    return %c0_i32, %c0_i32_0 : i32, i32
  }
  func.func @transform_10(%arg0: i32) -> (i32, i32) {
    %c0_i32 = arith.constant 0 : i32
    %c0_i32_0 = arith.constant 0 : i32
    %c0_i32_1 = arith.constant 0 : i32
    return %c0_i32, %c0_i32_0 : i32, i32
  }
  func.func @transform_11(%arg0: i32) -> (i32, i32) {
    %c0_i32 = arith.constant 0 : i32
    %c0_i32_0 = arith.constant 0 : i32
    %c0_i32_1 = arith.constant 0 : i32
    return %c0_i32, %c0_i32_0 : i32, i32
  }
  func.func @transform_12(%arg0: i32) -> (i32, i32) {
    %c0_i32 = arith.constant 0 : i32
    %c0_i32_0 = arith.constant 0 : i32
    return %arg0, %c0_i32 : i32, i32
  }
}

module attributes {stable_mosaic.version = 11 : i64} {
  func.func @fused_layer_kernel(%arg0: i32, %arg1: memref<32x32xbf16, #tpu.memory_space<vmem>>, %arg2: memref<1x32xf32, #tpu.memory_space<vmem>>, %arg3: memref<1x32xf32, #tpu.memory_space<vmem>>, %arg4: memref<32x192xbf16, #tpu.memory_space<vmem>>, %arg5: memref<4x16x32xbf16, #tpu.memory_space<vmem>>, %arg6: memref<1x32xf32, #tpu.memory_space<vmem>>, %arg7: memref<1x32xf32, #tpu.memory_space<vmem>>, %arg8: memref<1x32xf32, #tpu.memory_space<vmem>>, %arg9: memref<32x128xbf16, #tpu.memory_space<vmem>>, %arg10: memref<1x128xf32, #tpu.memory_space<vmem>>, %arg11: memref<128x32xbf16, #tpu.memory_space<vmem>>, %arg12: memref<1x32xf32, #tpu.memory_space<vmem>>, %arg13: memref<1x32xf32, #tpu.memory_space<vmem>>, %arg14: memref<1x32xf32, #tpu.memory_space<vmem>>, %arg15: memref<32x32xbf16, #tpu.memory_space<vmem>>) attributes {dimension_semantics = [#tpu.dimension_semantics<parallel>], iteration_bounds = array<i64: 2>, scalar_prefetch = 0 : i64, scratch_operands = 0 : i64, tpu.core_type = #tpu.core_type<tc>, window_params = [{transform_indices = @transform_0, window_bounds = array<i64: 32, 32>}, {pipeline_mode = #tpu.pipeline_mode<synchronous>, transform_indices = @transform_1, window_bounds = array<i64: 1, 32>}, {pipeline_mode = #tpu.pipeline_mode<synchronous>, transform_indices = @transform_2, window_bounds = array<i64: 1, 32>}, {pipeline_mode = #tpu.pipeline_mode<synchronous>, transform_indices = @transform_3, window_bounds = array<i64: 32, 192>}, {pipeline_mode = #tpu.pipeline_mode<synchronous>, transform_indices = @transform_4, window_bounds = array<i64: 4, 16, 32>}, {pipeline_mode = #tpu.pipeline_mode<synchronous>, transform_indices = @transform_5, window_bounds = array<i64: 1, 32>}, {pipeline_mode = #tpu.pipeline_mode<synchronous>, transform_indices = @transform_6, window_bounds = array<i64: 1, 32>}, {pipeline_mode = #tpu.pipeline_mode<synchronous>, transform_indices = @transform_7, window_bounds = array<i64: 1, 32>}, {pipeline_mode = #tpu.pipeline_mode<synchronous>, transform_indices = @transform_8, window_bounds = array<i64: 32, 128>}, {pipeline_mode = #tpu.pipeline_mode<synchronous>, transform_indices = @transform_9, window_bounds = array<i64: 1, 128>}, {pipeline_mode = #tpu.pipeline_mode<synchronous>, transform_indices = @transform_10, window_bounds = array<i64: 128, 32>}, {pipeline_mode = #tpu.pipeline_mode<synchronous>, transform_indices = @transform_11, window_bounds = array<i64: 1, 32>}, {pipeline_mode = #tpu.pipeline_mode<synchronous>, transform_indices = @transform_12, window_bounds = array<i64: 1, 32>}, {pipeline_mode = #tpu.pipeline_mode<synchronous>, transform_indices = @transform_13, window_bounds = array<i64: 1, 32>}, {transform_indices = @transform_14, window_bounds = array<i64: 32, 32>}]} {
    %c0 = arith.constant 0 : index
    %c0_0 = arith.constant 0 : index
    %0 = vector.load %arg1[%c0, %c0_0] : memref<32x32xbf16, #tpu.memory_space<vmem>>, vector<32x32xbf16>
    %1 = arith.extf %0 : vector<32x32xbf16> to vector<32x32xf32>
    %c0_1 = arith.constant 0 : index
    %c0_2 = arith.constant 0 : index
    %2 = vector.load %arg2[%c0_1, %c0_2] : memref<1x32xf32, #tpu.memory_space<vmem>>, vector<1x32xf32>
    %c0_3 = arith.constant 0 : index
    %c0_4 = arith.constant 0 : index
    %3 = vector.load %arg3[%c0_3, %c0_4] : memref<1x32xf32, #tpu.memory_space<vmem>>, vector<1x32xf32>
    %cst = arith.constant dense<0.000000e+00> : vector<32xf32>
    %4 = vector.multi_reduction <add>, %1, %cst [1] : vector<32x32xf32> to vector<32xf32>
    %5 = vector.shape_cast %4 : vector<32xf32> to vector<32x1xf32>
    %cst_5 = arith.constant 3.200000e+01 : f32
    %6 = vector.broadcast %cst_5 : f32 to vector<32x1xf32>
    %7 = arith.divf %5, %6 : vector<32x1xf32>
    %8 = vector.broadcast %7 : vector<32x1xf32> to vector<32x32xf32>
    %9 = arith.subf %1, %8 : vector<32x32xf32>
    %10 = arith.mulf %9, %9 : vector<32x32xf32>
    %cst_6 = arith.constant dense<0.000000e+00> : vector<32xf32>
    %11 = vector.multi_reduction <add>, %10, %cst_6 [1] : vector<32x32xf32> to vector<32xf32>
    %12 = vector.shape_cast %11 : vector<32xf32> to vector<32x1xf32>
    %cst_7 = arith.constant 3.200000e+01 : f32
    %13 = vector.broadcast %cst_7 : f32 to vector<32x1xf32>
    %14 = arith.divf %12, %13 : vector<32x1xf32>
    %cst_8 = arith.constant 9.99999974E-6 : f32
    %15 = vector.broadcast %cst_8 : f32 to vector<32x1xf32>
    %16 = arith.addf %14, %15 : vector<32x1xf32>
    %17 = math.rsqrt %16 : vector<32x1xf32>
    %18 = vector.broadcast %17 : vector<32x1xf32> to vector<32x32xf32>
    %19 = arith.mulf %9, %18 : vector<32x32xf32>
    %20 = vector.broadcast %2 : vector<1x32xf32> to vector<32x32xf32>
    %21 = arith.mulf %19, %20 : vector<32x32xf32>
    %22 = vector.broadcast %3 : vector<1x32xf32> to vector<32x32xf32>
    %23 = arith.addf %21, %22 : vector<32x32xf32>
    %24 = arith.truncf %23 : vector<32x32xf32> to vector<32x32xbf16>
    %c0_9 = arith.constant 0 : index
    %c0_10 = arith.constant 0 : index
    %25 = vector.load %arg4[%c0_9, %c0_10] : memref<32x192xbf16, #tpu.memory_space<vmem>>, vector<32x192xbf16>
    %cst_11 = arith.constant dense<0.000000e+00> : vector<32x192xf32>
    %26 = tpu.matmul %24, %25, %cst_11 {dimension_numbers = #tpu.dot_dimension_numbers<[1], [0], [0], [1], [0, 0, 1, 1], [], []>} : vector<32x32xbf16>, vector<32x192xbf16>, vector<32x192xf32> -> vector<32x192xf32>
    %c0_12 = arith.constant 0 : index
    %c0_13 = arith.constant 0 : index
    %c0_14 = arith.constant 0 : index
    %27 = vector.load %arg5[%c0_12, %c0_13, %c0_14] : memref<4x16x32xbf16, #tpu.memory_space<vmem>>, vector<4x16x32xbf16>
    %28 = tpu.iota {dimensions = array<i32: 1>} : vector<8x8xi32>
    %c5_i32 = arith.constant 5 : i32
    %29 = vector.broadcast %c5_i32 : i32 to vector<8x8xi32>
    %30 = arith.cmpi slt, %28, %29 : vector<8x8xi32>
    %cst_15 = arith.constant 0.000000e+00 : f32
    %cst_16 = arith.constant -1.000000e+30 : f32
    %31 = vector.broadcast %cst_15 : f32 to vector<8x8xf32>
    %32 = vector.broadcast %cst_16 : f32 to vector<8x8xf32>
    %33 = arith.select %30, %31, %32 : vector<8x8xi1>, vector<8x8xf32>
    %34 = vector.shape_cast %33 : vector<8x8xf32> to vector<1x8x8xf32>
    %35 = vector.extract_strided_slice %26 {offsets = [0, 0], sizes = [8, 16], strides = [1, 1]} : vector<32x192xf32> to vector<8x16xf32>
    %36 = vector.extract_strided_slice %26 {offsets = [0, 16], sizes = [8, 16], strides = [1, 1]} : vector<32x192xf32> to vector<8x16xf32>
    %37 = vector.extract_strided_slice %26 {offsets = [0, 32], sizes = [8, 16], strides = [1, 1]} : vector<32x192xf32> to vector<8x16xf32>
    %38 = vector.extract_strided_slice %26 {offsets = [0, 48], sizes = [8, 16], strides = [1, 1]} : vector<32x192xf32> to vector<8x16xf32>
    %39 = vector.shape_cast %35 : vector<8x16xf32> to vector<1x8x16xf32>
    %40 = vector.shape_cast %36 : vector<8x16xf32> to vector<1x8x16xf32>
    %41 = vector.shape_cast %37 : vector<8x16xf32> to vector<1x8x16xf32>
    %42 = vector.shape_cast %38 : vector<8x16xf32> to vector<1x8x16xf32>
    %43 = tpu.concatenate %39, %40, %41, %42 in 0 : vector<1x8x16xf32>, vector<1x8x16xf32>, vector<1x8x16xf32>, vector<1x8x16xf32> -> vector<4x8x16xf32>
    %44 = arith.truncf %43 : vector<4x8x16xf32> to vector<4x8x16xbf16>
    %45 = vector.extract_strided_slice %26 {offsets = [0, 64], sizes = [8, 16], strides = [1, 1]} : vector<32x192xf32> to vector<8x16xf32>
    %46 = vector.extract_strided_slice %26 {offsets = [0, 80], sizes = [8, 16], strides = [1, 1]} : vector<32x192xf32> to vector<8x16xf32>
    %47 = vector.extract_strided_slice %26 {offsets = [0, 96], sizes = [8, 16], strides = [1, 1]} : vector<32x192xf32> to vector<8x16xf32>
    %48 = vector.extract_strided_slice %26 {offsets = [0, 112], sizes = [8, 16], strides = [1, 1]} : vector<32x192xf32> to vector<8x16xf32>
    %49 = vector.shape_cast %45 : vector<8x16xf32> to vector<1x8x16xf32>
    %50 = vector.shape_cast %46 : vector<8x16xf32> to vector<1x8x16xf32>
    %51 = vector.shape_cast %47 : vector<8x16xf32> to vector<1x8x16xf32>
    %52 = vector.shape_cast %48 : vector<8x16xf32> to vector<1x8x16xf32>
    %53 = tpu.concatenate %49, %50, %51, %52 in 0 : vector<1x8x16xf32>, vector<1x8x16xf32>, vector<1x8x16xf32>, vector<1x8x16xf32> -> vector<4x8x16xf32>
    %54 = arith.truncf %53 : vector<4x8x16xf32> to vector<4x8x16xbf16>
    %55 = vector.extract_strided_slice %26 {offsets = [0, 128], sizes = [8, 16], strides = [1, 1]} : vector<32x192xf32> to vector<8x16xf32>
    %56 = vector.extract_strided_slice %26 {offsets = [0, 144], sizes = [8, 16], strides = [1, 1]} : vector<32x192xf32> to vector<8x16xf32>
    %57 = vector.extract_strided_slice %26 {offsets = [0, 160], sizes = [8, 16], strides = [1, 1]} : vector<32x192xf32> to vector<8x16xf32>
    %58 = vector.extract_strided_slice %26 {offsets = [0, 176], sizes = [8, 16], strides = [1, 1]} : vector<32x192xf32> to vector<8x16xf32>
    %59 = vector.shape_cast %55 : vector<8x16xf32> to vector<1x8x16xf32>
    %60 = vector.shape_cast %56 : vector<8x16xf32> to vector<1x8x16xf32>
    %61 = vector.shape_cast %57 : vector<8x16xf32> to vector<1x8x16xf32>
    %62 = vector.shape_cast %58 : vector<8x16xf32> to vector<1x8x16xf32>
    %63 = tpu.concatenate %59, %60, %61, %62 in 0 : vector<1x8x16xf32>, vector<1x8x16xf32>, vector<1x8x16xf32>, vector<1x8x16xf32> -> vector<4x8x16xf32>
    %64 = arith.truncf %63 : vector<4x8x16xf32> to vector<4x8x16xbf16>
    "tpu.trace_start"() <{level = 10 : i32, message = "hid,hjd->hij"}> : () -> ()
    %cst_17 = arith.constant dense<0.000000e+00> : vector<4x8x8xf32>
    %65 = tpu.matmul %44, %54, %cst_17 {dimension_numbers = #tpu.dot_dimension_numbers<[2], [2], [1], [1], [0, 0, 0, 1, 1, 1], [0], [0]>} : vector<4x8x16xbf16>, vector<4x8x16xbf16>, vector<4x8x8xf32> -> vector<4x8x8xf32>
    "tpu.trace_stop"() : () -> ()
    %66 = vector.broadcast %34 : vector<1x8x8xf32> to vector<4x8x8xf32>
    %67 = arith.addf %65, %66 : vector<4x8x8xf32>
    %cst_18 = arith.constant dense<0xFF800000> : vector<4x8xf32>
    %68 = vector.multi_reduction <maximumf>, %67, %cst_18 [2] : vector<4x8x8xf32> to vector<4x8xf32>
    %69 = vector.shape_cast %68 : vector<4x8xf32> to vector<4x8x1xf32>
    %70 = vector.broadcast %69 : vector<4x8x1xf32> to vector<4x8x8xf32>
    %71 = arith.subf %67, %70 : vector<4x8x8xf32>
    %72 = math.exp %71 : vector<4x8x8xf32>
    %cst_19 = arith.constant dense<0.000000e+00> : vector<4x8xf32>
    %73 = vector.multi_reduction <add>, %72, %cst_19 [2] : vector<4x8x8xf32> to vector<4x8xf32>
    %74 = vector.shape_cast %73 : vector<4x8xf32> to vector<4x8x1xf32>
    %75 = tpu.reciprocal %74 {approx = true} : vector<4x8x1xf32> -> vector<4x8x1xf32>
    %76 = vector.broadcast %75 : vector<4x8x1xf32> to vector<4x8x8xf32>
    %77 = arith.mulf %72, %76 : vector<4x8x8xf32>
    %78 = arith.truncf %77 : vector<4x8x8xf32> to vector<4x8x8xbf16>
    "tpu.trace_start"() <{level = 10 : i32, message = "hij,hjd->hid"}> : () -> ()
    %cst_20 = arith.constant dense<0.000000e+00> : vector<4x8x16xf32>
    %79 = tpu.matmul %78, %64, %cst_20 {dimension_numbers = #tpu.dot_dimension_numbers<[2], [1], [1], [2], [0, 0, 0, 1, 1, 2], [0], [0]>} : vector<4x8x8xbf16>, vector<4x8x16xbf16>, vector<4x8x16xf32> -> vector<4x8x16xf32>
    "tpu.trace_stop"() : () -> ()
    %80 = arith.truncf %79 : vector<4x8x16xf32> to vector<4x8x16xbf16>
    "tpu.trace_start"() <{level = 10 : i32, message = "hnd,hdo->hno"}> : () -> ()
    %cst_21 = arith.constant dense<0.000000e+00> : vector<4x8x32xf32>
    %81 = tpu.matmul %80, %27, %cst_21 {dimension_numbers = #tpu.dot_dimension_numbers<[2], [1], [1], [2], [0, 0, 0, 1, 1, 2], [0], [0]>} : vector<4x8x16xbf16>, vector<4x16x32xbf16>, vector<4x8x32xf32> -> vector<4x8x32xf32>
    "tpu.trace_stop"() : () -> ()
    %82 = vector.extract_strided_slice %81 {offsets = [0, 0, 0], sizes = [1, 8, 32], strides = [1, 1, 1]} : vector<4x8x32xf32> to vector<1x8x32xf32>
    %83 = vector.shape_cast %82 : vector<1x8x32xf32> to vector<8x32xf32>
    %84 = vector.extract_strided_slice %81 {offsets = [1, 0, 0], sizes = [1, 8, 32], strides = [1, 1, 1]} : vector<4x8x32xf32> to vector<1x8x32xf32>
    %85 = vector.shape_cast %84 : vector<1x8x32xf32> to vector<8x32xf32>
    %86 = arith.addf %83, %85 : vector<8x32xf32>
    %87 = vector.extract_strided_slice %81 {offsets = [2, 0, 0], sizes = [1, 8, 32], strides = [1, 1, 1]} : vector<4x8x32xf32> to vector<1x8x32xf32>
    %88 = vector.shape_cast %87 : vector<1x8x32xf32> to vector<8x32xf32>
    %89 = arith.addf %86, %88 : vector<8x32xf32>
    %90 = vector.extract_strided_slice %81 {offsets = [3, 0, 0], sizes = [1, 8, 32], strides = [1, 1, 1]} : vector<4x8x32xf32> to vector<1x8x32xf32>
    %91 = vector.shape_cast %90 : vector<1x8x32xf32> to vector<8x32xf32>
    %92 = arith.addf %89, %91 : vector<8x32xf32>
    %93 = vector.extract_strided_slice %26 {offsets = [8, 0], sizes = [8, 16], strides = [1, 1]} : vector<32x192xf32> to vector<8x16xf32>
    %94 = vector.extract_strided_slice %26 {offsets = [8, 16], sizes = [8, 16], strides = [1, 1]} : vector<32x192xf32> to vector<8x16xf32>
    %95 = vector.extract_strided_slice %26 {offsets = [8, 32], sizes = [8, 16], strides = [1, 1]} : vector<32x192xf32> to vector<8x16xf32>
    %96 = vector.extract_strided_slice %26 {offsets = [8, 48], sizes = [8, 16], strides = [1, 1]} : vector<32x192xf32> to vector<8x16xf32>
    %97 = vector.shape_cast %93 : vector<8x16xf32> to vector<1x8x16xf32>
    %98 = vector.shape_cast %94 : vector<8x16xf32> to vector<1x8x16xf32>
    %99 = vector.shape_cast %95 : vector<8x16xf32> to vector<1x8x16xf32>
    %100 = vector.shape_cast %96 : vector<8x16xf32> to vector<1x8x16xf32>
    %101 = tpu.concatenate %97, %98, %99, %100 in 0 : vector<1x8x16xf32>, vector<1x8x16xf32>, vector<1x8x16xf32>, vector<1x8x16xf32> -> vector<4x8x16xf32>
    %102 = arith.truncf %101 : vector<4x8x16xf32> to vector<4x8x16xbf16>
    %103 = vector.extract_strided_slice %26 {offsets = [8, 64], sizes = [8, 16], strides = [1, 1]} : vector<32x192xf32> to vector<8x16xf32>
    %104 = vector.extract_strided_slice %26 {offsets = [8, 80], sizes = [8, 16], strides = [1, 1]} : vector<32x192xf32> to vector<8x16xf32>
    %105 = vector.extract_strided_slice %26 {offsets = [8, 96], sizes = [8, 16], strides = [1, 1]} : vector<32x192xf32> to vector<8x16xf32>
    %106 = vector.extract_strided_slice %26 {offsets = [8, 112], sizes = [8, 16], strides = [1, 1]} : vector<32x192xf32> to vector<8x16xf32>
    %107 = vector.shape_cast %103 : vector<8x16xf32> to vector<1x8x16xf32>
    %108 = vector.shape_cast %104 : vector<8x16xf32> to vector<1x8x16xf32>
    %109 = vector.shape_cast %105 : vector<8x16xf32> to vector<1x8x16xf32>
    %110 = vector.shape_cast %106 : vector<8x16xf32> to vector<1x8x16xf32>
    %111 = tpu.concatenate %107, %108, %109, %110 in 0 : vector<1x8x16xf32>, vector<1x8x16xf32>, vector<1x8x16xf32>, vector<1x8x16xf32> -> vector<4x8x16xf32>
    %112 = arith.truncf %111 : vector<4x8x16xf32> to vector<4x8x16xbf16>
    %113 = vector.extract_strided_slice %26 {offsets = [8, 128], sizes = [8, 16], strides = [1, 1]} : vector<32x192xf32> to vector<8x16xf32>
    %114 = vector.extract_strided_slice %26 {offsets = [8, 144], sizes = [8, 16], strides = [1, 1]} : vector<32x192xf32> to vector<8x16xf32>
    %115 = vector.extract_strided_slice %26 {offsets = [8, 160], sizes = [8, 16], strides = [1, 1]} : vector<32x192xf32> to vector<8x16xf32>
    %116 = vector.extract_strided_slice %26 {offsets = [8, 176], sizes = [8, 16], strides = [1, 1]} : vector<32x192xf32> to vector<8x16xf32>
    %117 = vector.shape_cast %113 : vector<8x16xf32> to vector<1x8x16xf32>
    %118 = vector.shape_cast %114 : vector<8x16xf32> to vector<1x8x16xf32>
    %119 = vector.shape_cast %115 : vector<8x16xf32> to vector<1x8x16xf32>
    %120 = vector.shape_cast %116 : vector<8x16xf32> to vector<1x8x16xf32>
    %121 = tpu.concatenate %117, %118, %119, %120 in 0 : vector<1x8x16xf32>, vector<1x8x16xf32>, vector<1x8x16xf32>, vector<1x8x16xf32> -> vector<4x8x16xf32>
    %122 = arith.truncf %121 : vector<4x8x16xf32> to vector<4x8x16xbf16>
    "tpu.trace_start"() <{level = 10 : i32, message = "hid,hjd->hij"}> : () -> ()
    %cst_22 = arith.constant dense<0.000000e+00> : vector<4x8x8xf32>
    %123 = tpu.matmul %102, %112, %cst_22 {dimension_numbers = #tpu.dot_dimension_numbers<[2], [2], [1], [1], [0, 0, 0, 1, 1, 1], [0], [0]>} : vector<4x8x16xbf16>, vector<4x8x16xbf16>, vector<4x8x8xf32> -> vector<4x8x8xf32>
    "tpu.trace_stop"() : () -> ()
    %124 = vector.broadcast %34 : vector<1x8x8xf32> to vector<4x8x8xf32>
    %125 = arith.addf %123, %124 : vector<4x8x8xf32>
    %cst_23 = arith.constant dense<0xFF800000> : vector<4x8xf32>
    %126 = vector.multi_reduction <maximumf>, %125, %cst_23 [2] : vector<4x8x8xf32> to vector<4x8xf32>
    %127 = vector.shape_cast %126 : vector<4x8xf32> to vector<4x8x1xf32>
    %128 = vector.broadcast %127 : vector<4x8x1xf32> to vector<4x8x8xf32>
    %129 = arith.subf %125, %128 : vector<4x8x8xf32>
    %130 = math.exp %129 : vector<4x8x8xf32>
    %cst_24 = arith.constant dense<0.000000e+00> : vector<4x8xf32>
    %131 = vector.multi_reduction <add>, %130, %cst_24 [2] : vector<4x8x8xf32> to vector<4x8xf32>
    %132 = vector.shape_cast %131 : vector<4x8xf32> to vector<4x8x1xf32>
    %133 = tpu.reciprocal %132 {approx = true} : vector<4x8x1xf32> -> vector<4x8x1xf32>
    %134 = vector.broadcast %133 : vector<4x8x1xf32> to vector<4x8x8xf32>
    %135 = arith.mulf %130, %134 : vector<4x8x8xf32>
    %136 = arith.truncf %135 : vector<4x8x8xf32> to vector<4x8x8xbf16>
    "tpu.trace_start"() <{level = 10 : i32, message = "hij,hjd->hid"}> : () -> ()
    %cst_25 = arith.constant dense<0.000000e+00> : vector<4x8x16xf32>
    %137 = tpu.matmul %136, %122, %cst_25 {dimension_numbers = #tpu.dot_dimension_numbers<[2], [1], [1], [2], [0, 0, 0, 1, 1, 2], [0], [0]>} : vector<4x8x8xbf16>, vector<4x8x16xbf16>, vector<4x8x16xf32> -> vector<4x8x16xf32>
    "tpu.trace_stop"() : () -> ()
    %138 = arith.truncf %137 : vector<4x8x16xf32> to vector<4x8x16xbf16>
    "tpu.trace_start"() <{level = 10 : i32, message = "hnd,hdo->hno"}> : () -> ()
    %cst_26 = arith.constant dense<0.000000e+00> : vector<4x8x32xf32>
    %139 = tpu.matmul %138, %27, %cst_26 {dimension_numbers = #tpu.dot_dimension_numbers<[2], [1], [1], [2], [0, 0, 0, 1, 1, 2], [0], [0]>} : vector<4x8x16xbf16>, vector<4x16x32xbf16>, vector<4x8x32xf32> -> vector<4x8x32xf32>
    "tpu.trace_stop"() : () -> ()
    %140 = vector.extract_strided_slice %139 {offsets = [0, 0, 0], sizes = [1, 8, 32], strides = [1, 1, 1]} : vector<4x8x32xf32> to vector<1x8x32xf32>
    %141 = vector.shape_cast %140 : vector<1x8x32xf32> to vector<8x32xf32>
    %142 = vector.extract_strided_slice %139 {offsets = [1, 0, 0], sizes = [1, 8, 32], strides = [1, 1, 1]} : vector<4x8x32xf32> to vector<1x8x32xf32>
    %143 = vector.shape_cast %142 : vector<1x8x32xf32> to vector<8x32xf32>
    %144 = arith.addf %141, %143 : vector<8x32xf32>
    %145 = vector.extract_strided_slice %139 {offsets = [2, 0, 0], sizes = [1, 8, 32], strides = [1, 1, 1]} : vector<4x8x32xf32> to vector<1x8x32xf32>
    %146 = vector.shape_cast %145 : vector<1x8x32xf32> to vector<8x32xf32>
    %147 = arith.addf %144, %146 : vector<8x32xf32>
    %148 = vector.extract_strided_slice %139 {offsets = [3, 0, 0], sizes = [1, 8, 32], strides = [1, 1, 1]} : vector<4x8x32xf32> to vector<1x8x32xf32>
    %149 = vector.shape_cast %148 : vector<1x8x32xf32> to vector<8x32xf32>
    %150 = arith.addf %147, %149 : vector<8x32xf32>
    %151 = vector.extract_strided_slice %26 {offsets = [16, 0], sizes = [8, 16], strides = [1, 1]} : vector<32x192xf32> to vector<8x16xf32>
    %152 = vector.extract_strided_slice %26 {offsets = [16, 16], sizes = [8, 16], strides = [1, 1]} : vector<32x192xf32> to vector<8x16xf32>
    %153 = vector.extract_strided_slice %26 {offsets = [16, 32], sizes = [8, 16], strides = [1, 1]} : vector<32x192xf32> to vector<8x16xf32>
    %154 = vector.extract_strided_slice %26 {offsets = [16, 48], sizes = [8, 16], strides = [1, 1]} : vector<32x192xf32> to vector<8x16xf32>
    %155 = vector.shape_cast %151 : vector<8x16xf32> to vector<1x8x16xf32>
    %156 = vector.shape_cast %152 : vector<8x16xf32> to vector<1x8x16xf32>
    %157 = vector.shape_cast %153 : vector<8x16xf32> to vector<1x8x16xf32>
    %158 = vector.shape_cast %154 : vector<8x16xf32> to vector<1x8x16xf32>
    %159 = tpu.concatenate %155, %156, %157, %158 in 0 : vector<1x8x16xf32>, vector<1x8x16xf32>, vector<1x8x16xf32>, vector<1x8x16xf32> -> vector<4x8x16xf32>
    %160 = arith.truncf %159 : vector<4x8x16xf32> to vector<4x8x16xbf16>
    %161 = vector.extract_strided_slice %26 {offsets = [16, 64], sizes = [8, 16], strides = [1, 1]} : vector<32x192xf32> to vector<8x16xf32>
    %162 = vector.extract_strided_slice %26 {offsets = [16, 80], sizes = [8, 16], strides = [1, 1]} : vector<32x192xf32> to vector<8x16xf32>
    %163 = vector.extract_strided_slice %26 {offsets = [16, 96], sizes = [8, 16], strides = [1, 1]} : vector<32x192xf32> to vector<8x16xf32>
    %164 = vector.extract_strided_slice %26 {offsets = [16, 112], sizes = [8, 16], strides = [1, 1]} : vector<32x192xf32> to vector<8x16xf32>
    %165 = vector.shape_cast %161 : vector<8x16xf32> to vector<1x8x16xf32>
    %166 = vector.shape_cast %162 : vector<8x16xf32> to vector<1x8x16xf32>
    %167 = vector.shape_cast %163 : vector<8x16xf32> to vector<1x8x16xf32>
    %168 = vector.shape_cast %164 : vector<8x16xf32> to vector<1x8x16xf32>
    %169 = tpu.concatenate %165, %166, %167, %168 in 0 : vector<1x8x16xf32>, vector<1x8x16xf32>, vector<1x8x16xf32>, vector<1x8x16xf32> -> vector<4x8x16xf32>
    %170 = arith.truncf %169 : vector<4x8x16xf32> to vector<4x8x16xbf16>
    %171 = vector.extract_strided_slice %26 {offsets = [16, 128], sizes = [8, 16], strides = [1, 1]} : vector<32x192xf32> to vector<8x16xf32>
    %172 = vector.extract_strided_slice %26 {offsets = [16, 144], sizes = [8, 16], strides = [1, 1]} : vector<32x192xf32> to vector<8x16xf32>
    %173 = vector.extract_strided_slice %26 {offsets = [16, 160], sizes = [8, 16], strides = [1, 1]} : vector<32x192xf32> to vector<8x16xf32>
    %174 = vector.extract_strided_slice %26 {offsets = [16, 176], sizes = [8, 16], strides = [1, 1]} : vector<32x192xf32> to vector<8x16xf32>
    %175 = vector.shape_cast %171 : vector<8x16xf32> to vector<1x8x16xf32>
    %176 = vector.shape_cast %172 : vector<8x16xf32> to vector<1x8x16xf32>
    %177 = vector.shape_cast %173 : vector<8x16xf32> to vector<1x8x16xf32>
    %178 = vector.shape_cast %174 : vector<8x16xf32> to vector<1x8x16xf32>
    %179 = tpu.concatenate %175, %176, %177, %178 in 0 : vector<1x8x16xf32>, vector<1x8x16xf32>, vector<1x8x16xf32>, vector<1x8x16xf32> -> vector<4x8x16xf32>
    %180 = arith.truncf %179 : vector<4x8x16xf32> to vector<4x8x16xbf16>
    "tpu.trace_start"() <{level = 10 : i32, message = "hid,hjd->hij"}> : () -> ()
    %cst_27 = arith.constant dense<0.000000e+00> : vector<4x8x8xf32>
    %181 = tpu.matmul %160, %170, %cst_27 {dimension_numbers = #tpu.dot_dimension_numbers<[2], [2], [1], [1], [0, 0, 0, 1, 1, 1], [0], [0]>} : vector<4x8x16xbf16>, vector<4x8x16xbf16>, vector<4x8x8xf32> -> vector<4x8x8xf32>
    "tpu.trace_stop"() : () -> ()
    %182 = vector.broadcast %34 : vector<1x8x8xf32> to vector<4x8x8xf32>
    %183 = arith.addf %181, %182 : vector<4x8x8xf32>
    %cst_28 = arith.constant dense<0xFF800000> : vector<4x8xf32>
    %184 = vector.multi_reduction <maximumf>, %183, %cst_28 [2] : vector<4x8x8xf32> to vector<4x8xf32>
    %185 = vector.shape_cast %184 : vector<4x8xf32> to vector<4x8x1xf32>
    %186 = vector.broadcast %185 : vector<4x8x1xf32> to vector<4x8x8xf32>
    %187 = arith.subf %183, %186 : vector<4x8x8xf32>
    %188 = math.exp %187 : vector<4x8x8xf32>
    %cst_29 = arith.constant dense<0.000000e+00> : vector<4x8xf32>
    %189 = vector.multi_reduction <add>, %188, %cst_29 [2] : vector<4x8x8xf32> to vector<4x8xf32>
    %190 = vector.shape_cast %189 : vector<4x8xf32> to vector<4x8x1xf32>
    %191 = tpu.reciprocal %190 {approx = true} : vector<4x8x1xf32> -> vector<4x8x1xf32>
    %192 = vector.broadcast %191 : vector<4x8x1xf32> to vector<4x8x8xf32>
    %193 = arith.mulf %188, %192 : vector<4x8x8xf32>
    %194 = arith.truncf %193 : vector<4x8x8xf32> to vector<4x8x8xbf16>
    "tpu.trace_start"() <{level = 10 : i32, message = "hij,hjd->hid"}> : () -> ()
    %cst_30 = arith.constant dense<0.000000e+00> : vector<4x8x16xf32>
    %195 = tpu.matmul %194, %180, %cst_30 {dimension_numbers = #tpu.dot_dimension_numbers<[2], [1], [1], [2], [0, 0, 0, 1, 1, 2], [0], [0]>} : vector<4x8x8xbf16>, vector<4x8x16xbf16>, vector<4x8x16xf32> -> vector<4x8x16xf32>
    "tpu.trace_stop"() : () -> ()
    %196 = arith.truncf %195 : vector<4x8x16xf32> to vector<4x8x16xbf16>
    "tpu.trace_start"() <{level = 10 : i32, message = "hnd,hdo->hno"}> : () -> ()
    %cst_31 = arith.constant dense<0.000000e+00> : vector<4x8x32xf32>
    %197 = tpu.matmul %196, %27, %cst_31 {dimension_numbers = #tpu.dot_dimension_numbers<[2], [1], [1], [2], [0, 0, 0, 1, 1, 2], [0], [0]>} : vector<4x8x16xbf16>, vector<4x16x32xbf16>, vector<4x8x32xf32> -> vector<4x8x32xf32>
    "tpu.trace_stop"() : () -> ()
    %198 = vector.extract_strided_slice %197 {offsets = [0, 0, 0], sizes = [1, 8, 32], strides = [1, 1, 1]} : vector<4x8x32xf32> to vector<1x8x32xf32>
    %199 = vector.shape_cast %198 : vector<1x8x32xf32> to vector<8x32xf32>
    %200 = vector.extract_strided_slice %197 {offsets = [1, 0, 0], sizes = [1, 8, 32], strides = [1, 1, 1]} : vector<4x8x32xf32> to vector<1x8x32xf32>
    %201 = vector.shape_cast %200 : vector<1x8x32xf32> to vector<8x32xf32>
    %202 = arith.addf %199, %201 : vector<8x32xf32>
    %203 = vector.extract_strided_slice %197 {offsets = [2, 0, 0], sizes = [1, 8, 32], strides = [1, 1, 1]} : vector<4x8x32xf32> to vector<1x8x32xf32>
    %204 = vector.shape_cast %203 : vector<1x8x32xf32> to vector<8x32xf32>
    %205 = arith.addf %202, %204 : vector<8x32xf32>
    %206 = vector.extract_strided_slice %197 {offsets = [3, 0, 0], sizes = [1, 8, 32], strides = [1, 1, 1]} : vector<4x8x32xf32> to vector<1x8x32xf32>
    %207 = vector.shape_cast %206 : vector<1x8x32xf32> to vector<8x32xf32>
    %208 = arith.addf %205, %207 : vector<8x32xf32>
    %209 = vector.extract_strided_slice %26 {offsets = [24, 0], sizes = [8, 16], strides = [1, 1]} : vector<32x192xf32> to vector<8x16xf32>
    %210 = vector.extract_strided_slice %26 {offsets = [24, 16], sizes = [8, 16], strides = [1, 1]} : vector<32x192xf32> to vector<8x16xf32>
    %211 = vector.extract_strided_slice %26 {offsets = [24, 32], sizes = [8, 16], strides = [1, 1]} : vector<32x192xf32> to vector<8x16xf32>
    %212 = vector.extract_strided_slice %26 {offsets = [24, 48], sizes = [8, 16], strides = [1, 1]} : vector<32x192xf32> to vector<8x16xf32>
    %213 = vector.shape_cast %209 : vector<8x16xf32> to vector<1x8x16xf32>
    %214 = vector.shape_cast %210 : vector<8x16xf32> to vector<1x8x16xf32>
    %215 = vector.shape_cast %211 : vector<8x16xf32> to vector<1x8x16xf32>
    %216 = vector.shape_cast %212 : vector<8x16xf32> to vector<1x8x16xf32>
    %217 = tpu.concatenate %213, %214, %215, %216 in 0 : vector<1x8x16xf32>, vector<1x8x16xf32>, vector<1x8x16xf32>, vector<1x8x16xf32> -> vector<4x8x16xf32>
    %218 = arith.truncf %217 : vector<4x8x16xf32> to vector<4x8x16xbf16>
    %219 = vector.extract_strided_slice %26 {offsets = [24, 64], sizes = [8, 16], strides = [1, 1]} : vector<32x192xf32> to vector<8x16xf32>
    %220 = vector.extract_strided_slice %26 {offsets = [24, 80], sizes = [8, 16], strides = [1, 1]} : vector<32x192xf32> to vector<8x16xf32>
    %221 = vector.extract_strided_slice %26 {offsets = [24, 96], sizes = [8, 16], strides = [1, 1]} : vector<32x192xf32> to vector<8x16xf32>
    %222 = vector.extract_strided_slice %26 {offsets = [24, 112], sizes = [8, 16], strides = [1, 1]} : vector<32x192xf32> to vector<8x16xf32>
    %223 = vector.shape_cast %219 : vector<8x16xf32> to vector<1x8x16xf32>
    %224 = vector.shape_cast %220 : vector<8x16xf32> to vector<1x8x16xf32>
    %225 = vector.shape_cast %221 : vector<8x16xf32> to vector<1x8x16xf32>
    %226 = vector.shape_cast %222 : vector<8x16xf32> to vector<1x8x16xf32>
    %227 = tpu.concatenate %223, %224, %225, %226 in 0 : vector<1x8x16xf32>, vector<1x8x16xf32>, vector<1x8x16xf32>, vector<1x8x16xf32> -> vector<4x8x16xf32>
    %228 = arith.truncf %227 : vector<4x8x16xf32> to vector<4x8x16xbf16>
    %229 = vector.extract_strided_slice %26 {offsets = [24, 128], sizes = [8, 16], strides = [1, 1]} : vector<32x192xf32> to vector<8x16xf32>
    %230 = vector.extract_strided_slice %26 {offsets = [24, 144], sizes = [8, 16], strides = [1, 1]} : vector<32x192xf32> to vector<8x16xf32>
    %231 = vector.extract_strided_slice %26 {offsets = [24, 160], sizes = [8, 16], strides = [1, 1]} : vector<32x192xf32> to vector<8x16xf32>
    %232 = vector.extract_strided_slice %26 {offsets = [24, 176], sizes = [8, 16], strides = [1, 1]} : vector<32x192xf32> to vector<8x16xf32>
    %233 = vector.shape_cast %229 : vector<8x16xf32> to vector<1x8x16xf32>
    %234 = vector.shape_cast %230 : vector<8x16xf32> to vector<1x8x16xf32>
    %235 = vector.shape_cast %231 : vector<8x16xf32> to vector<1x8x16xf32>
    %236 = vector.shape_cast %232 : vector<8x16xf32> to vector<1x8x16xf32>
    %237 = tpu.concatenate %233, %234, %235, %236 in 0 : vector<1x8x16xf32>, vector<1x8x16xf32>, vector<1x8x16xf32>, vector<1x8x16xf32> -> vector<4x8x16xf32>
    %238 = arith.truncf %237 : vector<4x8x16xf32> to vector<4x8x16xbf16>
    "tpu.trace_start"() <{level = 10 : i32, message = "hid,hjd->hij"}> : () -> ()
    %cst_32 = arith.constant dense<0.000000e+00> : vector<4x8x8xf32>
    %239 = tpu.matmul %218, %228, %cst_32 {dimension_numbers = #tpu.dot_dimension_numbers<[2], [2], [1], [1], [0, 0, 0, 1, 1, 1], [0], [0]>} : vector<4x8x16xbf16>, vector<4x8x16xbf16>, vector<4x8x8xf32> -> vector<4x8x8xf32>
    "tpu.trace_stop"() : () -> ()
    %240 = vector.broadcast %34 : vector<1x8x8xf32> to vector<4x8x8xf32>
    %241 = arith.addf %239, %240 : vector<4x8x8xf32>
    %cst_33 = arith.constant dense<0xFF800000> : vector<4x8xf32>
    %242 = vector.multi_reduction <maximumf>, %241, %cst_33 [2] : vector<4x8x8xf32> to vector<4x8xf32>
    %243 = vector.shape_cast %242 : vector<4x8xf32> to vector<4x8x1xf32>
    %244 = vector.broadcast %243 : vector<4x8x1xf32> to vector<4x8x8xf32>
    %245 = arith.subf %241, %244 : vector<4x8x8xf32>
    %246 = math.exp %245 : vector<4x8x8xf32>
    %cst_34 = arith.constant dense<0.000000e+00> : vector<4x8xf32>
    %247 = vector.multi_reduction <add>, %246, %cst_34 [2] : vector<4x8x8xf32> to vector<4x8xf32>
    %248 = vector.shape_cast %247 : vector<4x8xf32> to vector<4x8x1xf32>
    %249 = tpu.reciprocal %248 {approx = true} : vector<4x8x1xf32> -> vector<4x8x1xf32>
    %250 = vector.broadcast %249 : vector<4x8x1xf32> to vector<4x8x8xf32>
    %251 = arith.mulf %246, %250 : vector<4x8x8xf32>
    %252 = arith.truncf %251 : vector<4x8x8xf32> to vector<4x8x8xbf16>
    "tpu.trace_start"() <{level = 10 : i32, message = "hij,hjd->hid"}> : () -> ()
    %cst_35 = arith.constant dense<0.000000e+00> : vector<4x8x16xf32>
    %253 = tpu.matmul %252, %238, %cst_35 {dimension_numbers = #tpu.dot_dimension_numbers<[2], [1], [1], [2], [0, 0, 0, 1, 1, 2], [0], [0]>} : vector<4x8x8xbf16>, vector<4x8x16xbf16>, vector<4x8x16xf32> -> vector<4x8x16xf32>
    "tpu.trace_stop"() : () -> ()
    %254 = arith.truncf %253 : vector<4x8x16xf32> to vector<4x8x16xbf16>
    "tpu.trace_start"() <{level = 10 : i32, message = "hnd,hdo->hno"}> : () -> ()
    %cst_36 = arith.constant dense<0.000000e+00> : vector<4x8x32xf32>
    %255 = tpu.matmul %254, %27, %cst_36 {dimension_numbers = #tpu.dot_dimension_numbers<[2], [1], [1], [2], [0, 0, 0, 1, 1, 2], [0], [0]>} : vector<4x8x16xbf16>, vector<4x16x32xbf16>, vector<4x8x32xf32> -> vector<4x8x32xf32>
    "tpu.trace_stop"() : () -> ()
    %256 = vector.extract_strided_slice %255 {offsets = [0, 0, 0], sizes = [1, 8, 32], strides = [1, 1, 1]} : vector<4x8x32xf32> to vector<1x8x32xf32>
    %257 = vector.shape_cast %256 : vector<1x8x32xf32> to vector<8x32xf32>
    %258 = vector.extract_strided_slice %255 {offsets = [1, 0, 0], sizes = [1, 8, 32], strides = [1, 1, 1]} : vector<4x8x32xf32> to vector<1x8x32xf32>
    %259 = vector.shape_cast %258 : vector<1x8x32xf32> to vector<8x32xf32>
    %260 = arith.addf %257, %259 : vector<8x32xf32>
    %261 = vector.extract_strided_slice %255 {offsets = [2, 0, 0], sizes = [1, 8, 32], strides = [1, 1, 1]} : vector<4x8x32xf32> to vector<1x8x32xf32>
    %262 = vector.shape_cast %261 : vector<1x8x32xf32> to vector<8x32xf32>
    %263 = arith.addf %260, %262 : vector<8x32xf32>
    %264 = vector.extract_strided_slice %255 {offsets = [3, 0, 0], sizes = [1, 8, 32], strides = [1, 1, 1]} : vector<4x8x32xf32> to vector<1x8x32xf32>
    %265 = vector.shape_cast %264 : vector<1x8x32xf32> to vector<8x32xf32>
    %266 = arith.addf %263, %265 : vector<8x32xf32>
    %267 = tpu.concatenate %92, %150, %208, %266 in 0 : vector<8x32xf32>, vector<8x32xf32>, vector<8x32xf32>, vector<8x32xf32> -> vector<32x32xf32>
    %268 = arith.addf %1, %267 : vector<32x32xf32>
    %c0_37 = arith.constant 0 : index
    %c0_38 = arith.constant 0 : index
    %269 = vector.load %arg6[%c0_37, %c0_38] : memref<1x32xf32, #tpu.memory_space<vmem>>, vector<1x32xf32>
    %270 = vector.broadcast %269 : vector<1x32xf32> to vector<32x32xf32>
    %271 = arith.addf %268, %270 : vector<32x32xf32>
    %c0_39 = arith.constant 0 : index
    %c0_40 = arith.constant 0 : index
    %272 = vector.load %arg7[%c0_39, %c0_40] : memref<1x32xf32, #tpu.memory_space<vmem>>, vector<1x32xf32>
    %c0_41 = arith.constant 0 : index
    %c0_42 = arith.constant 0 : index
    %273 = vector.load %arg8[%c0_41, %c0_42] : memref<1x32xf32, #tpu.memory_space<vmem>>, vector<1x32xf32>
    %cst_43 = arith.constant dense<0.000000e+00> : vector<32xf32>
    %274 = vector.multi_reduction <add>, %271, %cst_43 [1] : vector<32x32xf32> to vector<32xf32>
    %275 = vector.shape_cast %274 : vector<32xf32> to vector<32x1xf32>
    %cst_44 = arith.constant 3.200000e+01 : f32
    %276 = vector.broadcast %cst_44 : f32 to vector<32x1xf32>
    %277 = arith.divf %275, %276 : vector<32x1xf32>
    %278 = vector.broadcast %277 : vector<32x1xf32> to vector<32x32xf32>
    %279 = arith.subf %271, %278 : vector<32x32xf32>
    %280 = arith.mulf %279, %279 : vector<32x32xf32>
    %cst_45 = arith.constant dense<0.000000e+00> : vector<32xf32>
    %281 = vector.multi_reduction <add>, %280, %cst_45 [1] : vector<32x32xf32> to vector<32xf32>
    %282 = vector.shape_cast %281 : vector<32xf32> to vector<32x1xf32>
    %cst_46 = arith.constant 3.200000e+01 : f32
    %283 = vector.broadcast %cst_46 : f32 to vector<32x1xf32>
    %284 = arith.divf %282, %283 : vector<32x1xf32>
    %cst_47 = arith.constant 9.99999974E-6 : f32
    %285 = vector.broadcast %cst_47 : f32 to vector<32x1xf32>
    %286 = arith.addf %284, %285 : vector<32x1xf32>
    %287 = math.rsqrt %286 : vector<32x1xf32>
    %288 = vector.broadcast %287 : vector<32x1xf32> to vector<32x32xf32>
    %289 = arith.mulf %279, %288 : vector<32x32xf32>
    %290 = vector.broadcast %272 : vector<1x32xf32> to vector<32x32xf32>
    %291 = arith.mulf %289, %290 : vector<32x32xf32>
    %292 = vector.broadcast %273 : vector<1x32xf32> to vector<32x32xf32>
    %293 = arith.addf %291, %292 : vector<32x32xf32>
    %294 = arith.truncf %293 : vector<32x32xf32> to vector<32x32xbf16>
    %c0_48 = arith.constant 0 : index
    %c0_49 = arith.constant 0 : index
    %295 = vector.load %arg9[%c0_48, %c0_49] : memref<32x128xbf16, #tpu.memory_space<vmem>>, vector<32x128xbf16>
    %cst_50 = arith.constant dense<0.000000e+00> : vector<32x128xf32>
    %296 = tpu.matmul %294, %295, %cst_50 {dimension_numbers = #tpu.dot_dimension_numbers<[1], [0], [0], [1], [0, 0, 1, 1], [], []>} : vector<32x32xbf16>, vector<32x128xbf16>, vector<32x128xf32> -> vector<32x128xf32>
    %c0_51 = arith.constant 0 : index
    %c0_52 = arith.constant 0 : index
    %297 = vector.load %arg10[%c0_51, %c0_52] : memref<1x128xf32, #tpu.memory_space<vmem>>, vector<1x128xf32>
    %298 = vector.broadcast %297 : vector<1x128xf32> to vector<32x128xf32>
    %299 = arith.addf %296, %298 : vector<32x128xf32>
    %cst_53 = arith.constant 5.000000e-01 : f32
    %300 = vector.broadcast %cst_53 : f32 to vector<32x128xf32>
    %301 = arith.mulf %300, %299 : vector<32x128xf32>
    %cst_54 = arith.constant 4.471500e-02 : f32
    %302 = vector.broadcast %cst_54 : f32 to vector<32x128xf32>
    %303 = arith.mulf %302, %299 : vector<32x128xf32>
    %304 = arith.mulf %303, %299 : vector<32x128xf32>
    %305 = arith.mulf %304, %299 : vector<32x128xf32>
    %306 = arith.addf %299, %305 : vector<32x128xf32>
    %cst_55 = arith.constant 0.797884583 : f32
    %307 = vector.broadcast %cst_55 : f32 to vector<32x128xf32>
    %308 = arith.mulf %307, %306 : vector<32x128xf32>
    %309 = math.tanh %308 : vector<32x128xf32>
    %cst_56 = arith.constant 1.000000e+00 : f32
    %310 = vector.broadcast %cst_56 : f32 to vector<32x128xf32>
    %311 = arith.addf %310, %309 : vector<32x128xf32>
    %312 = arith.mulf %301, %311 : vector<32x128xf32>
    %313 = arith.truncf %312 : vector<32x128xf32> to vector<32x128xbf16>
    %c0_57 = arith.constant 0 : index
    %c0_58 = arith.constant 0 : index
    %314 = vector.load %arg11[%c0_57, %c0_58] : memref<128x32xbf16, #tpu.memory_space<vmem>>, vector<128x32xbf16>
    %cst_59 = arith.constant dense<0.000000e+00> : vector<32x32xf32>
    %315 = tpu.matmul %313, %314, %cst_59 {dimension_numbers = #tpu.dot_dimension_numbers<[1], [0], [0], [1], [0, 0, 1, 1], [], []>} : vector<32x128xbf16>, vector<128x32xbf16>, vector<32x32xf32> -> vector<32x32xf32>
    %c0_60 = arith.constant 0 : index
    %c0_61 = arith.constant 0 : index
    %316 = vector.load %arg12[%c0_60, %c0_61] : memref<1x32xf32, #tpu.memory_space<vmem>>, vector<1x32xf32>
    %317 = vector.broadcast %316 : vector<1x32xf32> to vector<32x32xf32>
    %318 = arith.addf %315, %317 : vector<32x32xf32>
    %319 = arith.addf %271, %318 : vector<32x32xf32>
    %c0_62 = arith.constant 0 : index
    %c0_63 = arith.constant 0 : index
    %320 = vector.load %arg13[%c0_62, %c0_63] : memref<1x32xf32, #tpu.memory_space<vmem>>, vector<1x32xf32>
    %c0_64 = arith.constant 0 : index
    %c0_65 = arith.constant 0 : index
    %321 = vector.load %arg14[%c0_64, %c0_65] : memref<1x32xf32, #tpu.memory_space<vmem>>, vector<1x32xf32>
    %cst_66 = arith.constant dense<0.000000e+00> : vector<32xf32>
    %322 = vector.multi_reduction <add>, %319, %cst_66 [1] : vector<32x32xf32> to vector<32xf32>
    %323 = vector.shape_cast %322 : vector<32xf32> to vector<32x1xf32>
    %cst_67 = arith.constant 3.200000e+01 : f32
    %324 = vector.broadcast %cst_67 : f32 to vector<32x1xf32>
    %325 = arith.divf %323, %324 : vector<32x1xf32>
    %326 = vector.broadcast %325 : vector<32x1xf32> to vector<32x32xf32>
    %327 = arith.subf %319, %326 : vector<32x32xf32>
    %328 = arith.mulf %327, %327 : vector<32x32xf32>
    %cst_68 = arith.constant dense<0.000000e+00> : vector<32xf32>
    %329 = vector.multi_reduction <add>, %328, %cst_68 [1] : vector<32x32xf32> to vector<32xf32>
    %330 = vector.shape_cast %329 : vector<32xf32> to vector<32x1xf32>
    %cst_69 = arith.constant 3.200000e+01 : f32
    %331 = vector.broadcast %cst_69 : f32 to vector<32x1xf32>
    %332 = arith.divf %330, %331 : vector<32x1xf32>
    %cst_70 = arith.constant 9.99999974E-6 : f32
    %333 = vector.broadcast %cst_70 : f32 to vector<32x1xf32>
    %334 = arith.addf %332, %333 : vector<32x1xf32>
    %335 = math.rsqrt %334 : vector<32x1xf32>
    %336 = vector.broadcast %335 : vector<32x1xf32> to vector<32x32xf32>
    %337 = arith.mulf %327, %336 : vector<32x32xf32>
    %338 = vector.broadcast %320 : vector<1x32xf32> to vector<32x32xf32>
    %339 = arith.mulf %337, %338 : vector<32x32xf32>
    %340 = vector.broadcast %321 : vector<1x32xf32> to vector<32x32xf32>
    %341 = arith.addf %339, %340 : vector<32x32xf32>
    %342 = arith.truncf %341 : vector<32x32xf32> to vector<32x32xbf16>
    %c0_71 = arith.constant 0 : index
    %c0_72 = arith.constant 0 : index
    %343 = vector.load %arg15[%c0_71, %c0_72] : memref<32x32xbf16, #tpu.memory_space<vmem>>, vector<32x32xbf16>
    tpu.vector_store %arg15[%c0_71, %c0_72], %342 {strides = array<i32>} : memref<32x32xbf16, #tpu.memory_space<vmem>>, vector<32x32xbf16>,
    return
  }
  func.func @transform_0(%arg0: i32) -> (i32, i32) {
    %c0_i32 = arith.constant 0 : i32
    %c0_i32_0 = arith.constant 0 : i32
    return %arg0, %c0_i32 : i32, i32
  }
  func.func @transform_1(%arg0: i32) -> (i32, i32) {
    %c0_i32 = arith.constant 0 : i32
    %c0_i32_0 = arith.constant 0 : i32
    %c0_i32_1 = arith.constant 0 : i32
    return %c0_i32, %c0_i32_0 : i32, i32
  }
  func.func @transform_2(%arg0: i32) -> (i32, i32) {
    %c0_i32 = arith.constant 0 : i32
    %c0_i32_0 = arith.constant 0 : i32
    %c0_i32_1 = arith.constant 0 : i32
    return %c0_i32, %c0_i32_0 : i32, i32
  }
  func.func @transform_3(%arg0: i32) -> (i32, i32) {
    %c0_i32 = arith.constant 0 : i32
    %c0_i32_0 = arith.constant 0 : i32
    %c0_i32_1 = arith.constant 0 : i32
    return %c0_i32, %c0_i32_0 : i32, i32
  }
  func.func @transform_4(%arg0: i32) -> (i32, i32, i32) {
    %c0_i32 = arith.constant 0 : i32
    %c0_i32_0 = arith.constant 0 : i32
    %c0_i32_1 = arith.constant 0 : i32
    %c0_i32_2 = arith.constant 0 : i32
    return %c0_i32, %c0_i32_0, %c0_i32_1 : i32, i32, i32
  }
  func.func @transform_5(%arg0: i32) -> (i32, i32) {
    %c0_i32 = arith.constant 0 : i32
    %c0_i32_0 = arith.constant 0 : i32
    %c0_i32_1 = arith.constant 0 : i32
    return %c0_i32, %c0_i32_0 : i32, i32
  }
  func.func @transform_6(%arg0: i32) -> (i32, i32) {
    %c0_i32 = arith.constant 0 : i32
    %c0_i32_0 = arith.constant 0 : i32
    %c0_i32_1 = arith.constant 0 : i32
    return %c0_i32, %c0_i32_0 : i32, i32
  }
  func.func @transform_7(%arg0: i32) -> (i32, i32) {
    %c0_i32 = arith.constant 0 : i32
    %c0_i32_0 = arith.constant 0 : i32
    %c0_i32_1 = arith.constant 0 : i32
    return %c0_i32, %c0_i32_0 : i32, i32
  }
  func.func @transform_8(%arg0: i32) -> (i32, i32) {
    %c0_i32 = arith.constant 0 : i32
    %c0_i32_0 = arith.constant 0 : i32
    %c0_i32_1 = arith.constant 0 : i32
    return %c0_i32, %c0_i32_0 : i32, i32
  }
  func.func @transform_9(%arg0: i32) -> (i32, i32) {
    %c0_i32 = arith.constant 0 : i32
    %c0_i32_0 = arith.constant 0 : i32
    %c0_i32_1 = arith.constant 0 : i32
    return %c0_i32, %c0_i32_0 : i32, i32
  }
  func.func @transform_10(%arg0: i32) -> (i32, i32) {
    %c0_i32 = arith.constant 0 : i32
    %c0_i32_0 = arith.constant 0 : i32
    %c0_i32_1 = arith.constant 0 : i32
    return %c0_i32, %c0_i32_0 : i32, i32
  }
  func.func @transform_11(%arg0: i32) -> (i32, i32) {
    %c0_i32 = arith.constant 0 : i32
    %c0_i32_0 = arith.constant 0 : i32
    %c0_i32_1 = arith.constant 0 : i32
    return %c0_i32, %c0_i32_0 : i32, i32
  }
  func.func @transform_12(%arg0: i32) -> (i32, i32) {
    %c0_i32 = arith.constant 0 : i32
    %c0_i32_0 = arith.constant 0 : i32
    %c0_i32_1 = arith.constant 0 : i32
    return %c0_i32, %c0_i32_0 : i32, i32
  }
  func.func @transform_13(%arg0: i32) -> (i32, i32) {
    %c0_i32 = arith.constant 0 : i32
    %c0_i32_0 = arith.constant 0 : i32
    %c0_i32_1 = arith.constant 0 : i32
    return %c0_i32, %c0_i32_0 : i32, i32
  }
  func.func @transform_14(%arg0: i32) -> (i32, i32) {
    %c0_i32 = arith.constant 0 : i32
    %c0_i32_0 = arith.constant 0 : i32
    return %arg0, %c0_i32 : i32, i32
  }
}

module attributes {stable_mosaic.version = 11 : i64} {
  func.func @fused_layer_kernel(%arg0: i32, %arg1: memref<16x32xbf16, #tpu.memory_space<vmem>>, %arg2: memref<1x32xf32, #tpu.memory_space<vmem>>, %arg3: memref<1x32xf32, #tpu.memory_space<vmem>>, %arg4: memref<32x192xbf16, #tpu.memory_space<vmem>>, %arg5: memref<4x16x32xbf16, #tpu.memory_space<vmem>>, %arg6: memref<1x32xf32, #tpu.memory_space<vmem>>, %arg7: memref<1x32xf32, #tpu.memory_space<vmem>>, %arg8: memref<1x32xf32, #tpu.memory_space<vmem>>, %arg9: memref<32x128xbf16, #tpu.memory_space<vmem>>, %arg10: memref<1x128xf32, #tpu.memory_space<vmem>>, %arg11: memref<128x32xbf16, #tpu.memory_space<vmem>>, %arg12: memref<1x32xf32, #tpu.memory_space<vmem>>, %arg13: memref<16x32xbf16, #tpu.memory_space<vmem>>) attributes {dimension_semantics = [#tpu.dimension_semantics<parallel>], iteration_bounds = array<i64: 1>, scalar_prefetch = 0 : i64, scratch_operands = 0 : i64, tpu.core_type = #tpu.core_type<tc>, window_params = [{transform_indices = @transform_0, window_bounds = array<i64: 16, 32>}, {pipeline_mode = #tpu.pipeline_mode<synchronous>, transform_indices = @transform_1, window_bounds = array<i64: 1, 32>}, {pipeline_mode = #tpu.pipeline_mode<synchronous>, transform_indices = @transform_2, window_bounds = array<i64: 1, 32>}, {pipeline_mode = #tpu.pipeline_mode<synchronous>, transform_indices = @transform_3, window_bounds = array<i64: 32, 192>}, {pipeline_mode = #tpu.pipeline_mode<synchronous>, transform_indices = @transform_4, window_bounds = array<i64: 4, 16, 32>}, {pipeline_mode = #tpu.pipeline_mode<synchronous>, transform_indices = @transform_5, window_bounds = array<i64: 1, 32>}, {pipeline_mode = #tpu.pipeline_mode<synchronous>, transform_indices = @transform_6, window_bounds = array<i64: 1, 32>}, {pipeline_mode = #tpu.pipeline_mode<synchronous>, transform_indices = @transform_7, window_bounds = array<i64: 1, 32>}, {pipeline_mode = #tpu.pipeline_mode<synchronous>, transform_indices = @transform_8, window_bounds = array<i64: 32, 128>}, {pipeline_mode = #tpu.pipeline_mode<synchronous>, transform_indices = @transform_9, window_bounds = array<i64: 1, 128>}, {pipeline_mode = #tpu.pipeline_mode<synchronous>, transform_indices = @transform_10, window_bounds = array<i64: 128, 32>}, {pipeline_mode = #tpu.pipeline_mode<synchronous>, transform_indices = @transform_11, window_bounds = array<i64: 1, 32>}, {transform_indices = @transform_12, window_bounds = array<i64: 16, 32>}]} {
    %c0 = arith.constant 0 : index
    %c0_0 = arith.constant 0 : index
    %0 = vector.load %arg1[%c0, %c0_0] : memref<16x32xbf16, #tpu.memory_space<vmem>>, vector<16x32xbf16>
    %1 = arith.extf %0 : vector<16x32xbf16> to vector<16x32xf32>
    %c0_1 = arith.constant 0 : index
    %c0_2 = arith.constant 0 : index
    %2 = vector.load %arg2[%c0_1, %c0_2] : memref<1x32xf32, #tpu.memory_space<vmem>>, vector<1x32xf32>
    %c0_3 = arith.constant 0 : index
    %c0_4 = arith.constant 0 : index
    %3 = vector.load %arg3[%c0_3, %c0_4] : memref<1x32xf32, #tpu.memory_space<vmem>>, vector<1x32xf32>
    %cst = arith.constant dense<0.000000e+00> : vector<16xf32>
    %4 = vector.multi_reduction <add>, %1, %cst [1] : vector<16x32xf32> to vector<16xf32>
    %5 = vector.shape_cast %4 : vector<16xf32> to vector<16x1xf32>
    %cst_5 = arith.constant 3.200000e+01 : f32
    %6 = vector.broadcast %cst_5 : f32 to vector<16x1xf32>
    %7 = arith.divf %5, %6 : vector<16x1xf32>
    %8 = vector.broadcast %7 : vector<16x1xf32> to vector<16x32xf32>
    %9 = arith.subf %1, %8 : vector<16x32xf32>
    %10 = arith.mulf %9, %9 : vector<16x32xf32>
    %cst_6 = arith.constant dense<0.000000e+00> : vector<16xf32>
    %11 = vector.multi_reduction <add>, %10, %cst_6 [1] : vector<16x32xf32> to vector<16xf32>
    %12 = vector.shape_cast %11 : vector<16xf32> to vector<16x1xf32>
    %cst_7 = arith.constant 3.200000e+01 : f32
    %13 = vector.broadcast %cst_7 : f32 to vector<16x1xf32>
    %14 = arith.divf %12, %13 : vector<16x1xf32>
    %cst_8 = arith.constant 9.99999974E-6 : f32
    %15 = vector.broadcast %cst_8 : f32 to vector<16x1xf32>
    %16 = arith.addf %14, %15 : vector<16x1xf32>
    %17 = math.rsqrt %16 : vector<16x1xf32>
    %18 = vector.broadcast %17 : vector<16x1xf32> to vector<16x32xf32>
    %19 = arith.mulf %9, %18 : vector<16x32xf32>
    %20 = vector.broadcast %2 : vector<1x32xf32> to vector<16x32xf32>
    %21 = arith.mulf %19, %20 : vector<16x32xf32>
    %22 = vector.broadcast %3 : vector<1x32xf32> to vector<16x32xf32>
    %23 = arith.addf %21, %22 : vector<16x32xf32>
    %24 = arith.truncf %23 : vector<16x32xf32> to vector<16x32xbf16>
    %c0_9 = arith.constant 0 : index
    %c0_10 = arith.constant 0 : index
    %25 = vector.load %arg4[%c0_9, %c0_10] : memref<32x192xbf16, #tpu.memory_space<vmem>>, vector<32x192xbf16>
    %cst_11 = arith.constant dense<0.000000e+00> : vector<16x192xf32>
    %26 = tpu.matmul %24, %25, %cst_11 {dimension_numbers = #tpu.dot_dimension_numbers<[1], [0], [0], [1], [0, 0, 1, 1], [], []>} : vector<16x32xbf16>, vector<32x192xbf16>, vector<16x192xf32> -> vector<16x192xf32>
    %c0_12 = arith.constant 0 : index
    %c0_13 = arith.constant 0 : index
    %c0_14 = arith.constant 0 : index
    %27 = vector.load %arg5[%c0_12, %c0_13, %c0_14] : memref<4x16x32xbf16, #tpu.memory_space<vmem>>, vector<4x16x32xbf16>
    %28 = tpu.iota {dimensions = array<i32: 1>} : vector<8x8xi32>
    %c5_i32 = arith.constant 5 : i32
    %29 = vector.broadcast %c5_i32 : i32 to vector<8x8xi32>
    %30 = arith.cmpi slt, %28, %29 : vector<8x8xi32>
    %cst_15 = arith.constant 0.000000e+00 : f32
    %cst_16 = arith.constant -1.000000e+30 : f32
    %31 = vector.broadcast %cst_15 : f32 to vector<8x8xf32>
    %32 = vector.broadcast %cst_16 : f32 to vector<8x8xf32>
    %33 = arith.select %30, %31, %32 : vector<8x8xi1>, vector<8x8xf32>
    %34 = vector.shape_cast %33 : vector<8x8xf32> to vector<1x8x8xf32>
    %35 = vector.extract_strided_slice %26 {offsets = [0, 0], sizes = [8, 16], strides = [1, 1]} : vector<16x192xf32> to vector<8x16xf32>
    %36 = vector.extract_strided_slice %26 {offsets = [0, 16], sizes = [8, 16], strides = [1, 1]} : vector<16x192xf32> to vector<8x16xf32>
    %37 = vector.extract_strided_slice %26 {offsets = [0, 32], sizes = [8, 16], strides = [1, 1]} : vector<16x192xf32> to vector<8x16xf32>
    %38 = vector.extract_strided_slice %26 {offsets = [0, 48], sizes = [8, 16], strides = [1, 1]} : vector<16x192xf32> to vector<8x16xf32>
    %39 = vector.shape_cast %35 : vector<8x16xf32> to vector<1x8x16xf32>
    %40 = vector.shape_cast %36 : vector<8x16xf32> to vector<1x8x16xf32>
    %41 = vector.shape_cast %37 : vector<8x16xf32> to vector<1x8x16xf32>
    %42 = vector.shape_cast %38 : vector<8x16xf32> to vector<1x8x16xf32>
    %43 = tpu.concatenate %39, %40, %41, %42 in 0 : vector<1x8x16xf32>, vector<1x8x16xf32>, vector<1x8x16xf32>, vector<1x8x16xf32> -> vector<4x8x16xf32>
    %44 = arith.truncf %43 : vector<4x8x16xf32> to vector<4x8x16xbf16>
    %45 = vector.extract_strided_slice %26 {offsets = [0, 64], sizes = [8, 16], strides = [1, 1]} : vector<16x192xf32> to vector<8x16xf32>
    %46 = vector.extract_strided_slice %26 {offsets = [0, 80], sizes = [8, 16], strides = [1, 1]} : vector<16x192xf32> to vector<8x16xf32>
    %47 = vector.extract_strided_slice %26 {offsets = [0, 96], sizes = [8, 16], strides = [1, 1]} : vector<16x192xf32> to vector<8x16xf32>
    %48 = vector.extract_strided_slice %26 {offsets = [0, 112], sizes = [8, 16], strides = [1, 1]} : vector<16x192xf32> to vector<8x16xf32>
    %49 = vector.shape_cast %45 : vector<8x16xf32> to vector<1x8x16xf32>
    %50 = vector.shape_cast %46 : vector<8x16xf32> to vector<1x8x16xf32>
    %51 = vector.shape_cast %47 : vector<8x16xf32> to vector<1x8x16xf32>
    %52 = vector.shape_cast %48 : vector<8x16xf32> to vector<1x8x16xf32>
    %53 = tpu.concatenate %49, %50, %51, %52 in 0 : vector<1x8x16xf32>, vector<1x8x16xf32>, vector<1x8x16xf32>, vector<1x8x16xf32> -> vector<4x8x16xf32>
    %54 = arith.truncf %53 : vector<4x8x16xf32> to vector<4x8x16xbf16>
    %55 = vector.extract_strided_slice %26 {offsets = [0, 128], sizes = [8, 16], strides = [1, 1]} : vector<16x192xf32> to vector<8x16xf32>
    %56 = vector.extract_strided_slice %26 {offsets = [0, 144], sizes = [8, 16], strides = [1, 1]} : vector<16x192xf32> to vector<8x16xf32>
    %57 = vector.extract_strided_slice %26 {offsets = [0, 160], sizes = [8, 16], strides = [1, 1]} : vector<16x192xf32> to vector<8x16xf32>
    %58 = vector.extract_strided_slice %26 {offsets = [0, 176], sizes = [8, 16], strides = [1, 1]} : vector<16x192xf32> to vector<8x16xf32>
    %59 = vector.shape_cast %55 : vector<8x16xf32> to vector<1x8x16xf32>
    %60 = vector.shape_cast %56 : vector<8x16xf32> to vector<1x8x16xf32>
    %61 = vector.shape_cast %57 : vector<8x16xf32> to vector<1x8x16xf32>
    %62 = vector.shape_cast %58 : vector<8x16xf32> to vector<1x8x16xf32>
    %63 = tpu.concatenate %59, %60, %61, %62 in 0 : vector<1x8x16xf32>, vector<1x8x16xf32>, vector<1x8x16xf32>, vector<1x8x16xf32> -> vector<4x8x16xf32>
    %64 = arith.truncf %63 : vector<4x8x16xf32> to vector<4x8x16xbf16>
    "tpu.trace_start"() <{level = 10 : i32, message = "hid,hjd->hij"}> : () -> ()
    %cst_17 = arith.constant dense<0.000000e+00> : vector<4x8x8xf32>
    %65 = tpu.matmul %44, %54, %cst_17 {dimension_numbers = #tpu.dot_dimension_numbers<[2], [2], [1], [1], [0, 0, 0, 1, 1, 1], [0], [0]>} : vector<4x8x16xbf16>, vector<4x8x16xbf16>, vector<4x8x8xf32> -> vector<4x8x8xf32>
    "tpu.trace_stop"() : () -> ()
    %66 = vector.broadcast %34 : vector<1x8x8xf32> to vector<4x8x8xf32>
    %67 = arith.addf %65, %66 : vector<4x8x8xf32>
    %cst_18 = arith.constant dense<0xFF800000> : vector<4x8xf32>
    %68 = vector.multi_reduction <maximumf>, %67, %cst_18 [2] : vector<4x8x8xf32> to vector<4x8xf32>
    %69 = vector.shape_cast %68 : vector<4x8xf32> to vector<4x8x1xf32>
    %70 = vector.broadcast %69 : vector<4x8x1xf32> to vector<4x8x8xf32>
    %71 = arith.subf %67, %70 : vector<4x8x8xf32>
    %72 = math.exp %71 : vector<4x8x8xf32>
    %cst_19 = arith.constant dense<0.000000e+00> : vector<4x8xf32>
    %73 = vector.multi_reduction <add>, %72, %cst_19 [2] : vector<4x8x8xf32> to vector<4x8xf32>
    %74 = vector.shape_cast %73 : vector<4x8xf32> to vector<4x8x1xf32>
    %75 = tpu.reciprocal %74 {approx = true} : vector<4x8x1xf32> -> vector<4x8x1xf32>
    %76 = vector.broadcast %75 : vector<4x8x1xf32> to vector<4x8x8xf32>
    %77 = arith.mulf %72, %76 : vector<4x8x8xf32>
    %78 = arith.truncf %77 : vector<4x8x8xf32> to vector<4x8x8xbf16>
    "tpu.trace_start"() <{level = 10 : i32, message = "hij,hjd->hid"}> : () -> ()
    %cst_20 = arith.constant dense<0.000000e+00> : vector<4x8x16xf32>
    %79 = tpu.matmul %78, %64, %cst_20 {dimension_numbers = #tpu.dot_dimension_numbers<[2], [1], [1], [2], [0, 0, 0, 1, 1, 2], [0], [0]>} : vector<4x8x8xbf16>, vector<4x8x16xbf16>, vector<4x8x16xf32> -> vector<4x8x16xf32>
    "tpu.trace_stop"() : () -> ()
    %80 = arith.truncf %79 : vector<4x8x16xf32> to vector<4x8x16xbf16>
    "tpu.trace_start"() <{level = 10 : i32, message = "hnd,hdo->hno"}> : () -> ()
    %cst_21 = arith.constant dense<0.000000e+00> : vector<4x8x32xf32>
    %81 = tpu.matmul %80, %27, %cst_21 {dimension_numbers = #tpu.dot_dimension_numbers<[2], [1], [1], [2], [0, 0, 0, 1, 1, 2], [0], [0]>} : vector<4x8x16xbf16>, vector<4x16x32xbf16>, vector<4x8x32xf32> -> vector<4x8x32xf32>
    "tpu.trace_stop"() : () -> ()
    %82 = vector.extract_strided_slice %81 {offsets = [0, 0, 0], sizes = [1, 8, 32], strides = [1, 1, 1]} : vector<4x8x32xf32> to vector<1x8x32xf32>
    %83 = vector.shape_cast %82 : vector<1x8x32xf32> to vector<8x32xf32>
    %84 = vector.extract_strided_slice %81 {offsets = [1, 0, 0], sizes = [1, 8, 32], strides = [1, 1, 1]} : vector<4x8x32xf32> to vector<1x8x32xf32>
    %85 = vector.shape_cast %84 : vector<1x8x32xf32> to vector<8x32xf32>
    %86 = arith.addf %83, %85 : vector<8x32xf32>
    %87 = vector.extract_strided_slice %81 {offsets = [2, 0, 0], sizes = [1, 8, 32], strides = [1, 1, 1]} : vector<4x8x32xf32> to vector<1x8x32xf32>
    %88 = vector.shape_cast %87 : vector<1x8x32xf32> to vector<8x32xf32>
    %89 = arith.addf %86, %88 : vector<8x32xf32>
    %90 = vector.extract_strided_slice %81 {offsets = [3, 0, 0], sizes = [1, 8, 32], strides = [1, 1, 1]} : vector<4x8x32xf32> to vector<1x8x32xf32>
    %91 = vector.shape_cast %90 : vector<1x8x32xf32> to vector<8x32xf32>
    %92 = arith.addf %89, %91 : vector<8x32xf32>
    %93 = vector.extract_strided_slice %26 {offsets = [8, 0], sizes = [8, 16], strides = [1, 1]} : vector<16x192xf32> to vector<8x16xf32>
    %94 = vector.extract_strided_slice %26 {offsets = [8, 16], sizes = [8, 16], strides = [1, 1]} : vector<16x192xf32> to vector<8x16xf32>
    %95 = vector.extract_strided_slice %26 {offsets = [8, 32], sizes = [8, 16], strides = [1, 1]} : vector<16x192xf32> to vector<8x16xf32>
    %96 = vector.extract_strided_slice %26 {offsets = [8, 48], sizes = [8, 16], strides = [1, 1]} : vector<16x192xf32> to vector<8x16xf32>
    %97 = vector.shape_cast %93 : vector<8x16xf32> to vector<1x8x16xf32>
    %98 = vector.shape_cast %94 : vector<8x16xf32> to vector<1x8x16xf32>
    %99 = vector.shape_cast %95 : vector<8x16xf32> to vector<1x8x16xf32>
    %100 = vector.shape_cast %96 : vector<8x16xf32> to vector<1x8x16xf32>
    %101 = tpu.concatenate %97, %98, %99, %100 in 0 : vector<1x8x16xf32>, vector<1x8x16xf32>, vector<1x8x16xf32>, vector<1x8x16xf32> -> vector<4x8x16xf32>
    %102 = arith.truncf %101 : vector<4x8x16xf32> to vector<4x8x16xbf16>
    %103 = vector.extract_strided_slice %26 {offsets = [8, 64], sizes = [8, 16], strides = [1, 1]} : vector<16x192xf32> to vector<8x16xf32>
    %104 = vector.extract_strided_slice %26 {offsets = [8, 80], sizes = [8, 16], strides = [1, 1]} : vector<16x192xf32> to vector<8x16xf32>
    %105 = vector.extract_strided_slice %26 {offsets = [8, 96], sizes = [8, 16], strides = [1, 1]} : vector<16x192xf32> to vector<8x16xf32>
    %106 = vector.extract_strided_slice %26 {offsets = [8, 112], sizes = [8, 16], strides = [1, 1]} : vector<16x192xf32> to vector<8x16xf32>
    %107 = vector.shape_cast %103 : vector<8x16xf32> to vector<1x8x16xf32>
    %108 = vector.shape_cast %104 : vector<8x16xf32> to vector<1x8x16xf32>
    %109 = vector.shape_cast %105 : vector<8x16xf32> to vector<1x8x16xf32>
    %110 = vector.shape_cast %106 : vector<8x16xf32> to vector<1x8x16xf32>
    %111 = tpu.concatenate %107, %108, %109, %110 in 0 : vector<1x8x16xf32>, vector<1x8x16xf32>, vector<1x8x16xf32>, vector<1x8x16xf32> -> vector<4x8x16xf32>
    %112 = arith.truncf %111 : vector<4x8x16xf32> to vector<4x8x16xbf16>
    %113 = vector.extract_strided_slice %26 {offsets = [8, 128], sizes = [8, 16], strides = [1, 1]} : vector<16x192xf32> to vector<8x16xf32>
    %114 = vector.extract_strided_slice %26 {offsets = [8, 144], sizes = [8, 16], strides = [1, 1]} : vector<16x192xf32> to vector<8x16xf32>
    %115 = vector.extract_strided_slice %26 {offsets = [8, 160], sizes = [8, 16], strides = [1, 1]} : vector<16x192xf32> to vector<8x16xf32>
    %116 = vector.extract_strided_slice %26 {offsets = [8, 176], sizes = [8, 16], strides = [1, 1]} : vector<16x192xf32> to vector<8x16xf32>
    %117 = vector.shape_cast %113 : vector<8x16xf32> to vector<1x8x16xf32>
    %118 = vector.shape_cast %114 : vector<8x16xf32> to vector<1x8x16xf32>
    %119 = vector.shape_cast %115 : vector<8x16xf32> to vector<1x8x16xf32>
    %120 = vector.shape_cast %116 : vector<8x16xf32> to vector<1x8x16xf32>
    %121 = tpu.concatenate %117, %118, %119, %120 in 0 : vector<1x8x16xf32>, vector<1x8x16xf32>, vector<1x8x16xf32>, vector<1x8x16xf32> -> vector<4x8x16xf32>
    %122 = arith.truncf %121 : vector<4x8x16xf32> to vector<4x8x16xbf16>
    "tpu.trace_start"() <{level = 10 : i32, message = "hid,hjd->hij"}> : () -> ()
    %cst_22 = arith.constant dense<0.000000e+00> : vector<4x8x8xf32>
    %123 = tpu.matmul %102, %112, %cst_22 {dimension_numbers = #tpu.dot_dimension_numbers<[2], [2], [1], [1], [0, 0, 0, 1, 1, 1], [0], [0]>} : vector<4x8x16xbf16>, vector<4x8x16xbf16>, vector<4x8x8xf32> -> vector<4x8x8xf32>
    "tpu.trace_stop"() : () -> ()
    %124 = vector.broadcast %34 : vector<1x8x8xf32> to vector<4x8x8xf32>
    %125 = arith.addf %123, %124 : vector<4x8x8xf32>
    %cst_23 = arith.constant dense<0xFF800000> : vector<4x8xf32>
    %126 = vector.multi_reduction <maximumf>, %125, %cst_23 [2] : vector<4x8x8xf32> to vector<4x8xf32>
    %127 = vector.shape_cast %126 : vector<4x8xf32> to vector<4x8x1xf32>
    %128 = vector.broadcast %127 : vector<4x8x1xf32> to vector<4x8x8xf32>
    %129 = arith.subf %125, %128 : vector<4x8x8xf32>
    %130 = math.exp %129 : vector<4x8x8xf32>
    %cst_24 = arith.constant dense<0.000000e+00> : vector<4x8xf32>
    %131 = vector.multi_reduction <add>, %130, %cst_24 [2] : vector<4x8x8xf32> to vector<4x8xf32>
    %132 = vector.shape_cast %131 : vector<4x8xf32> to vector<4x8x1xf32>
    %133 = tpu.reciprocal %132 {approx = true} : vector<4x8x1xf32> -> vector<4x8x1xf32>
    %134 = vector.broadcast %133 : vector<4x8x1xf32> to vector<4x8x8xf32>
    %135 = arith.mulf %130, %134 : vector<4x8x8xf32>
    %136 = arith.truncf %135 : vector<4x8x8xf32> to vector<4x8x8xbf16>
    "tpu.trace_start"() <{level = 10 : i32, message = "hij,hjd->hid"}> : () -> ()
    %cst_25 = arith.constant dense<0.000000e+00> : vector<4x8x16xf32>
    %137 = tpu.matmul %136, %122, %cst_25 {dimension_numbers = #tpu.dot_dimension_numbers<[2], [1], [1], [2], [0, 0, 0, 1, 1, 2], [0], [0]>} : vector<4x8x8xbf16>, vector<4x8x16xbf16>, vector<4x8x16xf32> -> vector<4x8x16xf32>
    "tpu.trace_stop"() : () -> ()
    %138 = arith.truncf %137 : vector<4x8x16xf32> to vector<4x8x16xbf16>
    "tpu.trace_start"() <{level = 10 : i32, message = "hnd,hdo->hno"}> : () -> ()
    %cst_26 = arith.constant dense<0.000000e+00> : vector<4x8x32xf32>
    %139 = tpu.matmul %138, %27, %cst_26 {dimension_numbers = #tpu.dot_dimension_numbers<[2], [1], [1], [2], [0, 0, 0, 1, 1, 2], [0], [0]>} : vector<4x8x16xbf16>, vector<4x16x32xbf16>, vector<4x8x32xf32> -> vector<4x8x32xf32>
    "tpu.trace_stop"() : () -> ()
    %140 = vector.extract_strided_slice %139 {offsets = [0, 0, 0], sizes = [1, 8, 32], strides = [1, 1, 1]} : vector<4x8x32xf32> to vector<1x8x32xf32>
    %141 = vector.shape_cast %140 : vector<1x8x32xf32> to vector<8x32xf32>
    %142 = vector.extract_strided_slice %139 {offsets = [1, 0, 0], sizes = [1, 8, 32], strides = [1, 1, 1]} : vector<4x8x32xf32> to vector<1x8x32xf32>
    %143 = vector.shape_cast %142 : vector<1x8x32xf32> to vector<8x32xf32>
    %144 = arith.addf %141, %143 : vector<8x32xf32>
    %145 = vector.extract_strided_slice %139 {offsets = [2, 0, 0], sizes = [1, 8, 32], strides = [1, 1, 1]} : vector<4x8x32xf32> to vector<1x8x32xf32>
    %146 = vector.shape_cast %145 : vector<1x8x32xf32> to vector<8x32xf32>
    %147 = arith.addf %144, %146 : vector<8x32xf32>
    %148 = vector.extract_strided_slice %139 {offsets = [3, 0, 0], sizes = [1, 8, 32], strides = [1, 1, 1]} : vector<4x8x32xf32> to vector<1x8x32xf32>
    %149 = vector.shape_cast %148 : vector<1x8x32xf32> to vector<8x32xf32>
    %150 = arith.addf %147, %149 : vector<8x32xf32>
    %151 = tpu.concatenate %92, %150 in 0 : vector<8x32xf32>, vector<8x32xf32> -> vector<16x32xf32>
    %152 = arith.addf %1, %151 : vector<16x32xf32>
    %c0_27 = arith.constant 0 : index
    %c0_28 = arith.constant 0 : index
    %153 = vector.load %arg6[%c0_27, %c0_28] : memref<1x32xf32, #tpu.memory_space<vmem>>, vector<1x32xf32>
    %154 = vector.broadcast %153 : vector<1x32xf32> to vector<16x32xf32>
    %155 = arith.addf %152, %154 : vector<16x32xf32>
    %c0_29 = arith.constant 0 : index
    %c0_30 = arith.constant 0 : index
    %156 = vector.load %arg7[%c0_29, %c0_30] : memref<1x32xf32, #tpu.memory_space<vmem>>, vector<1x32xf32>
    %c0_31 = arith.constant 0 : index
    %c0_32 = arith.constant 0 : index
    %157 = vector.load %arg8[%c0_31, %c0_32] : memref<1x32xf32, #tpu.memory_space<vmem>>, vector<1x32xf32>
    %cst_33 = arith.constant dense<0.000000e+00> : vector<16xf32>
    %158 = vector.multi_reduction <add>, %155, %cst_33 [1] : vector<16x32xf32> to vector<16xf32>
    %159 = vector.shape_cast %158 : vector<16xf32> to vector<16x1xf32>
    %cst_34 = arith.constant 3.200000e+01 : f32
    %160 = vector.broadcast %cst_34 : f32 to vector<16x1xf32>
    %161 = arith.divf %159, %160 : vector<16x1xf32>
    %162 = vector.broadcast %161 : vector<16x1xf32> to vector<16x32xf32>
    %163 = arith.subf %155, %162 : vector<16x32xf32>
    %164 = arith.mulf %163, %163 : vector<16x32xf32>
    %cst_35 = arith.constant dense<0.000000e+00> : vector<16xf32>
    %165 = vector.multi_reduction <add>, %164, %cst_35 [1] : vector<16x32xf32> to vector<16xf32>
    %166 = vector.shape_cast %165 : vector<16xf32> to vector<16x1xf32>
    %cst_36 = arith.constant 3.200000e+01 : f32
    %167 = vector.broadcast %cst_36 : f32 to vector<16x1xf32>
    %168 = arith.divf %166, %167 : vector<16x1xf32>
    %cst_37 = arith.constant 9.99999974E-6 : f32
    %169 = vector.broadcast %cst_37 : f32 to vector<16x1xf32>
    %170 = arith.addf %168, %169 : vector<16x1xf32>
    %171 = math.rsqrt %170 : vector<16x1xf32>
    %172 = vector.broadcast %171 : vector<16x1xf32> to vector<16x32xf32>
    %173 = arith.mulf %163, %172 : vector<16x32xf32>
    %174 = vector.broadcast %156 : vector<1x32xf32> to vector<16x32xf32>
    %175 = arith.mulf %173, %174 : vector<16x32xf32>
    %176 = vector.broadcast %157 : vector<1x32xf32> to vector<16x32xf32>
    %177 = arith.addf %175, %176 : vector<16x32xf32>
    %178 = arith.truncf %177 : vector<16x32xf32> to vector<16x32xbf16>
    %c0_38 = arith.constant 0 : index
    %c0_39 = arith.constant 0 : index
    %179 = vector.load %arg9[%c0_38, %c0_39] : memref<32x128xbf16, #tpu.memory_space<vmem>>, vector<32x128xbf16>
    %cst_40 = arith.constant dense<0.000000e+00> : vector<16x128xf32>
    %180 = tpu.matmul %178, %179, %cst_40 {dimension_numbers = #tpu.dot_dimension_numbers<[1], [0], [0], [1], [0, 0, 1, 1], [], []>} : vector<16x32xbf16>, vector<32x128xbf16>, vector<16x128xf32> -> vector<16x128xf32>
    %c0_41 = arith.constant 0 : index
    %c0_42 = arith.constant 0 : index
    %181 = vector.load %arg10[%c0_41, %c0_42] : memref<1x128xf32, #tpu.memory_space<vmem>>, vector<1x128xf32>
    %182 = vector.broadcast %181 : vector<1x128xf32> to vector<16x128xf32>
    %183 = arith.addf %180, %182 : vector<16x128xf32>
    %cst_43 = arith.constant 5.000000e-01 : f32
    %184 = vector.broadcast %cst_43 : f32 to vector<16x128xf32>
    %185 = arith.mulf %184, %183 : vector<16x128xf32>
    %cst_44 = arith.constant 4.471500e-02 : f32
    %186 = vector.broadcast %cst_44 : f32 to vector<16x128xf32>
    %187 = arith.mulf %186, %183 : vector<16x128xf32>
    %188 = arith.mulf %187, %183 : vector<16x128xf32>
    %189 = arith.mulf %188, %183 : vector<16x128xf32>
    %190 = arith.addf %183, %189 : vector<16x128xf32>
    %cst_45 = arith.constant 0.797884583 : f32
    %191 = vector.broadcast %cst_45 : f32 to vector<16x128xf32>
    %192 = arith.mulf %191, %190 : vector<16x128xf32>
    %193 = math.tanh %192 : vector<16x128xf32>
    %cst_46 = arith.constant 1.000000e+00 : f32
    %194 = vector.broadcast %cst_46 : f32 to vector<16x128xf32>
    %195 = arith.addf %194, %193 : vector<16x128xf32>
    %196 = arith.mulf %185, %195 : vector<16x128xf32>
    %197 = arith.truncf %196 : vector<16x128xf32> to vector<16x128xbf16>
    %c0_47 = arith.constant 0 : index
    %c0_48 = arith.constant 0 : index
    %198 = vector.load %arg11[%c0_47, %c0_48] : memref<128x32xbf16, #tpu.memory_space<vmem>>, vector<128x32xbf16>
    %cst_49 = arith.constant dense<0.000000e+00> : vector<16x32xf32>
    %199 = tpu.matmul %197, %198, %cst_49 {dimension_numbers = #tpu.dot_dimension_numbers<[1], [0], [0], [1], [0, 0, 1, 1], [], []>} : vector<16x128xbf16>, vector<128x32xbf16>, vector<16x32xf32> -> vector<16x32xf32>
    %c0_50 = arith.constant 0 : index
    %c0_51 = arith.constant 0 : index
    %200 = vector.load %arg12[%c0_50, %c0_51] : memref<1x32xf32, #tpu.memory_space<vmem>>, vector<1x32xf32>
    %201 = vector.broadcast %200 : vector<1x32xf32> to vector<16x32xf32>
    %202 = arith.addf %199, %201 : vector<16x32xf32>
    %203 = arith.addf %155, %202 : vector<16x32xf32>
    %204 = arith.truncf %203 : vector<16x32xf32> to vector<16x32xbf16>
    %c0_52 = arith.constant 0 : index
    %c0_53 = arith.constant 0 : index
    %205 = vector.load %arg13[%c0_52, %c0_53] : memref<16x32xbf16, #tpu.memory_space<vmem>>, vector<16x32xbf16>
    tpu.vector_store %arg13[%c0_52, %c0_53], %204 {strides = array<i32>} : memref<16x32xbf16, #tpu.memory_space<vmem>>, vector<16x32xbf16>,
    return
  }
  func.func @transform_0(%arg0: i32) -> (i32, i32) {
    %c0_i32 = arith.constant 0 : i32
    %c0_i32_0 = arith.constant 0 : i32
    return %arg0, %c0_i32 : i32, i32
  }
  func.func @transform_1(%arg0: i32) -> (i32, i32) {
    %c0_i32 = arith.constant 0 : i32
    %c0_i32_0 = arith.constant 0 : i32
    %c0_i32_1 = arith.constant 0 : i32
    return %c0_i32, %c0_i32_0 : i32, i32
  }
  func.func @transform_2(%arg0: i32) -> (i32, i32) {
    %c0_i32 = arith.constant 0 : i32
    %c0_i32_0 = arith.constant 0 : i32
    %c0_i32_1 = arith.constant 0 : i32
    return %c0_i32, %c0_i32_0 : i32, i32
  }
  func.func @transform_3(%arg0: i32) -> (i32, i32) {
    %c0_i32 = arith.constant 0 : i32
    %c0_i32_0 = arith.constant 0 : i32
    %c0_i32_1 = arith.constant 0 : i32
    return %c0_i32, %c0_i32_0 : i32, i32
  }
  func.func @transform_4(%arg0: i32) -> (i32, i32, i32) {
    %c0_i32 = arith.constant 0 : i32
    %c0_i32_0 = arith.constant 0 : i32
    %c0_i32_1 = arith.constant 0 : i32
    %c0_i32_2 = arith.constant 0 : i32
    return %c0_i32, %c0_i32_0, %c0_i32_1 : i32, i32, i32
  }
  func.func @transform_5(%arg0: i32) -> (i32, i32) {
    %c0_i32 = arith.constant 0 : i32
    %c0_i32_0 = arith.constant 0 : i32
    %c0_i32_1 = arith.constant 0 : i32
    return %c0_i32, %c0_i32_0 : i32, i32
  }
  func.func @transform_6(%arg0: i32) -> (i32, i32) {
    %c0_i32 = arith.constant 0 : i32
    %c0_i32_0 = arith.constant 0 : i32
    %c0_i32_1 = arith.constant 0 : i32
    return %c0_i32, %c0_i32_0 : i32, i32
  }
  func.func @transform_7(%arg0: i32) -> (i32, i32) {
    %c0_i32 = arith.constant 0 : i32
    %c0_i32_0 = arith.constant 0 : i32
    %c0_i32_1 = arith.constant 0 : i32
    return %c0_i32, %c0_i32_0 : i32, i32
  }
  func.func @transform_8(%arg0: i32) -> (i32, i32) {
    %c0_i32 = arith.constant 0 : i32
    %c0_i32_0 = arith.constant 0 : i32
    %c0_i32_1 = arith.constant 0 : i32
    return %c0_i32, %c0_i32_0 : i32, i32
  }
  func.func @transform_9(%arg0: i32) -> (i32, i32) {
    %c0_i32 = arith.constant 0 : i32
    %c0_i32_0 = arith.constant 0 : i32
    %c0_i32_1 = arith.constant 0 : i32
    return %c0_i32, %c0_i32_0 : i32, i32
  }
  func.func @transform_10(%arg0: i32) -> (i32, i32) {
    %c0_i32 = arith.constant 0 : i32
    %c0_i32_0 = arith.constant 0 : i32
    %c0_i32_1 = arith.constant 0 : i32
    return %c0_i32, %c0_i32_0 : i32, i32
  }
  func.func @transform_11(%arg0: i32) -> (i32, i32) {
    %c0_i32 = arith.constant 0 : i32
    %c0_i32_0 = arith.constant 0 : i32
    %c0_i32_1 = arith.constant 0 : i32
    return %c0_i32, %c0_i32_0 : i32, i32
  }
  func.func @transform_12(%arg0: i32) -> (i32, i32) {
    %c0_i32 = arith.constant 0 : i32
    %c0_i32_0 = arith.constant 0 : i32
    return %arg0, %c0_i32 : i32, i32
  }
}

module attributes {stable_mosaic.version = 11 : i64} {
  func.func @fused_layer_kernel(%arg0: i32, %arg1: memref<16x32xbf16, #tpu.memory_space<vmem>>, %arg2: memref<1x32xf32, #tpu.memory_space<vmem>>, %arg3: memref<1x32xf32, #tpu.memory_space<vmem>>, %arg4: memref<32x192xbf16, #tpu.memory_space<vmem>>, %arg5: memref<4x16x32xbf16, #tpu.memory_space<vmem>>, %arg6: memref<1x32xf32, #tpu.memory_space<vmem>>, %arg7: memref<1x32xf32, #tpu.memory_space<vmem>>, %arg8: memref<1x32xf32, #tpu.memory_space<vmem>>, %arg9: memref<32x128xbf16, #tpu.memory_space<vmem>>, %arg10: memref<1x128xf32, #tpu.memory_space<vmem>>, %arg11: memref<128x32xbf16, #tpu.memory_space<vmem>>, %arg12: memref<1x32xf32, #tpu.memory_space<vmem>>, %arg13: memref<1x32xf32, #tpu.memory_space<vmem>>, %arg14: memref<1x32xf32, #tpu.memory_space<vmem>>, %arg15: memref<16x32xbf16, #tpu.memory_space<vmem>>) attributes {dimension_semantics = [#tpu.dimension_semantics<parallel>], iteration_bounds = array<i64: 1>, scalar_prefetch = 0 : i64, scratch_operands = 0 : i64, tpu.core_type = #tpu.core_type<tc>, window_params = [{transform_indices = @transform_0, window_bounds = array<i64: 16, 32>}, {pipeline_mode = #tpu.pipeline_mode<synchronous>, transform_indices = @transform_1, window_bounds = array<i64: 1, 32>}, {pipeline_mode = #tpu.pipeline_mode<synchronous>, transform_indices = @transform_2, window_bounds = array<i64: 1, 32>}, {pipeline_mode = #tpu.pipeline_mode<synchronous>, transform_indices = @transform_3, window_bounds = array<i64: 32, 192>}, {pipeline_mode = #tpu.pipeline_mode<synchronous>, transform_indices = @transform_4, window_bounds = array<i64: 4, 16, 32>}, {pipeline_mode = #tpu.pipeline_mode<synchronous>, transform_indices = @transform_5, window_bounds = array<i64: 1, 32>}, {pipeline_mode = #tpu.pipeline_mode<synchronous>, transform_indices = @transform_6, window_bounds = array<i64: 1, 32>}, {pipeline_mode = #tpu.pipeline_mode<synchronous>, transform_indices = @transform_7, window_bounds = array<i64: 1, 32>}, {pipeline_mode = #tpu.pipeline_mode<synchronous>, transform_indices = @transform_8, window_bounds = array<i64: 32, 128>}, {pipeline_mode = #tpu.pipeline_mode<synchronous>, transform_indices = @transform_9, window_bounds = array<i64: 1, 128>}, {pipeline_mode = #tpu.pipeline_mode<synchronous>, transform_indices = @transform_10, window_bounds = array<i64: 128, 32>}, {pipeline_mode = #tpu.pipeline_mode<synchronous>, transform_indices = @transform_11, window_bounds = array<i64: 1, 32>}, {pipeline_mode = #tpu.pipeline_mode<synchronous>, transform_indices = @transform_12, window_bounds = array<i64: 1, 32>}, {pipeline_mode = #tpu.pipeline_mode<synchronous>, transform_indices = @transform_13, window_bounds = array<i64: 1, 32>}, {transform_indices = @transform_14, window_bounds = array<i64: 16, 32>}]} {
    %c0 = arith.constant 0 : index
    %c0_0 = arith.constant 0 : index
    %0 = vector.load %arg1[%c0, %c0_0] : memref<16x32xbf16, #tpu.memory_space<vmem>>, vector<16x32xbf16>
    %1 = arith.extf %0 : vector<16x32xbf16> to vector<16x32xf32>
    %c0_1 = arith.constant 0 : index
    %c0_2 = arith.constant 0 : index
    %2 = vector.load %arg2[%c0_1, %c0_2] : memref<1x32xf32, #tpu.memory_space<vmem>>, vector<1x32xf32>
    %c0_3 = arith.constant 0 : index
    %c0_4 = arith.constant 0 : index
    %3 = vector.load %arg3[%c0_3, %c0_4] : memref<1x32xf32, #tpu.memory_space<vmem>>, vector<1x32xf32>
    %cst = arith.constant dense<0.000000e+00> : vector<16xf32>
    %4 = vector.multi_reduction <add>, %1, %cst [1] : vector<16x32xf32> to vector<16xf32>
    %5 = vector.shape_cast %4 : vector<16xf32> to vector<16x1xf32>
    %cst_5 = arith.constant 3.200000e+01 : f32
    %6 = vector.broadcast %cst_5 : f32 to vector<16x1xf32>
    %7 = arith.divf %5, %6 : vector<16x1xf32>
    %8 = vector.broadcast %7 : vector<16x1xf32> to vector<16x32xf32>
    %9 = arith.subf %1, %8 : vector<16x32xf32>
    %10 = arith.mulf %9, %9 : vector<16x32xf32>
    %cst_6 = arith.constant dense<0.000000e+00> : vector<16xf32>
    %11 = vector.multi_reduction <add>, %10, %cst_6 [1] : vector<16x32xf32> to vector<16xf32>
    %12 = vector.shape_cast %11 : vector<16xf32> to vector<16x1xf32>
    %cst_7 = arith.constant 3.200000e+01 : f32
    %13 = vector.broadcast %cst_7 : f32 to vector<16x1xf32>
    %14 = arith.divf %12, %13 : vector<16x1xf32>
    %cst_8 = arith.constant 9.99999974E-6 : f32
    %15 = vector.broadcast %cst_8 : f32 to vector<16x1xf32>
    %16 = arith.addf %14, %15 : vector<16x1xf32>
    %17 = math.rsqrt %16 : vector<16x1xf32>
    %18 = vector.broadcast %17 : vector<16x1xf32> to vector<16x32xf32>
    %19 = arith.mulf %9, %18 : vector<16x32xf32>
    %20 = vector.broadcast %2 : vector<1x32xf32> to vector<16x32xf32>
    %21 = arith.mulf %19, %20 : vector<16x32xf32>
    %22 = vector.broadcast %3 : vector<1x32xf32> to vector<16x32xf32>
    %23 = arith.addf %21, %22 : vector<16x32xf32>
    %24 = arith.truncf %23 : vector<16x32xf32> to vector<16x32xbf16>
    %c0_9 = arith.constant 0 : index
    %c0_10 = arith.constant 0 : index
    %25 = vector.load %arg4[%c0_9, %c0_10] : memref<32x192xbf16, #tpu.memory_space<vmem>>, vector<32x192xbf16>
    %cst_11 = arith.constant dense<0.000000e+00> : vector<16x192xf32>
    %26 = tpu.matmul %24, %25, %cst_11 {dimension_numbers = #tpu.dot_dimension_numbers<[1], [0], [0], [1], [0, 0, 1, 1], [], []>} : vector<16x32xbf16>, vector<32x192xbf16>, vector<16x192xf32> -> vector<16x192xf32>
    %c0_12 = arith.constant 0 : index
    %c0_13 = arith.constant 0 : index
    %c0_14 = arith.constant 0 : index
    %27 = vector.load %arg5[%c0_12, %c0_13, %c0_14] : memref<4x16x32xbf16, #tpu.memory_space<vmem>>, vector<4x16x32xbf16>
    %28 = tpu.iota {dimensions = array<i32: 1>} : vector<8x8xi32>
    %c5_i32 = arith.constant 5 : i32
    %29 = vector.broadcast %c5_i32 : i32 to vector<8x8xi32>
    %30 = arith.cmpi slt, %28, %29 : vector<8x8xi32>
    %cst_15 = arith.constant 0.000000e+00 : f32
    %cst_16 = arith.constant -1.000000e+30 : f32
    %31 = vector.broadcast %cst_15 : f32 to vector<8x8xf32>
    %32 = vector.broadcast %cst_16 : f32 to vector<8x8xf32>
    %33 = arith.select %30, %31, %32 : vector<8x8xi1>, vector<8x8xf32>
    %34 = vector.shape_cast %33 : vector<8x8xf32> to vector<1x8x8xf32>
    %35 = vector.extract_strided_slice %26 {offsets = [0, 0], sizes = [8, 16], strides = [1, 1]} : vector<16x192xf32> to vector<8x16xf32>
    %36 = vector.extract_strided_slice %26 {offsets = [0, 16], sizes = [8, 16], strides = [1, 1]} : vector<16x192xf32> to vector<8x16xf32>
    %37 = vector.extract_strided_slice %26 {offsets = [0, 32], sizes = [8, 16], strides = [1, 1]} : vector<16x192xf32> to vector<8x16xf32>
    %38 = vector.extract_strided_slice %26 {offsets = [0, 48], sizes = [8, 16], strides = [1, 1]} : vector<16x192xf32> to vector<8x16xf32>
    %39 = vector.shape_cast %35 : vector<8x16xf32> to vector<1x8x16xf32>
    %40 = vector.shape_cast %36 : vector<8x16xf32> to vector<1x8x16xf32>
    %41 = vector.shape_cast %37 : vector<8x16xf32> to vector<1x8x16xf32>
    %42 = vector.shape_cast %38 : vector<8x16xf32> to vector<1x8x16xf32>
    %43 = tpu.concatenate %39, %40, %41, %42 in 0 : vector<1x8x16xf32>, vector<1x8x16xf32>, vector<1x8x16xf32>, vector<1x8x16xf32> -> vector<4x8x16xf32>
    %44 = arith.truncf %43 : vector<4x8x16xf32> to vector<4x8x16xbf16>
    %45 = vector.extract_strided_slice %26 {offsets = [0, 64], sizes = [8, 16], strides = [1, 1]} : vector<16x192xf32> to vector<8x16xf32>
    %46 = vector.extract_strided_slice %26 {offsets = [0, 80], sizes = [8, 16], strides = [1, 1]} : vector<16x192xf32> to vector<8x16xf32>
    %47 = vector.extract_strided_slice %26 {offsets = [0, 96], sizes = [8, 16], strides = [1, 1]} : vector<16x192xf32> to vector<8x16xf32>
    %48 = vector.extract_strided_slice %26 {offsets = [0, 112], sizes = [8, 16], strides = [1, 1]} : vector<16x192xf32> to vector<8x16xf32>
    %49 = vector.shape_cast %45 : vector<8x16xf32> to vector<1x8x16xf32>
    %50 = vector.shape_cast %46 : vector<8x16xf32> to vector<1x8x16xf32>
    %51 = vector.shape_cast %47 : vector<8x16xf32> to vector<1x8x16xf32>
    %52 = vector.shape_cast %48 : vector<8x16xf32> to vector<1x8x16xf32>
    %53 = tpu.concatenate %49, %50, %51, %52 in 0 : vector<1x8x16xf32>, vector<1x8x16xf32>, vector<1x8x16xf32>, vector<1x8x16xf32> -> vector<4x8x16xf32>
    %54 = arith.truncf %53 : vector<4x8x16xf32> to vector<4x8x16xbf16>
    %55 = vector.extract_strided_slice %26 {offsets = [0, 128], sizes = [8, 16], strides = [1, 1]} : vector<16x192xf32> to vector<8x16xf32>
    %56 = vector.extract_strided_slice %26 {offsets = [0, 144], sizes = [8, 16], strides = [1, 1]} : vector<16x192xf32> to vector<8x16xf32>
    %57 = vector.extract_strided_slice %26 {offsets = [0, 160], sizes = [8, 16], strides = [1, 1]} : vector<16x192xf32> to vector<8x16xf32>
    %58 = vector.extract_strided_slice %26 {offsets = [0, 176], sizes = [8, 16], strides = [1, 1]} : vector<16x192xf32> to vector<8x16xf32>
    %59 = vector.shape_cast %55 : vector<8x16xf32> to vector<1x8x16xf32>
    %60 = vector.shape_cast %56 : vector<8x16xf32> to vector<1x8x16xf32>
    %61 = vector.shape_cast %57 : vector<8x16xf32> to vector<1x8x16xf32>
    %62 = vector.shape_cast %58 : vector<8x16xf32> to vector<1x8x16xf32>
    %63 = tpu.concatenate %59, %60, %61, %62 in 0 : vector<1x8x16xf32>, vector<1x8x16xf32>, vector<1x8x16xf32>, vector<1x8x16xf32> -> vector<4x8x16xf32>
    %64 = arith.truncf %63 : vector<4x8x16xf32> to vector<4x8x16xbf16>
    "tpu.trace_start"() <{level = 10 : i32, message = "hid,hjd->hij"}> : () -> ()
    %cst_17 = arith.constant dense<0.000000e+00> : vector<4x8x8xf32>
    %65 = tpu.matmul %44, %54, %cst_17 {dimension_numbers = #tpu.dot_dimension_numbers<[2], [2], [1], [1], [0, 0, 0, 1, 1, 1], [0], [0]>} : vector<4x8x16xbf16>, vector<4x8x16xbf16>, vector<4x8x8xf32> -> vector<4x8x8xf32>
    "tpu.trace_stop"() : () -> ()
    %66 = vector.broadcast %34 : vector<1x8x8xf32> to vector<4x8x8xf32>
    %67 = arith.addf %65, %66 : vector<4x8x8xf32>
    %cst_18 = arith.constant dense<0xFF800000> : vector<4x8xf32>
    %68 = vector.multi_reduction <maximumf>, %67, %cst_18 [2] : vector<4x8x8xf32> to vector<4x8xf32>
    %69 = vector.shape_cast %68 : vector<4x8xf32> to vector<4x8x1xf32>
    %70 = vector.broadcast %69 : vector<4x8x1xf32> to vector<4x8x8xf32>
    %71 = arith.subf %67, %70 : vector<4x8x8xf32>
    %72 = math.exp %71 : vector<4x8x8xf32>
    %cst_19 = arith.constant dense<0.000000e+00> : vector<4x8xf32>
    %73 = vector.multi_reduction <add>, %72, %cst_19 [2] : vector<4x8x8xf32> to vector<4x8xf32>
    %74 = vector.shape_cast %73 : vector<4x8xf32> to vector<4x8x1xf32>
    %75 = tpu.reciprocal %74 {approx = true} : vector<4x8x1xf32> -> vector<4x8x1xf32>
    %76 = vector.broadcast %75 : vector<4x8x1xf32> to vector<4x8x8xf32>
    %77 = arith.mulf %72, %76 : vector<4x8x8xf32>
    %78 = arith.truncf %77 : vector<4x8x8xf32> to vector<4x8x8xbf16>
    "tpu.trace_start"() <{level = 10 : i32, message = "hij,hjd->hid"}> : () -> ()
    %cst_20 = arith.constant dense<0.000000e+00> : vector<4x8x16xf32>
    %79 = tpu.matmul %78, %64, %cst_20 {dimension_numbers = #tpu.dot_dimension_numbers<[2], [1], [1], [2], [0, 0, 0, 1, 1, 2], [0], [0]>} : vector<4x8x8xbf16>, vector<4x8x16xbf16>, vector<4x8x16xf32> -> vector<4x8x16xf32>
    "tpu.trace_stop"() : () -> ()
    %80 = arith.truncf %79 : vector<4x8x16xf32> to vector<4x8x16xbf16>
    "tpu.trace_start"() <{level = 10 : i32, message = "hnd,hdo->hno"}> : () -> ()
    %cst_21 = arith.constant dense<0.000000e+00> : vector<4x8x32xf32>
    %81 = tpu.matmul %80, %27, %cst_21 {dimension_numbers = #tpu.dot_dimension_numbers<[2], [1], [1], [2], [0, 0, 0, 1, 1, 2], [0], [0]>} : vector<4x8x16xbf16>, vector<4x16x32xbf16>, vector<4x8x32xf32> -> vector<4x8x32xf32>
    "tpu.trace_stop"() : () -> ()
    %82 = vector.extract_strided_slice %81 {offsets = [0, 0, 0], sizes = [1, 8, 32], strides = [1, 1, 1]} : vector<4x8x32xf32> to vector<1x8x32xf32>
    %83 = vector.shape_cast %82 : vector<1x8x32xf32> to vector<8x32xf32>
    %84 = vector.extract_strided_slice %81 {offsets = [1, 0, 0], sizes = [1, 8, 32], strides = [1, 1, 1]} : vector<4x8x32xf32> to vector<1x8x32xf32>
    %85 = vector.shape_cast %84 : vector<1x8x32xf32> to vector<8x32xf32>
    %86 = arith.addf %83, %85 : vector<8x32xf32>
    %87 = vector.extract_strided_slice %81 {offsets = [2, 0, 0], sizes = [1, 8, 32], strides = [1, 1, 1]} : vector<4x8x32xf32> to vector<1x8x32xf32>
    %88 = vector.shape_cast %87 : vector<1x8x32xf32> to vector<8x32xf32>
    %89 = arith.addf %86, %88 : vector<8x32xf32>
    %90 = vector.extract_strided_slice %81 {offsets = [3, 0, 0], sizes = [1, 8, 32], strides = [1, 1, 1]} : vector<4x8x32xf32> to vector<1x8x32xf32>
    %91 = vector.shape_cast %90 : vector<1x8x32xf32> to vector<8x32xf32>
    %92 = arith.addf %89, %91 : vector<8x32xf32>
    %93 = vector.extract_strided_slice %26 {offsets = [8, 0], sizes = [8, 16], strides = [1, 1]} : vector<16x192xf32> to vector<8x16xf32>
    %94 = vector.extract_strided_slice %26 {offsets = [8, 16], sizes = [8, 16], strides = [1, 1]} : vector<16x192xf32> to vector<8x16xf32>
    %95 = vector.extract_strided_slice %26 {offsets = [8, 32], sizes = [8, 16], strides = [1, 1]} : vector<16x192xf32> to vector<8x16xf32>
    %96 = vector.extract_strided_slice %26 {offsets = [8, 48], sizes = [8, 16], strides = [1, 1]} : vector<16x192xf32> to vector<8x16xf32>
    %97 = vector.shape_cast %93 : vector<8x16xf32> to vector<1x8x16xf32>
    %98 = vector.shape_cast %94 : vector<8x16xf32> to vector<1x8x16xf32>
    %99 = vector.shape_cast %95 : vector<8x16xf32> to vector<1x8x16xf32>
    %100 = vector.shape_cast %96 : vector<8x16xf32> to vector<1x8x16xf32>
    %101 = tpu.concatenate %97, %98, %99, %100 in 0 : vector<1x8x16xf32>, vector<1x8x16xf32>, vector<1x8x16xf32>, vector<1x8x16xf32> -> vector<4x8x16xf32>
    %102 = arith.truncf %101 : vector<4x8x16xf32> to vector<4x8x16xbf16>
    %103 = vector.extract_strided_slice %26 {offsets = [8, 64], sizes = [8, 16], strides = [1, 1]} : vector<16x192xf32> to vector<8x16xf32>
    %104 = vector.extract_strided_slice %26 {offsets = [8, 80], sizes = [8, 16], strides = [1, 1]} : vector<16x192xf32> to vector<8x16xf32>
    %105 = vector.extract_strided_slice %26 {offsets = [8, 96], sizes = [8, 16], strides = [1, 1]} : vector<16x192xf32> to vector<8x16xf32>
    %106 = vector.extract_strided_slice %26 {offsets = [8, 112], sizes = [8, 16], strides = [1, 1]} : vector<16x192xf32> to vector<8x16xf32>
    %107 = vector.shape_cast %103 : vector<8x16xf32> to vector<1x8x16xf32>
    %108 = vector.shape_cast %104 : vector<8x16xf32> to vector<1x8x16xf32>
    %109 = vector.shape_cast %105 : vector<8x16xf32> to vector<1x8x16xf32>
    %110 = vector.shape_cast %106 : vector<8x16xf32> to vector<1x8x16xf32>
    %111 = tpu.concatenate %107, %108, %109, %110 in 0 : vector<1x8x16xf32>, vector<1x8x16xf32>, vector<1x8x16xf32>, vector<1x8x16xf32> -> vector<4x8x16xf32>
    %112 = arith.truncf %111 : vector<4x8x16xf32> to vector<4x8x16xbf16>
    %113 = vector.extract_strided_slice %26 {offsets = [8, 128], sizes = [8, 16], strides = [1, 1]} : vector<16x192xf32> to vector<8x16xf32>
    %114 = vector.extract_strided_slice %26 {offsets = [8, 144], sizes = [8, 16], strides = [1, 1]} : vector<16x192xf32> to vector<8x16xf32>
    %115 = vector.extract_strided_slice %26 {offsets = [8, 160], sizes = [8, 16], strides = [1, 1]} : vector<16x192xf32> to vector<8x16xf32>
    %116 = vector.extract_strided_slice %26 {offsets = [8, 176], sizes = [8, 16], strides = [1, 1]} : vector<16x192xf32> to vector<8x16xf32>
    %117 = vector.shape_cast %113 : vector<8x16xf32> to vector<1x8x16xf32>
    %118 = vector.shape_cast %114 : vector<8x16xf32> to vector<1x8x16xf32>
    %119 = vector.shape_cast %115 : vector<8x16xf32> to vector<1x8x16xf32>
    %120 = vector.shape_cast %116 : vector<8x16xf32> to vector<1x8x16xf32>
    %121 = tpu.concatenate %117, %118, %119, %120 in 0 : vector<1x8x16xf32>, vector<1x8x16xf32>, vector<1x8x16xf32>, vector<1x8x16xf32> -> vector<4x8x16xf32>
    %122 = arith.truncf %121 : vector<4x8x16xf32> to vector<4x8x16xbf16>
    "tpu.trace_start"() <{level = 10 : i32, message = "hid,hjd->hij"}> : () -> ()
    %cst_22 = arith.constant dense<0.000000e+00> : vector<4x8x8xf32>
    %123 = tpu.matmul %102, %112, %cst_22 {dimension_numbers = #tpu.dot_dimension_numbers<[2], [2], [1], [1], [0, 0, 0, 1, 1, 1], [0], [0]>} : vector<4x8x16xbf16>, vector<4x8x16xbf16>, vector<4x8x8xf32> -> vector<4x8x8xf32>
    "tpu.trace_stop"() : () -> ()
    %124 = vector.broadcast %34 : vector<1x8x8xf32> to vector<4x8x8xf32>
    %125 = arith.addf %123, %124 : vector<4x8x8xf32>
    %cst_23 = arith.constant dense<0xFF800000> : vector<4x8xf32>
    %126 = vector.multi_reduction <maximumf>, %125, %cst_23 [2] : vector<4x8x8xf32> to vector<4x8xf32>
    %127 = vector.shape_cast %126 : vector<4x8xf32> to vector<4x8x1xf32>
    %128 = vector.broadcast %127 : vector<4x8x1xf32> to vector<4x8x8xf32>
    %129 = arith.subf %125, %128 : vector<4x8x8xf32>
    %130 = math.exp %129 : vector<4x8x8xf32>
    %cst_24 = arith.constant dense<0.000000e+00> : vector<4x8xf32>
    %131 = vector.multi_reduction <add>, %130, %cst_24 [2] : vector<4x8x8xf32> to vector<4x8xf32>
    %132 = vector.shape_cast %131 : vector<4x8xf32> to vector<4x8x1xf32>
    %133 = tpu.reciprocal %132 {approx = true} : vector<4x8x1xf32> -> vector<4x8x1xf32>
    %134 = vector.broadcast %133 : vector<4x8x1xf32> to vector<4x8x8xf32>
    %135 = arith.mulf %130, %134 : vector<4x8x8xf32>
    %136 = arith.truncf %135 : vector<4x8x8xf32> to vector<4x8x8xbf16>
    "tpu.trace_start"() <{level = 10 : i32, message = "hij,hjd->hid"}> : () -> ()
    %cst_25 = arith.constant dense<0.000000e+00> : vector<4x8x16xf32>
    %137 = tpu.matmul %136, %122, %cst_25 {dimension_numbers = #tpu.dot_dimension_numbers<[2], [1], [1], [2], [0, 0, 0, 1, 1, 2], [0], [0]>} : vector<4x8x8xbf16>, vector<4x8x16xbf16>, vector<4x8x16xf32> -> vector<4x8x16xf32>
    "tpu.trace_stop"() : () -> ()
    %138 = arith.truncf %137 : vector<4x8x16xf32> to vector<4x8x16xbf16>
    "tpu.trace_start"() <{level = 10 : i32, message = "hnd,hdo->hno"}> : () -> ()
    %cst_26 = arith.constant dense<0.000000e+00> : vector<4x8x32xf32>
    %139 = tpu.matmul %138, %27, %cst_26 {dimension_numbers = #tpu.dot_dimension_numbers<[2], [1], [1], [2], [0, 0, 0, 1, 1, 2], [0], [0]>} : vector<4x8x16xbf16>, vector<4x16x32xbf16>, vector<4x8x32xf32> -> vector<4x8x32xf32>
    "tpu.trace_stop"() : () -> ()
    %140 = vector.extract_strided_slice %139 {offsets = [0, 0, 0], sizes = [1, 8, 32], strides = [1, 1, 1]} : vector<4x8x32xf32> to vector<1x8x32xf32>
    %141 = vector.shape_cast %140 : vector<1x8x32xf32> to vector<8x32xf32>
    %142 = vector.extract_strided_slice %139 {offsets = [1, 0, 0], sizes = [1, 8, 32], strides = [1, 1, 1]} : vector<4x8x32xf32> to vector<1x8x32xf32>
    %143 = vector.shape_cast %142 : vector<1x8x32xf32> to vector<8x32xf32>
    %144 = arith.addf %141, %143 : vector<8x32xf32>
    %145 = vector.extract_strided_slice %139 {offsets = [2, 0, 0], sizes = [1, 8, 32], strides = [1, 1, 1]} : vector<4x8x32xf32> to vector<1x8x32xf32>
    %146 = vector.shape_cast %145 : vector<1x8x32xf32> to vector<8x32xf32>
    %147 = arith.addf %144, %146 : vector<8x32xf32>
    %148 = vector.extract_strided_slice %139 {offsets = [3, 0, 0], sizes = [1, 8, 32], strides = [1, 1, 1]} : vector<4x8x32xf32> to vector<1x8x32xf32>
    %149 = vector.shape_cast %148 : vector<1x8x32xf32> to vector<8x32xf32>
    %150 = arith.addf %147, %149 : vector<8x32xf32>
    %151 = tpu.concatenate %92, %150 in 0 : vector<8x32xf32>, vector<8x32xf32> -> vector<16x32xf32>
    %152 = arith.addf %1, %151 : vector<16x32xf32>
    %c0_27 = arith.constant 0 : index
    %c0_28 = arith.constant 0 : index
    %153 = vector.load %arg6[%c0_27, %c0_28] : memref<1x32xf32, #tpu.memory_space<vmem>>, vector<1x32xf32>
    %154 = vector.broadcast %153 : vector<1x32xf32> to vector<16x32xf32>
    %155 = arith.addf %152, %154 : vector<16x32xf32>
    %c0_29 = arith.constant 0 : index
    %c0_30 = arith.constant 0 : index
    %156 = vector.load %arg7[%c0_29, %c0_30] : memref<1x32xf32, #tpu.memory_space<vmem>>, vector<1x32xf32>
    %c0_31 = arith.constant 0 : index
    %c0_32 = arith.constant 0 : index
    %157 = vector.load %arg8[%c0_31, %c0_32] : memref<1x32xf32, #tpu.memory_space<vmem>>, vector<1x32xf32>
    %cst_33 = arith.constant dense<0.000000e+00> : vector<16xf32>
    %158 = vector.multi_reduction <add>, %155, %cst_33 [1] : vector<16x32xf32> to vector<16xf32>
    %159 = vector.shape_cast %158 : vector<16xf32> to vector<16x1xf32>
    %cst_34 = arith.constant 3.200000e+01 : f32
    %160 = vector.broadcast %cst_34 : f32 to vector<16x1xf32>
    %161 = arith.divf %159, %160 : vector<16x1xf32>
    %162 = vector.broadcast %161 : vector<16x1xf32> to vector<16x32xf32>
    %163 = arith.subf %155, %162 : vector<16x32xf32>
    %164 = arith.mulf %163, %163 : vector<16x32xf32>
    %cst_35 = arith.constant dense<0.000000e+00> : vector<16xf32>
    %165 = vector.multi_reduction <add>, %164, %cst_35 [1] : vector<16x32xf32> to vector<16xf32>
    %166 = vector.shape_cast %165 : vector<16xf32> to vector<16x1xf32>
    %cst_36 = arith.constant 3.200000e+01 : f32
    %167 = vector.broadcast %cst_36 : f32 to vector<16x1xf32>
    %168 = arith.divf %166, %167 : vector<16x1xf32>
    %cst_37 = arith.constant 9.99999974E-6 : f32
    %169 = vector.broadcast %cst_37 : f32 to vector<16x1xf32>
    %170 = arith.addf %168, %169 : vector<16x1xf32>
    %171 = math.rsqrt %170 : vector<16x1xf32>
    %172 = vector.broadcast %171 : vector<16x1xf32> to vector<16x32xf32>
    %173 = arith.mulf %163, %172 : vector<16x32xf32>
    %174 = vector.broadcast %156 : vector<1x32xf32> to vector<16x32xf32>
    %175 = arith.mulf %173, %174 : vector<16x32xf32>
    %176 = vector.broadcast %157 : vector<1x32xf32> to vector<16x32xf32>
    %177 = arith.addf %175, %176 : vector<16x32xf32>
    %178 = arith.truncf %177 : vector<16x32xf32> to vector<16x32xbf16>
    %c0_38 = arith.constant 0 : index
    %c0_39 = arith.constant 0 : index
    %179 = vector.load %arg9[%c0_38, %c0_39] : memref<32x128xbf16, #tpu.memory_space<vmem>>, vector<32x128xbf16>
    %cst_40 = arith.constant dense<0.000000e+00> : vector<16x128xf32>
    %180 = tpu.matmul %178, %179, %cst_40 {dimension_numbers = #tpu.dot_dimension_numbers<[1], [0], [0], [1], [0, 0, 1, 1], [], []>} : vector<16x32xbf16>, vector<32x128xbf16>, vector<16x128xf32> -> vector<16x128xf32>
    %c0_41 = arith.constant 0 : index
    %c0_42 = arith.constant 0 : index
    %181 = vector.load %arg10[%c0_41, %c0_42] : memref<1x128xf32, #tpu.memory_space<vmem>>, vector<1x128xf32>
    %182 = vector.broadcast %181 : vector<1x128xf32> to vector<16x128xf32>
    %183 = arith.addf %180, %182 : vector<16x128xf32>
    %cst_43 = arith.constant 5.000000e-01 : f32
    %184 = vector.broadcast %cst_43 : f32 to vector<16x128xf32>
    %185 = arith.mulf %184, %183 : vector<16x128xf32>
    %cst_44 = arith.constant 4.471500e-02 : f32
    %186 = vector.broadcast %cst_44 : f32 to vector<16x128xf32>
    %187 = arith.mulf %186, %183 : vector<16x128xf32>
    %188 = arith.mulf %187, %183 : vector<16x128xf32>
    %189 = arith.mulf %188, %183 : vector<16x128xf32>
    %190 = arith.addf %183, %189 : vector<16x128xf32>
    %cst_45 = arith.constant 0.797884583 : f32
    %191 = vector.broadcast %cst_45 : f32 to vector<16x128xf32>
    %192 = arith.mulf %191, %190 : vector<16x128xf32>
    %193 = math.tanh %192 : vector<16x128xf32>
    %cst_46 = arith.constant 1.000000e+00 : f32
    %194 = vector.broadcast %cst_46 : f32 to vector<16x128xf32>
    %195 = arith.addf %194, %193 : vector<16x128xf32>
    %196 = arith.mulf %185, %195 : vector<16x128xf32>
    %197 = arith.truncf %196 : vector<16x128xf32> to vector<16x128xbf16>
    %c0_47 = arith.constant 0 : index
    %c0_48 = arith.constant 0 : index
    %198 = vector.load %arg11[%c0_47, %c0_48] : memref<128x32xbf16, #tpu.memory_space<vmem>>, vector<128x32xbf16>
    %cst_49 = arith.constant dense<0.000000e+00> : vector<16x32xf32>
    %199 = tpu.matmul %197, %198, %cst_49 {dimension_numbers = #tpu.dot_dimension_numbers<[1], [0], [0], [1], [0, 0, 1, 1], [], []>} : vector<16x128xbf16>, vector<128x32xbf16>, vector<16x32xf32> -> vector<16x32xf32>
    %c0_50 = arith.constant 0 : index
    %c0_51 = arith.constant 0 : index
    %200 = vector.load %arg12[%c0_50, %c0_51] : memref<1x32xf32, #tpu.memory_space<vmem>>, vector<1x32xf32>
    %201 = vector.broadcast %200 : vector<1x32xf32> to vector<16x32xf32>
    %202 = arith.addf %199, %201 : vector<16x32xf32>
    %203 = arith.addf %155, %202 : vector<16x32xf32>
    %c0_52 = arith.constant 0 : index
    %c0_53 = arith.constant 0 : index
    %204 = vector.load %arg13[%c0_52, %c0_53] : memref<1x32xf32, #tpu.memory_space<vmem>>, vector<1x32xf32>
    %c0_54 = arith.constant 0 : index
    %c0_55 = arith.constant 0 : index
    %205 = vector.load %arg14[%c0_54, %c0_55] : memref<1x32xf32, #tpu.memory_space<vmem>>, vector<1x32xf32>
    %cst_56 = arith.constant dense<0.000000e+00> : vector<16xf32>
    %206 = vector.multi_reduction <add>, %203, %cst_56 [1] : vector<16x32xf32> to vector<16xf32>
    %207 = vector.shape_cast %206 : vector<16xf32> to vector<16x1xf32>
    %cst_57 = arith.constant 3.200000e+01 : f32
    %208 = vector.broadcast %cst_57 : f32 to vector<16x1xf32>
    %209 = arith.divf %207, %208 : vector<16x1xf32>
    %210 = vector.broadcast %209 : vector<16x1xf32> to vector<16x32xf32>
    %211 = arith.subf %203, %210 : vector<16x32xf32>
    %212 = arith.mulf %211, %211 : vector<16x32xf32>
    %cst_58 = arith.constant dense<0.000000e+00> : vector<16xf32>
    %213 = vector.multi_reduction <add>, %212, %cst_58 [1] : vector<16x32xf32> to vector<16xf32>
    %214 = vector.shape_cast %213 : vector<16xf32> to vector<16x1xf32>
    %cst_59 = arith.constant 3.200000e+01 : f32
    %215 = vector.broadcast %cst_59 : f32 to vector<16x1xf32>
    %216 = arith.divf %214, %215 : vector<16x1xf32>
    %cst_60 = arith.constant 9.99999974E-6 : f32
    %217 = vector.broadcast %cst_60 : f32 to vector<16x1xf32>
    %218 = arith.addf %216, %217 : vector<16x1xf32>
    %219 = math.rsqrt %218 : vector<16x1xf32>
    %220 = vector.broadcast %219 : vector<16x1xf32> to vector<16x32xf32>
    %221 = arith.mulf %211, %220 : vector<16x32xf32>
    %222 = vector.broadcast %204 : vector<1x32xf32> to vector<16x32xf32>
    %223 = arith.mulf %221, %222 : vector<16x32xf32>
    %224 = vector.broadcast %205 : vector<1x32xf32> to vector<16x32xf32>
    %225 = arith.addf %223, %224 : vector<16x32xf32>
    %226 = arith.truncf %225 : vector<16x32xf32> to vector<16x32xbf16>
    %c0_61 = arith.constant 0 : index
    %c0_62 = arith.constant 0 : index
    %227 = vector.load %arg15[%c0_61, %c0_62] : memref<16x32xbf16, #tpu.memory_space<vmem>>, vector<16x32xbf16>
    tpu.vector_store %arg15[%c0_61, %c0_62], %226 {strides = array<i32>} : memref<16x32xbf16, #tpu.memory_space<vmem>>, vector<16x32xbf16>,
    return
  }
  func.func @transform_0(%arg0: i32) -> (i32, i32) {
    %c0_i32 = arith.constant 0 : i32
    %c0_i32_0 = arith.constant 0 : i32
    return %arg0, %c0_i32 : i32, i32
  }
  func.func @transform_1(%arg0: i32) -> (i32, i32) {
    %c0_i32 = arith.constant 0 : i32
    %c0_i32_0 = arith.constant 0 : i32
    %c0_i32_1 = arith.constant 0 : i32
    return %c0_i32, %c0_i32_0 : i32, i32
  }
  func.func @transform_2(%arg0: i32) -> (i32, i32) {
    %c0_i32 = arith.constant 0 : i32
    %c0_i32_0 = arith.constant 0 : i32
    %c0_i32_1 = arith.constant 0 : i32
    return %c0_i32, %c0_i32_0 : i32, i32
  }
  func.func @transform_3(%arg0: i32) -> (i32, i32) {
    %c0_i32 = arith.constant 0 : i32
    %c0_i32_0 = arith.constant 0 : i32
    %c0_i32_1 = arith.constant 0 : i32
    return %c0_i32, %c0_i32_0 : i32, i32
  }
  func.func @transform_4(%arg0: i32) -> (i32, i32, i32) {
    %c0_i32 = arith.constant 0 : i32
    %c0_i32_0 = arith.constant 0 : i32
    %c0_i32_1 = arith.constant 0 : i32
    %c0_i32_2 = arith.constant 0 : i32
    return %c0_i32, %c0_i32_0, %c0_i32_1 : i32, i32, i32
  }
  func.func @transform_5(%arg0: i32) -> (i32, i32) {
    %c0_i32 = arith.constant 0 : i32
    %c0_i32_0 = arith.constant 0 : i32
    %c0_i32_1 = arith.constant 0 : i32
    return %c0_i32, %c0_i32_0 : i32, i32
  }
  func.func @transform_6(%arg0: i32) -> (i32, i32) {
    %c0_i32 = arith.constant 0 : i32
    %c0_i32_0 = arith.constant 0 : i32
    %c0_i32_1 = arith.constant 0 : i32
    return %c0_i32, %c0_i32_0 : i32, i32
  }
  func.func @transform_7(%arg0: i32) -> (i32, i32) {
    %c0_i32 = arith.constant 0 : i32
    %c0_i32_0 = arith.constant 0 : i32
    %c0_i32_1 = arith.constant 0 : i32
    return %c0_i32, %c0_i32_0 : i32, i32
  }
  func.func @transform_8(%arg0: i32) -> (i32, i32) {
    %c0_i32 = arith.constant 0 : i32
    %c0_i32_0 = arith.constant 0 : i32
    %c0_i32_1 = arith.constant 0 : i32
    return %c0_i32, %c0_i32_0 : i32, i32
  }
  func.func @transform_9(%arg0: i32) -> (i32, i32) {
    %c0_i32 = arith.constant 0 : i32
    %c0_i32_0 = arith.constant 0 : i32
    %c0_i32_1 = arith.constant 0 : i32
    return %c0_i32, %c0_i32_0 : i32, i32
  }
  func.func @transform_10(%arg0: i32) -> (i32, i32) {
    %c0_i32 = arith.constant 0 : i32
    %c0_i32_0 = arith.constant 0 : i32
    %c0_i32_1 = arith.constant 0 : i32
    return %c0_i32, %c0_i32_0 : i32, i32
  }
  func.func @transform_11(%arg0: i32) -> (i32, i32) {
    %c0_i32 = arith.constant 0 : i32
    %c0_i32_0 = arith.constant 0 : i32
    %c0_i32_1 = arith.constant 0 : i32
    return %c0_i32, %c0_i32_0 : i32, i32
  }
  func.func @transform_12(%arg0: i32) -> (i32, i32) {
    %c0_i32 = arith.constant 0 : i32
    %c0_i32_0 = arith.constant 0 : i32
    %c0_i32_1 = arith.constant 0 : i32
    return %c0_i32, %c0_i32_0 : i32, i32
  }
  func.func @transform_13(%arg0: i32) -> (i32, i32) {
    %c0_i32 = arith.constant 0 : i32
    %c0_i32_0 = arith.constant 0 : i32
    %c0_i32_1 = arith.constant 0 : i32
    return %c0_i32, %c0_i32_0 : i32, i32
  }
  func.func @transform_14(%arg0: i32) -> (i32, i32) {
    %c0_i32 = arith.constant 0 : i32
    %c0_i32_0 = arith.constant 0 : i32
    return %arg0, %c0_i32 : i32, i32
  }
}

module attributes {stable_mosaic.version = 11 : i64} {
  func.func @mlp_head_kernel(%arg0: i32, %arg1: memref<2x32xbf16, #tpu.memory_space<vmem>>, %arg2: memref<1x32xf32, #tpu.memory_space<vmem>>, %arg3: memref<1x32xf32, #tpu.memory_space<vmem>>, %arg4: memref<32x8xbf16, #tpu.memory_space<vmem>>, %arg5: memref<1x8xf32, #tpu.memory_space<vmem>>, %arg6: memref<2x8xf32, #tpu.memory_space<vmem>>) attributes {dimension_semantics = [#tpu.dimension_semantics<parallel>], iteration_bounds = array<i64: 1>, scalar_prefetch = 0 : i64, scratch_operands = 0 : i64, tpu.core_type = #tpu.core_type<tc>, window_params = [{pipeline_mode = #tpu.pipeline_mode<synchronous>, transform_indices = @transform_0, window_bounds = array<i64: 2, 32>}, {pipeline_mode = #tpu.pipeline_mode<synchronous>, transform_indices = @transform_1, window_bounds = array<i64: 1, 32>}, {pipeline_mode = #tpu.pipeline_mode<synchronous>, transform_indices = @transform_2, window_bounds = array<i64: 1, 32>}, {pipeline_mode = #tpu.pipeline_mode<synchronous>, transform_indices = @transform_3, window_bounds = array<i64: 32, 8>}, {pipeline_mode = #tpu.pipeline_mode<synchronous>, transform_indices = @transform_4, window_bounds = array<i64: 1, 8>}, {pipeline_mode = #tpu.pipeline_mode<synchronous>, transform_indices = @transform_5, window_bounds = array<i64: 2, 8>}]} {
    %c0 = arith.constant 0 : index
    %c0_0 = arith.constant 0 : index
    %0 = vector.load %arg1[%c0, %c0_0] : memref<2x32xbf16, #tpu.memory_space<vmem>>, vector<2x32xbf16>
    %1 = arith.extf %0 : vector<2x32xbf16> to vector<2x32xf32>
    %c0_1 = arith.constant 0 : index
    %c0_2 = arith.constant 0 : index
    %2 = vector.load %arg2[%c0_1, %c0_2] : memref<1x32xf32, #tpu.memory_space<vmem>>, vector<1x32xf32>
    %c0_3 = arith.constant 0 : index
    %c0_4 = arith.constant 0 : index
    %3 = vector.load %arg3[%c0_3, %c0_4] : memref<1x32xf32, #tpu.memory_space<vmem>>, vector<1x32xf32>
    %cst = arith.constant dense<0.000000e+00> : vector<2xf32>
    %4 = vector.multi_reduction <add>, %1, %cst [1] : vector<2x32xf32> to vector<2xf32>
    %5 = vector.shape_cast %4 : vector<2xf32> to vector<2x1xf32>
    %cst_5 = arith.constant 3.200000e+01 : f32
    %6 = vector.broadcast %cst_5 : f32 to vector<2x1xf32>
    %7 = arith.divf %5, %6 : vector<2x1xf32>
    %8 = vector.broadcast %7 : vector<2x1xf32> to vector<2x32xf32>
    %9 = arith.subf %1, %8 : vector<2x32xf32>
    %10 = arith.mulf %9, %9 : vector<2x32xf32>
    %cst_6 = arith.constant dense<0.000000e+00> : vector<2xf32>
    %11 = vector.multi_reduction <add>, %10, %cst_6 [1] : vector<2x32xf32> to vector<2xf32>
    %12 = vector.shape_cast %11 : vector<2xf32> to vector<2x1xf32>
    %cst_7 = arith.constant 3.200000e+01 : f32
    %13 = vector.broadcast %cst_7 : f32 to vector<2x1xf32>
    %14 = arith.divf %12, %13 : vector<2x1xf32>
    %cst_8 = arith.constant 9.99999974E-6 : f32
    %15 = vector.broadcast %cst_8 : f32 to vector<2x1xf32>
    %16 = arith.addf %14, %15 : vector<2x1xf32>
    %17 = math.rsqrt %16 : vector<2x1xf32>
    %18 = vector.broadcast %17 : vector<2x1xf32> to vector<2x32xf32>
    %19 = arith.mulf %9, %18 : vector<2x32xf32>
    %20 = vector.broadcast %2 : vector<1x32xf32> to vector<2x32xf32>
    %21 = arith.mulf %19, %20 : vector<2x32xf32>
    %22 = vector.broadcast %3 : vector<1x32xf32> to vector<2x32xf32>
    %23 = arith.addf %21, %22 : vector<2x32xf32>
    %24 = arith.truncf %23 : vector<2x32xf32> to vector<2x32xbf16>
    %c0_9 = arith.constant 0 : index
    %c0_10 = arith.constant 0 : index
    %25 = vector.load %arg4[%c0_9, %c0_10] : memref<32x8xbf16, #tpu.memory_space<vmem>>, vector<32x8xbf16>
    %cst_11 = arith.constant dense<0.000000e+00> : vector<2x8xf32>
    %26 = tpu.matmul %24, %25, %cst_11 {dimension_numbers = #tpu.dot_dimension_numbers<[1], [0], [0], [1], [0, 0, 1, 1], [], []>} : vector<2x32xbf16>, vector<32x8xbf16>, vector<2x8xf32> -> vector<2x8xf32>
    %c0_12 = arith.constant 0 : index
    %c0_13 = arith.constant 0 : index
    %27 = vector.load %arg5[%c0_12, %c0_13] : memref<1x8xf32, #tpu.memory_space<vmem>>, vector<1x8xf32>
    %28 = vector.broadcast %27 : vector<1x8xf32> to vector<2x8xf32>
    %29 = arith.addf %26, %28 : vector<2x8xf32>
    %c0_14 = arith.constant 0 : index
    %c0_15 = arith.constant 0 : index
    %30 = vector.load %arg6[%c0_14, %c0_15] : memref<2x8xf32, #tpu.memory_space<vmem>>, vector<2x8xf32>
    tpu.vector_store %arg6[%c0_14, %c0_15], %29 {strides = array<i32>} : memref<2x8xf32, #tpu.memory_space<vmem>>, vector<2x8xf32>,
    return
  }
  func.func @transform_0(%arg0: i32) -> (i32, i32) {
    %c0_i32 = arith.constant 0 : i32
    %c0_i32_0 = arith.constant 0 : i32
    %c0_i32_1 = arith.constant 0 : i32
    return %c0_i32, %c0_i32_0 : i32, i32
  }
  func.func @transform_1(%arg0: i32) -> (i32, i32) {
    %c0_i32 = arith.constant 0 : i32
    %c0_i32_0 = arith.constant 0 : i32
    %c0_i32_1 = arith.constant 0 : i32
    return %c0_i32, %c0_i32_0 : i32, i32
  }
  func.func @transform_2(%arg0: i32) -> (i32, i32) {
    %c0_i32 = arith.constant 0 : i32
    %c0_i32_0 = arith.constant 0 : i32
    %c0_i32_1 = arith.constant 0 : i32
    return %c0_i32, %c0_i32_0 : i32, i32
  }
  func.func @transform_3(%arg0: i32) -> (i32, i32) {
    %c0_i32 = arith.constant 0 : i32
    %c0_i32_0 = arith.constant 0 : i32
    %c0_i32_1 = arith.constant 0 : i32
    return %c0_i32, %c0_i32_0 : i32, i32
  }
  func.func @transform_4(%arg0: i32) -> (i32, i32) {
    %c0_i32 = arith.constant 0 : i32
    %c0_i32_0 = arith.constant 0 : i32
    %c0_i32_1 = arith.constant 0 : i32
    return %c0_i32, %c0_i32_0 : i32, i32
  }
  func.func @transform_5(%arg0: i32) -> (i32, i32) {
    %c0_i32 = arith.constant 0 : i32
    %c0_i32_0 = arith.constant 0 : i32
    %c0_i32_1 = arith.constant 0 : i32
    return %c0_i32, %c0_i32_0 : i32, i32
  }
}

</mosaic_0001>

<bundles_post_ra>
// kernel: _lambda_.6
= control target key start
LH: loop header
LB: loop body
LE: loop exit
PB: predicated region body
PF: predicated region fallthrough
CT: control target
= control target key end

     0   :  { %s468_s12 = smov 0   ;;  %s534_s0 = inlined_call_operand.vmem [shape: f32[32,192], index: 0, kind: input, shape index: {}]   ;;  %s535_s1 = inlined_call_operand.vmem [shape: bf16[192,32], index: 1, kind: input, shape index: {}]   ;;  %s536_s2 = inlined_call_operand.vmem [shape: f32[1,32], index: 2, kind: input, shape index: {}]   ;;  %s537_s3 = inlined_call_operand.vmem [shape: f32[32,32], index: 3, kind: output, shape index: {}]  }
   0x1 LB: > { %s391_s13 = sadd.s32 4294967295, %s445_s12   ;;  %p395_p0 = scmp.ge.s32.totalorder %s445_s12, 1  ;;  %s445_s12 = sphi %s468_s12, %s13_s12  }
   0x2   : > { %p139_p1 = scmp.lt.s32.totalorder %s445_s12, 3 }
   0x4   : > { %p140_p2 = pnand %p395_p0, %p139_p1 }
   0x5   : > { %v427_v0 = vld [vmem:[%s535_s1] sm:$0xff] (!%p140_p2)   ;;  %v447_v1 = vmov (!%p140_p2), 0   ;;  %s396_s16 = sshll.u32 (!%p140_p2), %s391_s13, 1  ;;  %v428_v2 = vld [vmem:[%s535_s1 + $0x8] sm:$0xff] (!%p140_p2)   ;;  %v429_v3 = vld [vmem:[%s535_s1 + $0x10] sm:$0xff] (!%p140_p2)   ;;  %vm287_vm0 = vcmask (!%p140_p2), 523264  }
   0x6   : > { %143 = sbr.rel (%p140_p2) target bundleno = 271 (0x10f), region = 32  ;;  %291 = vmatprep.subr.bf16.mxu0 (!%p140_p2), %v447_v1  ;;  %p165_p3 = scmp.lt.s32.totalorder (!%p140_p2), %s396_s16, 3  ;;  %v430_v4 = vld [vmem:[%s535_s1 + $0x18] sm:$0xff] (!%p140_p2)   ;;  %v431_v8 = vld [vmem:[%s535_s1 + $0x20] sm:$0xff] (!%p140_p2)   ;;  %v432_v9 = vld [vmem:[%s535_s1 + $0x28] sm:$0xff] (!%p140_p2)   ;;  %vm332_vm1 = vcmask (!%p140_p2), 261120  }
   0x7   : > { %292 = vmatpush1.bf16.msra.mxu0 (!%p140_p2), %v427_v0  ;;  %v433_v10 = vld [vmem:[%s535_s1 + $0x30] sm:$0xff] (!%p140_p2)   ;;  %v434_v11 = vld [vmem:[%s535_s1 + $0x38] sm:$0xff] (!%p140_p2)   ;;  %v435_v12 = vld [vmem:[%s535_s1 + $0x40] sm:$0xff] (!%p140_p2)  }
   0x8   : > { %293 = vmatprep.subr.bf16.mxu0 (!%p140_p2), %v447_v1  ;;  %v436_v13 = vld [vmem:[%s535_s1 + $0x48] sm:$0xff] (!%p140_p2)   ;;  %v437_v14 = vld [vmem:[%s535_s1 + $0x50] sm:$0xff] (!%p140_p2)   ;;  %v438_v15 = vld [vmem:[%s535_s1 + $0x58] sm:$0xff] (!%p140_p2)  }
   0x9   : > { %v401_v19 = vld [vmem:[%s536_s2] ss:$0 sm:$0xff] (!%p140_p2) }
   0xb   : > { %294 = vmatpush1.bf16.msra.mxu0 (!%p140_p2), %v428_v2 }
   0xc   : > { %295 = vmatprep.subr.bf16.mxu0 (!%p140_p2), %v447_v1 }
   0xd   : > { %s539_s16 = smov (!%p165_p3, %s396_s16), 3 }
   0xe   : > { %s417_s21 = sshll.u32 %s539_s16, 4  ;;  %s400_s18 = sshll.u32 %s539_s16, 3 }
   0xf   : > { %s491_s24 = scalar_lea.vmem %s534_s0, %s417_s21  ;;  %296 = vmatpush1.bf16.msra.mxu0 %v429_v3  ;;  %s175_s23 = scalar_lea.vmem %s537_s3, %s400_s18 }
  0x10   : > { %297 = vmatprep.subr.bf16.mxu0 %v447_v1  ;;  %v179_v5 = vld [vmem:[%s491_s24 + $0x8] sm:$0xff]  ;;  %v181_v6 = vld [vmem:[%s491_s24 + $0x18] sm:$0xff]  ;;  %v178_v16 = vld [vmem:[%s491_s24] sm:$0xff] }
  0x11   : > { %v183_v7 = vpack.c.bf16 %v181_v6, %v179_v5  ;;  %v180_v17 = vld [vmem:[%s491_s24 + $0x10] sm:$0xff] }
  0x12   : > { %v182_v18 = vpack.c.bf16 %v180_v17, %v178_v16 }
  0x13   : > { %298 = vmatpush1.bf16.msra.mxu0 %v430_v4  ;;  %414 = vmatprep.mubr.msk.bf16.mxu0 %vm287_vm0, %v183_v7 }
  0x14   : > { %299 = vmatprep.subr.bf16.mxu0 %v447_v1 }
  0x17   : > { %300 = vmatpush1.bf16.msra.mxu0 %v431_v8 }
  0x18   : > { %301 = vmatprep.subr.bf16.mxu0 %v447_v1 }
  0x1b   : > { %302 = vmatpush1.bf16.msra.mxu0 %v432_v9 }
  0x1c   : > { %303 = vmatprep.subr.bf16.mxu0 %v447_v1 }
  0x1f   : > { %304 = vmatpush1.bf16.msra.mxu0 %v433_v10 }
  0x20   : > { %305 = vmatprep.subr.bf16.mxu0 %v447_v1 }
  0x23   : > { %306 = vmatpush1.bf16.msra.mxu0 %v434_v11 }
  0x24   : > { %307 = vmatprep.subr.bf16.mxu0 %v447_v1 }
  0x27   : > { %308 = vmatpush1.bf16.msra.mxu0 %v435_v12 }
  0x28   : > { %309 = vmatprep.subr.bf16.mxu0 %v447_v1 }
  0x2b   : > { %310 = vmatpush1.bf16.msra.mxu0 %v436_v13 }
  0x2c   : > { %311 = vmatprep.subr.bf16.mxu0 %v447_v1 }
  0x2f   : > { %312 = vmatpush1.bf16.msra.mxu0 %v437_v14 }
  0x30   : > { %313 = vmatprep.subr.bf16.mxu0 %v447_v1 }
  0x33   : > { %314 = vmatpush1.bf16.msra.mxu0 %v438_v15 }
  0x36   : > { %324 = vmatmul.mubr.bf16.vlgmr.msra.gmra.mrb[0].mxu0 %v182_v18 }
 0x109   : > { %v325_v20 = vpop.f32.mrb[0].mxu0 }
 0x10a   : > { %v326_v21 = vadd.f32 %v401_v19, %v325_v20  ;;  %v327_v22 = vpop.f32.mrb[1].mxu0 }
 0x10b   : > { %v328_v23 = vpop.f32.mrb[2].mxu0 }
 0x10c   : > { %333 = vst.msk [vmem:[%s175_s23] sm:$0xff] %vm332_vm1, %v326_v21  ;;  %v329_v24 = vadd.f32 %v401_v19, %v328_v23  ;;  %v330_v25 = vpop.f32.mrb[3].mxu0 }
 0x10e   : > { %334 = vst.msk [vmem:[%s175_s23 + $0x8] sm:$0xff] %vm332_vm1, %v329_v24 }
 0x10f PF: > { %s13_s12 = sadd.s32 1, %s445_s12  }
 0x110   : > { %p10_p4 = scmp.ge.s32.totalorder %s13_s12, 4  }
 0x112   :  { %12 = sbr.rel (!%p10_p4) target bundleno = 1 (0x1), region = 62 }

// kernel: _lambda_.7
= control target key start
LH: loop header
LB: loop body
LE: loop exit
PB: predicated region body
PF: predicated region fallthrough
CT: control target
= control target key end

     0   :  { %s4314_s21 = smov 0   ;;  %s4957_s0 = inlined_call_operand.vmem [shape: bf16[64,32], index: 0, kind: input, shape index: {}]   ;;  %s4958_s1 = inlined_call_operand.vmem [shape: f32[1,32], index: 1, kind: input, shape index: {}]   ;;  %s4959_s2 = inlined_call_operand.vmem [shape: f32[1,32], index: 2, kind: input, shape index: {}]   ;;  %s4960_s3 = inlined_call_operand.vmem [shape: bf16[32,192], index: 3, kind: input, shape index: {}]   ;;  %s4961_s4 = inlined_call_operand.vmem [shape: bf16[4,16,32], index: 4, kind: input, shape index: {}]   ;;  %s4962_s5 = inlined_call_operand.vmem [shape: f32[1,32], index: 5, kind: input, shape index: {}]   ;;  %s4963_s6 = inlined_call_operand.vmem [shape: f32[1,32], index: 6, kind: input, shape index: {}]   ;;  %s4964_s7 = inlined_call_operand.vmem [shape: f32[1,32], index: 7, kind: input, shape index: {}]   ;;  %s4965_s8 = inlined_call_operand.vmem [shape: bf16[32,128], index: 8, kind: input, shape index: {}]   ;;  %s4966_s9 = inlined_call_operand.vmem [shape: f32[1,128], index: 9, kind: input, shape index: {}]   ;;  %s4967_s10 = inlined_call_operand.vmem [shape: bf16[128,32], index: 10, kind: input, shape index: {}]   ;;  %s4968_s11 = inlined_call_operand.vmem [shape: f32[1,32], index: 11, kind: input, shape index: {}]   ;;  %s4969_s12 = inlined_call_operand.vmem [shape: bf16[64,32], index: 12, kind: output, shape index: {}]  }
   0x1 LB: > { %s3574_s22 = sadd.s32 4294967295, %s4239_s21   ;;  %p3578_p0 = scmp.ge.s32.totalorder %s4239_s21, 1  ;;  %s4239_s21 = sphi %s4314_s21, %s22_s21  }
   0x2   : > { %p363_p1 = scmp.lt.s32.totalorder %s4239_s21, 3 }
   0x4   : > { %p364_p2 = pnand %p3578_p0, %p363_p1 }
   0x5   : > { %s3579_s23 = sshll.u32 (!%p364_p2), %s3574_s22, 2  ;;  %vm428_vm0 = vcmask (!%p364_p2), 261120   ;;  %v4121_v15 = vld [vmem:[%s4960_s3 + $0x4] ss:$8 sps:$4 sm:$0xff] (!%p364_p2)   ;;  %v4123_v16 = vld [vmem:[%s4960_s3] ss:$8 sps:$4 sm:$0xff] (!%p364_p2)  }
   0x6   : > { %367 = sbr.rel (%p364_p2) target bundleno = 4825 (0x12d9), region = 68  ;;  %p406_p3 = scmp.lt.s32.totalorder (!%p364_p2), %s3579_s23, 7  ;;  %534 = vmatprep.subr.bf16.mxu0 (!%p364_p2), %v4121_v15  ;;  %v4124_v17 = vld [vmem:[%s4960_s3 + $0x14] ss:$8 sps:$4 sm:$0xff] (!%p364_p2)   ;;  %v4126_v18 = vld [vmem:[%s4960_s3 + $0x10] ss:$8 sps:$4 sm:$0xff] (!%p364_p2)  }
   0x7   : > { %535 = vmatpush1.bf16.msra.mxu0 (!%p364_p2), %v4123_v16  ;;  %v4241_v19 = vmov (!%p364_p2), 0   ;;  %v4369_v33 = vld [vmem:[%s4958_s1] ss:$0 sm:$0xff] (!%p364_p2)  ;;  %s4242_s25 = smov (!%p364_p2), 96   ;;  %s4243_s26 = smov (!%p364_p2), 112   ;;  %v4245_v56 = vmov (!%p364_p2), 0.0  }
   0x8   : > { %566 = vmatprep.mubr.bf16.mxu0 (!%p364_p2), %v4241_v19  ;;  %536 = vmatprep.subr.bf16.mxu0 (!%p364_p2), %v4124_v17  ;;  %v4375_v37 = vld [vmem:[%s4959_s2] ss:$0 sm:$0xff] (!%p364_p2)  ;;  %s4246_s28 = smov (!%p364_p2), 64   ;;  %vm4247_vm1 = vmmov (!%p364_p2), 0   ;;  %vm630_vm2 = vcmask (!%p364_p2), 130048   ;;  %vm876_vm3 = vcmask (!%p364_p2), 1043456  }
   0x9   : > { %3795 = vmatprep.subr.bf16.mxu1 (!%p364_p2), %v4245_v56  ;;  %3797 = vmatprep.mubr.msk.bf16.mxu1 (!%p364_p2), %vm4247_vm1, %v4245_v56  ;;  %vm824_vm5 = vcmask (!%p364_p2), 64512   ;;  %vm3513_vm6 = vcmask (!%p364_p2), 257024  }
   0xb   : > { %537 = vmatpush1.bf16.msra.mxu0 (!%p364_p2), %v4126_v18 }
   0xc   : > { %3789 = vmatprep.subr.bf16.mxu0 (!%p364_p2), %v4245_v56 }
   0xd   : > { %s4971_s23 = smov (!%p406_p3, %s3579_s23), 7 }
   0xe   : > { %s3580_s24 = sshll.u32 %s4971_s23, 2 }
   0xf   : > { %s4330_s27 = scalar_lea.vmem %s4957_s0, %s3580_s24  ;;  %s415_s14 = scalar_lea.vmem %s4969_s12, %s3580_s24 }
  0x10   : > { %v3671_v0 = vld [vmem:[%s4330_s27] sm:$0xff]   ;;  %v3678_v20 = vld [vmem:[%s4330_s27 + $0x8] sm:$0xff]   ;;  %s4244_s27 = smov 80  }
  0x11   : > { %v4333_v1 = vunpack.c.l.bf16 %v3671_v0  ;;  %v4335_v2 = vunpack.c.h.bf16 %v3671_v0  ;;  %v4358_v21 = vunpack.c.h.bf16 %v3678_v20  ;;  %v4360_v22 = vunpack.c.l.bf16 %v3678_v20 }
  0x13   : > { %v429_v3 = vsel %vm428_vm0, %v4333_v1, 0.0  ;;  %v432_v4 = vsel %vm428_vm0, %v4335_v2, 0.0  ;;  %v438_v23 = vsel %vm428_vm0, %v4358_v21, 0.0  ;;  %v435_v24 = vsel %vm428_vm0, %v4360_v22, 0.0 }
  0x14   : > { %430 = vadd.xlane.f32.xlu0 %v429_v3 }
  0x18   : > { %433 = vadd.xlane.f32.xlu0 %v432_v4 }
  0x1c   : > { %436 = vadd.xlane.f32.xlu0 %v435_v24 }
  0xa1   : > { %v431_v5 = vpop.xlane.xlu0 %430 }
  0xa2   : > { %v442_v6 = vmul.f32 0.03125, %v431_v5 }
  0xa4   : > { %v446_v7 = vsub.f32 %v4333_v1, %v442_v6 }
  0xa5   : > { %v434_v8 = vpop.xlane.xlu0 %433 }
  0xa6   : > { %v443_v9 = vmul.f32 0.03125, %v434_v8  ;;  %v450_v10 = vmul.f32 %v446_v7, %v446_v7 }
  0xa8   : > { %v447_v11 = vsub.f32 %v4335_v2, %v443_v9  ;;  %v454_v12 = vsel %vm428_vm0, %v450_v10, 0.0 }
  0xa9   : > { %455 = vadd.xlane.f32.xlu1 %v454_v12  ;;  %v437_v49 = vpop.xlane.xlu0 %436 }
  0xaa   : > { %v451_v13 = vmul.f32 %v447_v11, %v447_v11  ;;  %v444_v51 = vmul.f32 0.03125, %v437_v49 }
  0xac   : > { %v457_v14 = vsel %vm428_vm0, %v451_v13, 0.0  ;;  %v448_v53 = vsub.f32 %v4360_v22, %v444_v51 }
  0xad   : > { %458 = vadd.xlane.f32.xlu1 %v457_v14 }
  0xae   : > { %v452_v54 = vmul.f32 %v448_v53, %v448_v53 }
  0xb0   : > { %v460_v55 = vsel %vm428_vm0, %v452_v54, 0.0 }
  0xb1   : > { %439 = vadd.xlane.f32.xlu1 %v438_v23 }
 0x136   : > { %v456_v25 = vpop.xlane.xlu1 %455 }
 0x137   : > { %v466_v26 = vmul.f32 0.03125, %v456_v25 }
 0x139   : > { %v470_v27 = vadd.f32 1e-05, %v466_v26 }
 0x13a   : > { %v459_v28 = vpop.xlane.xlu1 %458 }
 0x13b   : > { %4141 = vrsqrt.f32 %v470_v27  ;;  %v467_v29 = vmul.f32 0.03125, %v459_v28 }
 0x13d   : > { %v471_v30 = vadd.f32 1e-05, %v467_v29  ;;  %v595_v29 = vlaneseq }
 0x13e   : > { %v440_v46 = vpop.xlane.xlu1 %439 }
 0x13f   : > { %4143 = vrsqrt.f32 %v471_v30  ;;  %v445_v47 = vmul.f32 0.03125, %v440_v46  ;;  %v596_v30 = vand.u32 127, %v595_v29 }
 0x141   : > { %v449_v48 = vsub.f32 %v4358_v21, %v445_v47  ;;  %vm597_vm4 = vcmp.lt.s32.totalorder %v596_v30, 5 }
 0x143   : > { %v453_v50 = vmul.f32 %v449_v48, %v449_v48 }
 0x145   : > { %v4142_v31 = vpop.eup %4141  ;;  %v463_v52 = vsel %vm428_vm0, %v453_v50, 0.0 }
 0x146   : > { %v478_v32 = vmul.f32 %v4142_v31, %v446_v7 }
 0x148   : > { %v488_v36 = vmul.f32 %v4369_v33, %v478_v32 }
 0x149   : > { %v4144_v34 = vpop.eup %4143 }
 0x14a   : > { %v479_v35 = vmul.f32 %v4144_v34, %v447_v11  ;;  %v498_v39 = vadd.f32 %v4375_v37, %v488_v36 }
 0x14c   : > { %v489_v38 = vmul.f32 %v4369_v33, %v479_v35  ;;  %v4248_v35 = vmov -1e+30  }
 0x14d   : > { %v4441_v36 = vsel %vm597_vm4, 0.0, %v4248_v35 }
 0x14e   : > { %v499_v40 = vadd.f32 %v4375_v37, %v489_v38 }
 0x150   : > { %v502_v41 = vpack.c.bf16 %v499_v40, %v498_v39 }
 0x152   : > { %3589 = vmatmul.mubr.msk.bf16.vlgmr.msra.gmra.mrb[0].mxu0 %vm428_vm0, %v502_v41 }
 0x153   : > { %576 = vmatprep.mubr.bf16.mxu0 %v4241_v19 }
 0x225   : > { %v568_v42 = vpop.f32.mrb[0].mxu0 }
 0x226   : > { %603 = vrot.lane.b32.xlu1 %v568_v42, %s4242_s25  ;;  %600 = vrot.lane.b32.xlu0 %v568_v42, %s4243_s26  ;;  %v4383_v43 = vpop.f32.mrb[1].mxu0  ;;  %v609_v57 = vpack.c.bf16 %v568_v42, %v568_v42 }
 0x227   : > { %v4385_v44 = vpop.f32.mrb[2].mxu0  ;;  %v623_v27 = vpack.c.bf16 %v4383_v43, %v4383_v43 }
 0x228   : > { %v4387_v45 = vpop.f32.mrb[3].mxu0 }
 0x229   : > { %v878_v28 = vsel %vm876_vm3, %v623_v27, 0 }
 0x22a   : > { %606 = vrot.lane.b32.xlu1 %v568_v42, %s4244_s27 }
 0x245   : > { %464 = vadd.xlane.f32.xlu0 %v463_v52 }
 0x24e   : > { %461 = vadd.xlane.f32.xlu1 %v460_v55 }
 0x25b   : > { %628 = vrot.lane.b32.xlu0 %v609_v57, %s4246_s28 }
 0x298   : > { %v604_v58 = vpop.permute.xlu1 %603  ;;  %v601_v59 = vpop.permute.xlu0 %600 }
 0x299   : > { %v610_v60 = vpack.c.bf16 %v601_v59, %v601_v59  ;;  %v611_v62 = vpack.c.bf16 %v604_v58, %v604_v58 }
 0x29b   : > { %678 = vrot.lane.b32.xlu1 %v610_v60, %s4246_s28 }
 0x29c   : > { %v607_v61 = vpop.permute.xlu1 %606 }
 0x29d   : > { %v612_v63 = vpack.c.bf16 %v607_v61, %v607_v61 }
 0x29f   : > { %776 = vrot.lane.b32.xlu0 %v612_v63, %s4246_s28  ;;  %727 = vrot.lane.b32.xlu1 %v611_v62, %s4246_s28 }
 0x2d2   : > { %v465_v0 = vpop.xlane.xlu0 %464 }
 0x2d3   : > { %v469_v3 = vmul.f32 0.03125, %v465_v0 }
 0x2d5   : > { %v473_v4 = vadd.f32 1e-05, %v469_v3 }
 0x2d6   : > { %v629_v5 = vpop.permute.xlu0 %628 }
 0x2d7   : > { %v635_v6 = vsel %vm630_vm2, %v629_v5, 0  ;;  %4145 = vrsqrt.f32 %v473_v4 }
 0x2d8   : > { %3790 = vmatpush3.bf16.xpose.msra.mxu0 %v635_v6 }
 0x2d9   : > { %3801 = vmatprep.subr.bf16.mxu0 %v4245_v56 }
 0x2db   : > { %v462_v7 = vpop.xlane.xlu1 %461 }
 0x2dc   : > { %v468_v8 = vmul.f32 0.03125, %v462_v7 }
 0x2de   : > { %v472_v9 = vadd.f32 1e-05, %v468_v8 }
 0x2e0   : > { %4147 = vrsqrt.f32 %v472_v9 }
 0x2e1   : > { %v4146_v10 = vpop.eup %4145 }
 0x2e2   : > { %v481_v11 = vmul.f32 %v4146_v10, %v449_v48 }
 0x2e4   : > { %v491_v14 = vmul.f32 %v4369_v33, %v481_v11 }
 0x2e6   : > { %v501_v17 = vadd.f32 %v4375_v37, %v491_v14 }
 0x2ea   : > { %v4148_v12 = vpop.eup %4147 }
 0x2eb   : > { %v480_v13 = vmul.f32 %v4148_v12, %v448_v53 }
 0x2ed   : > { %v490_v15 = vmul.f32 %v4369_v33, %v480_v13 }
 0x2ef   : > { %v500_v16 = vadd.f32 %v4375_v37, %v490_v15 }
 0x2f1   : > { %v503_v18 = vpack.c.bf16 %v501_v17, %v500_v16 }
 0x2f3   : > { %3590 = vmatmul.mubr.msk.bf16.gmra.mrb[4].mxu0 %vm428_vm0, %v503_v18 }
 0x2f4   : > { %3791 = vmatprep.mubr.msk.bf16.mxu0 %vm4247_vm1, %v4245_v56 }
 0x2fb   : > { %3792 = vmatmul.mubr.msk.bf16.vlgmr.msra.gmra.mrb[8].mxu0 %vm630_vm2, %v609_v57 }
 0x2fc   : > { %3803 = vmatprep.mubr.msk.bf16.mxu0 %vm4247_vm1, %v4245_v56 }
 0x30d   : > { %v679_v19 = vpop.permute.xlu1 %678 }
 0x30e   : > { %v684_v20 = vsel %vm630_vm2, %v679_v19, 0 }
 0x30f   : > { %3796 = vmatpush3.bf16.xpose.msra.mxu1 %v684_v20 }
 0x310   : > { %3807 = vmatprep.subr.bf16.mxu1 %v4245_v56 }
 0x311   : > { %v728_v23 = vpop.permute.xlu1 %727  ;;  %v777_v25 = vpop.permute.xlu0 %776 }
 0x312   : > { %v733_v24 = vsel %vm630_vm2, %v728_v23, 0  ;;  %v782_v26 = vsel %vm630_vm2, %v777_v25, 0 }
 0x313   : > { %3802 = vmatpush3.bf16.xpose.msra.mxu0 %v733_v24 }
 0x314   : > { %3813 = vmatprep.subr.bf16.mxu0 %v4245_v56 }
 0x316   : > { %3798 = vmatmul.mubr.msk.bf16.vlgmr.msra.gmra.mrb[0].mxu1 %vm630_vm2, %v610_v60 }
 0x317   : > { %3808 = vmatpush3.bf16.xpose.msra.mxu1 %v782_v26  ;;  %3809 = vmatprep.mubr.msk.bf16.mxu1 %vm4247_vm1, %v4245_v56 }
 0x318   : > { %3819 = vmatprep.subr.bf16.mxu1 %v4245_v56 }
 0x31a   : > { %3804 = vmatmul.mubr.msk.bf16.vlgmr.msra.gmra.mrb[12].mxu0 %vm630_vm2, %v611_v62 }
 0x31b   : > { %3814 = vmatpush3.bf16.msra.mxu0 %v878_v28  ;;  %3815 = vmatprep.mubr.msk.bf16.mxu0 %vm4247_vm1, %v4245_v56  ;;  %v4469_v28 = vpack.c.bf16 %v4385_v44, %v4385_v44 }
 0x31c   : > { %3825 = vmatprep.subr.bf16.mxu0 %v4245_v56 }
 0x31e   : > { %3810 = vmatmul.mubr.msk.bf16.vlgmr.msra.gmra.mrb[4].mxu1 %vm630_vm2, %v612_v63 }
 0x31f   : > { %3821 = vmatprep.mubr.msk.bf16.mxu1 %vm4247_vm1, %v4245_v56 }
 0x3c6   : > { %v4433_v31 = vpop.f32.mrb[4].mxu0 }
 0x3c7   : > { %v4435_v32 = vpop.f32.mrb[5].mxu0 }
 0x3c8   : > { %v4437_v33 = vpop.f32.mrb[6].mxu0 }
 0x3c9   : > { %v4439_v34 = vpop.f32.mrb[7].mxu0 }
 0x3ce   : > { %v671_v37 = vpop.f32.mrb[8].mxu0 }
 0x3cf   : > { %v672_v38 = vadd.f32 %v671_v37, %v4441_v36  ;;  %v3793_v39 = vpop.f32.mrb[9].mxu0 }
 0x3d0   : > { %v674_v40 = vpop.f32.mrb[10].mxu0 }
 0x3d1   : > { %v3794_v41 = vpop.f32.mrb[11].mxu0  ;;  %v825_v42 = vsel %vm824_vm5, %v672_v38, -inf }
 0x3d2   : > { %826 = vmax.xlane.f32.xlu1 %v825_v42 }
 0x3e3   : > { %614 = vrot.lane.b32.xlu1 %v4383_v43, %s4243_s26 }
 0x3e9   : > { %v720_v46 = vpop.f32.mrb[0].mxu1 }
 0x3ea   : > { %v721_v47 = vadd.f32 %v720_v46, %v4441_v36  ;;  %v3799_v48 = vpop.f32.mrb[1].mxu1 }
 0x3eb   : > { %v723_v49 = vpop.f32.mrb[2].mxu1 }
 0x3ec   : > { %v3800_v50 = vpop.f32.mrb[3].mxu1  ;;  %v828_v51 = vsel %vm824_vm5, %v721_v47, -inf }
 0x3ed   : > { %829 = vmax.xlane.f32.xlu0 %v828_v51  ;;  %v769_v52 = vpop.f32.mrb[12].mxu0 }
 0x3ee   : > { %v770_v53 = vadd.f32 %v769_v52, %v4441_v36  ;;  %v3805_v54 = vpop.f32.mrb[13].mxu0 }
 0x3ef   : > { %v772_v55 = vpop.f32.mrb[14].mxu0 }
 0x3f0   : > { %v3806_v57 = vpop.f32.mrb[15].mxu0  ;;  %v831_v58 = vsel %vm824_vm5, %v770_v53, -inf }
 0x3f1   : > { %832 = vmax.xlane.f32.xlu0 %v831_v58  ;;  %v818_v59 = vpop.f32.mrb[4].mxu1 }
 0x3f2   : > { %v819_v60 = vadd.f32 %v818_v59, %v4441_v36  ;;  %v3811_v61 = vpop.f32.mrb[5].mxu1 }
 0x3f3   : > { %v821_v62 = vpop.f32.mrb[6].mxu1 }
 0x3f4   : > { %v3812_v63 = vpop.f32.mrb[7].mxu1  ;;  %v834_v0 = vsel %vm824_vm5, %v819_v60, -inf }
 0x3f5   : > { %835 = vmax.xlane.f32.xlu0 %v834_v0  ;;  %v4506_v0 = vld [vmem:[%s4961_s4] sm:$0xff]  }
 0x45f   : > { %v827_v3 = vpop.xlane.xlu1 %826 }
 0x460   : > { %v837_v4 = vsub.f32 %v672_v38, %v827_v3  ;;  %v4513_v3 = vld [vmem:[%s4961_s4 + $0x8] sm:$0xff]  }
 0x462   : > { %v841_v5 = vmul.f32 1.442695, %v837_v4 }
 0x463   : > { %v615_v6 = vpop.permute.xlu1 %614 }
 0x464   : > { %4149 = vpow2.f32 %v841_v5  ;;  %v624_v7 = vpack.c.bf16 %v615_v6, %v615_v6  ;;  %v4520_v5 = vld [vmem:[%s4961_s4 + $0x10] sm:$0xff]  }
 0x466   : > { %v924_v8 = vsel %vm876_vm3, %v624_v7, 0 }
 0x467   : > { %3820 = vmatpush3.bf16.msra.mxu1 %v924_v8 }
 0x468   : > { %3831 = vmatprep.subr.bf16.mxu1 %v4245_v56 }
 0x46e   : > { %v4150_v9 = vpop.eup %4149 }
 0x46f   : > { %v849_v10 = vsel %vm824_vm5, %v4150_v9, 0.0 }
 0x470   : > { %850 = vadd.xlane.f32.xlu1 %v849_v10 }
 0x47a   : > { %v830_v11 = vpop.xlane.xlu0 %829 }
 0x47b   : > { %v838_v12 = vsub.f32 %v721_v47, %v830_v11  ;;  %v4530_v11 = vld [vmem:[%s4961_s4 + $0x18] sm:$0xff]  }
 0x47d   : > { %v843_v13 = vmul.f32 1.442695, %v838_v12 }
 0x47e   : > { %v833_v14 = vpop.xlane.xlu0 %832 }
 0x47f   : > { %4151 = vpow2.f32 %v843_v13  ;;  %v839_v15 = vsub.f32 %v770_v53, %v833_v14 }
 0x481   : > { %v845_v16 = vmul.f32 1.442695, %v839_v15 }
 0x482   : > { %v836_v17 = vpop.xlane.xlu0 %835 }
 0x483   : > { %4153 = vpow2.f32 %v845_v16  ;;  %v840_v18 = vsub.f32 %v819_v60, %v836_v17 }
 0x485   : > { %v847_v19 = vmul.f32 1.442695, %v840_v18 }
 0x487   : > { %4155 = vpow2.f32 %v847_v19 }
 0x489   : > { %v4152_v20 = vpop.eup %4151 }
 0x48a   : > { %v852_v23 = vsel %vm824_vm5, %v4152_v20, 0.0 }
 0x48b   : > { %853 = vadd.xlane.f32.xlu0 %v852_v23 }
 0x48d   : > { %v4154_v24 = vpop.eup %4153 }
 0x48e   : > { %v855_v25 = vsel %vm824_vm5, %v4154_v24, 0.0 }
 0x48f   : > { %856 = vadd.xlane.f32.xlu1 %v855_v25 }
 0x491   : > { %v4156_v26 = vpop.eup %4155 }
 0x492   : > { %v858_v27 = vsel %vm824_vm5, %v4156_v26, 0.0 }
 0x493   : > { %859 = vadd.xlane.f32.xlu0 %v858_v27 }
 0x4a0   : > { %620 = vrot.lane.b32.xlu1 %v4383_v43, %s4244_s27 }
 0x4a4   : > { %1262 = vrot.lane.b32.xlu1 %v4385_v44, %s4243_s26 }
 0x4a8   : > { %1265 = vrot.lane.b32.xlu1 %v4385_v44, %s4242_s25 }
 0x4a9   : > { %617 = vrot.lane.b32.xlu0 %v4383_v43, %s4242_s25 }
 0x4ac   : > { %1290 = vrot.lane.b32.xlu1 %v4469_v28, %s4246_s28 }
 0x4ad   : > { %1268 = vrot.lane.b32.xlu0 %v4385_v44, %s4244_s27 }
 0x4fd   : > { %v851_v29 = vpop.xlane.xlu1 %850 }
 0x4fe   : > { %4157 = vrcp.f32 %v851_v29 }
 0x508   : > { %v4158_v30 = vpop.eup %4157 }
 0x509   : > { %v865_v35 = vmul.f32 %v4158_v30, %v4150_v9 }
 0x50b   : > { %v869_v37 = vpack.c.bf16 %v865_v35, %v865_v35 }
 0x50d   : > { %3816 = vmatmul.mubr.msk.bf16.vlgmr.msra.gmra.mrb[16].mxu0 %vm824_vm5, %v869_v37 }
 0x50e   : > { %3827 = vmatprep.mubr.msk.bf16.mxu0 %vm4247_vm1, %v4245_v56 }
 0x518   : > { %v854_v43 = vpop.xlane.xlu0 %853 }
 0x519   : > { %4159 = vrcp.f32 %v854_v43 }
 0x51c   : > { %v857_v38 = vpop.xlane.xlu1 %856 }
 0x51d   : > { %4161 = vrcp.f32 %v857_v38 }
 0x520   : > { %v621_v39 = vpop.permute.xlu1 %620  ;;  %v860_v40 = vpop.xlane.xlu0 %859 }
 0x521   : > { %4163 = vrcp.f32 %v860_v40  ;;  %v626_v44 = vpack.c.bf16 %v621_v39, %v621_v39  ;;  %v1285_v40 = vpack.c.bf16 %v4387_v45, %v4387_v45 }
 0x523   : > { %v4160_v41 = vpop.eup %4159  ;;  %v1016_v54 = vsel %vm876_vm3, %v626_v44, 0 }
 0x524   : > { %v866_v42 = vmul.f32 %v4160_v41, %v4152_v20  ;;  %v1263_v46 = vpop.permute.xlu1 %1262  ;;  %v618_v47 = vpop.permute.xlu0 %617 }
 0x525   : > { %v4478_v48 = vpack.c.bf16 %v1263_v46, %v1263_v46  ;;  %v625_v49 = vpack.c.bf16 %v618_v47, %v618_v47 }
 0x526   : > { %v870_v50 = vpack.c.bf16 %v866_v42, %v866_v42 }
 0x527   : > { %v4162_v51 = vpop.eup %4161  ;;  %v970_v52 = vsel %vm876_vm3, %v625_v49, 0  ;;  %1339 = vrot.lane.b32.xlu0 %v4478_v48, %s4246_s28 }
 0x528   : > { %v867_v53 = vmul.f32 %v4162_v51, %v4154_v24  ;;  %v1266_v55 = vpop.permute.xlu1 %1265  ;;  %3822 = vmatmul.mubr.msk.bf16.vlgmr.msra.gmra.mrb[8].mxu1 %vm824_vm5, %v870_v50  ;;  %3826 = vmatpush3.bf16.msra.mxu0 %v970_v52  ;;  %v1269_v57 = vpop.permute.xlu0 %1268 }
 0x529   : > { %v4485_v58 = vpack.c.bf16 %v1266_v55, %v1266_v55  ;;  %3832 = vmatpush3.bf16.msra.mxu1 %v1016_v54  ;;  %v4487_v59 = vpack.c.bf16 %v1269_v57, %v1269_v57  ;;  %3833 = vmatprep.mubr.msk.bf16.mxu1 %vm4247_vm1, %v4245_v56 }
 0x52a   : > { %v871_v60 = vpack.c.bf16 %v867_v53, %v867_v53  ;;  %3837 = vmatprep.subr.bf16.mxu0 %v4245_v56  ;;  %3843 = vmatprep.subr.bf16.mxu1 %v4245_v56 }
 0x52b   : > { %v4164_v61 = vpop.eup %4163  ;;  %1388 = vrot.lane.b32.xlu1 %v4485_v58, %s4246_s28  ;;  %1437 = vrot.lane.b32.xlu0 %v4487_v59, %s4246_s28 }
 0x52c   : > { %v868_v62 = vmul.f32 %v4164_v61, %v4156_v26  ;;  %3828 = vmatmul.mubr.msk.bf16.vlgmr.msra.gmra.mrb[20].mxu0 %vm824_vm5, %v871_v60  ;;  %v1291_v16 = vpop.permute.xlu1 %1290 }
 0x52d   : > { %3839 = vmatprep.mubr.msk.bf16.mxu0 %vm4247_vm1, %v4245_v56  ;;  %3838 = vmatpush3.bf16.msra.mxu0 %v4506_v0  ;;  %v1296_v23 = vsel %vm630_vm2, %v1291_v16, 0 }
 0x52e   : > { %v872_v63 = vpack.c.bf16 %v868_v62, %v868_v62  ;;  %3849 = vmatprep.subr.bf16.mxu0 %v4245_v56 }
 0x530   : > { %3834 = vmatmul.mubr.msk.bf16.vlgmr.msra.gmra.mrb[12].mxu1 %vm824_vm5, %v872_v63 }
 0x531   : > { %3845 = vmatprep.mubr.msk.bf16.mxu1 %vm4247_vm1, %v4245_v56  ;;  %3844 = vmatpush3.bf16.msra.mxu1 %v4513_v3 }
 0x532   : > { %3855 = vmatprep.subr.bf16.mxu1 %v4245_v56 }
 0x599   : > { %v1340_v26 = vpop.permute.xlu0 %1339 }
 0x59a   : > { %v1345_v37 = vsel %vm630_vm2, %v1340_v26, 0 }
 0x59d   : > { %v1389_v43 = vpop.permute.xlu1 %1388  ;;  %v1438_v39 = vpop.permute.xlu0 %1437 }
 0x59e   : > { %v1394_v38 = vsel %vm630_vm2, %v1389_v43, 0  ;;  %v1443_v41 = vsel %vm630_vm2, %v1438_v39, 0 }
 0x5e0   : > { %v914_v4 = vpop.f32.mrb[16].mxu0 }
 0x5e1   : > { %v1058_v6 = vpack.c.bf16 %v914_v4, %v914_v4  ;;  %v3817_v7 = vpop.f32.mrb[17].mxu0 }
 0x5e2   : > { %v917_v8 = vpop.f32.mrb[18].mxu0 }
 0x5e3   : > { %v3818_v9 = vpop.f32.mrb[19].mxu0  ;;  %3840 = vmatmul.mubr.msk.bf16.vlgmr.msra.gmra.mrb[24].mxu0 %vm630_vm2, %v1058_v6 }
 0x5e4   : > { %3850 = vmatpush3.bf16.msra.mxu0 %v4520_v5  ;;  %3851 = vmatprep.mubr.msk.bf16.mxu0 %vm4247_vm1, %v4245_v56 }
 0x5e5   : > { %3861 = vmatprep.subr.bf16.mxu0 %v4245_v56 }
 0x5fb   : > { %v960_v10 = vpop.f32.mrb[8].mxu1 }
 0x5fc   : > { %v1059_v12 = vpack.c.bf16 %v960_v10, %v960_v10  ;;  %v3823_v13 = vpop.f32.mrb[9].mxu1 }
 0x5fd   : > { %v963_v14 = vpop.f32.mrb[10].mxu1 }
 0x5fe   : > { %v3824_v15 = vpop.f32.mrb[11].mxu1  ;;  %3846 = vmatmul.mubr.msk.bf16.vlgmr.msra.gmra.mrb[16].mxu1 %vm630_vm2, %v1059_v12 }
 0x5ff   : > { %3856 = vmatpush3.bf16.msra.mxu1 %v4530_v11  ;;  %v1006_v17 = vpop.f32.mrb[20].mxu0  ;;  %3857 = vmatprep.mubr.msk.bf16.mxu1 %vm4247_vm1, %v4245_v56 }
 0x600   : > { %v1060_v18 = vpack.c.bf16 %v1006_v17, %v1006_v17  ;;  %v3829_v19 = vpop.f32.mrb[21].mxu0  ;;  %3867 = vmatprep.subr.bf16.mxu1 %v4245_v56 }
 0x601   : > { %v1009_v20 = vpop.f32.mrb[22].mxu0 }
 0x602   : > { %v3830_v24 = vpop.f32.mrb[23].mxu0  ;;  %3852 = vmatmul.mubr.msk.bf16.vlgmr.msra.gmra.mrb[28].mxu0 %vm630_vm2, %v1060_v18 }
 0x603   : > { %3862 = vmatpush3.bf16.xpose.msra.mxu0 %v1296_v23  ;;  %v1052_v25 = vpop.f32.mrb[12].mxu1  ;;  %3863 = vmatprep.mubr.msk.bf16.mxu0 %vm4247_vm1, %v4245_v56 }
 0x604   : > { %v1061_v27 = vpack.c.bf16 %v1052_v25, %v1052_v25  ;;  %v3835_v29 = vpop.f32.mrb[13].mxu1  ;;  %3873 = vmatprep.subr.bf16.mxu0 %v4245_v56 }
 0x605   : > { %v1055_v30 = vpop.f32.mrb[14].mxu1 }
 0x606   : > { %v3836_v35 = vpop.f32.mrb[15].mxu1  ;;  %3858 = vmatmul.mubr.msk.bf16.vlgmr.msra.gmra.mrb[20].mxu1 %vm630_vm2, %v1061_v27 }
 0x607   : > { %3869 = vmatprep.mubr.msk.bf16.mxu1 %vm4247_vm1, %v4245_v56 }
 0x608   : > { %3868 = vmatpush3.bf16.xpose.msra.mxu1 %v1345_v37 }
 0x609   : > { %3879 = vmatprep.subr.bf16.mxu1 %v4245_v56 }
 0x60a   : > { %3864 = vmatmul.mubr.msk.bf16.vlgmr.msra.gmra.mrb[32].mxu0 %vm630_vm2, %v4469_v28  ;;  %v1537_v28 = vsel %vm876_vm3, %v1285_v40, 0 }
 0x60b   : > { %3874 = vmatpush3.bf16.xpose.msra.mxu0 %v1394_v38  ;;  %3875 = vmatprep.mubr.msk.bf16.mxu0 %vm4247_vm1, %v4245_v56 }
 0x60c   : > { %3885 = vmatprep.subr.bf16.mxu0 %v4245_v56 }
 0x60f   : > { %3870 = vmatmul.mubr.msk.bf16.vlgmr.msra.gmra.mrb[24].mxu1 %vm630_vm2, %v4478_v48 }
 0x610   : > { %3880 = vmatpush3.bf16.xpose.msra.mxu1 %v1443_v41  ;;  %3881 = vmatprep.mubr.msk.bf16.mxu1 %vm4247_vm1, %v4245_v56 }
 0x611   : > { %3891 = vmatprep.subr.bf16.mxu1 %v4245_v56 }
 0x612   : > { %3876 = vmatmul.mubr.msk.bf16.vlgmr.msra.gmra.mrb[36].mxu0 %vm630_vm2, %v4485_v58 }
 0x613   : > { %3886 = vmatpush3.bf16.msra.mxu0 %v1537_v28  ;;  %3887 = vmatprep.mubr.msk.bf16.mxu0 %vm4247_vm1, %v4245_v56 }
 0x614   : > { %3897 = vmatprep.subr.bf16.mxu0 %v4245_v56 }
 0x617   : > { %3882 = vmatmul.mubr.msk.bf16.vlgmr.msra.gmra.mrb[28].mxu1 %vm630_vm2, %v4487_v59 }
 0x618   : > { %3893 = vmatprep.mubr.msk.bf16.mxu1 %vm4247_vm1, %v4245_v56 }
 0x6b6   : > { %v1105_v42 = vpop.f32.mrb[24].mxu0 }
 0x6b7   : > { %v3841_v44 = vpop.f32.mrb[25].mxu0 }
 0x6b8   : > { %v1108_v46 = vpop.f32.mrb[26].mxu0 }
 0x6b9   : > { %v3842_v47 = vpop.f32.mrb[27].mxu0 }
 0x6d1   : > { %v1154_v48 = vpop.f32.mrb[16].mxu1 }
 0x6d2   : > { %v1258_v49 = vadd.f32 %v1154_v48, %v1105_v42  ;;  %v3847_v50 = vpop.f32.mrb[17].mxu1 }
 0x6d3   : > { %v1157_v51 = vpop.f32.mrb[18].mxu1 }
 0x6d4   : > { %v3848_v52 = vpop.f32.mrb[19].mxu1 }
 0x6d5   : > { %v1203_v53 = vpop.f32.mrb[28].mxu0 }
 0x6d6   : > { %v1259_v54 = vadd.f32 %v1258_v49, %v1203_v53  ;;  %v3853_v55 = vpop.f32.mrb[29].mxu0 }
 0x6d7   : > { %v1206_v57 = vpop.f32.mrb[30].mxu0 }
 0x6d8   : > { %v3854_v58 = vpop.f32.mrb[31].mxu0 }
 0x6d9   : > { %v1252_v60 = vpop.f32.mrb[20].mxu1 }
 0x6da   : > { %v4571_v61 = vadd.f32 %v1259_v54, %v1252_v60  ;;  %v3859_v59 = vpop.f32.mrb[21].mxu1 }
 0x6db   : > { %v1255_v62 = vpop.f32.mrb[22].mxu1 }
 0x6dc   : > { %v3860_v63 = vpop.f32.mrb[23].mxu1 }
 0x6dd   : > { %v1332_v4 = vpop.f32.mrb[32].mxu0  ;;  %v4599_v63 = vpack.c.bf16 %v4433_v31, %v4433_v31 }
 0x6de   : > { %v1333_v6 = vadd.f32 %v1332_v4, %v4441_v36  ;;  %v3865_v7 = vpop.f32.mrb[33].mxu0 }
 0x6df   : > { %v1335_v8 = vpop.f32.mrb[34].mxu0 }
 0x6e0   : > { %v3866_v9 = vpop.f32.mrb[35].mxu0  ;;  %v1485_v10 = vsel %vm824_vm5, %v1333_v6, -inf }
 0x6e1   : > { %1486 = vmax.xlane.f32.xlu1 %v1485_v10 }
 0x6e2   : > { %v1381_v12 = vpop.f32.mrb[24].mxu1 }
 0x6e3   : > { %v1382_v13 = vadd.f32 %v1381_v12, %v4441_v36  ;;  %v3871_v14 = vpop.f32.mrb[25].mxu1 }
 0x6e4   : > { %v1384_v15 = vpop.f32.mrb[26].mxu1 }
 0x6e5   : > { %v3872_v16 = vpop.f32.mrb[27].mxu1  ;;  %v1430_v17 = vpop.f32.mrb[36].mxu0  ;;  %v1488_v18 = vsel %vm824_vm5, %v1382_v13, -inf }
 0x6e6   : > { %v1431_v19 = vadd.f32 %v1430_v17, %v4441_v36  ;;  %1489 = vmax.xlane.f32.xlu0 %v1488_v18  ;;  %v3877_v20 = vpop.f32.mrb[37].mxu0 }
 0x6e7   : > { %v1433_v23 = vpop.f32.mrb[38].mxu0 }
 0x6e8   : > { %v3878_v24 = vpop.f32.mrb[39].mxu0  ;;  %v1491_v25 = vsel %vm824_vm5, %v1431_v19, -inf }
 0x6ea   : > { %1492 = vmax.xlane.f32.xlu0 %v1491_v25  ;;  %v1479_v26 = vpop.f32.mrb[28].mxu1 }
 0x6eb   : > { %v1480_v27 = vadd.f32 %v1479_v26, %v4441_v36  ;;  %v3883_v29 = vpop.f32.mrb[29].mxu1 }
 0x6ec   : > { %v1482_v30 = vpop.f32.mrb[30].mxu1 }
 0x6ed   : > { %v3884_v35 = vpop.f32.mrb[31].mxu1  ;;  %v1494_v37 = vsel %vm824_vm5, %v1480_v27, -inf }
 0x6ee   : > { %1495 = vmax.xlane.f32.xlu0 %v1494_v37 }
 0x6f2   : > { %1276 = vrot.lane.b32.xlu1 %v4387_v45, %s4243_s26 }
 0x76e   : > { %v1487_v43 = vpop.xlane.xlu1 %1486 }
 0x76f   : > { %v1497_v38 = vsub.f32 %v1333_v6, %v1487_v43 }
 0x771   : > { %v1501_v39 = vmul.f32 1.442695, %v1497_v38 }
 0x772   : > { %v1277_v40 = vpop.permute.xlu1 %1276 }
 0x773   : > { %4165 = vpow2.f32 %v1501_v39  ;;  %v1286_v41 = vpack.c.bf16 %v1277_v40, %v1277_v40  ;;  %v1490_v28 = vpop.xlane.xlu0 %1489 }
 0x774   : > { %v1498_v42 = vsub.f32 %v1382_v13, %v1490_v28 }
 0x775   : > { %v1583_v44 = vsel %vm876_vm3, %v1286_v41, 0 }
 0x776   : > { %v1503_v46 = vmul.f32 1.442695, %v1498_v42  ;;  %3892 = vmatpush3.bf16.msra.mxu1 %v1583_v44 }
 0x777   : > { %v1493_v47 = vpop.xlane.xlu0 %1492  ;;  %3903 = vmatprep.subr.bf16.mxu1 %v4245_v56 }
 0x778   : > { %4167 = vpow2.f32 %v1503_v46  ;;  %v1499_v48 = vsub.f32 %v1431_v19, %v1493_v47 }
 0x77a   : > { %v1505_v49 = vmul.f32 1.442695, %v1499_v48 }
 0x77b   : > { %v1496_v50 = vpop.xlane.xlu0 %1495 }
 0x77c   : > { %4169 = vpow2.f32 %v1505_v49  ;;  %v1500_v51 = vsub.f32 %v1480_v27, %v1496_v50 }
 0x77d   : > { %v4166_v52 = vpop.eup %4165 }
 0x77e   : > { %v1507_v53 = vmul.f32 1.442695, %v1500_v51  ;;  %v1509_v54 = vsel %vm824_vm5, %v4166_v52, 0.0 }
 0x77f   : > { %1510 = vadd.xlane.f32.xlu1 %v1509_v54 }
 0x780   : > { %4171 = vpow2.f32 %v1507_v53 }
 0x782   : > { %v4168_v55 = vpop.eup %4167 }
 0x783   : > { %v1512_v57 = vsel %vm824_vm5, %v4168_v55, 0.0 }
 0x784   : > { %1513 = vadd.xlane.f32.xlu0 %v1512_v57 }
 0x786   : > { %v4170_v58 = vpop.eup %4169 }
 0x787   : > { %v1515_v60 = vsel %vm824_vm5, %v4170_v58, 0.0 }
 0x788   : > { %1516 = vadd.xlane.f32.xlu1 %v1515_v60 }
 0x78a   : > { %v4172_v59 = vpop.eup %4171 }
 0x78b   : > { %v1518_v62 = vsel %vm824_vm5, %v4172_v59, 0.0 }
 0x78c   : > { %1519 = vadd.xlane.f32.xlu0 %v1518_v62 }
 0x799   : > { %1282 = vrot.lane.b32.xlu1 %v4387_v45, %s4244_s27 }
 0x79d   : > { %1897 = vrot.lane.b32.xlu1 %v4433_v31, %s4243_s26 }
 0x7a1   : > { %1900 = vrot.lane.b32.xlu1 %v4433_v31, %s4242_s25 }
 0x7a2   : > { %1279 = vrot.lane.b32.xlu0 %v4387_v45, %s4242_s25 }
 0x7a5   : > { %1925 = vrot.lane.b32.xlu1 %v4599_v63, %s4246_s28 }
 0x7a6   : > { %1903 = vrot.lane.b32.xlu0 %v4433_v31, %s4244_s27 }
 0x80c   : > { %v1511_v4 = vpop.xlane.xlu1 %1510 }
 0x80d   : > { %4173 = vrcp.f32 %v1511_v4 }
 0x811   : > { %v1514_v6 = vpop.xlane.xlu0 %1513 }
 0x812   : > { %4175 = vrcp.f32 %v1514_v6 }
 0x815   : > { %v1517_v7 = vpop.xlane.xlu1 %1516 }
 0x816   : > { %4177 = vrcp.f32 %v1517_v7 }
 0x817   : > { %v4174_v8 = vpop.eup %4173 }
 0x818   : > { %v1525_v9 = vmul.f32 %v4174_v8, %v4166_v52 }
 0x819   : > { %v1283_v10 = vpop.permute.xlu1 %1282  ;;  %v1520_v45 = vpop.xlane.xlu0 %1519 }
 0x81a   : > { %4179 = vrcp.f32 %v1520_v45  ;;  %v1529_v12 = vpack.c.bf16 %v1525_v9, %v1525_v9  ;;  %v1288_v15 = vpack.c.bf16 %v1283_v10, %v1283_v10  ;;  %v1920_v45 = vpack.c.bf16 %v4435_v32, %v4435_v32 }
 0x81c   : > { %v4176_v13 = vpop.eup %4175  ;;  %3888 = vmatmul.mubr.msk.bf16.vlgmr.msra.gmra.mrb[40].mxu0 %vm824_vm5, %v1529_v12  ;;  %v1675_v25 = vsel %vm876_vm3, %v1288_v15, 0 }
 0x81d   : > { %v1526_v14 = vmul.f32 %v4176_v13, %v4168_v55  ;;  %v1898_v16 = vpop.permute.xlu1 %1897  ;;  %v1280_v17 = vpop.permute.xlu0 %1279  ;;  %3899 = vmatprep.mubr.msk.bf16.mxu0 %vm4247_vm1, %v4245_v56 }
 0x81e   : > { %v4608_v31 = vpack.c.bf16 %v1898_v16, %v1898_v16  ;;  %v1287_v18 = vpack.c.bf16 %v1280_v17, %v1280_v17 }
 0x81f   : > { %v1530_v19 = vpack.c.bf16 %v1526_v14, %v1526_v14 }
 0x820   : > { %v4178_v20 = vpop.eup %4177  ;;  %v1629_v23 = vsel %vm876_vm3, %v1287_v18, 0  ;;  %1974 = vrot.lane.b32.xlu0 %v4608_v31, %s4246_s28 }
 0x821   : > { %v1527_v24 = vmul.f32 %v4178_v20, %v4170_v58  ;;  %v1901_v26 = vpop.permute.xlu1 %1900  ;;  %3894 = vmatmul.mubr.msk.bf16.vlgmr.msra.gmra.mrb[32].mxu1 %vm824_vm5, %v1530_v19  ;;  %3898 = vmatpush3.bf16.msra.mxu0 %v1629_v23  ;;  %v1904_v27 = vpop.permute.xlu0 %1903 }
 0x822   : > { %v4615_v29 = vpack.c.bf16 %v1901_v26, %v1901_v26  ;;  %3904 = vmatpush3.bf16.msra.mxu1 %v1675_v25  ;;  %v4617_v30 = vpack.c.bf16 %v1904_v27, %v1904_v27  ;;  %3905 = vmatprep.mubr.msk.bf16.mxu1 %vm4247_vm1, %v4245_v56 }
 0x823   : > { %v1531_v35 = vpack.c.bf16 %v1527_v24, %v1527_v24  ;;  %3909 = vmatprep.subr.bf16.mxu0 %v4245_v56  ;;  %3915 = vmatprep.subr.bf16.mxu1 %v4245_v56 }
 0x824   : > { %v4180_v37 = vpop.eup %4179  ;;  %2023 = vrot.lane.b32.xlu1 %v4615_v29, %s4246_s28  ;;  %2072 = vrot.lane.b32.xlu0 %v4617_v30, %s4246_s28 }
 0x825   : > { %v1528_v43 = vmul.f32 %v4180_v37, %v4172_v59  ;;  %3900 = vmatmul.mubr.msk.bf16.vlgmr.msra.gmra.mrb[44].mxu0 %vm824_vm5, %v1531_v35  ;;  %v1926_v50 = vpop.permute.xlu1 %1925 }
 0x826   : > { %3910 = vmatpush3.bf16.msra.mxu0 %v4506_v0  ;;  %3911 = vmatprep.mubr.msk.bf16.mxu0 %vm4247_vm1, %v4245_v56  ;;  %v1931_v55 = vsel %vm630_vm2, %v1926_v50, 0 }
 0x827   : > { %v1532_v38 = vpack.c.bf16 %v1528_v43, %v1528_v43  ;;  %3921 = vmatprep.subr.bf16.mxu0 %v4245_v56 }
 0x829   : > { %3906 = vmatmul.mubr.msk.bf16.vlgmr.msra.gmra.mrb[36].mxu1 %vm824_vm5, %v1532_v38 }
 0x82a   : > { %3916 = vmatpush3.bf16.msra.mxu1 %v4513_v3  ;;  %3917 = vmatprep.mubr.msk.bf16.mxu1 %vm4247_vm1, %v4245_v56 }
 0x82b   : > { %3927 = vmatprep.subr.bf16.mxu1 %v4245_v56 }
 0x892   : > { %v1975_v60 = vpop.permute.xlu0 %1974 }
 0x893   : > { %v1980_v7 = vsel %vm630_vm2, %v1975_v60, 0 }
 0x896   : > { %v2024_v8 = vpop.permute.xlu1 %2023  ;;  %v2073_v10 = vpop.permute.xlu0 %2072 }
 0x897   : > { %v2029_v9 = vsel %vm630_vm2, %v2024_v8, 0  ;;  %v2078_v12 = vsel %vm630_vm2, %v2073_v10, 0 }
 0x8ef   : > { %v1573_v39 = vpop.f32.mrb[40].mxu0 }
 0x8f0   : > { %v1717_v40 = vpack.c.bf16 %v1573_v39, %v1573_v39  ;;  %v3889_v41 = vpop.f32.mrb[41].mxu0 }
 0x8f1   : > { %v1576_v28 = vpop.f32.mrb[42].mxu0 }
 0x8f2   : > { %v3890_v42 = vpop.f32.mrb[43].mxu0  ;;  %3912 = vmatmul.mubr.msk.bf16.vlgmr.msra.gmra.mrb[48].mxu0 %vm630_vm2, %v1717_v40 }
 0x8f3   : > { %3922 = vmatpush3.bf16.msra.mxu0 %v4520_v5  ;;  %3923 = vmatprep.mubr.msk.bf16.mxu0 %vm4247_vm1, %v4245_v56 }
 0x8f4   : > { %v1619_v44 = vpop.f32.mrb[32].mxu1  ;;  %3933 = vmatprep.subr.bf16.mxu0 %v4245_v56 }
 0x8f5   : > { %v1718_v46 = vpack.c.bf16 %v1619_v44, %v1619_v44  ;;  %v3895_v47 = vpop.f32.mrb[33].mxu1 }
 0x8f6   : > { %v1622_v48 = vpop.f32.mrb[34].mxu1 }
 0x8f7   : > { %v3896_v49 = vpop.f32.mrb[35].mxu1  ;;  %3918 = vmatmul.mubr.msk.bf16.vlgmr.msra.gmra.mrb[40].mxu1 %vm630_vm2, %v1718_v46 }
 0x8f8   : > { %3928 = vmatpush3.bf16.msra.mxu1 %v4530_v11  ;;  %v1665_v51 = vpop.f32.mrb[44].mxu0  ;;  %3929 = vmatprep.mubr.msk.bf16.mxu1 %vm4247_vm1, %v4245_v56 }
 0x8f9   : > { %v1719_v52 = vpack.c.bf16 %v1665_v51, %v1665_v51  ;;  %v3901_v53 = vpop.f32.mrb[45].mxu0  ;;  %3939 = vmatprep.subr.bf16.mxu1 %v4245_v56 }
 0x8fa   : > { %v1668_v54 = vpop.f32.mrb[46].mxu0 }
 0x8fb   : > { %v3902_v57 = vpop.f32.mrb[47].mxu0  ;;  %3924 = vmatmul.mubr.msk.bf16.vlgmr.msra.gmra.mrb[52].mxu0 %vm630_vm2, %v1719_v52 }
 0x8fc   : > { %v1711_v58 = vpop.f32.mrb[36].mxu1  ;;  %3934 = vmatpush3.bf16.xpose.msra.mxu0 %v1931_v55  ;;  %3935 = vmatprep.mubr.msk.bf16.mxu0 %vm4247_vm1, %v4245_v56 }
 0x8fd   : > { %v1720_v59 = vpack.c.bf16 %v1711_v58, %v1711_v58  ;;  %v3907_v62 = vpop.f32.mrb[37].mxu1  ;;  %3945 = vmatprep.subr.bf16.mxu0 %v4245_v56 }
 0x8fe   : > { %v1714_v4 = vpop.f32.mrb[38].mxu1 }
 0x8ff   : > { %v3908_v6 = vpop.f32.mrb[39].mxu1  ;;  %3930 = vmatmul.mubr.msk.bf16.vlgmr.msra.gmra.mrb[44].mxu1 %vm630_vm2, %v1720_v59 }
 0x900   : > { %3941 = vmatprep.mubr.msk.bf16.mxu1 %vm4247_vm1, %v4245_v56 }
 0x901   : > { %3940 = vmatpush3.bf16.xpose.msra.mxu1 %v1980_v7 }
 0x902   : > { %3951 = vmatprep.subr.bf16.mxu1 %v4245_v56 }
 0x903   : > { %3936 = vmatmul.mubr.msk.bf16.vlgmr.msra.gmra.mrb[56].mxu0 %vm630_vm2, %v4599_v63  ;;  %v2172_v63 = vsel %vm876_vm3, %v1920_v45, 0 }
 0x904   : > { %3946 = vmatpush3.bf16.xpose.msra.mxu0 %v2029_v9  ;;  %3947 = vmatprep.mubr.msk.bf16.mxu0 %vm4247_vm1, %v4245_v56 }
 0x905   : > { %3957 = vmatprep.subr.bf16.mxu0 %v4245_v56 }
 0x908   : > { %3942 = vmatmul.mubr.msk.bf16.vlgmr.msra.gmra.mrb[48].mxu1 %vm630_vm2, %v4608_v31 }
 0x909   : > { %3952 = vmatpush3.bf16.xpose.msra.mxu1 %v2078_v12  ;;  %3953 = vmatprep.mubr.msk.bf16.mxu1 %vm4247_vm1, %v4245_v56 }
 0x90a   : > { %3963 = vmatprep.subr.bf16.mxu1 %v4245_v56 }
 0x90b   : > { %3948 = vmatmul.mubr.msk.bf16.vlgmr.msra.gmra.mrb[60].mxu0 %vm630_vm2, %v4615_v29 }
 0x90c   : > { %3958 = vmatpush3.bf16.msra.mxu0 %v2172_v63  ;;  %3959 = vmatprep.mubr.msk.bf16.mxu0 %vm4247_vm1, %v4245_v56 }
 0x90d   : > { %3969 = vmatprep.subr.bf16.mxu0 %v4245_v56 }
 0x910   : > { %3954 = vmatmul.mubr.msk.bf16.vlgmr.msra.gmra.mrb[52].mxu1 %vm630_vm2, %v4617_v30 }
 0x911   : > { %3965 = vmatprep.mubr.msk.bf16.mxu1 %vm4247_vm1, %v4245_v56 }
 0x9c5   : > { %v1758_v13 = vpop.f32.mrb[48].mxu0 }
 0x9c6   : > { %v3913_v14 = vpop.f32.mrb[49].mxu0 }
 0x9c7   : > { %v1761_v15 = vpop.f32.mrb[50].mxu0 }
 0x9c8   : > { %v3914_v16 = vpop.f32.mrb[51].mxu0 }
 0x9ca   : > { %v1801_v17 = vpop.f32.mrb[40].mxu1 }
 0x9cb   : > { %v1893_v31 = vadd.f32 %v1801_v17, %v1758_v13  ;;  %v3919_v18 = vpop.f32.mrb[41].mxu1 }
 0x9cc   : > { %v1804_v19 = vpop.f32.mrb[42].mxu1 }
 0x9cd   : > { %v3920_v20 = vpop.f32.mrb[43].mxu1 }
 0x9ce   : > { %v1844_v23 = vpop.f32.mrb[52].mxu0 }
 0x9cf   : > { %v1894_v24 = vadd.f32 %v1893_v31, %v1844_v23  ;;  %v3925_v25 = vpop.f32.mrb[53].mxu0 }
 0x9d0   : > { %v1847_v26 = vpop.f32.mrb[54].mxu0 }
 0x9d1   : > { %v3926_v27 = vpop.f32.mrb[55].mxu0 }
 0x9d2   : > { %v1887_v29 = vpop.f32.mrb[44].mxu1 }
 0x9d3   : > { %v4681_v35 = vadd.f32 %v1894_v24, %v1887_v29  ;;  %v3931_v30 = vpop.f32.mrb[45].mxu1 }
 0x9d4   : > { %v1890_v37 = vpop.f32.mrb[46].mxu1 }
 0x9d5   : > { %v3932_v43 = vpop.f32.mrb[47].mxu1  ;;  %v4709_v37 = vpack.c.bf16 %v4437_v33, %v4437_v33 }
 0x9d6   : > { %v1967_v38 = vpop.f32.mrb[56].mxu0 }
 0x9d7   : > { %v1968_v39 = vadd.f32 %v1967_v38, %v4441_v36  ;;  %v3937_v40 = vpop.f32.mrb[57].mxu0 }
 0x9d8   : > { %v1970_v41 = vpop.f32.mrb[58].mxu0 }
 0x9d9   : > { %v3938_v28 = vpop.f32.mrb[59].mxu0  ;;  %v2120_v42 = vsel %vm824_vm5, %v1968_v39, -inf }
 0x9da   : > { %2121 = vmax.xlane.f32.xlu1 %v2120_v42 }
 0x9db   : > { %v2016_v44 = vpop.f32.mrb[48].mxu1 }
 0x9dc   : > { %v2017_v46 = vadd.f32 %v2016_v44, %v4441_v36  ;;  %v3943_v47 = vpop.f32.mrb[49].mxu1 }
 0x9dd   : > { %v2019_v48 = vpop.f32.mrb[50].mxu1 }
 0x9de   : > { %v3944_v49 = vpop.f32.mrb[51].mxu1  ;;  %v2065_v50 = vpop.f32.mrb[60].mxu0  ;;  %v2123_v51 = vsel %vm824_vm5, %v2017_v46, -inf }
 0x9df   : > { %v2066_v52 = vadd.f32 %v2065_v50, %v4441_v36  ;;  %2124 = vmax.xlane.f32.xlu0 %v2123_v51  ;;  %v3949_v53 = vpop.f32.mrb[61].mxu0 }
 0x9e0   : > { %v2068_v54 = vpop.f32.mrb[62].mxu0 }
 0x9e1   : > { %v3950_v55 = vpop.f32.mrb[63].mxu0  ;;  %v2126_v57 = vsel %vm824_vm5, %v2066_v52, -inf }
 0x9e3   : > { %2127 = vmax.xlane.f32.xlu0 %v2126_v57  ;;  %v2114_v58 = vpop.f32.mrb[52].mxu1 }
 0x9e4   : > { %v2115_v60 = vadd.f32 %v2114_v58, %v4441_v36  ;;  %v3955_v59 = vpop.f32.mrb[53].mxu1 }
 0x9e5   : > { %v2117_v62 = vpop.f32.mrb[54].mxu1 }
 0x9e6   : > { %v3956_v4 = vpop.f32.mrb[55].mxu1  ;;  %v2129_v6 = vsel %vm824_vm5, %v2115_v60, -inf }
 0x9e7   : > { %2130 = vmax.xlane.f32.xlu0 %v2129_v6 }
 0x9eb   : > { %1911 = vrot.lane.b32.xlu1 %v4435_v32, %s4243_s26 }
 0xa67   : > { %v2122_v7 = vpop.xlane.xlu1 %2121 }
 0xa68   : > { %v2132_v8 = vsub.f32 %v1968_v39, %v2122_v7 }
 0xa6a   : > { %v2136_v9 = vmul.f32 1.442695, %v2132_v8 }
 0xa6b   : > { %v1912_v10 = vpop.permute.xlu1 %1911 }
 0xa6c   : > { %4181 = vpow2.f32 %v2136_v9  ;;  %v1921_v45 = vpack.c.bf16 %v1912_v10, %v1912_v10  ;;  %v2125_v12 = vpop.xlane.xlu0 %2124 }
 0xa6d   : > { %v2133_v63 = vsub.f32 %v2017_v46, %v2125_v12 }
 0xa6e   : > { %v2218_v13 = vsel %vm876_vm3, %v1921_v45, 0 }
 0xa6f   : > { %v2138_v14 = vmul.f32 1.442695, %v2133_v63  ;;  %3964 = vmatpush3.bf16.msra.mxu1 %v2218_v13 }
 0xa70   : > { %v2128_v15 = vpop.xlane.xlu0 %2127  ;;  %3975 = vmatprep.subr.bf16.mxu1 %v4245_v56 }
 0xa71   : > { %4183 = vpow2.f32 %v2138_v14  ;;  %v2134_v16 = vsub.f32 %v2066_v52, %v2128_v15 }
 0xa73   : > { %v2140_v17 = vmul.f32 1.442695, %v2134_v16 }
 0xa74   : > { %v2131_v31 = vpop.xlane.xlu0 %2130 }
 0xa75   : > { %4185 = vpow2.f32 %v2140_v17  ;;  %v2135_v18 = vsub.f32 %v2115_v60, %v2131_v31 }
 0xa76   : > { %v4182_v19 = vpop.eup %4181 }
 0xa77   : > { %v2142_v20 = vmul.f32 1.442695, %v2135_v18  ;;  %v2144_v23 = vsel %vm824_vm5, %v4182_v19, 0.0 }
 0xa78   : > { %2145 = vadd.xlane.f32.xlu1 %v2144_v23 }
 0xa79   : > { %4187 = vpow2.f32 %v2142_v20 }
 0xa7b   : > { %v4184_v24 = vpop.eup %4183 }
 0xa7c   : > { %v2147_v25 = vsel %vm824_vm5, %v4184_v24, 0.0 }
 0xa7d   : > { %2148 = vadd.xlane.f32.xlu0 %v2147_v25 }
 0xa7f   : > { %v4186_v26 = vpop.eup %4185 }
 0xa80   : > { %v2150_v27 = vsel %vm824_vm5, %v4186_v26, 0.0 }
 0xa81   : > { %2151 = vadd.xlane.f32.xlu1 %v2150_v27 }
 0xa83   : > { %v4188_v29 = vpop.eup %4187 }
 0xa84   : > { %v2153_v30 = vsel %vm824_vm5, %v4188_v29, 0.0 }
 0xa85   : > { %2154 = vadd.xlane.f32.xlu0 %v2153_v30 }
 0xa92   : > { %1917 = vrot.lane.b32.xlu1 %v4435_v32, %s4244_s27 }
 0xa96   : > { %2532 = vrot.lane.b32.xlu1 %v4437_v33, %s4243_s26 }
 0xa9a   : > { %2535 = vrot.lane.b32.xlu1 %v4437_v33, %s4242_s25 }
 0xa9b   : > { %1914 = vrot.lane.b32.xlu0 %v4435_v32, %s4242_s25 }
 0xa9e   : > { %2560 = vrot.lane.b32.xlu1 %v4709_v37, %s4246_s28 }
 0xa9f   : > { %2538 = vrot.lane.b32.xlu0 %v4437_v33, %s4244_s27 }
 0xb05   : > { %v2146_v43 = vpop.xlane.xlu1 %2145 }
 0xb06   : > { %4189 = vrcp.f32 %v2146_v43 }
 0xb0a   : > { %v2149_v38 = vpop.xlane.xlu0 %2148 }
 0xb0b   : > { %4191 = vrcp.f32 %v2149_v38  ;;  %v2555_v38 = vpack.c.bf16 %v4439_v34, %v4439_v34 }
 0xb0e   : > { %v2152_v39 = vpop.xlane.xlu1 %2151 }
 0xb0f   : > { %4193 = vrcp.f32 %v2152_v39 }
 0xb10   : > { %v4190_v40 = vpop.eup %4189 }
 0xb11   : > { %v2160_v41 = vmul.f32 %v4190_v40, %v4182_v19 }
 0xb12   : > { %v1918_v28 = vpop.permute.xlu1 %1917  ;;  %v2155_v32 = vpop.xlane.xlu0 %2154 }
 0xb13   : > { %4195 = vrcp.f32 %v2155_v32  ;;  %v2164_v42 = vpack.c.bf16 %v2160_v41, %v2160_v41  ;;  %v1923_v47 = vpack.c.bf16 %v1918_v28, %v1918_v28 }
 0xb15   : > { %v4192_v44 = vpop.eup %4191  ;;  %3960 = vmatmul.mubr.msk.bf16.vlgmr.msra.gmra.mrb[64].mxu0 %vm824_vm5, %v2164_v42  ;;  %v2310_v55 = vsel %vm876_vm3, %v1923_v47, 0 }
 0xb16   : > { %v2161_v46 = vmul.f32 %v4192_v44, %v4184_v24  ;;  %v2533_v48 = vpop.permute.xlu1 %2532  ;;  %v1915_v49 = vpop.permute.xlu0 %1914  ;;  %3971 = vmatprep.mubr.msk.bf16.mxu0 %vm4247_vm1, %v4245_v56 }
 0xb17   : > { %v4718_v33 = vpack.c.bf16 %v2533_v48, %v2533_v48  ;;  %v1922_v50 = vpack.c.bf16 %v1915_v49, %v1915_v49 }
 0xb18   : > { %v2165_v51 = vpack.c.bf16 %v2161_v46, %v2161_v46 }
 0xb19   : > { %v4194_v52 = vpop.eup %4193  ;;  %v2264_v53 = vsel %vm876_vm3, %v1922_v50, 0  ;;  %2609 = vrot.lane.b32.xlu0 %v4718_v33, %s4246_s28 }
 0xb1a   : > { %v2162_v54 = vmul.f32 %v4194_v52, %v4186_v26  ;;  %v2536_v57 = vpop.permute.xlu1 %2535  ;;  %3966 = vmatmul.mubr.msk.bf16.vlgmr.msra.gmra.mrb[56].mxu1 %vm824_vm5, %v2165_v51  ;;  %3970 = vmatpush3.bf16.msra.mxu0 %v2264_v53  ;;  %v2539_v58 = vpop.permute.xlu0 %2538 }
 0xb1b   : > { %v4725_v60 = vpack.c.bf16 %v2536_v57, %v2536_v57  ;;  %3976 = vmatpush3.bf16.msra.mxu1 %v2310_v55  ;;  %v4727_v59 = vpack.c.bf16 %v2539_v58, %v2539_v58  ;;  %3977 = vmatprep.mubr.msk.bf16.mxu1 %vm4247_vm1, %v4245_v56 }
 0xb1c   : > { %v2166_v62 = vpack.c.bf16 %v2162_v54, %v2162_v54  ;;  %3981 = vmatprep.subr.bf16.mxu0 %v4245_v56  ;;  %3987 = vmatprep.subr.bf16.mxu1 %v4245_v56 }
 0xb1d   : > { %v4196_v4 = vpop.eup %4195  ;;  %2658 = vrot.lane.b32.xlu1 %v4725_v60, %s4246_s28  ;;  %2707 = vrot.lane.b32.xlu0 %v4727_v59, %s4246_s28 }
 0xb1e   : > { %v2163_v6 = vmul.f32 %v4196_v4, %v4188_v29  ;;  %3972 = vmatmul.mubr.msk.bf16.vlgmr.msra.gmra.mrb[68].mxu0 %vm824_vm5, %v2166_v62  ;;  %v2561_v15 = vpop.permute.xlu1 %2560 }
 0xb1f   : > { %3982 = vmatpush3.bf16.msra.mxu0 %v4506_v0  ;;  %3983 = vmatprep.mubr.msk.bf16.mxu0 %vm4247_vm1, %v4245_v56  ;;  %v2566_v18 = vsel %vm630_vm2, %v2561_v15, 0 }
 0xb20   : > { %v2167_v7 = vpack.c.bf16 %v2163_v6, %v2163_v6  ;;  %3993 = vmatprep.subr.bf16.mxu0 %v4245_v56 }
 0xb22   : > { %3978 = vmatmul.mubr.msk.bf16.vlgmr.msra.gmra.mrb[60].mxu1 %vm824_vm5, %v2167_v7 }
 0xb23   : > { %3988 = vmatpush3.bf16.msra.mxu1 %v4513_v3  ;;  %3989 = vmatprep.mubr.msk.bf16.mxu1 %vm4247_vm1, %v4245_v56 }
 0xb24   : > { %3999 = vmatprep.subr.bf16.mxu1 %v4245_v56 }
 0xb8f   : > { %v2659_v29 = vpop.permute.xlu1 %2658 }
 0xb90   : > { %v2664_v30 = vsel %vm630_vm2, %v2659_v29, 0 }
 0xbe8   : > { %v2208_v8 = vpop.f32.mrb[64].mxu0 }
 0xbe9   : > { %v2352_v9 = vpack.c.bf16 %v2208_v8, %v2208_v8  ;;  %v3961_v10 = vpop.f32.mrb[65].mxu0 }
 0xbea   : > { %v2211_v45 = vpop.f32.mrb[66].mxu0 }
 0xbeb   : > { %v3962_v0 = vpop.f32.mrb[67].mxu0  ;;  %3984 = vmatmul.mubr.msk.bf16.vlgmr.msra.gmra.mrb[72].mxu0 %vm630_vm2, %v2352_v9 }
 0xbec   : > { %3994 = vmatpush3.bf16.msra.mxu0 %v4520_v5  ;;  %3995 = vmatprep.mubr.msk.bf16.mxu0 %vm4247_vm1, %v4245_v56 }
 0xbed   : > { %v2254_v12 = vpop.f32.mrb[56].mxu1  ;;  %4005 = vmatprep.subr.bf16.mxu0 %v4245_v56 }
 0xbee   : > { %v2353_v3 = vpack.c.bf16 %v2254_v12, %v2254_v12  ;;  %v3967_v63 = vpop.f32.mrb[57].mxu1 }
 0xbef   : > { %v2257_v13 = vpop.f32.mrb[58].mxu1 }
 0xbf0   : > { %v3968_v14 = vpop.f32.mrb[59].mxu1  ;;  %3990 = vmatmul.mubr.msk.bf16.vlgmr.msra.gmra.mrb[64].mxu1 %vm630_vm2, %v2353_v3 }
 0xbf1   : > { %4000 = vmatpush3.bf16.msra.mxu1 %v4530_v11  ;;  %v2300_v16 = vpop.f32.mrb[68].mxu0  ;;  %4001 = vmatprep.mubr.msk.bf16.mxu1 %vm4247_vm1, %v4245_v56  ;;  %v2610_v11 = vpop.permute.xlu0 %2609 }
 0xbf2   : > { %v2354_v5 = vpack.c.bf16 %v2300_v16, %v2300_v16  ;;  %v3973_v17 = vpop.f32.mrb[69].mxu0  ;;  %4011 = vmatprep.subr.bf16.mxu1 %v4245_v56  ;;  %v2615_v27 = vsel %vm630_vm2, %v2610_v11, 0 }
 0xbf3   : > { %v2303_v31 = vpop.f32.mrb[70].mxu0 }
 0xbf4   : > { %v3974_v19 = vpop.f32.mrb[71].mxu0  ;;  %3996 = vmatmul.mubr.msk.bf16.vlgmr.msra.gmra.mrb[76].mxu0 %vm630_vm2, %v2354_v5 }
 0xbf5   : > { %v2346_v20 = vpop.f32.mrb[60].mxu1  ;;  %4006 = vmatpush3.bf16.xpose.msra.mxu0 %v2566_v18  ;;  %4007 = vmatprep.mubr.msk.bf16.mxu0 %vm4247_vm1, %v4245_v56  ;;  %v2708_v43 = vpop.permute.xlu0 %2707 }
 0xbf6   : > { %v2355_v23 = vpack.c.bf16 %v2346_v20, %v2346_v20  ;;  %v3979_v24 = vpop.f32.mrb[61].mxu1  ;;  %4017 = vmatprep.subr.bf16.mxu0 %v4245_v56  ;;  %v2713_v39 = vsel %vm630_vm2, %v2708_v43, 0 }
 0xbf7   : > { %v2349_v25 = vpop.f32.mrb[62].mxu1 }
 0xbf8   : > { %v3980_v26 = vpop.f32.mrb[63].mxu1  ;;  %4002 = vmatmul.mubr.msk.bf16.vlgmr.msra.gmra.mrb[68].mxu1 %vm630_vm2, %v2355_v23 }
 0xbf9   : > { %4013 = vmatprep.mubr.msk.bf16.mxu1 %vm4247_vm1, %v4245_v56 }
 0xbfa   : > { %4012 = vmatpush3.bf16.xpose.msra.mxu1 %v2615_v27 }
 0xbfb   : > { %4023 = vmatprep.subr.bf16.mxu1 %v4245_v56 }
 0xbfc   : > { %4008 = vmatmul.mubr.msk.bf16.vlgmr.msra.gmra.mrb[80].mxu0 %vm630_vm2, %v4709_v37  ;;  %v2807_v37 = vsel %vm876_vm3, %v2555_v38, 0 }
 0xbfd   : > { %4018 = vmatpush3.bf16.xpose.msra.mxu0 %v2664_v30  ;;  %4019 = vmatprep.mubr.msk.bf16.mxu0 %vm4247_vm1, %v4245_v56 }
 0xbfe   : > { %4029 = vmatprep.subr.bf16.mxu0 %v4245_v56 }
 0xc01   : > { %4014 = vmatmul.mubr.msk.bf16.vlgmr.msra.gmra.mrb[72].mxu1 %vm630_vm2, %v4718_v33 }
 0xc02   : > { %4024 = vmatpush3.bf16.xpose.msra.mxu1 %v2713_v39  ;;  %4025 = vmatprep.mubr.msk.bf16.mxu1 %vm4247_vm1, %v4245_v56 }
 0xc03   : > { %4035 = vmatprep.subr.bf16.mxu1 %v4245_v56 }
 0xc04   : > { %4020 = vmatmul.mubr.msk.bf16.vlgmr.msra.gmra.mrb[84].mxu0 %vm630_vm2, %v4725_v60 }
 0xc05   : > { %4030 = vmatpush3.bf16.msra.mxu0 %v2807_v37  ;;  %4031 = vmatprep.mubr.msk.bf16.mxu0 %vm4247_vm1, %v4245_v56 }
 0xc06   : > { %4041 = vmatprep.subr.bf16.mxu0 %v4245_v56 }
 0xc09   : > { %4026 = vmatmul.mubr.msk.bf16.vlgmr.msra.gmra.mrb[76].mxu1 %vm630_vm2, %v4727_v59 }
 0xc0a   : > { %4037 = vmatprep.mubr.msk.bf16.mxu1 %vm4247_vm1, %v4245_v56 }
 0xcbe   : > { %v2393_v40 = vpop.f32.mrb[72].mxu0 }
 0xcbf   : > { %v3985_v41 = vpop.f32.mrb[73].mxu0 }
 0xcc0   : > { %v2396_v28 = vpop.f32.mrb[74].mxu0 }
 0xcc1   : > { %v3986_v32 = vpop.f32.mrb[75].mxu0 }
 0xcc3   : > { %v2436_v42 = vpop.f32.mrb[64].mxu1 }
 0xcc4   : > { %v2528_v44 = vadd.f32 %v2436_v42, %v2393_v40  ;;  %v3991_v46 = vpop.f32.mrb[65].mxu1 }
 0xcc5   : > { %v2439_v47 = vpop.f32.mrb[66].mxu1 }
 0xcc6   : > { %v3992_v48 = vpop.f32.mrb[67].mxu1 }
 0xcc7   : > { %v2479_v49 = vpop.f32.mrb[76].mxu0 }
 0xcc8   : > { %v2529_v33 = vadd.f32 %v2528_v44, %v2479_v49  ;;  %v3997_v50 = vpop.f32.mrb[77].mxu0 }
 0xcc9   : > { %v2482_v51 = vpop.f32.mrb[78].mxu0  ;;  %v4818_v50 = vld [vmem:[%s4962_s5] ss:$0 sm:$0xff] }
 0xcca   : > { %v3998_v52 = vpop.f32.mrb[79].mxu0 }
 0xccb   : > { %v2522_v53 = vpop.f32.mrb[68].mxu1  ;;  %v3167_v52 = vadd.f32 %v4335_v2, %v4681_v35 }
 0xccc   : > { %v4791_v54 = vadd.f32 %v2529_v33, %v2522_v53  ;;  %v4003_v55 = vpop.f32.mrb[69].mxu1  ;;  %v3166_v33 = vadd.f32 %v4333_v1, %v4571_v61 }
 0xccd   : > { %v2525_v57 = vpop.f32.mrb[70].mxu1  ;;  %v4826_v53 = vadd.f32 %v4818_v50, %v3167_v52 }
 0xcce   : > { %v4004_v58 = vpop.f32.mrb[71].mxu1  ;;  %v4821_v51 = vadd.f32 %v4818_v50, %v3166_v33 }
 0xccf   : > { %v2602_v60 = vpop.f32.mrb[80].mxu0  ;;  %v3186_v55 = vsel %vm428_vm0, %v4826_v53, 0.0 }
 0xcd0   : > { %v2603_v59 = vadd.f32 %v2602_v60, %v4441_v36  ;;  %v4009_v62 = vpop.f32.mrb[81].mxu0  ;;  %v3183_v1 = vsel %vm428_vm0, %v4821_v51, 0.0 }
 0xcd1   : > { %v2605_v4 = vpop.f32.mrb[82].mxu0 }
 0xcd2   : > { %v4010_v6 = vpop.f32.mrb[83].mxu0  ;;  %v2755_v7 = vsel %vm824_vm5, %v2603_v59, -inf }
 0xcd3   : > { %2756 = vmax.xlane.f32.xlu1 %v2755_v7 }
 0xcd4   : > { %v2651_v8 = vpop.f32.mrb[72].mxu1 }
 0xcd5   : > { %v2652_v9 = vadd.f32 %v2651_v8, %v4441_v36  ;;  %v4015_v10 = vpop.f32.mrb[73].mxu1 }
 0xcd6   : > { %v2654_v45 = vpop.f32.mrb[74].mxu1 }
 0xcd7   : > { %v4016_v0 = vpop.f32.mrb[75].mxu1  ;;  %v2700_v12 = vpop.f32.mrb[84].mxu0  ;;  %v2758_v3 = vsel %vm824_vm5, %v2652_v9, -inf }
 0xcd8   : > { %v2701_v63 = vadd.f32 %v2700_v12, %v4441_v36  ;;  %2759 = vmax.xlane.f32.xlu0 %v2758_v3  ;;  %v4021_v13 = vpop.f32.mrb[85].mxu0 }
 0xcd9   : > { %v2703_v14 = vpop.f32.mrb[86].mxu0 }
 0xcda   : > { %v4022_v15 = vpop.f32.mrb[87].mxu0  ;;  %v2761_v16 = vsel %vm824_vm5, %v2701_v63, -inf }
 0xcdb   : > { %v4229_v15 = vld [vmem:[%s4961_s4] sm:$0xff]  }
 0xcdc   : > { %2762 = vmax.xlane.f32.xlu0 %v2761_v16  ;;  %v2749_v5 = vpop.f32.mrb[76].mxu1 }
 0xcdd   : > { %v2750_v17 = vadd.f32 %v2749_v5, %v4441_v36  ;;  %v4027_v31 = vpop.f32.mrb[77].mxu1  ;;  %v4230_v5 = vld [vmem:[%s4961_s4 + $0x8] sm:$0xff]  }
 0xcde   : > { %v2752_v18 = vpop.f32.mrb[78].mxu1 }
 0xcdf   : > { %v4028_v19 = vpop.f32.mrb[79].mxu1  ;;  %v2764_v20 = vsel %vm824_vm5, %v2750_v17, -inf }
 0xce0   : > { %2765 = vmax.xlane.f32.xlu0 %v2764_v20 }
 0xce4   : > { %2546 = vrot.lane.b32.xlu1 %v4439_v34, %s4243_s26 }
 0xd60   : > { %v2757_v11 = vpop.xlane.xlu1 %2756 }
 0xd61   : > { %v2767_v23 = vsub.f32 %v2603_v59, %v2757_v11 }
 0xd63   : > { %v2771_v24 = vmul.f32 1.442695, %v2767_v23 }
 0xd64   : > { %v2547_v25 = vpop.permute.xlu1 %2546 }
 0xd65   : > { %4197 = vpow2.f32 %v2771_v24  ;;  %v2556_v26 = vpack.c.bf16 %v2547_v25, %v2547_v25  ;;  %v2760_v27 = vpop.xlane.xlu0 %2759 }
 0xd66   : > { %v2768_v29 = vsub.f32 %v2652_v9, %v2760_v27 }
 0xd67   : > { %v2853_v30 = vsel %vm876_vm3, %v2556_v26, 0 }
 0xd68   : > { %v2773_v36 = vmul.f32 1.442695, %v2768_v29  ;;  %4036 = vmatpush3.bf16.msra.mxu1 %v2853_v30 }
 0xd69   : > { %v2763_v43 = vpop.xlane.xlu0 %2762  ;;  %4047 = vmatprep.subr.bf16.mxu1 %v4245_v56 }
 0xd6a   : > { %4199 = vpow2.f32 %v2773_v36  ;;  %v2769_v38 = vsub.f32 %v2701_v63, %v2763_v43 }
 0xd6c   : > { %v2775_v39 = vmul.f32 1.442695, %v2769_v38 }
 0xd6d   : > { %v2766_v37 = vpop.xlane.xlu0 %2765 }
 0xd6e   : > { %4201 = vpow2.f32 %v2775_v39  ;;  %v2770_v40 = vsub.f32 %v2750_v17, %v2766_v37  ;;  %v4231_v39 = vld [vmem:[%s4961_s4 + $0x10] sm:$0xff]  }
 0xd6f   : > { %v4198_v41 = vpop.eup %4197 }
 0xd70   : > { %v2777_v28 = vmul.f32 1.442695, %v2770_v40  ;;  %v2779_v32 = vsel %vm824_vm5, %v4198_v41, 0.0 }
 0xd71   : > { %2780 = vadd.xlane.f32.xlu1 %v2779_v32 }
 0xd72   : > { %4203 = vpow2.f32 %v2777_v28 }
 0xd74   : > { %v4200_v42 = vpop.eup %4199 }
 0xd75   : > { %v2782_v44 = vsel %vm824_vm5, %v4200_v42, 0.0 }
 0xd76   : > { %2783 = vadd.xlane.f32.xlu0 %v2782_v44  ;;  %v4232_v44 = vld [vmem:[%s4961_s4 + $0x18] sm:$0xff]  }
 0xd78   : > { %v4202_v46 = vpop.eup %4201 }
 0xd79   : > { %v2785_v47 = vsel %vm824_vm5, %v4202_v46, 0.0 }
 0xd7a   : > { %2786 = vadd.xlane.f32.xlu1 %v2785_v47 }
 0xd7c   : > { %v4204_v48 = vpop.eup %4203 }
 0xd7d   : > { %v2788_v49 = vsel %vm824_vm5, %v4204_v48, 0.0 }
 0xd7e   : > { %2789 = vadd.xlane.f32.xlu0 %v2788_v49 }
 0xd8b   : > { %2552 = vrot.lane.b32.xlu1 %v4439_v34, %s4244_s27 }
 0xd94   : > { %2549 = vrot.lane.b32.xlu0 %v4439_v34, %s4242_s25  ;;  %v3168_v34 = vadd.f32 %v4360_v22, %v4791_v54 }
 0xd96   : > { %v4833_v61 = vadd.f32 %v4818_v50, %v3168_v34 }
 0xd98   : > { %v3189_v2 = vsel %vm428_vm0, %v4833_v61, 0.0 }
 0xdaf   : > { %3184 = vadd.xlane.f32.xlu1 %v3183_v1 }
 0xdb3   : > { %3187 = vadd.xlane.f32.xlu0 %v3186_v55 }
 0xdb7   : > { %3190 = vadd.xlane.f32.xlu0 %v3189_v2 }
 0xdfe   : > { %v2781_v35 = vpop.xlane.xlu1 %2780 }
 0xdff   : > { %4205 = vrcp.f32 %v2781_v35 }
 0xe03   : > { %v2784_v57 = vpop.xlane.xlu0 %2783 }
 0xe04   : > { %4207 = vrcp.f32 %v2784_v57 }
 0xe07   : > { %v2787_v22 = vpop.xlane.xlu1 %2786 }
 0xe08   : > { %4209 = vrcp.f32 %v2787_v22 }
 0xe09   : > { %v4206_v54 = vpop.eup %4205 }
 0xe0a   : > { %v2795_v58 = vmul.f32 %v4206_v54, %v4198_v41 }
 0xe0b   : > { %v2790_v60 = vpop.xlane.xlu0 %2789  ;;  %v2553_v59 = vpop.permute.xlu1 %2552 }
 0xe0c   : > { %4211 = vrcp.f32 %v2790_v60  ;;  %v2799_v62 = vpack.c.bf16 %v2795_v58, %v2795_v58  ;;  %v2558_v7 = vpack.c.bf16 %v2553_v59, %v2553_v59 }
 0xe0e   : > { %v4208_v4 = vpop.eup %4207  ;;  %4032 = vmatmul.mubr.msk.bf16.vlgmr.msra.gmra.mrb[88].mxu0 %vm824_vm5, %v2799_v62  ;;  %v2945_v3 = vsel %vm876_vm3, %v2558_v7, 0 }
 0xe0f   : > { %v2796_v6 = vmul.f32 %v4208_v4, %v4200_v42  ;;  %v2550_v8 = vpop.permute.xlu0 %2549  ;;  %4043 = vmatprep.mubr.msk.bf16.mxu0 %vm4247_vm1, %v4245_v56 }
 0xe10   : > { %v2557_v9 = vpack.c.bf16 %v2550_v8, %v2550_v8 }
 0xe11   : > { %v2800_v10 = vpack.c.bf16 %v2796_v6, %v2796_v6 }
 0xe12   : > { %v4210_v45 = vpop.eup %4209  ;;  %v2899_v0 = vsel %vm876_vm3, %v2557_v9, 0 }
 0xe13   : > { %v2797_v12 = vmul.f32 %v4210_v45, %v4202_v46  ;;  %4038 = vmatmul.mubr.msk.bf16.vlgmr.msra.gmra.mrb[80].mxu1 %vm824_vm5, %v2800_v10  ;;  %4042 = vmatpush3.bf16.msra.mxu0 %v2899_v0 }
 0xe14   : > { %4048 = vmatpush3.bf16.msra.mxu1 %v2945_v3  ;;  %4049 = vmatprep.mubr.msk.bf16.mxu1 %vm4247_vm1, %v4245_v56 }
 0xe15   : > { %v2801_v63 = vpack.c.bf16 %v2797_v12, %v2797_v12  ;;  %4053 = vmatprep.subr.bf16.mxu0 %v4245_v56  ;;  %4059 = vmatprep.subr.bf16.mxu1 %v4245_v56 }
 0xe16   : > { %v4212_v13 = vpop.eup %4211 }
 0xe17   : > { %v2798_v14 = vmul.f32 %v4212_v13, %v4204_v48  ;;  %4044 = vmatmul.mubr.msk.bf16.vlgmr.msra.gmra.mrb[92].mxu0 %vm824_vm5, %v2801_v63 }
 0xe18   : > { %4054 = vmatpush3.bf16.msra.mxu0 %v4229_v15  ;;  %4055 = vmatprep.mubr.msk.bf16.mxu0 %vm4247_vm1, %v4245_v56 }
 0xe19   : > { %v2802_v16 = vpack.c.bf16 %v2798_v14, %v2798_v14  ;;  %4065 = vmatprep.subr.bf16.mxu0 %v4245_v56 }
 0xe1b   : > { %4050 = vmatmul.mubr.msk.bf16.vlgmr.msra.gmra.mrb[84].mxu1 %vm824_vm5, %v2802_v16 }
 0xe1c   : > { %4060 = vmatpush3.bf16.msra.mxu1 %v4230_v5  ;;  %4061 = vmatprep.mubr.msk.bf16.mxu1 %vm4247_vm1, %v4245_v56 }
 0xe1d   : > { %4071 = vmatprep.subr.bf16.mxu1 %v4245_v56 }
 0xe3c   : > { %v3185_v17 = vpop.xlane.xlu1 %3184 }
 0xe3d   : > { %v3195_v31 = vmul.f32 0.03125, %v3185_v17 }
 0xe3f   : > { %v4864_v18 = vsub.f32 %v4821_v51, %v3195_v31 }
 0xe40   : > { %v3188_v19 = vpop.xlane.xlu0 %3187 }
 0xe41   : > { %v3203_v20 = vmul.f32 %v4864_v18, %v4864_v18  ;;  %v3196_v8 = vmul.f32 0.03125, %v3188_v19 }
 0xe43   : > { %v3207_v11 = vsel %vm428_vm0, %v3203_v20, 0.0  ;;  %v3200_v3 = vsub.f32 %v4826_v53, %v3196_v8 }
 0xe44   : > { %3208 = vadd.xlane.f32.xlu0 %v3207_v11  ;;  %v3191_v23 = vpop.xlane.xlu0 %3190 }
 0xe45   : > { %v3197_v24 = vmul.f32 0.03125, %v3191_v23  ;;  %v3204_v16 = vmul.f32 %v3200_v3, %v3200_v3 }
 0xe47   : > { %v4870_v25 = vsub.f32 %v4833_v61, %v3197_v24  ;;  %v3210_v5 = vsel %vm428_vm0, %v3204_v16, 0.0 }
 0xe49   : > { %v3205_v26 = vmul.f32 %v4870_v25, %v4870_v25 }
 0xe4b   : > { %v3213_v27 = vsel %vm428_vm0, %v3205_v26, 0.0 }
 0xe4c   : > { %3214 = vadd.xlane.f32.xlu0 %v3213_v27 }
 0xed1   : > { %v3209_v17 = vpop.xlane.xlu0 %3208 }
 0xed2   : > { %v3219_v31 = vmul.f32 0.03125, %v3209_v17 }
 0xed4   : > { %v3223_v19 = vadd.f32 1e-05, %v3219_v31 }
 0xed6   : > { %4213 = vrsqrt.f32 %v3223_v19 }
 0xee1   : > { %v2843_v29 = vpop.f32.mrb[88].mxu0 }
 0xee2   : > { %v2987_v30 = vpack.c.bf16 %v2843_v29, %v2843_v29  ;;  %v4033_v36 = vpop.f32.mrb[89].mxu0  ;;  %v4214_v29 = vpop.eup %4213 }
 0xee3   : > { %v2846_v43 = vpop.f32.mrb[90].mxu0  ;;  %v3644_v36 = vld [vmem:[%s4963_s6] ss:$0 sm:$0xff] }
 0xee4   : > { %v4034_v38 = vpop.f32.mrb[91].mxu0  ;;  %4056 = vmatmul.mubr.msk.bf16.vlgmr.msra.gmra.mrb[96].mxu0 %vm630_vm2, %v2987_v30  ;;  %v3231_v30 = vmul.f32 %v4214_v29, %v4864_v18  ;;  %v4131_v18 = vld [vmem:[%s4965_s8] sm:$0xff]  }
 0xee5   : > { %4066 = vmatpush3.bf16.msra.mxu0 %v4231_v39  ;;  %4067 = vmatprep.mubr.msk.bf16.mxu0 %vm4247_vm1, %v4245_v56 }
 0xee6   : > { %v2889_v37 = vpop.f32.mrb[80].mxu1  ;;  %v3241_v39 = vmul.f32 %v3644_v36, %v3231_v30  ;;  %4077 = vmatprep.subr.bf16.mxu0 %v4131_v18 }
 0xee7   : > { %v2988_v40 = vpack.c.bf16 %v2889_v37, %v2889_v37  ;;  %v4039_v41 = vpop.f32.mrb[81].mxu1  ;;  %v3645_v37 = vld [vmem:[%s4964_s7] ss:$0 sm:$0xff] }
 0xee8   : > { %v2892_v28 = vpop.f32.mrb[82].mxu1  ;;  %v3251_v41 = vadd.f32 %v3645_v37, %v3241_v39 }
 0xee9   : > { %v4040_v32 = vpop.f32.mrb[83].mxu1  ;;  %4062 = vmatmul.mubr.msk.bf16.vlgmr.msra.gmra.mrb[88].mxu1 %vm630_vm2, %v2988_v40 }
 0xeea   : > { %v2935_v42 = vpop.f32.mrb[92].mxu0  ;;  %4072 = vmatpush3.bf16.msra.mxu1 %v4232_v44  ;;  %4073 = vmatprep.mubr.msk.bf16.mxu1 %vm4247_vm1, %v4245_v56  ;;  %v3215_v44 = vpop.xlane.xlu0 %3214 }
 0xeeb   : > { %v2989_v46 = vpack.c.bf16 %v2935_v42, %v2935_v42  ;;  %v4045_v47 = vpop.f32.mrb[93].mxu0  ;;  %v4132_v42 = vld [vmem:[%s4965_s8 + $0x8] sm:$0xff]  }
 0xeec   : > { %v2938_v48 = vpop.f32.mrb[94].mxu0 }
 0xeed   : > { %v4046_v49 = vpop.f32.mrb[95].mxu0  ;;  %4068 = vmatmul.mubr.msk.bf16.vlgmr.msra.gmra.mrb[100].mxu0 %vm630_vm2, %v2989_v46  ;;  %v3221_v46 = vmul.f32 0.03125, %v3215_v44 }
 0xeee   : > { %v2981_v33 = vpop.f32.mrb[84].mxu1  ;;  %4078 = vmatpush3.bf16.msra.mxu0 %v4131_v18 }
 0xeef   : > { %v2990_v52 = vpack.c.bf16 %v2981_v33, %v2981_v33  ;;  %v4051_v34 = vpop.f32.mrb[85].mxu1  ;;  %4079 = vmatprep.subr.bf16.mxu0 %v4132_v42  ;;  %v3225_v47 = vadd.f32 1e-05, %v3221_v46 }
 0xef0   : > { %v2984_v1 = vpop.f32.mrb[86].mxu1 }
 0xef1   : > { %v4052_v55 = vpop.f32.mrb[87].mxu1  ;;  %4074 = vmatmul.mubr.msk.bf16.vlgmr.msra.gmra.mrb[92].mxu1 %vm630_vm2, %v2990_v52 }
 0xef2   : > { %4080 = vmatpush3.bf16.msra.mxu0 %v4132_v42 }
 0xfb7   : > { %v3028_v2 = vpop.f32.mrb[96].mxu0 }
 0xfb8   : > { %v4057_v35 = vpop.f32.mrb[97].mxu0 }
 0xfb9   : > { %v3031_v57 = vpop.f32.mrb[98].mxu0 }
 0xfba   : > { %v4058_v22 = vpop.f32.mrb[99].mxu0 }
 0xfbc   : > { %v3071_v54 = vpop.f32.mrb[88].mxu1 }
 0xfbd   : > { %v3163_v58 = vadd.f32 %v3071_v54, %v3028_v2  ;;  %v4063_v56 = vpop.f32.mrb[89].mxu1 }
 0xfbe   : > { %v3074_v60 = vpop.f32.mrb[90].mxu1  ;;  %v4134_v56 = vld [vmem:[%s4967_s10 + $0x8] sm:$0xff]  }
 0xfbf   : > { %v4064_v59 = vpop.f32.mrb[91].mxu1  ;;  %v4136_v60 = vld [vmem:[%s4967_s10 + $0x18] sm:$0xff]  }
 0xfc0   : > { %v3114_v62 = vpop.f32.mrb[100].mxu0  ;;  %v4137_v59 = vld [vmem:[%s4967_s10 + $0x20] sm:$0xff]  }
 0xfc1   : > { %v3164_v4 = vadd.f32 %v3163_v58, %v3114_v62  ;;  %v4069_v6 = vpop.f32.mrb[101].mxu0  ;;  %v4133_v58 = vld [vmem:[%s4967_s10] sm:$0xff]   ;;  %v4138_v62 = vld [vmem:[%s4967_s10 + $0x28] sm:$0xff]  }
 0xfc2   : > { %v3117_v7 = vpop.f32.mrb[102].mxu0  ;;  %4085 = vmatprep.subr.bf16.mxu1 %v4133_v58  ;;  %v4140_v6 = vld [vmem:[%s4967_s10 + $0x38] sm:$0xff]  }
 0xfc3   : > { %v4070_v9 = vpop.f32.mrb[103].mxu0  ;;  %4086 = vmatpush3.bf16.msra.mxu1 %v4133_v58  ;;  %v3646_v7 = vld [vmem:[%s4966_s9] ss:$0 sm:$0xff] }
 0xfc4   : > { %v3157_v10 = vpop.f32.mrb[92].mxu1  ;;  %4087 = vmatprep.subr.bf16.mxu1 %v4134_v56 }
 0xfc5   : > { %v3165_v45 = vadd.f32 %v3164_v4, %v3157_v10  ;;  %v4075_v0 = vpop.f32.mrb[93].mxu1  ;;  %v4139_v4 = vld [vmem:[%s4967_s10 + $0x30] sm:$0xff]  }
 0xfc6   : > { %v3160_v12 = vpop.f32.mrb[94].mxu1 }
 0xfc7   : > { %v3169_v63 = vadd.f32 %v4358_v21, %v3165_v45  ;;  %v4076_v13 = vpop.f32.mrb[95].mxu1  ;;  %4088 = vmatpush3.bf16.msra.mxu1 %v4134_v56 }
 0xfc9   : > { %v4892_v14 = vadd.f32 %v4818_v50, %v3169_v63 }
 0xfcb   : > { %v3192_v15 = vsel %vm428_vm0, %v4892_v14, 0.0 }
 0xfcc   : > { %3193 = vadd.xlane.f32.xlu1 %v3192_v15 }
 0xfd0   : > { %3211 = vadd.xlane.f32.xlu1 %v3210_v5 }
0x1059   : > { %v3194_v20 = vpop.xlane.xlu1 %3193 }
0x105a   : > { %v3198_v11 = vmul.f32 0.03125, %v3194_v20 }
0x105c   : > { %v3202_v21 = vsub.f32 %v4892_v14, %v3198_v11 }
0x105d   : > { %v3212_v23 = vpop.xlane.xlu1 %3211 }
0x105e   : > { %v3220_v24 = vmul.f32 0.03125, %v3212_v23  ;;  %v3206_v50 = vmul.f32 %v3202_v21, %v3202_v21 }
0x1060   : > { %v3224_v26 = vadd.f32 1e-05, %v3220_v24  ;;  %v3216_v27 = vsel %vm428_vm0, %v3206_v50, 0.0 }
0x1061   : > { %3217 = vadd.xlane.f32.xlu1 %v3216_v27 }
0x1062   : > { %4215 = vrsqrt.f32 %v3224_v26 }
0x1063   : > { %4217 = vrsqrt.f32 %v3225_v47 }
0x106c   : > { %v4216_v43 = vpop.eup %4215 }
0x106d   : > { %v3232_v38 = vmul.f32 %v4216_v43, %v3200_v3  ;;  %v4218_v52 = vpop.eup %4217 }
0x106e   : > { %v3233_v34 = vmul.f32 %v4218_v52, %v4870_v25  ;;  %v4135_v25 = vld [vmem:[%s4967_s10 + $0x10] sm:$0xff]  }
0x106f   : > { %v3242_v40 = vmul.f32 %v3644_v36, %v3232_v38  ;;  %4089 = vmatprep.subr.bf16.mxu1 %v4135_v25 }
0x1070   : > { %v3243_v55 = vmul.f32 %v3644_v36, %v3233_v34  ;;  %4090 = vmatpush3.bf16.msra.mxu1 %v4135_v25 }
0x1071   : > { %v3252_v28 = vadd.f32 %v3645_v37, %v3242_v40  ;;  %4091 = vmatprep.subr.bf16.mxu1 %v4136_v60 }
0x1072   : > { %v3253_v57 = vadd.f32 %v3645_v37, %v3243_v55 }
0x1073   : > { %v3255_v32 = vpack.c.bf16 %v3252_v28, %v3251_v41 }
0x1074   : > { %4092 = vmatpush3.bf16.msra.mxu1 %v4136_v60 }
0x1075   : > { %4081 = vmatprep.mubr.msk.bf16.mxu0 %vm428_vm0, %v3255_v32  ;;  %4093 = vmatprep.subr.bf16.mxu1 %v4137_v59 }
0x1078   : > { %4094 = vmatpush3.bf16.msra.mxu1 %v4137_v59 }
0x1079   : > { %4095 = vmatprep.subr.bf16.mxu1 %v4138_v62 }
0x107c   : > { %4096 = vmatpush3.bf16.msra.mxu1 %v4138_v62 }
0x107d   : > { %4097 = vmatprep.subr.bf16.mxu1 %v4139_v4 }
0x1080   : > { %4098 = vmatpush3.bf16.msra.mxu1 %v4139_v4 }
0x1081   : > { %4099 = vmatprep.subr.bf16.mxu1 %v4140_v6 }
0x1084   : > { %4100 = vmatpush3.bf16.msra.mxu1 %v4140_v6 }
0x10ee   : > { %v3218_v48 = vpop.xlane.xlu1 %3217 }
0x10ef   : > { %v3222_v49 = vmul.f32 0.03125, %v3218_v48 }
0x10f1   : > { %v3226_v33 = vadd.f32 1e-05, %v3222_v49 }
0x10f3   : > { %4219 = vrsqrt.f32 %v3226_v33 }
0x10fd   : > { %v4220_v1 = vpop.eup %4219 }
0x10fe   : > { %v3234_v2 = vmul.f32 %v4220_v1, %v3202_v21 }
0x1100   : > { %v3244_v35 = vmul.f32 %v3644_v36, %v3234_v2  ;;  %v3651_v2 = vld [vmem:[%s4968_s11] ss:$0 sm:$0xff] }
0x1102   : > { %v3254_v22 = vadd.f32 %v3645_v37, %v3244_v35 }
0x1104   : > { %v3256_v54 = vpack.c.bf16 %v3254_v22, %v3253_v57 }
0x1106   : > { %4082 = vmatmul.mubr.msk.bf16.vlgmr.msra.gmra.mrb[104].mxu0 %vm428_vm0, %v3256_v54 }
0x11d9   : > { %v4083_v8 = vpop.f32.mrb[104].mxu0 }
0x11da   : > { %v3329_v9 = vadd.f32 %v4083_v8, %v3646_v7  ;;  %v3320_v10 = vpop.f32.mrb[105].mxu0 }
0x11db   : > { %v3321_v45 = vadd.f32 %v3646_v7, %v3320_v10  ;;  %v4084_v0 = vpop.f32.mrb[106].mxu0 }
0x11dc   : > { %v3341_v12 = vmul.f32 0.044715, %v3329_v9  ;;  %v3332_v3 = vadd.f32 %v4084_v0, %v3646_v7  ;;  %v3323_v63 = vpop.f32.mrb[107].mxu0  ;;  %v3337_v18 = vmul.f32 0.5, %v3329_v9 }
0x11dd   : > { %v3339_v13 = vmul.f32 0.044715, %v3321_v45  ;;  %v3324_v15 = vadd.f32 %v3646_v7, %v3323_v63  ;;  %v3335_v46 = vmul.f32 0.5, %v3321_v45 }
0x11de   : > { %v3345_v16 = vmul.f32 %v3341_v12, %v3329_v9  ;;  %v3342_v5 = vmul.f32 0.044715, %v3332_v3  ;;  %v3338_v42 = vmul.f32 0.5, %v3332_v3 }
0x11df   : > { %v3343_v17 = vmul.f32 %v3339_v13, %v3321_v45  ;;  %v3340_v31 = vmul.f32 0.044715, %v3324_v15  ;;  %v3336_v47 = vmul.f32 0.5, %v3324_v15 }
0x11e0   : > { %v3349_v19 = vmul.f32 %v3345_v16, %v3329_v9  ;;  %v3346_v20 = vmul.f32 %v3342_v5, %v3332_v3 }
0x11e1   : > { %v3347_v11 = vmul.f32 %v3343_v17, %v3321_v45  ;;  %v3344_v21 = vmul.f32 %v3340_v31, %v3324_v15 }
0x11e2   : > { %v3353_v23 = vadd.f32 %v3349_v19, %v3329_v9  ;;  %v3350_v24 = vmul.f32 %v3346_v20, %v3332_v3 }
0x11e3   : > { %v3348_v50 = vmul.f32 %v3344_v21, %v3324_v15  ;;  %v3351_v26 = vadd.f32 %v3347_v11, %v3321_v45 }
0x11e4   : > { %v3357_v27 = vmul.f32 0.7978846, %v3353_v23  ;;  %v3354_v29 = vadd.f32 %v3350_v24, %v3332_v3 }
0x11e5   : > { %v3352_v30 = vadd.f32 %v3348_v50, %v3324_v15  ;;  %v3355_v36 = vmul.f32 0.7978846, %v3351_v26 }
0x11e6   : > { %4221 = vtanh.f32 %v3357_v27  ;;  %v3358_v43 = vmul.f32 0.7978846, %v3354_v29 }
0x11e7   : > { %v3356_v38 = vmul.f32 0.7978846, %v3352_v30  ;;  %4223 = vtanh.f32 %v3355_v36 }
0x11e8   : > { %4225 = vtanh.f32 %v3358_v43 }
0x11e9   : > { %4227 = vtanh.f32 %v3356_v38 }
0x11f0   : > { %v4222_v39 = vpop.eup %4221 }
0x11f1   : > { %v4224_v37 = vpop.eup %4223  ;;  %v3365_v40 = vadd.f32 1.0, %v4222_v39 }
0x11f2   : > { %v4226_v41 = vpop.eup %4225  ;;  %v3363_v28 = vadd.f32 1.0, %v4224_v37 }
0x11f3   : > { %v4228_v32 = vpop.eup %4227  ;;  %v3366_v44 = vadd.f32 1.0, %v4226_v41  ;;  %v3369_v49 = vmul.f32 %v3365_v40, %v3337_v18 }
0x11f4   : > { %v3364_v48 = vadd.f32 1.0, %v4228_v32  ;;  %v3367_v52 = vmul.f32 %v3363_v28, %v3335_v46 }
0x11f5   : > { %v3370_v33 = vmul.f32 %v3366_v44, %v3338_v42 }
0x11f6   : > { %v3368_v34 = vmul.f32 %v3364_v48, %v3336_v47 }
0x11f7   : > { %v3372_v1 = vpack.c.bf16 %v3370_v33, %v3369_v49 }
0x11f8   : > { %v3371_v55 = vpack.c.bf16 %v3368_v34, %v3367_v52 }
0x11fa   : > { %4101 = vmatprep.mubr.bf16.mxu1 %v3371_v55 }
0x11fb   : > { %4102 = vmatmul.mubr.bf16.vlgmr.msra.gmra.mrb[96].mxu1 %v3372_v1 }
0x12ce   : > { %v4103_v35 = vpop.f32.mrb[96].mxu1 }
0x12cf   : > { %v3487_v57 = vadd.f32 %v4103_v35, %v3651_v2  ;;  %v3478_v22 = vpop.f32.mrb[97].mxu1 }
0x12d0   : > { %v3479_v54 = vadd.f32 %v3651_v2, %v3478_v22  ;;  %v4104_v58 = vpop.f32.mrb[98].mxu1 }
0x12d1   : > { %v3490_v56 = vadd.f32 %v4104_v58, %v3651_v2  ;;  %v3481_v25 = vpop.f32.mrb[99].mxu1  ;;  %v3495_v62 = vadd.f32 %v3487_v57, %v4833_v61 }
0x12d2   : > { %v3493_v60 = vadd.f32 %v3479_v54, %v4821_v51  ;;  %v3482_v59 = vadd.f32 %v3651_v2, %v3481_v25 }
0x12d3   : > { %v3496_v6 = vadd.f32 %v3490_v56, %v4892_v14  ;;  %v3668_v9 = vpack.c.bf16 %v3495_v62, %v3495_v62 }
0x12d4   : > { %v3666_v4 = vpack.c.bf16 %v3493_v60, %v3493_v60  ;;  %v3494_v7 = vadd.f32 %v3482_v59, %v4826_v53 }
0x12d5   : > { %v3669_v10 = vpack.c.bf16 %v3496_v6, %v3496_v6  ;;  %3516 = vst.msk [vmem:[%s415_s14 + $0x8] sm:$0xf] %vm3513_vm6, %v3668_v9 }
0x12d6   : > { %3514 = vst.msk [vmem:[%s415_s14] sm:$0xf] %vm3513_vm6, %v3666_v4  ;;  %v3667_v8 = vpack.c.bf16 %v3494_v7, %v3494_v7 }
0x12d7   : > { %3517 = vst.msk [vmem:[%s415_s14 + $0xc] sm:$0xf] %vm3513_vm6, %v3669_v10 }
0x12d8   : > { %3515 = vst.msk [vmem:[%s415_s14 + $0x4] sm:$0xf] %vm3513_vm6, %v3667_v8 }
0x12d9 PF: > { %s22_s21 = sadd.s32 1, %s4239_s21  }
0x12da   : > { %p19_p4 = scmp.ge.s32.totalorder %s22_s21, 4  }
0x12dc   :  { %21 = sbr.rel (!%p19_p4) target bundleno = 1 (0x1), region = 98 }

// kernel: _lambda_.8
= control target key start
LH: loop header
LB: loop body
LE: loop exit
PB: predicated region body
PF: predicated region fallthrough
CT: control target
= control target key end

     0   :  { %s4462_s29 = smov 0   ;;  %s5119_s0 = inlined_call_operand.vmem [shape: bf16[64,32], index: 0, kind: input, shape index: {}]   ;;  %s5120_s1 = inlined_call_operand.vmem [shape: f32[1,32], index: 1, kind: input, shape index: {}]   ;;  %s5121_s2 = inlined_call_operand.vmem [shape: f32[1,32], index: 2, kind: input, shape index: {}]   ;;  %s5122_s3 = inlined_call_operand.vmem [shape: bf16[32,192], index: 3, kind: input, shape index: {}]   ;;  %s5123_s4 = inlined_call_operand.vmem [shape: bf16[4,16,32], index: 4, kind: input, shape index: {}]   ;;  %s5124_s5 = inlined_call_operand.vmem [shape: f32[1,32], index: 5, kind: input, shape index: {}]   ;;  %s5125_s6 = inlined_call_operand.vmem [shape: f32[1,32], index: 6, kind: input, shape index: {}]   ;;  %s5126_s7 = inlined_call_operand.vmem [shape: f32[1,32], index: 7, kind: input, shape index: {}]   ;;  %s5127_s8 = inlined_call_operand.vmem [shape: bf16[32,128], index: 8, kind: input, shape index: {}]   ;;  %s5128_s9 = inlined_call_operand.vmem [shape: f32[1,128], index: 9, kind: input, shape index: {}]   ;;  %s5129_s10 = inlined_call_operand.vmem [shape: bf16[128,32], index: 10, kind: input, shape index: {}]   ;;  %s5130_s11 = inlined_call_operand.vmem [shape: f32[1,32], index: 11, kind: input, shape index: {}]   ;;  %s5131_s12 = inlined_call_operand.vmem [shape: f32[1,32], index: 12, kind: input, shape index: {}]   ;;  %s5132_s13 = inlined_call_operand.vmem [shape: f32[1,32], index: 13, kind: input, shape index: {}]   ;;  %s5133_s14 = inlined_call_operand.vmem [shape: bf16[64,32], index: 14, kind: output, shape index: {}]  }
   0x1 LB: > { %s3702_s30 = sadd.s32 4294967295, %s4377_s29   ;;  %p3706_p0 = scmp.ge.s32.totalorder %s4377_s29, 1  ;;  %s4377_s29 = sphi %s4462_s29, %s24_s29  }
   0x2   : > { %p413_p1 = scmp.lt.s32.totalorder %s4377_s29, 3 }
   0x4   : > { %p414_p2 = pnand %p3706_p0, %p413_p1 }
   0x5   : > { %s3707_s15 = sshll.u32 (!%p414_p2), %s3702_s30, 2  ;;  %vm482_vm0 = vcmask (!%p414_p2), 261120   ;;  %v4251_v15 = vld [vmem:[%s5122_s3 + $0x4] ss:$8 sps:$4 sm:$0xff] (!%p414_p2)   ;;  %v4253_v16 = vld [vmem:[%s5122_s3] ss:$8 sps:$4 sm:$0xff] (!%p414_p2)  }
   0x6   : > { %417 = sbr.rel (%p414_p2) target bundleno = 5142 (0x1416), region = 76  ;;  %p460_p3 = scmp.lt.s32.totalorder (!%p414_p2), %s3707_s15, 7  ;;  %588 = vmatprep.subr.bf16.mxu0 (!%p414_p2), %v4251_v15  ;;  %v4254_v17 = vld [vmem:[%s5122_s3 + $0x14] ss:$8 sps:$4 sm:$0xff] (!%p414_p2)   ;;  %v4256_v18 = vld [vmem:[%s5122_s3 + $0x10] ss:$8 sps:$4 sm:$0xff] (!%p414_p2)  }
   0x7   : > { %589 = vmatpush1.bf16.msra.mxu0 (!%p414_p2), %v4253_v16  ;;  %v4379_v19 = vmov (!%p414_p2), 0   ;;  %v4517_v33 = vld [vmem:[%s5120_s1] ss:$0 sm:$0xff] (!%p414_p2)  ;;  %s4381_s20 = smov (!%p414_p2), 112   ;;  %s4382_s21 = smov (!%p414_p2), 80   ;;  %v4383_v56 = vmov (!%p414_p2), 0.0  }
   0x8   : > { %620 = vmatprep.mubr.bf16.mxu0 (!%p414_p2), %v4379_v19  ;;  %590 = vmatprep.subr.bf16.mxu0 (!%p414_p2), %v4254_v17  ;;  %v4523_v37 = vld [vmem:[%s5121_s2] ss:$0 sm:$0xff] (!%p414_p2)  ;;  %s4384_s22 = smov (!%p414_p2), 64   ;;  %vm4385_vm1 = vmmov (!%p414_p2), 0   ;;  %vm684_vm2 = vcmask (!%p414_p2), 130048   ;;  %vm930_vm3 = vcmask (!%p414_p2), 1043456  }
   0x9   : > { %3925 = vmatprep.subr.bf16.mxu1 (!%p414_p2), %v4383_v56  ;;  %3927 = vmatprep.mubr.msk.bf16.mxu1 (!%p414_p2), %vm4385_vm1, %v4383_v56  ;;  %vm878_vm5 = vcmask (!%p414_p2), 64512   ;;  %vm3641_vm6 = vcmask (!%p414_p2), 257024  }
   0xb   : > { %591 = vmatpush1.bf16.msra.mxu0 (!%p414_p2), %v4256_v18 }
   0xc   : > { %3919 = vmatprep.subr.bf16.mxu0 (!%p414_p2), %v4383_v56 }
   0xd   : > { %s5135_s15 = smov (!%p460_p3, %s3707_s15), 7 }
   0xe   : > { %s3708_s16 = sshll.u32 %s5135_s15, 2 }
   0xf   : > { %s4478_s19 = scalar_lea.vmem %s5119_s0, %s3708_s16  ;;  %s469_s23 = scalar_lea.vmem %s5133_s14, %s3708_s16 }
  0x10   : > { %v3801_v0 = vld [vmem:[%s4478_s19] sm:$0xff]   ;;  %v3808_v20 = vld [vmem:[%s4478_s19 + $0x8] sm:$0xff]   ;;  %s4380_s19 = smov 96  }
  0x11   : > { %v4481_v1 = vunpack.c.l.bf16 %v3801_v0  ;;  %v4483_v2 = vunpack.c.h.bf16 %v3801_v0  ;;  %v4506_v21 = vunpack.c.h.bf16 %v3808_v20  ;;  %v4508_v22 = vunpack.c.l.bf16 %v3808_v20 }
  0x13   : > { %v483_v3 = vsel %vm482_vm0, %v4481_v1, 0.0  ;;  %v486_v4 = vsel %vm482_vm0, %v4483_v2, 0.0  ;;  %v492_v23 = vsel %vm482_vm0, %v4506_v21, 0.0  ;;  %v489_v24 = vsel %vm482_vm0, %v4508_v22, 0.0 }
  0x14   : > { %484 = vadd.xlane.f32.xlu0 %v483_v3 }
  0x18   : > { %487 = vadd.xlane.f32.xlu0 %v486_v4 }
  0x1c   : > { %490 = vadd.xlane.f32.xlu0 %v489_v24 }
  0xa1   : > { %v485_v5 = vpop.xlane.xlu0 %484 }
  0xa2   : > { %v496_v6 = vmul.f32 0.03125, %v485_v5 }
  0xa4   : > { %v500_v7 = vsub.f32 %v4481_v1, %v496_v6 }
  0xa5   : > { %v488_v8 = vpop.xlane.xlu0 %487 }
  0xa6   : > { %v497_v9 = vmul.f32 0.03125, %v488_v8  ;;  %v504_v10 = vmul.f32 %v500_v7, %v500_v7 }
  0xa8   : > { %v501_v11 = vsub.f32 %v4483_v2, %v497_v9  ;;  %v508_v12 = vsel %vm482_vm0, %v504_v10, 0.0 }
  0xa9   : > { %509 = vadd.xlane.f32.xlu1 %v508_v12  ;;  %v491_v49 = vpop.xlane.xlu0 %490 }
  0xaa   : > { %v505_v13 = vmul.f32 %v501_v11, %v501_v11  ;;  %v498_v51 = vmul.f32 0.03125, %v491_v49 }
  0xac   : > { %v511_v14 = vsel %vm482_vm0, %v505_v13, 0.0  ;;  %v502_v53 = vsub.f32 %v4508_v22, %v498_v51 }
  0xad   : > { %512 = vadd.xlane.f32.xlu1 %v511_v14 }
  0xae   : > { %v506_v54 = vmul.f32 %v502_v53, %v502_v53 }
  0xb0   : > { %v514_v55 = vsel %vm482_vm0, %v506_v54, 0.0 }
  0xb1   : > { %493 = vadd.xlane.f32.xlu1 %v492_v23 }
 0x136   : > { %v510_v25 = vpop.xlane.xlu1 %509 }
 0x137   : > { %v520_v26 = vmul.f32 0.03125, %v510_v25 }
 0x139   : > { %v524_v27 = vadd.f32 1e-05, %v520_v26 }
 0x13a   : > { %v513_v28 = vpop.xlane.xlu1 %512 }
 0x13b   : > { %4271 = vrsqrt.f32 %v524_v27  ;;  %v521_v29 = vmul.f32 0.03125, %v513_v28 }
 0x13d   : > { %v525_v30 = vadd.f32 1e-05, %v521_v29  ;;  %v649_v29 = vlaneseq }
 0x13e   : > { %v494_v46 = vpop.xlane.xlu1 %493 }
 0x13f   : > { %4273 = vrsqrt.f32 %v525_v30  ;;  %v499_v47 = vmul.f32 0.03125, %v494_v46  ;;  %v650_v30 = vand.u32 127, %v649_v29 }
 0x141   : > { %v503_v48 = vsub.f32 %v4506_v21, %v499_v47  ;;  %vm651_vm4 = vcmp.lt.s32.totalorder %v650_v30, 5 }
 0x143   : > { %v507_v50 = vmul.f32 %v503_v48, %v503_v48 }
 0x145   : > { %v4272_v31 = vpop.eup %4271  ;;  %v517_v52 = vsel %vm482_vm0, %v507_v50, 0.0 }
 0x146   : > { %v532_v32 = vmul.f32 %v4272_v31, %v500_v7 }
 0x148   : > { %v542_v36 = vmul.f32 %v4517_v33, %v532_v32 }
 0x149   : > { %v4274_v34 = vpop.eup %4273 }
 0x14a   : > { %v533_v35 = vmul.f32 %v4274_v34, %v501_v11  ;;  %v552_v39 = vadd.f32 %v4523_v37, %v542_v36 }
 0x14c   : > { %v543_v38 = vmul.f32 %v4517_v33, %v533_v35  ;;  %v4386_v35 = vmov -1e+30  }
 0x14d   : > { %v4589_v36 = vsel %vm651_vm4, 0.0, %v4386_v35 }
 0x14e   : > { %v553_v40 = vadd.f32 %v4523_v37, %v543_v38 }
 0x150   : > { %v556_v41 = vpack.c.bf16 %v553_v40, %v552_v39 }
 0x152   : > { %3717 = vmatmul.mubr.msk.bf16.vlgmr.msra.gmra.mrb[0].mxu0 %vm482_vm0, %v556_v41 }
 0x153   : > { %630 = vmatprep.mubr.bf16.mxu0 %v4379_v19 }
 0x225   : > { %v622_v42 = vpop.f32.mrb[0].mxu0 }
 0x226   : > { %657 = vrot.lane.b32.xlu1 %v622_v42, %s4380_s19  ;;  %654 = vrot.lane.b32.xlu0 %v622_v42, %s4381_s20  ;;  %v4531_v43 = vpop.f32.mrb[1].mxu0  ;;  %v663_v57 = vpack.c.bf16 %v622_v42, %v622_v42 }
 0x227   : > { %v4533_v44 = vpop.f32.mrb[2].mxu0  ;;  %v677_v27 = vpack.c.bf16 %v4531_v43, %v4531_v43 }
 0x228   : > { %v4535_v45 = vpop.f32.mrb[3].mxu0 }
 0x229   : > { %v932_v28 = vsel %vm930_vm3, %v677_v27, 0 }
 0x22a   : > { %660 = vrot.lane.b32.xlu1 %v622_v42, %s4382_s21 }
 0x245   : > { %518 = vadd.xlane.f32.xlu0 %v517_v52 }
 0x24e   : > { %515 = vadd.xlane.f32.xlu1 %v514_v55 }
 0x25b   : > { %682 = vrot.lane.b32.xlu0 %v663_v57, %s4384_s22 }
 0x298   : > { %v658_v58 = vpop.permute.xlu1 %657  ;;  %v655_v59 = vpop.permute.xlu0 %654 }
 0x299   : > { %v664_v60 = vpack.c.bf16 %v655_v59, %v655_v59  ;;  %v665_v62 = vpack.c.bf16 %v658_v58, %v658_v58 }
 0x29b   : > { %732 = vrot.lane.b32.xlu1 %v664_v60, %s4384_s22 }
 0x29c   : > { %v661_v61 = vpop.permute.xlu1 %660 }
 0x29d   : > { %v666_v63 = vpack.c.bf16 %v661_v61, %v661_v61 }
 0x29f   : > { %830 = vrot.lane.b32.xlu0 %v666_v63, %s4384_s22  ;;  %781 = vrot.lane.b32.xlu1 %v665_v62, %s4384_s22 }
 0x2d2   : > { %v519_v0 = vpop.xlane.xlu0 %518 }
 0x2d3   : > { %v523_v3 = vmul.f32 0.03125, %v519_v0 }
 0x2d5   : > { %v527_v4 = vadd.f32 1e-05, %v523_v3 }
 0x2d6   : > { %v683_v5 = vpop.permute.xlu0 %682 }
 0x2d7   : > { %v689_v6 = vsel %vm684_vm2, %v683_v5, 0  ;;  %4275 = vrsqrt.f32 %v527_v4 }
 0x2d8   : > { %3920 = vmatpush3.bf16.xpose.msra.mxu0 %v689_v6 }
 0x2d9   : > { %3931 = vmatprep.subr.bf16.mxu0 %v4383_v56 }
 0x2db   : > { %v516_v7 = vpop.xlane.xlu1 %515 }
 0x2dc   : > { %v522_v8 = vmul.f32 0.03125, %v516_v7 }
 0x2de   : > { %v526_v9 = vadd.f32 1e-05, %v522_v8 }
 0x2e0   : > { %4277 = vrsqrt.f32 %v526_v9 }
 0x2e1   : > { %v4276_v10 = vpop.eup %4275 }
 0x2e2   : > { %v535_v11 = vmul.f32 %v4276_v10, %v503_v48 }
 0x2e4   : > { %v545_v14 = vmul.f32 %v4517_v33, %v535_v11 }
 0x2e6   : > { %v555_v17 = vadd.f32 %v4523_v37, %v545_v14 }
 0x2ea   : > { %v4278_v12 = vpop.eup %4277 }
 0x2eb   : > { %v534_v13 = vmul.f32 %v4278_v12, %v502_v53 }
 0x2ed   : > { %v544_v15 = vmul.f32 %v4517_v33, %v534_v13 }
 0x2ef   : > { %v554_v16 = vadd.f32 %v4523_v37, %v544_v15 }
 0x2f1   : > { %v557_v18 = vpack.c.bf16 %v555_v17, %v554_v16 }
 0x2f3   : > { %3718 = vmatmul.mubr.msk.bf16.gmra.mrb[4].mxu0 %vm482_vm0, %v557_v18 }
 0x2f4   : > { %3921 = vmatprep.mubr.msk.bf16.mxu0 %vm4385_vm1, %v4383_v56 }
 0x2fb   : > { %3922 = vmatmul.mubr.msk.bf16.vlgmr.msra.gmra.mrb[8].mxu0 %vm684_vm2, %v663_v57 }
 0x2fc   : > { %3933 = vmatprep.mubr.msk.bf16.mxu0 %vm4385_vm1, %v4383_v56 }
 0x30d   : > { %v733_v19 = vpop.permute.xlu1 %732 }
 0x30e   : > { %v738_v20 = vsel %vm684_vm2, %v733_v19, 0 }
 0x30f   : > { %3926 = vmatpush3.bf16.xpose.msra.mxu1 %v738_v20 }
 0x310   : > { %3937 = vmatprep.subr.bf16.mxu1 %v4383_v56 }
 0x311   : > { %v782_v23 = vpop.permute.xlu1 %781  ;;  %v831_v25 = vpop.permute.xlu0 %830 }
 0x312   : > { %v787_v24 = vsel %vm684_vm2, %v782_v23, 0  ;;  %v836_v26 = vsel %vm684_vm2, %v831_v25, 0 }
 0x313   : > { %3932 = vmatpush3.bf16.xpose.msra.mxu0 %v787_v24 }
 0x314   : > { %3943 = vmatprep.subr.bf16.mxu0 %v4383_v56 }
 0x316   : > { %3928 = vmatmul.mubr.msk.bf16.vlgmr.msra.gmra.mrb[0].mxu1 %vm684_vm2, %v664_v60 }
 0x317   : > { %3938 = vmatpush3.bf16.xpose.msra.mxu1 %v836_v26  ;;  %3939 = vmatprep.mubr.msk.bf16.mxu1 %vm4385_vm1, %v4383_v56 }
 0x318   : > { %3949 = vmatprep.subr.bf16.mxu1 %v4383_v56 }
 0x31a   : > { %3934 = vmatmul.mubr.msk.bf16.vlgmr.msra.gmra.mrb[12].mxu0 %vm684_vm2, %v665_v62 }
 0x31b   : > { %3944 = vmatpush3.bf16.msra.mxu0 %v932_v28  ;;  %3945 = vmatprep.mubr.msk.bf16.mxu0 %vm4385_vm1, %v4383_v56  ;;  %v4617_v28 = vpack.c.bf16 %v4533_v44, %v4533_v44 }
 0x31c   : > { %3955 = vmatprep.subr.bf16.mxu0 %v4383_v56 }
 0x31e   : > { %3940 = vmatmul.mubr.msk.bf16.vlgmr.msra.gmra.mrb[4].mxu1 %vm684_vm2, %v666_v63 }
 0x31f   : > { %3951 = vmatprep.mubr.msk.bf16.mxu1 %vm4385_vm1, %v4383_v56 }
 0x3c6   : > { %v4581_v31 = vpop.f32.mrb[4].mxu0 }
 0x3c7   : > { %v4583_v32 = vpop.f32.mrb[5].mxu0 }
 0x3c8   : > { %v4585_v33 = vpop.f32.mrb[6].mxu0 }
 0x3c9   : > { %v4587_v34 = vpop.f32.mrb[7].mxu0 }
 0x3ce   : > { %v725_v37 = vpop.f32.mrb[8].mxu0 }
 0x3cf   : > { %v726_v38 = vadd.f32 %v725_v37, %v4589_v36  ;;  %v3923_v39 = vpop.f32.mrb[9].mxu0 }
 0x3d0   : > { %v728_v40 = vpop.f32.mrb[10].mxu0 }
 0x3d1   : > { %v3924_v41 = vpop.f32.mrb[11].mxu0  ;;  %v879_v42 = vsel %vm878_vm5, %v726_v38, -inf }
 0x3d2   : > { %880 = vmax.xlane.f32.xlu1 %v879_v42 }
 0x3e3   : > { %668 = vrot.lane.b32.xlu1 %v4531_v43, %s4381_s20 }
 0x3e9   : > { %v774_v46 = vpop.f32.mrb[0].mxu1 }
 0x3ea   : > { %v775_v47 = vadd.f32 %v774_v46, %v4589_v36  ;;  %v3929_v48 = vpop.f32.mrb[1].mxu1 }
 0x3eb   : > { %v777_v49 = vpop.f32.mrb[2].mxu1 }
 0x3ec   : > { %v3930_v50 = vpop.f32.mrb[3].mxu1  ;;  %v882_v51 = vsel %vm878_vm5, %v775_v47, -inf }
 0x3ed   : > { %883 = vmax.xlane.f32.xlu0 %v882_v51  ;;  %v823_v52 = vpop.f32.mrb[12].mxu0 }
 0x3ee   : > { %v824_v53 = vadd.f32 %v823_v52, %v4589_v36  ;;  %v3935_v54 = vpop.f32.mrb[13].mxu0 }
 0x3ef   : > { %v826_v55 = vpop.f32.mrb[14].mxu0 }
 0x3f0   : > { %v3936_v57 = vpop.f32.mrb[15].mxu0  ;;  %v885_v58 = vsel %vm878_vm5, %v824_v53, -inf }
 0x3f1   : > { %886 = vmax.xlane.f32.xlu0 %v885_v58  ;;  %v872_v59 = vpop.f32.mrb[4].mxu1 }
 0x3f2   : > { %v873_v60 = vadd.f32 %v872_v59, %v4589_v36  ;;  %v3941_v61 = vpop.f32.mrb[5].mxu1 }
 0x3f3   : > { %v875_v62 = vpop.f32.mrb[6].mxu1 }
 0x3f4   : > { %v3942_v63 = vpop.f32.mrb[7].mxu1  ;;  %v888_v0 = vsel %vm878_vm5, %v873_v60, -inf }
 0x3f5   : > { %889 = vmax.xlane.f32.xlu0 %v888_v0  ;;  %v4654_v0 = vld [vmem:[%s5123_s4] sm:$0xff]  }
 0x45f   : > { %v881_v3 = vpop.xlane.xlu1 %880 }
 0x460   : > { %v891_v4 = vsub.f32 %v726_v38, %v881_v3  ;;  %v4661_v3 = vld [vmem:[%s5123_s4 + $0x8] sm:$0xff]  }
 0x462   : > { %v895_v5 = vmul.f32 1.442695, %v891_v4 }
 0x463   : > { %v669_v6 = vpop.permute.xlu1 %668 }
 0x464   : > { %4279 = vpow2.f32 %v895_v5  ;;  %v678_v7 = vpack.c.bf16 %v669_v6, %v669_v6  ;;  %v4668_v5 = vld [vmem:[%s5123_s4 + $0x10] sm:$0xff]  }
 0x466   : > { %v978_v8 = vsel %vm930_vm3, %v678_v7, 0 }
 0x467   : > { %3950 = vmatpush3.bf16.msra.mxu1 %v978_v8 }
 0x468   : > { %3961 = vmatprep.subr.bf16.mxu1 %v4383_v56 }
 0x46e   : > { %v4280_v9 = vpop.eup %4279 }
 0x46f   : > { %v903_v10 = vsel %vm878_vm5, %v4280_v9, 0.0 }
 0x470   : > { %904 = vadd.xlane.f32.xlu1 %v903_v10 }
 0x47a   : > { %v884_v11 = vpop.xlane.xlu0 %883 }
 0x47b   : > { %v892_v12 = vsub.f32 %v775_v47, %v884_v11  ;;  %v4678_v11 = vld [vmem:[%s5123_s4 + $0x18] sm:$0xff]  }
 0x47d   : > { %v897_v13 = vmul.f32 1.442695, %v892_v12 }
 0x47e   : > { %v887_v14 = vpop.xlane.xlu0 %886 }
 0x47f   : > { %4281 = vpow2.f32 %v897_v13  ;;  %v893_v15 = vsub.f32 %v824_v53, %v887_v14 }
 0x481   : > { %v899_v16 = vmul.f32 1.442695, %v893_v15 }
 0x482   : > { %v890_v17 = vpop.xlane.xlu0 %889 }
 0x483   : > { %4283 = vpow2.f32 %v899_v16  ;;  %v894_v18 = vsub.f32 %v873_v60, %v890_v17 }
 0x485   : > { %v901_v19 = vmul.f32 1.442695, %v894_v18 }
 0x487   : > { %4285 = vpow2.f32 %v901_v19 }
 0x489   : > { %v4282_v20 = vpop.eup %4281 }
 0x48a   : > { %v906_v23 = vsel %vm878_vm5, %v4282_v20, 0.0 }
 0x48b   : > { %907 = vadd.xlane.f32.xlu0 %v906_v23 }
 0x48d   : > { %v4284_v24 = vpop.eup %4283 }
 0x48e   : > { %v909_v25 = vsel %vm878_vm5, %v4284_v24, 0.0 }
 0x48f   : > { %910 = vadd.xlane.f32.xlu1 %v909_v25 }
 0x491   : > { %v4286_v26 = vpop.eup %4285 }
 0x492   : > { %v912_v27 = vsel %vm878_vm5, %v4286_v26, 0.0 }
 0x493   : > { %913 = vadd.xlane.f32.xlu0 %v912_v27 }
 0x4a0   : > { %674 = vrot.lane.b32.xlu1 %v4531_v43, %s4382_s21 }
 0x4a4   : > { %1316 = vrot.lane.b32.xlu1 %v4533_v44, %s4381_s20 }
 0x4a8   : > { %1319 = vrot.lane.b32.xlu1 %v4533_v44, %s4380_s19 }
 0x4a9   : > { %671 = vrot.lane.b32.xlu0 %v4531_v43, %s4380_s19 }
 0x4ac   : > { %1344 = vrot.lane.b32.xlu1 %v4617_v28, %s4384_s22 }
 0x4ad   : > { %1322 = vrot.lane.b32.xlu0 %v4533_v44, %s4382_s21 }
 0x4fd   : > { %v905_v29 = vpop.xlane.xlu1 %904 }
 0x4fe   : > { %4287 = vrcp.f32 %v905_v29 }
 0x508   : > { %v4288_v30 = vpop.eup %4287 }
 0x509   : > { %v919_v35 = vmul.f32 %v4288_v30, %v4280_v9 }
 0x50b   : > { %v923_v37 = vpack.c.bf16 %v919_v35, %v919_v35 }
 0x50d   : > { %3946 = vmatmul.mubr.msk.bf16.vlgmr.msra.gmra.mrb[16].mxu0 %vm878_vm5, %v923_v37 }
 0x50e   : > { %3957 = vmatprep.mubr.msk.bf16.mxu0 %vm4385_vm1, %v4383_v56 }
 0x518   : > { %v908_v43 = vpop.xlane.xlu0 %907 }
 0x519   : > { %4289 = vrcp.f32 %v908_v43 }
 0x51c   : > { %v911_v38 = vpop.xlane.xlu1 %910 }
 0x51d   : > { %4291 = vrcp.f32 %v911_v38 }
 0x520   : > { %v675_v39 = vpop.permute.xlu1 %674  ;;  %v914_v40 = vpop.xlane.xlu0 %913 }
 0x521   : > { %4293 = vrcp.f32 %v914_v40  ;;  %v680_v44 = vpack.c.bf16 %v675_v39, %v675_v39  ;;  %v1339_v40 = vpack.c.bf16 %v4535_v45, %v4535_v45 }
 0x523   : > { %v4290_v41 = vpop.eup %4289  ;;  %v1070_v54 = vsel %vm930_vm3, %v680_v44, 0 }
 0x524   : > { %v920_v42 = vmul.f32 %v4290_v41, %v4282_v20  ;;  %v1317_v46 = vpop.permute.xlu1 %1316  ;;  %v672_v47 = vpop.permute.xlu0 %671 }
 0x525   : > { %v4626_v48 = vpack.c.bf16 %v1317_v46, %v1317_v46  ;;  %v679_v49 = vpack.c.bf16 %v672_v47, %v672_v47 }
 0x526   : > { %v924_v50 = vpack.c.bf16 %v920_v42, %v920_v42 }
 0x527   : > { %v4292_v51 = vpop.eup %4291  ;;  %v1024_v52 = vsel %vm930_vm3, %v679_v49, 0  ;;  %1393 = vrot.lane.b32.xlu0 %v4626_v48, %s4384_s22 }
 0x528   : > { %v921_v53 = vmul.f32 %v4292_v51, %v4284_v24  ;;  %v1320_v55 = vpop.permute.xlu1 %1319  ;;  %3952 = vmatmul.mubr.msk.bf16.vlgmr.msra.gmra.mrb[8].mxu1 %vm878_vm5, %v924_v50  ;;  %3956 = vmatpush3.bf16.msra.mxu0 %v1024_v52  ;;  %v1323_v57 = vpop.permute.xlu0 %1322 }
 0x529   : > { %v4633_v58 = vpack.c.bf16 %v1320_v55, %v1320_v55  ;;  %3962 = vmatpush3.bf16.msra.mxu1 %v1070_v54  ;;  %v4635_v59 = vpack.c.bf16 %v1323_v57, %v1323_v57  ;;  %3963 = vmatprep.mubr.msk.bf16.mxu1 %vm4385_vm1, %v4383_v56 }
 0x52a   : > { %v925_v60 = vpack.c.bf16 %v921_v53, %v921_v53  ;;  %3967 = vmatprep.subr.bf16.mxu0 %v4383_v56  ;;  %3973 = vmatprep.subr.bf16.mxu1 %v4383_v56 }
 0x52b   : > { %v4294_v61 = vpop.eup %4293  ;;  %1442 = vrot.lane.b32.xlu1 %v4633_v58, %s4384_s22  ;;  %1491 = vrot.lane.b32.xlu0 %v4635_v59, %s4384_s22 }
 0x52c   : > { %v922_v62 = vmul.f32 %v4294_v61, %v4286_v26  ;;  %3958 = vmatmul.mubr.msk.bf16.vlgmr.msra.gmra.mrb[20].mxu0 %vm878_vm5, %v925_v60  ;;  %v1345_v16 = vpop.permute.xlu1 %1344 }
 0x52d   : > { %3969 = vmatprep.mubr.msk.bf16.mxu0 %vm4385_vm1, %v4383_v56  ;;  %3968 = vmatpush3.bf16.msra.mxu0 %v4654_v0  ;;  %v1350_v23 = vsel %vm684_vm2, %v1345_v16, 0 }
 0x52e   : > { %v926_v63 = vpack.c.bf16 %v922_v62, %v922_v62  ;;  %3979 = vmatprep.subr.bf16.mxu0 %v4383_v56 }
 0x530   : > { %3964 = vmatmul.mubr.msk.bf16.vlgmr.msra.gmra.mrb[12].mxu1 %vm878_vm5, %v926_v63 }
 0x531   : > { %3975 = vmatprep.mubr.msk.bf16.mxu1 %vm4385_vm1, %v4383_v56  ;;  %3974 = vmatpush3.bf16.msra.mxu1 %v4661_v3 }
 0x532   : > { %3985 = vmatprep.subr.bf16.mxu1 %v4383_v56 }
 0x599   : > { %v1394_v26 = vpop.permute.xlu0 %1393 }
 0x59a   : > { %v1399_v37 = vsel %vm684_vm2, %v1394_v26, 0 }
 0x59d   : > { %v1443_v43 = vpop.permute.xlu1 %1442  ;;  %v1492_v39 = vpop.permute.xlu0 %1491 }
 0x59e   : > { %v1448_v38 = vsel %vm684_vm2, %v1443_v43, 0  ;;  %v1497_v41 = vsel %vm684_vm2, %v1492_v39, 0 }
 0x5e0   : > { %v968_v4 = vpop.f32.mrb[16].mxu0 }
 0x5e1   : > { %v1112_v6 = vpack.c.bf16 %v968_v4, %v968_v4  ;;  %v3947_v7 = vpop.f32.mrb[17].mxu0 }
 0x5e2   : > { %v971_v8 = vpop.f32.mrb[18].mxu0 }
 0x5e3   : > { %v3948_v9 = vpop.f32.mrb[19].mxu0  ;;  %3970 = vmatmul.mubr.msk.bf16.vlgmr.msra.gmra.mrb[24].mxu0 %vm684_vm2, %v1112_v6 }
 0x5e4   : > { %3980 = vmatpush3.bf16.msra.mxu0 %v4668_v5  ;;  %3981 = vmatprep.mubr.msk.bf16.mxu0 %vm4385_vm1, %v4383_v56 }
 0x5e5   : > { %3991 = vmatprep.subr.bf16.mxu0 %v4383_v56 }
 0x5fb   : > { %v1014_v10 = vpop.f32.mrb[8].mxu1 }
 0x5fc   : > { %v1113_v12 = vpack.c.bf16 %v1014_v10, %v1014_v10  ;;  %v3953_v13 = vpop.f32.mrb[9].mxu1 }
 0x5fd   : > { %v1017_v14 = vpop.f32.mrb[10].mxu1 }
 0x5fe   : > { %v3954_v15 = vpop.f32.mrb[11].mxu1  ;;  %3976 = vmatmul.mubr.msk.bf16.vlgmr.msra.gmra.mrb[16].mxu1 %vm684_vm2, %v1113_v12 }
 0x5ff   : > { %3986 = vmatpush3.bf16.msra.mxu1 %v4678_v11  ;;  %v1060_v17 = vpop.f32.mrb[20].mxu0  ;;  %3987 = vmatprep.mubr.msk.bf16.mxu1 %vm4385_vm1, %v4383_v56 }
 0x600   : > { %v1114_v18 = vpack.c.bf16 %v1060_v17, %v1060_v17  ;;  %v3959_v19 = vpop.f32.mrb[21].mxu0  ;;  %3997 = vmatprep.subr.bf16.mxu1 %v4383_v56 }
 0x601   : > { %v1063_v20 = vpop.f32.mrb[22].mxu0 }
 0x602   : > { %v3960_v24 = vpop.f32.mrb[23].mxu0  ;;  %3982 = vmatmul.mubr.msk.bf16.vlgmr.msra.gmra.mrb[28].mxu0 %vm684_vm2, %v1114_v18 }
 0x603   : > { %3992 = vmatpush3.bf16.xpose.msra.mxu0 %v1350_v23  ;;  %v1106_v25 = vpop.f32.mrb[12].mxu1  ;;  %3993 = vmatprep.mubr.msk.bf16.mxu0 %vm4385_vm1, %v4383_v56 }
 0x604   : > { %v1115_v27 = vpack.c.bf16 %v1106_v25, %v1106_v25  ;;  %v3965_v29 = vpop.f32.mrb[13].mxu1  ;;  %4003 = vmatprep.subr.bf16.mxu0 %v4383_v56 }
 0x605   : > { %v1109_v30 = vpop.f32.mrb[14].mxu1 }
 0x606   : > { %v3966_v35 = vpop.f32.mrb[15].mxu1  ;;  %3988 = vmatmul.mubr.msk.bf16.vlgmr.msra.gmra.mrb[20].mxu1 %vm684_vm2, %v1115_v27 }
 0x607   : > { %3999 = vmatprep.mubr.msk.bf16.mxu1 %vm4385_vm1, %v4383_v56 }
 0x608   : > { %3998 = vmatpush3.bf16.xpose.msra.mxu1 %v1399_v37 }
 0x609   : > { %4009 = vmatprep.subr.bf16.mxu1 %v4383_v56 }
 0x60a   : > { %3994 = vmatmul.mubr.msk.bf16.vlgmr.msra.gmra.mrb[32].mxu0 %vm684_vm2, %v4617_v28  ;;  %v1591_v28 = vsel %vm930_vm3, %v1339_v40, 0 }
 0x60b   : > { %4004 = vmatpush3.bf16.xpose.msra.mxu0 %v1448_v38  ;;  %4005 = vmatprep.mubr.msk.bf16.mxu0 %vm4385_vm1, %v4383_v56 }
 0x60c   : > { %4015 = vmatprep.subr.bf16.mxu0 %v4383_v56 }
 0x60f   : > { %4000 = vmatmul.mubr.msk.bf16.vlgmr.msra.gmra.mrb[24].mxu1 %vm684_vm2, %v4626_v48 }
 0x610   : > { %4010 = vmatpush3.bf16.xpose.msra.mxu1 %v1497_v41  ;;  %4011 = vmatprep.mubr.msk.bf16.mxu1 %vm4385_vm1, %v4383_v56 }
 0x611   : > { %4021 = vmatprep.subr.bf16.mxu1 %v4383_v56 }
 0x612   : > { %4006 = vmatmul.mubr.msk.bf16.vlgmr.msra.gmra.mrb[36].mxu0 %vm684_vm2, %v4633_v58 }
 0x613   : > { %4016 = vmatpush3.bf16.msra.mxu0 %v1591_v28  ;;  %4017 = vmatprep.mubr.msk.bf16.mxu0 %vm4385_vm1, %v4383_v56 }
 0x614   : > { %4027 = vmatprep.subr.bf16.mxu0 %v4383_v56 }
 0x617   : > { %4012 = vmatmul.mubr.msk.bf16.vlgmr.msra.gmra.mrb[28].mxu1 %vm684_vm2, %v4635_v59 }
 0x618   : > { %4023 = vmatprep.mubr.msk.bf16.mxu1 %vm4385_vm1, %v4383_v56 }
 0x6b6   : > { %v1159_v42 = vpop.f32.mrb[24].mxu0 }
 0x6b7   : > { %v3971_v44 = vpop.f32.mrb[25].mxu0 }
 0x6b8   : > { %v1162_v46 = vpop.f32.mrb[26].mxu0 }
 0x6b9   : > { %v3972_v47 = vpop.f32.mrb[27].mxu0 }
 0x6d1   : > { %v1208_v48 = vpop.f32.mrb[16].mxu1 }
 0x6d2   : > { %v1312_v49 = vadd.f32 %v1208_v48, %v1159_v42  ;;  %v3977_v50 = vpop.f32.mrb[17].mxu1 }
 0x6d3   : > { %v1211_v51 = vpop.f32.mrb[18].mxu1 }
 0x6d4   : > { %v3978_v52 = vpop.f32.mrb[19].mxu1 }
 0x6d5   : > { %v1257_v53 = vpop.f32.mrb[28].mxu0 }
 0x6d6   : > { %v1313_v54 = vadd.f32 %v1312_v49, %v1257_v53  ;;  %v3983_v55 = vpop.f32.mrb[29].mxu0 }
 0x6d7   : > { %v1260_v57 = vpop.f32.mrb[30].mxu0 }
 0x6d8   : > { %v3984_v58 = vpop.f32.mrb[31].mxu0 }
 0x6d9   : > { %v1306_v60 = vpop.f32.mrb[20].mxu1 }
 0x6da   : > { %v4719_v61 = vadd.f32 %v1313_v54, %v1306_v60  ;;  %v3989_v59 = vpop.f32.mrb[21].mxu1 }
 0x6db   : > { %v1309_v62 = vpop.f32.mrb[22].mxu1 }
 0x6dc   : > { %v3990_v63 = vpop.f32.mrb[23].mxu1 }
 0x6dd   : > { %v1386_v4 = vpop.f32.mrb[32].mxu0  ;;  %v4747_v63 = vpack.c.bf16 %v4581_v31, %v4581_v31 }
 0x6de   : > { %v1387_v6 = vadd.f32 %v1386_v4, %v4589_v36  ;;  %v3995_v7 = vpop.f32.mrb[33].mxu0 }
 0x6df   : > { %v1389_v8 = vpop.f32.mrb[34].mxu0 }
 0x6e0   : > { %v3996_v9 = vpop.f32.mrb[35].mxu0  ;;  %v1539_v10 = vsel %vm878_vm5, %v1387_v6, -inf }
 0x6e1   : > { %1540 = vmax.xlane.f32.xlu1 %v1539_v10 }
 0x6e2   : > { %v1435_v12 = vpop.f32.mrb[24].mxu1 }
 0x6e3   : > { %v1436_v13 = vadd.f32 %v1435_v12, %v4589_v36  ;;  %v4001_v14 = vpop.f32.mrb[25].mxu1 }
 0x6e4   : > { %v1438_v15 = vpop.f32.mrb[26].mxu1 }
 0x6e5   : > { %v4002_v16 = vpop.f32.mrb[27].mxu1  ;;  %v1484_v17 = vpop.f32.mrb[36].mxu0  ;;  %v1542_v18 = vsel %vm878_vm5, %v1436_v13, -inf }
 0x6e6   : > { %v1485_v19 = vadd.f32 %v1484_v17, %v4589_v36  ;;  %1543 = vmax.xlane.f32.xlu0 %v1542_v18  ;;  %v4007_v20 = vpop.f32.mrb[37].mxu0 }
 0x6e7   : > { %v1487_v23 = vpop.f32.mrb[38].mxu0 }
 0x6e8   : > { %v4008_v24 = vpop.f32.mrb[39].mxu0  ;;  %v1545_v25 = vsel %vm878_vm5, %v1485_v19, -inf }
 0x6ea   : > { %1546 = vmax.xlane.f32.xlu0 %v1545_v25  ;;  %v1533_v26 = vpop.f32.mrb[28].mxu1 }
 0x6eb   : > { %v1534_v27 = vadd.f32 %v1533_v26, %v4589_v36  ;;  %v4013_v29 = vpop.f32.mrb[29].mxu1 }
 0x6ec   : > { %v1536_v30 = vpop.f32.mrb[30].mxu1 }
 0x6ed   : > { %v4014_v35 = vpop.f32.mrb[31].mxu1  ;;  %v1548_v37 = vsel %vm878_vm5, %v1534_v27, -inf }
 0x6ee   : > { %1549 = vmax.xlane.f32.xlu0 %v1548_v37 }
 0x6f2   : > { %1330 = vrot.lane.b32.xlu1 %v4535_v45, %s4381_s20 }
 0x76e   : > { %v1541_v43 = vpop.xlane.xlu1 %1540 }
 0x76f   : > { %v1551_v38 = vsub.f32 %v1387_v6, %v1541_v43 }
 0x771   : > { %v1555_v39 = vmul.f32 1.442695, %v1551_v38 }
 0x772   : > { %v1331_v40 = vpop.permute.xlu1 %1330 }
 0x773   : > { %4295 = vpow2.f32 %v1555_v39  ;;  %v1340_v41 = vpack.c.bf16 %v1331_v40, %v1331_v40  ;;  %v1544_v28 = vpop.xlane.xlu0 %1543 }
 0x774   : > { %v1552_v42 = vsub.f32 %v1436_v13, %v1544_v28 }
 0x775   : > { %v1637_v44 = vsel %vm930_vm3, %v1340_v41, 0 }
 0x776   : > { %v1557_v46 = vmul.f32 1.442695, %v1552_v42  ;;  %4022 = vmatpush3.bf16.msra.mxu1 %v1637_v44 }
 0x777   : > { %v1547_v47 = vpop.xlane.xlu0 %1546  ;;  %4033 = vmatprep.subr.bf16.mxu1 %v4383_v56 }
 0x778   : > { %4297 = vpow2.f32 %v1557_v46  ;;  %v1553_v48 = vsub.f32 %v1485_v19, %v1547_v47 }
 0x77a   : > { %v1559_v49 = vmul.f32 1.442695, %v1553_v48 }
 0x77b   : > { %v1550_v50 = vpop.xlane.xlu0 %1549 }
 0x77c   : > { %4299 = vpow2.f32 %v1559_v49  ;;  %v1554_v51 = vsub.f32 %v1534_v27, %v1550_v50 }
 0x77d   : > { %v4296_v52 = vpop.eup %4295 }
 0x77e   : > { %v1561_v53 = vmul.f32 1.442695, %v1554_v51  ;;  %v1563_v54 = vsel %vm878_vm5, %v4296_v52, 0.0 }
 0x77f   : > { %1564 = vadd.xlane.f32.xlu1 %v1563_v54 }
 0x780   : > { %4301 = vpow2.f32 %v1561_v53 }
 0x782   : > { %v4298_v55 = vpop.eup %4297 }
 0x783   : > { %v1566_v57 = vsel %vm878_vm5, %v4298_v55, 0.0 }
 0x784   : > { %1567 = vadd.xlane.f32.xlu0 %v1566_v57 }
 0x786   : > { %v4300_v58 = vpop.eup %4299 }
 0x787   : > { %v1569_v60 = vsel %vm878_vm5, %v4300_v58, 0.0 }
 0x788   : > { %1570 = vadd.xlane.f32.xlu1 %v1569_v60 }
 0x78a   : > { %v4302_v59 = vpop.eup %4301 }
 0x78b   : > { %v1572_v62 = vsel %vm878_vm5, %v4302_v59, 0.0 }
 0x78c   : > { %1573 = vadd.xlane.f32.xlu0 %v1572_v62 }
 0x799   : > { %1336 = vrot.lane.b32.xlu1 %v4535_v45, %s4382_s21 }
 0x79d   : > { %1951 = vrot.lane.b32.xlu1 %v4581_v31, %s4381_s20 }
 0x7a1   : > { %1954 = vrot.lane.b32.xlu1 %v4581_v31, %s4380_s19 }
 0x7a2   : > { %1333 = vrot.lane.b32.xlu0 %v4535_v45, %s4380_s19 }
 0x7a5   : > { %1979 = vrot.lane.b32.xlu1 %v4747_v63, %s4384_s22 }
 0x7a6   : > { %1957 = vrot.lane.b32.xlu0 %v4581_v31, %s4382_s21 }
 0x80c   : > { %v1565_v4 = vpop.xlane.xlu1 %1564 }
 0x80d   : > { %4303 = vrcp.f32 %v1565_v4 }
 0x811   : > { %v1568_v6 = vpop.xlane.xlu0 %1567 }
 0x812   : > { %4305 = vrcp.f32 %v1568_v6 }
 0x815   : > { %v1571_v7 = vpop.xlane.xlu1 %1570 }
 0x816   : > { %4307 = vrcp.f32 %v1571_v7 }
 0x817   : > { %v4304_v8 = vpop.eup %4303 }
 0x818   : > { %v1579_v9 = vmul.f32 %v4304_v8, %v4296_v52 }
 0x819   : > { %v1337_v10 = vpop.permute.xlu1 %1336  ;;  %v1574_v45 = vpop.xlane.xlu0 %1573 }
 0x81a   : > { %4309 = vrcp.f32 %v1574_v45  ;;  %v1583_v12 = vpack.c.bf16 %v1579_v9, %v1579_v9  ;;  %v1342_v15 = vpack.c.bf16 %v1337_v10, %v1337_v10  ;;  %v1974_v45 = vpack.c.bf16 %v4583_v32, %v4583_v32 }
 0x81c   : > { %v4306_v13 = vpop.eup %4305  ;;  %4018 = vmatmul.mubr.msk.bf16.vlgmr.msra.gmra.mrb[40].mxu0 %vm878_vm5, %v1583_v12  ;;  %v1729_v25 = vsel %vm930_vm3, %v1342_v15, 0 }
 0x81d   : > { %v1580_v14 = vmul.f32 %v4306_v13, %v4298_v55  ;;  %v1952_v16 = vpop.permute.xlu1 %1951  ;;  %v1334_v17 = vpop.permute.xlu0 %1333  ;;  %4029 = vmatprep.mubr.msk.bf16.mxu0 %vm4385_vm1, %v4383_v56 }
 0x81e   : > { %v4756_v31 = vpack.c.bf16 %v1952_v16, %v1952_v16  ;;  %v1341_v18 = vpack.c.bf16 %v1334_v17, %v1334_v17 }
 0x81f   : > { %v1584_v19 = vpack.c.bf16 %v1580_v14, %v1580_v14 }
 0x820   : > { %v4308_v20 = vpop.eup %4307  ;;  %v1683_v23 = vsel %vm930_vm3, %v1341_v18, 0  ;;  %2028 = vrot.lane.b32.xlu0 %v4756_v31, %s4384_s22 }
 0x821   : > { %v1581_v24 = vmul.f32 %v4308_v20, %v4300_v58  ;;  %v1955_v26 = vpop.permute.xlu1 %1954  ;;  %4024 = vmatmul.mubr.msk.bf16.vlgmr.msra.gmra.mrb[32].mxu1 %vm878_vm5, %v1584_v19  ;;  %4028 = vmatpush3.bf16.msra.mxu0 %v1683_v23  ;;  %v1958_v27 = vpop.permute.xlu0 %1957 }
 0x822   : > { %v4763_v29 = vpack.c.bf16 %v1955_v26, %v1955_v26  ;;  %4034 = vmatpush3.bf16.msra.mxu1 %v1729_v25  ;;  %v4765_v30 = vpack.c.bf16 %v1958_v27, %v1958_v27  ;;  %4035 = vmatprep.mubr.msk.bf16.mxu1 %vm4385_vm1, %v4383_v56 }
 0x823   : > { %v1585_v35 = vpack.c.bf16 %v1581_v24, %v1581_v24  ;;  %4039 = vmatprep.subr.bf16.mxu0 %v4383_v56  ;;  %4045 = vmatprep.subr.bf16.mxu1 %v4383_v56 }
 0x824   : > { %v4310_v37 = vpop.eup %4309  ;;  %2077 = vrot.lane.b32.xlu1 %v4763_v29, %s4384_s22  ;;  %2126 = vrot.lane.b32.xlu0 %v4765_v30, %s4384_s22 }
 0x825   : > { %v1582_v43 = vmul.f32 %v4310_v37, %v4302_v59  ;;  %4030 = vmatmul.mubr.msk.bf16.vlgmr.msra.gmra.mrb[44].mxu0 %vm878_vm5, %v1585_v35  ;;  %v1980_v50 = vpop.permute.xlu1 %1979 }
 0x826   : > { %4040 = vmatpush3.bf16.msra.mxu0 %v4654_v0  ;;  %4041 = vmatprep.mubr.msk.bf16.mxu0 %vm4385_vm1, %v4383_v56  ;;  %v1985_v55 = vsel %vm684_vm2, %v1980_v50, 0 }
 0x827   : > { %v1586_v38 = vpack.c.bf16 %v1582_v43, %v1582_v43  ;;  %4051 = vmatprep.subr.bf16.mxu0 %v4383_v56 }
 0x829   : > { %4036 = vmatmul.mubr.msk.bf16.vlgmr.msra.gmra.mrb[36].mxu1 %vm878_vm5, %v1586_v38 }
 0x82a   : > { %4046 = vmatpush3.bf16.msra.mxu1 %v4661_v3  ;;  %4047 = vmatprep.mubr.msk.bf16.mxu1 %vm4385_vm1, %v4383_v56 }
 0x82b   : > { %4057 = vmatprep.subr.bf16.mxu1 %v4383_v56 }
 0x892   : > { %v2029_v60 = vpop.permute.xlu0 %2028 }
 0x893   : > { %v2034_v7 = vsel %vm684_vm2, %v2029_v60, 0 }
 0x896   : > { %v2078_v8 = vpop.permute.xlu1 %2077  ;;  %v2127_v10 = vpop.permute.xlu0 %2126 }
 0x897   : > { %v2083_v9 = vsel %vm684_vm2, %v2078_v8, 0  ;;  %v2132_v12 = vsel %vm684_vm2, %v2127_v10, 0 }
 0x8ef   : > { %v1627_v39 = vpop.f32.mrb[40].mxu0 }
 0x8f0   : > { %v1771_v40 = vpack.c.bf16 %v1627_v39, %v1627_v39  ;;  %v4019_v41 = vpop.f32.mrb[41].mxu0 }
 0x8f1   : > { %v1630_v28 = vpop.f32.mrb[42].mxu0 }
 0x8f2   : > { %v4020_v42 = vpop.f32.mrb[43].mxu0  ;;  %4042 = vmatmul.mubr.msk.bf16.vlgmr.msra.gmra.mrb[48].mxu0 %vm684_vm2, %v1771_v40 }
 0x8f3   : > { %4052 = vmatpush3.bf16.msra.mxu0 %v4668_v5  ;;  %4053 = vmatprep.mubr.msk.bf16.mxu0 %vm4385_vm1, %v4383_v56 }
 0x8f4   : > { %v1673_v44 = vpop.f32.mrb[32].mxu1  ;;  %4063 = vmatprep.subr.bf16.mxu0 %v4383_v56 }
 0x8f5   : > { %v1772_v46 = vpack.c.bf16 %v1673_v44, %v1673_v44  ;;  %v4025_v47 = vpop.f32.mrb[33].mxu1 }
 0x8f6   : > { %v1676_v48 = vpop.f32.mrb[34].mxu1 }
 0x8f7   : > { %v4026_v49 = vpop.f32.mrb[35].mxu1  ;;  %4048 = vmatmul.mubr.msk.bf16.vlgmr.msra.gmra.mrb[40].mxu1 %vm684_vm2, %v1772_v46 }
 0x8f8   : > { %4058 = vmatpush3.bf16.msra.mxu1 %v4678_v11  ;;  %v1719_v51 = vpop.f32.mrb[44].mxu0  ;;  %4059 = vmatprep.mubr.msk.bf16.mxu1 %vm4385_vm1, %v4383_v56 }
 0x8f9   : > { %v1773_v52 = vpack.c.bf16 %v1719_v51, %v1719_v51  ;;  %v4031_v53 = vpop.f32.mrb[45].mxu0  ;;  %4069 = vmatprep.subr.bf16.mxu1 %v4383_v56 }
 0x8fa   : > { %v1722_v54 = vpop.f32.mrb[46].mxu0 }
 0x8fb   : > { %v4032_v57 = vpop.f32.mrb[47].mxu0  ;;  %4054 = vmatmul.mubr.msk.bf16.vlgmr.msra.gmra.mrb[52].mxu0 %vm684_vm2, %v1773_v52 }
 0x8fc   : > { %v1765_v58 = vpop.f32.mrb[36].mxu1  ;;  %4064 = vmatpush3.bf16.xpose.msra.mxu0 %v1985_v55  ;;  %4065 = vmatprep.mubr.msk.bf16.mxu0 %vm4385_vm1, %v4383_v56 }
 0x8fd   : > { %v1774_v59 = vpack.c.bf16 %v1765_v58, %v1765_v58  ;;  %v4037_v62 = vpop.f32.mrb[37].mxu1  ;;  %4075 = vmatprep.subr.bf16.mxu0 %v4383_v56 }
 0x8fe   : > { %v1768_v4 = vpop.f32.mrb[38].mxu1 }
 0x8ff   : > { %v4038_v6 = vpop.f32.mrb[39].mxu1  ;;  %4060 = vmatmul.mubr.msk.bf16.vlgmr.msra.gmra.mrb[44].mxu1 %vm684_vm2, %v1774_v59 }
 0x900   : > { %4071 = vmatprep.mubr.msk.bf16.mxu1 %vm4385_vm1, %v4383_v56 }
 0x901   : > { %4070 = vmatpush3.bf16.xpose.msra.mxu1 %v2034_v7 }
 0x902   : > { %4081 = vmatprep.subr.bf16.mxu1 %v4383_v56 }
 0x903   : > { %4066 = vmatmul.mubr.msk.bf16.vlgmr.msra.gmra.mrb[56].mxu0 %vm684_vm2, %v4747_v63  ;;  %v2226_v63 = vsel %vm930_vm3, %v1974_v45, 0 }
 0x904   : > { %4076 = vmatpush3.bf16.xpose.msra.mxu0 %v2083_v9  ;;  %4077 = vmatprep.mubr.msk.bf16.mxu0 %vm4385_vm1, %v4383_v56 }
 0x905   : > { %4087 = vmatprep.subr.bf16.mxu0 %v4383_v56 }
 0x908   : > { %4072 = vmatmul.mubr.msk.bf16.vlgmr.msra.gmra.mrb[48].mxu1 %vm684_vm2, %v4756_v31 }
 0x909   : > { %4082 = vmatpush3.bf16.xpose.msra.mxu1 %v2132_v12  ;;  %4083 = vmatprep.mubr.msk.bf16.mxu1 %vm4385_vm1, %v4383_v56 }
 0x90a   : > { %4093 = vmatprep.subr.bf16.mxu1 %v4383_v56 }
 0x90b   : > { %4078 = vmatmul.mubr.msk.bf16.vlgmr.msra.gmra.mrb[60].mxu0 %vm684_vm2, %v4763_v29 }
 0x90c   : > { %4088 = vmatpush3.bf16.msra.mxu0 %v2226_v63  ;;  %4089 = vmatprep.mubr.msk.bf16.mxu0 %vm4385_vm1, %v4383_v56 }
 0x90d   : > { %4099 = vmatprep.subr.bf16.mxu0 %v4383_v56 }
 0x910   : > { %4084 = vmatmul.mubr.msk.bf16.vlgmr.msra.gmra.mrb[52].mxu1 %vm684_vm2, %v4765_v30 }
 0x911   : > { %4095 = vmatprep.mubr.msk.bf16.mxu1 %vm4385_vm1, %v4383_v56 }
 0x9c5   : > { %v1812_v13 = vpop.f32.mrb[48].mxu0 }
 0x9c6   : > { %v4043_v14 = vpop.f32.mrb[49].mxu0 }
 0x9c7   : > { %v1815_v15 = vpop.f32.mrb[50].mxu0 }
 0x9c8   : > { %v4044_v16 = vpop.f32.mrb[51].mxu0 }
 0x9ca   : > { %v1855_v17 = vpop.f32.mrb[40].mxu1 }
 0x9cb   : > { %v1947_v31 = vadd.f32 %v1855_v17, %v1812_v13  ;;  %v4049_v18 = vpop.f32.mrb[41].mxu1 }
 0x9cc   : > { %v1858_v19 = vpop.f32.mrb[42].mxu1 }
 0x9cd   : > { %v4050_v20 = vpop.f32.mrb[43].mxu1 }
 0x9ce   : > { %v1898_v23 = vpop.f32.mrb[52].mxu0 }
 0x9cf   : > { %v1948_v24 = vadd.f32 %v1947_v31, %v1898_v23  ;;  %v4055_v25 = vpop.f32.mrb[53].mxu0 }
 0x9d0   : > { %v1901_v26 = vpop.f32.mrb[54].mxu0 }
 0x9d1   : > { %v4056_v27 = vpop.f32.mrb[55].mxu0 }
 0x9d2   : > { %v1941_v29 = vpop.f32.mrb[44].mxu1 }
 0x9d3   : > { %v4829_v35 = vadd.f32 %v1948_v24, %v1941_v29  ;;  %v4061_v30 = vpop.f32.mrb[45].mxu1 }
 0x9d4   : > { %v1944_v37 = vpop.f32.mrb[46].mxu1 }
 0x9d5   : > { %v4062_v43 = vpop.f32.mrb[47].mxu1  ;;  %v4857_v37 = vpack.c.bf16 %v4585_v33, %v4585_v33 }
 0x9d6   : > { %v2021_v38 = vpop.f32.mrb[56].mxu0 }
 0x9d7   : > { %v2022_v39 = vadd.f32 %v2021_v38, %v4589_v36  ;;  %v4067_v40 = vpop.f32.mrb[57].mxu0 }
 0x9d8   : > { %v2024_v41 = vpop.f32.mrb[58].mxu0 }
 0x9d9   : > { %v4068_v28 = vpop.f32.mrb[59].mxu0  ;;  %v2174_v42 = vsel %vm878_vm5, %v2022_v39, -inf }
 0x9da   : > { %2175 = vmax.xlane.f32.xlu1 %v2174_v42 }
 0x9db   : > { %v2070_v44 = vpop.f32.mrb[48].mxu1 }
 0x9dc   : > { %v2071_v46 = vadd.f32 %v2070_v44, %v4589_v36  ;;  %v4073_v47 = vpop.f32.mrb[49].mxu1 }
 0x9dd   : > { %v2073_v48 = vpop.f32.mrb[50].mxu1 }
 0x9de   : > { %v4074_v49 = vpop.f32.mrb[51].mxu1  ;;  %v2119_v50 = vpop.f32.mrb[60].mxu0  ;;  %v2177_v51 = vsel %vm878_vm5, %v2071_v46, -inf }
 0x9df   : > { %v2120_v52 = vadd.f32 %v2119_v50, %v4589_v36  ;;  %2178 = vmax.xlane.f32.xlu0 %v2177_v51  ;;  %v4079_v53 = vpop.f32.mrb[61].mxu0 }
 0x9e0   : > { %v2122_v54 = vpop.f32.mrb[62].mxu0 }
 0x9e1   : > { %v4080_v55 = vpop.f32.mrb[63].mxu0  ;;  %v2180_v57 = vsel %vm878_vm5, %v2120_v52, -inf }
 0x9e3   : > { %2181 = vmax.xlane.f32.xlu0 %v2180_v57  ;;  %v2168_v58 = vpop.f32.mrb[52].mxu1 }
 0x9e4   : > { %v2169_v60 = vadd.f32 %v2168_v58, %v4589_v36  ;;  %v4085_v59 = vpop.f32.mrb[53].mxu1 }
 0x9e5   : > { %v2171_v62 = vpop.f32.mrb[54].mxu1 }
 0x9e6   : > { %v4086_v4 = vpop.f32.mrb[55].mxu1  ;;  %v2183_v6 = vsel %vm878_vm5, %v2169_v60, -inf }
 0x9e7   : > { %2184 = vmax.xlane.f32.xlu0 %v2183_v6 }
 0x9eb   : > { %1965 = vrot.lane.b32.xlu1 %v4583_v32, %s4381_s20 }
 0xa67   : > { %v2176_v7 = vpop.xlane.xlu1 %2175 }
 0xa68   : > { %v2186_v8 = vsub.f32 %v2022_v39, %v2176_v7 }
 0xa6a   : > { %v2190_v9 = vmul.f32 1.442695, %v2186_v8 }
 0xa6b   : > { %v1966_v10 = vpop.permute.xlu1 %1965 }
 0xa6c   : > { %4311 = vpow2.f32 %v2190_v9  ;;  %v1975_v45 = vpack.c.bf16 %v1966_v10, %v1966_v10  ;;  %v2179_v12 = vpop.xlane.xlu0 %2178 }
 0xa6d   : > { %v2187_v63 = vsub.f32 %v2071_v46, %v2179_v12 }
 0xa6e   : > { %v2272_v13 = vsel %vm930_vm3, %v1975_v45, 0 }
 0xa6f   : > { %v2192_v14 = vmul.f32 1.442695, %v2187_v63  ;;  %4094 = vmatpush3.bf16.msra.mxu1 %v2272_v13 }
 0xa70   : > { %v2182_v15 = vpop.xlane.xlu0 %2181  ;;  %4105 = vmatprep.subr.bf16.mxu1 %v4383_v56 }
 0xa71   : > { %4313 = vpow2.f32 %v2192_v14  ;;  %v2188_v16 = vsub.f32 %v2120_v52, %v2182_v15 }
 0xa73   : > { %v2194_v17 = vmul.f32 1.442695, %v2188_v16 }
 0xa74   : > { %v2185_v31 = vpop.xlane.xlu0 %2184 }
 0xa75   : > { %4315 = vpow2.f32 %v2194_v17  ;;  %v2189_v18 = vsub.f32 %v2169_v60, %v2185_v31 }
 0xa76   : > { %v4312_v19 = vpop.eup %4311 }
 0xa77   : > { %v2196_v20 = vmul.f32 1.442695, %v2189_v18  ;;  %v2198_v23 = vsel %vm878_vm5, %v4312_v19, 0.0 }
 0xa78   : > { %2199 = vadd.xlane.f32.xlu1 %v2198_v23 }
 0xa79   : > { %4317 = vpow2.f32 %v2196_v20 }
 0xa7b   : > { %v4314_v24 = vpop.eup %4313 }
 0xa7c   : > { %v2201_v25 = vsel %vm878_vm5, %v4314_v24, 0.0 }
 0xa7d   : > { %2202 = vadd.xlane.f32.xlu0 %v2201_v25 }
 0xa7f   : > { %v4316_v26 = vpop.eup %4315 }
 0xa80   : > { %v2204_v27 = vsel %vm878_vm5, %v4316_v26, 0.0 }
 0xa81   : > { %2205 = vadd.xlane.f32.xlu1 %v2204_v27 }
 0xa83   : > { %v4318_v29 = vpop.eup %4317 }
 0xa84   : > { %v2207_v30 = vsel %vm878_vm5, %v4318_v29, 0.0 }
 0xa85   : > { %2208 = vadd.xlane.f32.xlu0 %v2207_v30 }
 0xa92   : > { %1971 = vrot.lane.b32.xlu1 %v4583_v32, %s4382_s21 }
 0xa96   : > { %2586 = vrot.lane.b32.xlu1 %v4585_v33, %s4381_s20 }
 0xa9a   : > { %2589 = vrot.lane.b32.xlu1 %v4585_v33, %s4380_s19 }
 0xa9b   : > { %1968 = vrot.lane.b32.xlu0 %v4583_v32, %s4380_s19 }
 0xa9e   : > { %2614 = vrot.lane.b32.xlu1 %v4857_v37, %s4384_s22 }
 0xa9f   : > { %2592 = vrot.lane.b32.xlu0 %v4585_v33, %s4382_s21 }
 0xb05   : > { %v2200_v43 = vpop.xlane.xlu1 %2199 }
 0xb06   : > { %4319 = vrcp.f32 %v2200_v43 }
 0xb0a   : > { %v2203_v38 = vpop.xlane.xlu0 %2202 }
 0xb0b   : > { %4321 = vrcp.f32 %v2203_v38  ;;  %v2609_v38 = vpack.c.bf16 %v4587_v34, %v4587_v34 }
 0xb0e   : > { %v2206_v39 = vpop.xlane.xlu1 %2205 }
 0xb0f   : > { %4323 = vrcp.f32 %v2206_v39 }
 0xb10   : > { %v4320_v40 = vpop.eup %4319 }
 0xb11   : > { %v2214_v41 = vmul.f32 %v4320_v40, %v4312_v19 }
 0xb12   : > { %v1972_v28 = vpop.permute.xlu1 %1971  ;;  %v2209_v32 = vpop.xlane.xlu0 %2208 }
 0xb13   : > { %4325 = vrcp.f32 %v2209_v32  ;;  %v2218_v42 = vpack.c.bf16 %v2214_v41, %v2214_v41  ;;  %v1977_v47 = vpack.c.bf16 %v1972_v28, %v1972_v28 }
 0xb15   : > { %v4322_v44 = vpop.eup %4321  ;;  %4090 = vmatmul.mubr.msk.bf16.vlgmr.msra.gmra.mrb[64].mxu0 %vm878_vm5, %v2218_v42  ;;  %v2364_v55 = vsel %vm930_vm3, %v1977_v47, 0 }
 0xb16   : > { %v2215_v46 = vmul.f32 %v4322_v44, %v4314_v24  ;;  %v2587_v48 = vpop.permute.xlu1 %2586  ;;  %v1969_v49 = vpop.permute.xlu0 %1968  ;;  %4101 = vmatprep.mubr.msk.bf16.mxu0 %vm4385_vm1, %v4383_v56 }
 0xb17   : > { %v4866_v33 = vpack.c.bf16 %v2587_v48, %v2587_v48  ;;  %v1976_v50 = vpack.c.bf16 %v1969_v49, %v1969_v49 }
 0xb18   : > { %v2219_v51 = vpack.c.bf16 %v2215_v46, %v2215_v46 }
 0xb19   : > { %v4324_v52 = vpop.eup %4323  ;;  %v2318_v53 = vsel %vm930_vm3, %v1976_v50, 0  ;;  %2663 = vrot.lane.b32.xlu0 %v4866_v33, %s4384_s22 }
 0xb1a   : > { %v2216_v54 = vmul.f32 %v4324_v52, %v4316_v26  ;;  %v2590_v57 = vpop.permute.xlu1 %2589  ;;  %4096 = vmatmul.mubr.msk.bf16.vlgmr.msra.gmra.mrb[56].mxu1 %vm878_vm5, %v2219_v51  ;;  %4100 = vmatpush3.bf16.msra.mxu0 %v2318_v53  ;;  %v2593_v58 = vpop.permute.xlu0 %2592 }
 0xb1b   : > { %v4873_v60 = vpack.c.bf16 %v2590_v57, %v2590_v57  ;;  %4106 = vmatpush3.bf16.msra.mxu1 %v2364_v55  ;;  %v4875_v59 = vpack.c.bf16 %v2593_v58, %v2593_v58  ;;  %4107 = vmatprep.mubr.msk.bf16.mxu1 %vm4385_vm1, %v4383_v56 }
 0xb1c   : > { %v2220_v62 = vpack.c.bf16 %v2216_v54, %v2216_v54  ;;  %4111 = vmatprep.subr.bf16.mxu0 %v4383_v56  ;;  %4117 = vmatprep.subr.bf16.mxu1 %v4383_v56 }
 0xb1d   : > { %v4326_v4 = vpop.eup %4325  ;;  %2712 = vrot.lane.b32.xlu1 %v4873_v60, %s4384_s22  ;;  %2761 = vrot.lane.b32.xlu0 %v4875_v59, %s4384_s22 }
 0xb1e   : > { %v2217_v6 = vmul.f32 %v4326_v4, %v4318_v29  ;;  %4102 = vmatmul.mubr.msk.bf16.vlgmr.msra.gmra.mrb[68].mxu0 %vm878_vm5, %v2220_v62  ;;  %v2615_v15 = vpop.permute.xlu1 %2614 }
 0xb1f   : > { %4112 = vmatpush3.bf16.msra.mxu0 %v4654_v0  ;;  %4113 = vmatprep.mubr.msk.bf16.mxu0 %vm4385_vm1, %v4383_v56  ;;  %v2620_v18 = vsel %vm684_vm2, %v2615_v15, 0 }
 0xb20   : > { %v2221_v7 = vpack.c.bf16 %v2217_v6, %v2217_v6  ;;  %4123 = vmatprep.subr.bf16.mxu0 %v4383_v56 }
 0xb22   : > { %4108 = vmatmul.mubr.msk.bf16.vlgmr.msra.gmra.mrb[60].mxu1 %vm878_vm5, %v2221_v7 }
 0xb23   : > { %4118 = vmatpush3.bf16.msra.mxu1 %v4661_v3  ;;  %4119 = vmatprep.mubr.msk.bf16.mxu1 %vm4385_vm1, %v4383_v56 }
 0xb24   : > { %4129 = vmatprep.subr.bf16.mxu1 %v4383_v56 }
 0xb8f   : > { %v2713_v29 = vpop.permute.xlu1 %2712 }
 0xb90   : > { %v2718_v30 = vsel %vm684_vm2, %v2713_v29, 0 }
 0xbe8   : > { %v2262_v8 = vpop.f32.mrb[64].mxu0 }
 0xbe9   : > { %v2406_v9 = vpack.c.bf16 %v2262_v8, %v2262_v8  ;;  %v4091_v10 = vpop.f32.mrb[65].mxu0 }
 0xbea   : > { %v2265_v45 = vpop.f32.mrb[66].mxu0 }
 0xbeb   : > { %v4092_v0 = vpop.f32.mrb[67].mxu0  ;;  %4114 = vmatmul.mubr.msk.bf16.vlgmr.msra.gmra.mrb[72].mxu0 %vm684_vm2, %v2406_v9 }
 0xbec   : > { %4124 = vmatpush3.bf16.msra.mxu0 %v4668_v5  ;;  %4125 = vmatprep.mubr.msk.bf16.mxu0 %vm4385_vm1, %v4383_v56 }
 0xbed   : > { %v2308_v12 = vpop.f32.mrb[56].mxu1  ;;  %4135 = vmatprep.subr.bf16.mxu0 %v4383_v56 }
 0xbee   : > { %v2407_v3 = vpack.c.bf16 %v2308_v12, %v2308_v12  ;;  %v4097_v63 = vpop.f32.mrb[57].mxu1 }
 0xbef   : > { %v2311_v13 = vpop.f32.mrb[58].mxu1 }
 0xbf0   : > { %v4098_v14 = vpop.f32.mrb[59].mxu1  ;;  %4120 = vmatmul.mubr.msk.bf16.vlgmr.msra.gmra.mrb[64].mxu1 %vm684_vm2, %v2407_v3 }
 0xbf1   : > { %4130 = vmatpush3.bf16.msra.mxu1 %v4678_v11  ;;  %v2354_v16 = vpop.f32.mrb[68].mxu0  ;;  %4131 = vmatprep.mubr.msk.bf16.mxu1 %vm4385_vm1, %v4383_v56  ;;  %v2664_v11 = vpop.permute.xlu0 %2663 }
 0xbf2   : > { %v2408_v5 = vpack.c.bf16 %v2354_v16, %v2354_v16  ;;  %v4103_v17 = vpop.f32.mrb[69].mxu0  ;;  %4141 = vmatprep.subr.bf16.mxu1 %v4383_v56  ;;  %v2669_v27 = vsel %vm684_vm2, %v2664_v11, 0 }
 0xbf3   : > { %v2357_v31 = vpop.f32.mrb[70].mxu0 }
 0xbf4   : > { %v4104_v19 = vpop.f32.mrb[71].mxu0  ;;  %4126 = vmatmul.mubr.msk.bf16.vlgmr.msra.gmra.mrb[76].mxu0 %vm684_vm2, %v2408_v5 }
 0xbf5   : > { %v2400_v20 = vpop.f32.mrb[60].mxu1  ;;  %4136 = vmatpush3.bf16.xpose.msra.mxu0 %v2620_v18  ;;  %4137 = vmatprep.mubr.msk.bf16.mxu0 %vm4385_vm1, %v4383_v56  ;;  %v2762_v43 = vpop.permute.xlu0 %2761 }
 0xbf6   : > { %v2409_v23 = vpack.c.bf16 %v2400_v20, %v2400_v20  ;;  %v4109_v24 = vpop.f32.mrb[61].mxu1  ;;  %4147 = vmatprep.subr.bf16.mxu0 %v4383_v56  ;;  %v2767_v39 = vsel %vm684_vm2, %v2762_v43, 0 }
 0xbf7   : > { %v2403_v25 = vpop.f32.mrb[62].mxu1 }
 0xbf8   : > { %v4110_v26 = vpop.f32.mrb[63].mxu1  ;;  %4132 = vmatmul.mubr.msk.bf16.vlgmr.msra.gmra.mrb[68].mxu1 %vm684_vm2, %v2409_v23 }
 0xbf9   : > { %4143 = vmatprep.mubr.msk.bf16.mxu1 %vm4385_vm1, %v4383_v56 }
 0xbfa   : > { %4142 = vmatpush3.bf16.xpose.msra.mxu1 %v2669_v27 }
 0xbfb   : > { %4153 = vmatprep.subr.bf16.mxu1 %v4383_v56 }
 0xbfc   : > { %4138 = vmatmul.mubr.msk.bf16.vlgmr.msra.gmra.mrb[80].mxu0 %vm684_vm2, %v4857_v37  ;;  %v2861_v37 = vsel %vm930_vm3, %v2609_v38, 0 }
 0xbfd   : > { %4148 = vmatpush3.bf16.xpose.msra.mxu0 %v2718_v30  ;;  %4149 = vmatprep.mubr.msk.bf16.mxu0 %vm4385_vm1, %v4383_v56 }
 0xbfe   : > { %4159 = vmatprep.subr.bf16.mxu0 %v4383_v56 }
 0xc01   : > { %4144 = vmatmul.mubr.msk.bf16.vlgmr.msra.gmra.mrb[72].mxu1 %vm684_vm2, %v4866_v33 }
 0xc02   : > { %4154 = vmatpush3.bf16.xpose.msra.mxu1 %v2767_v39  ;;  %4155 = vmatprep.mubr.msk.bf16.mxu1 %vm4385_vm1, %v4383_v56 }
 0xc03   : > { %4165 = vmatprep.subr.bf16.mxu1 %v4383_v56 }
 0xc04   : > { %4150 = vmatmul.mubr.msk.bf16.vlgmr.msra.gmra.mrb[84].mxu0 %vm684_vm2, %v4873_v60 }
 0xc05   : > { %4160 = vmatpush3.bf16.msra.mxu0 %v2861_v37  ;;  %4161 = vmatprep.mubr.msk.bf16.mxu0 %vm4385_vm1, %v4383_v56 }
 0xc06   : > { %4171 = vmatprep.subr.bf16.mxu0 %v4383_v56 }
 0xc09   : > { %4156 = vmatmul.mubr.msk.bf16.vlgmr.msra.gmra.mrb[76].mxu1 %vm684_vm2, %v4875_v59 }
 0xc0a   : > { %4167 = vmatprep.mubr.msk.bf16.mxu1 %vm4385_vm1, %v4383_v56 }
 0xcbe   : > { %v2447_v40 = vpop.f32.mrb[72].mxu0 }
 0xcbf   : > { %v4115_v41 = vpop.f32.mrb[73].mxu0 }
 0xcc0   : > { %v2450_v28 = vpop.f32.mrb[74].mxu0 }
 0xcc1   : > { %v4116_v32 = vpop.f32.mrb[75].mxu0 }
 0xcc3   : > { %v2490_v42 = vpop.f32.mrb[64].mxu1 }
 0xcc4   : > { %v2582_v44 = vadd.f32 %v2490_v42, %v2447_v40  ;;  %v4121_v46 = vpop.f32.mrb[65].mxu1 }
 0xcc5   : > { %v2493_v47 = vpop.f32.mrb[66].mxu1 }
 0xcc6   : > { %v4122_v48 = vpop.f32.mrb[67].mxu1 }
 0xcc7   : > { %v2533_v49 = vpop.f32.mrb[76].mxu0 }
 0xcc8   : > { %v2583_v33 = vadd.f32 %v2582_v44, %v2533_v49  ;;  %v4127_v50 = vpop.f32.mrb[77].mxu0 }
 0xcc9   : > { %v2536_v51 = vpop.f32.mrb[78].mxu0  ;;  %v4966_v50 = vld [vmem:[%s5124_s5] ss:$0 sm:$0xff] }
 0xcca   : > { %v4128_v52 = vpop.f32.mrb[79].mxu0 }
 0xccb   : > { %v2576_v53 = vpop.f32.mrb[68].mxu1  ;;  %v3221_v52 = vadd.f32 %v4483_v2, %v4829_v35 }
 0xccc   : > { %v4939_v54 = vadd.f32 %v2583_v33, %v2576_v53  ;;  %v4133_v55 = vpop.f32.mrb[69].mxu1  ;;  %v3220_v33 = vadd.f32 %v4481_v1, %v4719_v61 }
 0xccd   : > { %v2579_v57 = vpop.f32.mrb[70].mxu1  ;;  %v4974_v53 = vadd.f32 %v4966_v50, %v3221_v52 }
 0xcce   : > { %v4134_v58 = vpop.f32.mrb[71].mxu1  ;;  %v4969_v51 = vadd.f32 %v4966_v50, %v3220_v33 }
 0xccf   : > { %v2656_v60 = vpop.f32.mrb[80].mxu0  ;;  %v3240_v55 = vsel %vm482_vm0, %v4974_v53, 0.0 }
 0xcd0   : > { %v2657_v59 = vadd.f32 %v2656_v60, %v4589_v36  ;;  %v4139_v62 = vpop.f32.mrb[81].mxu0  ;;  %v3237_v1 = vsel %vm482_vm0, %v4969_v51, 0.0 }
 0xcd1   : > { %v2659_v4 = vpop.f32.mrb[82].mxu0 }
 0xcd2   : > { %v4140_v6 = vpop.f32.mrb[83].mxu0  ;;  %v2809_v7 = vsel %vm878_vm5, %v2657_v59, -inf }
 0xcd3   : > { %2810 = vmax.xlane.f32.xlu1 %v2809_v7 }
 0xcd4   : > { %v2705_v8 = vpop.f32.mrb[72].mxu1 }
 0xcd5   : > { %v2706_v9 = vadd.f32 %v2705_v8, %v4589_v36  ;;  %v4145_v10 = vpop.f32.mrb[73].mxu1 }
 0xcd6   : > { %v2708_v45 = vpop.f32.mrb[74].mxu1 }
 0xcd7   : > { %v4146_v0 = vpop.f32.mrb[75].mxu1  ;;  %v2754_v12 = vpop.f32.mrb[84].mxu0  ;;  %v2812_v3 = vsel %vm878_vm5, %v2706_v9, -inf }
 0xcd8   : > { %v2755_v63 = vadd.f32 %v2754_v12, %v4589_v36  ;;  %2813 = vmax.xlane.f32.xlu0 %v2812_v3  ;;  %v4151_v13 = vpop.f32.mrb[85].mxu0 }
 0xcd9   : > { %v2757_v14 = vpop.f32.mrb[86].mxu0 }
 0xcda   : > { %v4152_v15 = vpop.f32.mrb[87].mxu0  ;;  %v2815_v16 = vsel %vm878_vm5, %v2755_v63, -inf }
 0xcdb   : > { %v4367_v15 = vld [vmem:[%s5123_s4] sm:$0xff]  }
 0xcdc   : > { %2816 = vmax.xlane.f32.xlu0 %v2815_v16  ;;  %v2803_v5 = vpop.f32.mrb[76].mxu1 }
 0xcdd   : > { %v2804_v17 = vadd.f32 %v2803_v5, %v4589_v36  ;;  %v4157_v31 = vpop.f32.mrb[77].mxu1  ;;  %v4368_v5 = vld [vmem:[%s5123_s4 + $0x8] sm:$0xff]  }
 0xcde   : > { %v2806_v18 = vpop.f32.mrb[78].mxu1 }
 0xcdf   : > { %v4158_v19 = vpop.f32.mrb[79].mxu1  ;;  %v2818_v20 = vsel %vm878_vm5, %v2804_v17, -inf }
 0xce0   : > { %2819 = vmax.xlane.f32.xlu0 %v2818_v20 }
 0xce4   : > { %2600 = vrot.lane.b32.xlu1 %v4587_v34, %s4381_s20 }
 0xd60   : > { %v2811_v11 = vpop.xlane.xlu1 %2810 }
 0xd61   : > { %v2821_v23 = vsub.f32 %v2657_v59, %v2811_v11 }
 0xd63   : > { %v2825_v24 = vmul.f32 1.442695, %v2821_v23 }
 0xd64   : > { %v2601_v25 = vpop.permute.xlu1 %2600 }
 0xd65   : > { %4327 = vpow2.f32 %v2825_v24  ;;  %v2610_v26 = vpack.c.bf16 %v2601_v25, %v2601_v25  ;;  %v2814_v27 = vpop.xlane.xlu0 %2813 }
 0xd66   : > { %v2822_v29 = vsub.f32 %v2706_v9, %v2814_v27 }
 0xd67   : > { %v2907_v30 = vsel %vm930_vm3, %v2610_v26, 0 }
 0xd68   : > { %v2827_v36 = vmul.f32 1.442695, %v2822_v29  ;;  %4166 = vmatpush3.bf16.msra.mxu1 %v2907_v30 }
 0xd69   : > { %v2817_v43 = vpop.xlane.xlu0 %2816  ;;  %4177 = vmatprep.subr.bf16.mxu1 %v4383_v56 }
 0xd6a   : > { %4329 = vpow2.f32 %v2827_v36  ;;  %v2823_v38 = vsub.f32 %v2755_v63, %v2817_v43 }
 0xd6c   : > { %v2829_v39 = vmul.f32 1.442695, %v2823_v38 }
 0xd6d   : > { %v2820_v37 = vpop.xlane.xlu0 %2819 }
 0xd6e   : > { %4331 = vpow2.f32 %v2829_v39  ;;  %v2824_v40 = vsub.f32 %v2804_v17, %v2820_v37  ;;  %v4369_v39 = vld [vmem:[%s5123_s4 + $0x10] sm:$0xff]  }
 0xd6f   : > { %v4328_v41 = vpop.eup %4327 }
 0xd70   : > { %v2831_v28 = vmul.f32 1.442695, %v2824_v40  ;;  %v2833_v32 = vsel %vm878_vm5, %v4328_v41, 0.0 }
 0xd71   : > { %2834 = vadd.xlane.f32.xlu1 %v2833_v32 }
 0xd72   : > { %4333 = vpow2.f32 %v2831_v28 }
 0xd74   : > { %v4330_v42 = vpop.eup %4329 }
 0xd75   : > { %v2836_v44 = vsel %vm878_vm5, %v4330_v42, 0.0 }
 0xd76   : > { %2837 = vadd.xlane.f32.xlu0 %v2836_v44  ;;  %v4370_v44 = vld [vmem:[%s5123_s4 + $0x18] sm:$0xff]  }
 0xd78   : > { %v4332_v46 = vpop.eup %4331 }
 0xd79   : > { %v2839_v47 = vsel %vm878_vm5, %v4332_v46, 0.0 }
 0xd7a   : > { %2840 = vadd.xlane.f32.xlu1 %v2839_v47 }
 0xd7c   : > { %v4334_v48 = vpop.eup %4333 }
 0xd7d   : > { %v2842_v49 = vsel %vm878_vm5, %v4334_v48, 0.0 }
 0xd7e   : > { %2843 = vadd.xlane.f32.xlu0 %v2842_v49 }
 0xd8b   : > { %2606 = vrot.lane.b32.xlu1 %v4587_v34, %s4382_s21 }
 0xd94   : > { %2603 = vrot.lane.b32.xlu0 %v4587_v34, %s4380_s19  ;;  %v3222_v34 = vadd.f32 %v4508_v22, %v4939_v54 }
 0xd96   : > { %v4981_v61 = vadd.f32 %v4966_v50, %v3222_v34 }
 0xd98   : > { %v3243_v2 = vsel %vm482_vm0, %v4981_v61, 0.0 }
 0xdaf   : > { %3238 = vadd.xlane.f32.xlu1 %v3237_v1 }
 0xdb3   : > { %3241 = vadd.xlane.f32.xlu0 %v3240_v55 }
 0xdb7   : > { %3244 = vadd.xlane.f32.xlu0 %v3243_v2 }
 0xdfe   : > { %v2835_v35 = vpop.xlane.xlu1 %2834 }
 0xdff   : > { %4335 = vrcp.f32 %v2835_v35 }
 0xe03   : > { %v2838_v57 = vpop.xlane.xlu0 %2837 }
 0xe04   : > { %4337 = vrcp.f32 %v2838_v57 }
 0xe07   : > { %v2841_v22 = vpop.xlane.xlu1 %2840 }
 0xe08   : > { %4339 = vrcp.f32 %v2841_v22 }
 0xe09   : > { %v4336_v54 = vpop.eup %4335 }
 0xe0a   : > { %v2849_v58 = vmul.f32 %v4336_v54, %v4328_v41 }
 0xe0b   : > { %v2844_v60 = vpop.xlane.xlu0 %2843  ;;  %v2607_v59 = vpop.permute.xlu1 %2606 }
 0xe0c   : > { %4341 = vrcp.f32 %v2844_v60  ;;  %v2853_v62 = vpack.c.bf16 %v2849_v58, %v2849_v58  ;;  %v2612_v7 = vpack.c.bf16 %v2607_v59, %v2607_v59 }
 0xe0e   : > { %v4338_v4 = vpop.eup %4337  ;;  %4162 = vmatmul.mubr.msk.bf16.vlgmr.msra.gmra.mrb[88].mxu0 %vm878_vm5, %v2853_v62  ;;  %v2999_v3 = vsel %vm930_vm3, %v2612_v7, 0 }
 0xe0f   : > { %v2850_v6 = vmul.f32 %v4338_v4, %v4330_v42  ;;  %v2604_v8 = vpop.permute.xlu0 %2603  ;;  %4173 = vmatprep.mubr.msk.bf16.mxu0 %vm4385_vm1, %v4383_v56 }
 0xe10   : > { %v2611_v9 = vpack.c.bf16 %v2604_v8, %v2604_v8 }
 0xe11   : > { %v2854_v10 = vpack.c.bf16 %v2850_v6, %v2850_v6 }
 0xe12   : > { %v4340_v45 = vpop.eup %4339  ;;  %v2953_v0 = vsel %vm930_vm3, %v2611_v9, 0 }
 0xe13   : > { %v2851_v12 = vmul.f32 %v4340_v45, %v4332_v46  ;;  %4168 = vmatmul.mubr.msk.bf16.vlgmr.msra.gmra.mrb[80].mxu1 %vm878_vm5, %v2854_v10  ;;  %4172 = vmatpush3.bf16.msra.mxu0 %v2953_v0 }
 0xe14   : > { %4178 = vmatpush3.bf16.msra.mxu1 %v2999_v3  ;;  %4179 = vmatprep.mubr.msk.bf16.mxu1 %vm4385_vm1, %v4383_v56 }
 0xe15   : > { %v2855_v63 = vpack.c.bf16 %v2851_v12, %v2851_v12  ;;  %4183 = vmatprep.subr.bf16.mxu0 %v4383_v56  ;;  %4189 = vmatprep.subr.bf16.mxu1 %v4383_v56 }
 0xe16   : > { %v4342_v13 = vpop.eup %4341 }
 0xe17   : > { %v2852_v14 = vmul.f32 %v4342_v13, %v4334_v48  ;;  %4174 = vmatmul.mubr.msk.bf16.vlgmr.msra.gmra.mrb[92].mxu0 %vm878_vm5, %v2855_v63 }
 0xe18   : > { %4184 = vmatpush3.bf16.msra.mxu0 %v4367_v15  ;;  %4185 = vmatprep.mubr.msk.bf16.mxu0 %vm4385_vm1, %v4383_v56 }
 0xe19   : > { %v2856_v16 = vpack.c.bf16 %v2852_v14, %v2852_v14  ;;  %4195 = vmatprep.subr.bf16.mxu0 %v4383_v56 }
 0xe1b   : > { %4180 = vmatmul.mubr.msk.bf16.vlgmr.msra.gmra.mrb[84].mxu1 %vm878_vm5, %v2856_v16 }
 0xe1c   : > { %4190 = vmatpush3.bf16.msra.mxu1 %v4368_v5  ;;  %4191 = vmatprep.mubr.msk.bf16.mxu1 %vm4385_vm1, %v4383_v56 }
 0xe1d   : > { %4201 = vmatprep.subr.bf16.mxu1 %v4383_v56 }
 0xe3c   : > { %v3239_v17 = vpop.xlane.xlu1 %3238 }
 0xe3d   : > { %v3249_v31 = vmul.f32 0.03125, %v3239_v17 }
 0xe3f   : > { %v5012_v18 = vsub.f32 %v4969_v51, %v3249_v31 }
 0xe40   : > { %v3242_v19 = vpop.xlane.xlu0 %3241 }
 0xe41   : > { %v3257_v20 = vmul.f32 %v5012_v18, %v5012_v18  ;;  %v3250_v8 = vmul.f32 0.03125, %v3242_v19 }
 0xe43   : > { %v3261_v11 = vsel %vm482_vm0, %v3257_v20, 0.0  ;;  %v3254_v3 = vsub.f32 %v4974_v53, %v3250_v8 }
 0xe44   : > { %3262 = vadd.xlane.f32.xlu0 %v3261_v11  ;;  %v3245_v23 = vpop.xlane.xlu0 %3244 }
 0xe45   : > { %v3251_v24 = vmul.f32 0.03125, %v3245_v23  ;;  %v3258_v16 = vmul.f32 %v3254_v3, %v3254_v3 }
 0xe47   : > { %v5018_v25 = vsub.f32 %v4981_v61, %v3251_v24  ;;  %v3264_v5 = vsel %vm482_vm0, %v3258_v16, 0.0 }
 0xe49   : > { %v3259_v26 = vmul.f32 %v5018_v25, %v5018_v25 }
 0xe4b   : > { %v3267_v27 = vsel %vm482_vm0, %v3259_v26, 0.0 }
 0xe4c   : > { %3268 = vadd.xlane.f32.xlu0 %v3267_v27 }
 0xed1   : > { %v3263_v17 = vpop.xlane.xlu0 %3262 }
 0xed2   : > { %v3273_v31 = vmul.f32 0.03125, %v3263_v17 }
 0xed4   : > { %v3277_v19 = vadd.f32 1e-05, %v3273_v31 }
 0xed6   : > { %4343 = vrsqrt.f32 %v3277_v19 }
 0xee1   : > { %v2897_v29 = vpop.f32.mrb[88].mxu0 }
 0xee2   : > { %v3041_v30 = vpack.c.bf16 %v2897_v29, %v2897_v29  ;;  %v4163_v36 = vpop.f32.mrb[89].mxu0  ;;  %v4344_v29 = vpop.eup %4343 }
 0xee3   : > { %v2900_v43 = vpop.f32.mrb[90].mxu0  ;;  %v3772_v36 = vld [vmem:[%s5125_s6] ss:$0 sm:$0xff] }
 0xee4   : > { %v4164_v38 = vpop.f32.mrb[91].mxu0  ;;  %4186 = vmatmul.mubr.msk.bf16.vlgmr.msra.gmra.mrb[96].mxu0 %vm684_vm2, %v3041_v30  ;;  %v3285_v30 = vmul.f32 %v4344_v29, %v5012_v18  ;;  %v4261_v18 = vld [vmem:[%s5127_s8] sm:$0xff]  }
 0xee5   : > { %4196 = vmatpush3.bf16.msra.mxu0 %v4369_v39  ;;  %4197 = vmatprep.mubr.msk.bf16.mxu0 %vm4385_vm1, %v4383_v56 }
 0xee6   : > { %v2943_v37 = vpop.f32.mrb[80].mxu1  ;;  %v3295_v39 = vmul.f32 %v3772_v36, %v3285_v30  ;;  %4207 = vmatprep.subr.bf16.mxu0 %v4261_v18 }
 0xee7   : > { %v3042_v40 = vpack.c.bf16 %v2943_v37, %v2943_v37  ;;  %v4169_v41 = vpop.f32.mrb[81].mxu1  ;;  %v3773_v37 = vld [vmem:[%s5126_s7] ss:$0 sm:$0xff] }
 0xee8   : > { %v2946_v28 = vpop.f32.mrb[82].mxu1  ;;  %v3305_v41 = vadd.f32 %v3773_v37, %v3295_v39 }
 0xee9   : > { %v4170_v32 = vpop.f32.mrb[83].mxu1  ;;  %4192 = vmatmul.mubr.msk.bf16.vlgmr.msra.gmra.mrb[88].mxu1 %vm684_vm2, %v3042_v40 }
 0xeea   : > { %v2989_v42 = vpop.f32.mrb[92].mxu0  ;;  %4202 = vmatpush3.bf16.msra.mxu1 %v4370_v44  ;;  %4203 = vmatprep.mubr.msk.bf16.mxu1 %vm4385_vm1, %v4383_v56  ;;  %v3269_v44 = vpop.xlane.xlu0 %3268 }
 0xeeb   : > { %v3043_v46 = vpack.c.bf16 %v2989_v42, %v2989_v42  ;;  %v4175_v47 = vpop.f32.mrb[93].mxu0  ;;  %v4262_v42 = vld [vmem:[%s5127_s8 + $0x8] sm:$0xff]  }
 0xeec   : > { %v2992_v48 = vpop.f32.mrb[94].mxu0 }
 0xeed   : > { %v4176_v49 = vpop.f32.mrb[95].mxu0  ;;  %4198 = vmatmul.mubr.msk.bf16.vlgmr.msra.gmra.mrb[100].mxu0 %vm684_vm2, %v3043_v46  ;;  %v3275_v46 = vmul.f32 0.03125, %v3269_v44 }
 0xeee   : > { %v3035_v33 = vpop.f32.mrb[84].mxu1  ;;  %4208 = vmatpush3.bf16.msra.mxu0 %v4261_v18 }
 0xeef   : > { %v3044_v52 = vpack.c.bf16 %v3035_v33, %v3035_v33  ;;  %v4181_v34 = vpop.f32.mrb[85].mxu1  ;;  %4209 = vmatprep.subr.bf16.mxu0 %v4262_v42  ;;  %v3279_v47 = vadd.f32 1e-05, %v3275_v46 }
 0xef0   : > { %v3038_v1 = vpop.f32.mrb[86].mxu1 }
 0xef1   : > { %v4182_v55 = vpop.f32.mrb[87].mxu1  ;;  %4204 = vmatmul.mubr.msk.bf16.vlgmr.msra.gmra.mrb[92].mxu1 %vm684_vm2, %v3044_v52 }
 0xef2   : > { %4210 = vmatpush3.bf16.msra.mxu0 %v4262_v42 }
 0xfb7   : > { %v3082_v2 = vpop.f32.mrb[96].mxu0 }
 0xfb8   : > { %v4187_v35 = vpop.f32.mrb[97].mxu0 }
 0xfb9   : > { %v3085_v57 = vpop.f32.mrb[98].mxu0 }
 0xfba   : > { %v4188_v22 = vpop.f32.mrb[99].mxu0 }
 0xfbc   : > { %v3125_v54 = vpop.f32.mrb[88].mxu1 }
 0xfbd   : > { %v3217_v58 = vadd.f32 %v3125_v54, %v3082_v2  ;;  %v4193_v56 = vpop.f32.mrb[89].mxu1 }
 0xfbe   : > { %v3128_v60 = vpop.f32.mrb[90].mxu1  ;;  %v4264_v56 = vld [vmem:[%s5129_s10 + $0x8] sm:$0xff]  }
 0xfbf   : > { %v4194_v59 = vpop.f32.mrb[91].mxu1  ;;  %v4266_v60 = vld [vmem:[%s5129_s10 + $0x18] sm:$0xff]  }
 0xfc0   : > { %v3168_v62 = vpop.f32.mrb[100].mxu0  ;;  %v4267_v59 = vld [vmem:[%s5129_s10 + $0x20] sm:$0xff]  }
 0xfc1   : > { %v3218_v4 = vadd.f32 %v3217_v58, %v3168_v62  ;;  %v4199_v6 = vpop.f32.mrb[101].mxu0  ;;  %v4263_v58 = vld [vmem:[%s5129_s10] sm:$0xff]   ;;  %v4268_v62 = vld [vmem:[%s5129_s10 + $0x28] sm:$0xff]  }
 0xfc2   : > { %v3171_v7 = vpop.f32.mrb[102].mxu0  ;;  %4215 = vmatprep.subr.bf16.mxu1 %v4263_v58  ;;  %v4270_v6 = vld [vmem:[%s5129_s10 + $0x38] sm:$0xff]  }
 0xfc3   : > { %v4200_v9 = vpop.f32.mrb[103].mxu0  ;;  %4216 = vmatpush3.bf16.msra.mxu1 %v4263_v58  ;;  %v3774_v7 = vld [vmem:[%s5128_s9] ss:$0 sm:$0xff] }
 0xfc4   : > { %v3211_v10 = vpop.f32.mrb[92].mxu1  ;;  %4217 = vmatprep.subr.bf16.mxu1 %v4264_v56 }
 0xfc5   : > { %v3219_v45 = vadd.f32 %v3218_v4, %v3211_v10  ;;  %v4205_v0 = vpop.f32.mrb[93].mxu1  ;;  %v4269_v4 = vld [vmem:[%s5129_s10 + $0x30] sm:$0xff]  }
 0xfc6   : > { %v3214_v12 = vpop.f32.mrb[94].mxu1 }
 0xfc7   : > { %v3223_v63 = vadd.f32 %v4506_v21, %v3219_v45  ;;  %v4206_v13 = vpop.f32.mrb[95].mxu1  ;;  %4218 = vmatpush3.bf16.msra.mxu1 %v4264_v56 }
 0xfc9   : > { %v5040_v14 = vadd.f32 %v4966_v50, %v3223_v63 }
 0xfcb   : > { %v3246_v15 = vsel %vm482_vm0, %v5040_v14, 0.0 }
 0xfcc   : > { %3247 = vadd.xlane.f32.xlu1 %v3246_v15 }
 0xfd0   : > { %3265 = vadd.xlane.f32.xlu1 %v3264_v5 }
0x1059   : > { %v3248_v20 = vpop.xlane.xlu1 %3247 }
0x105a   : > { %v3252_v11 = vmul.f32 0.03125, %v3248_v20 }
0x105c   : > { %v3256_v21 = vsub.f32 %v5040_v14, %v3252_v11 }
0x105d   : > { %v3266_v23 = vpop.xlane.xlu1 %3265 }
0x105e   : > { %v3274_v24 = vmul.f32 0.03125, %v3266_v23  ;;  %v3260_v50 = vmul.f32 %v3256_v21, %v3256_v21 }
0x1060   : > { %v3278_v26 = vadd.f32 1e-05, %v3274_v24  ;;  %v3270_v27 = vsel %vm482_vm0, %v3260_v50, 0.0 }
0x1061   : > { %3271 = vadd.xlane.f32.xlu1 %v3270_v27 }
0x1062   : > { %4345 = vrsqrt.f32 %v3278_v26 }
0x1063   : > { %4347 = vrsqrt.f32 %v3279_v47 }
0x106c   : > { %v4346_v43 = vpop.eup %4345 }
0x106d   : > { %v3286_v38 = vmul.f32 %v4346_v43, %v3254_v3  ;;  %v4348_v52 = vpop.eup %4347 }
0x106e   : > { %v3287_v34 = vmul.f32 %v4348_v52, %v5018_v25  ;;  %v4265_v25 = vld [vmem:[%s5129_s10 + $0x10] sm:$0xff]  }
0x106f   : > { %v3296_v40 = vmul.f32 %v3772_v36, %v3286_v38  ;;  %4219 = vmatprep.subr.bf16.mxu1 %v4265_v25 }
0x1070   : > { %v3297_v55 = vmul.f32 %v3772_v36, %v3287_v34  ;;  %4220 = vmatpush3.bf16.msra.mxu1 %v4265_v25 }
0x1071   : > { %v3306_v28 = vadd.f32 %v3773_v37, %v3296_v40  ;;  %4221 = vmatprep.subr.bf16.mxu1 %v4266_v60 }
0x1072   : > { %v3307_v57 = vadd.f32 %v3773_v37, %v3297_v55 }
0x1073   : > { %v3309_v32 = vpack.c.bf16 %v3306_v28, %v3305_v41 }
0x1074   : > { %4222 = vmatpush3.bf16.msra.mxu1 %v4266_v60 }
0x1075   : > { %4211 = vmatprep.mubr.msk.bf16.mxu0 %vm482_vm0, %v3309_v32  ;;  %4223 = vmatprep.subr.bf16.mxu1 %v4267_v59 }
0x1078   : > { %4224 = vmatpush3.bf16.msra.mxu1 %v4267_v59 }
0x1079   : > { %4225 = vmatprep.subr.bf16.mxu1 %v4268_v62 }
0x107c   : > { %4226 = vmatpush3.bf16.msra.mxu1 %v4268_v62 }
0x107d   : > { %4227 = vmatprep.subr.bf16.mxu1 %v4269_v4 }
0x1080   : > { %4228 = vmatpush3.bf16.msra.mxu1 %v4269_v4 }
0x1081   : > { %4229 = vmatprep.subr.bf16.mxu1 %v4270_v6 }
0x1084   : > { %4230 = vmatpush3.bf16.msra.mxu1 %v4270_v6 }
0x10ee   : > { %v3272_v48 = vpop.xlane.xlu1 %3271 }
0x10ef   : > { %v3276_v49 = vmul.f32 0.03125, %v3272_v48 }
0x10f1   : > { %v3280_v33 = vadd.f32 1e-05, %v3276_v49 }
0x10f3   : > { %4349 = vrsqrt.f32 %v3280_v33 }
0x10fd   : > { %v4350_v1 = vpop.eup %4349 }
0x10fe   : > { %v3288_v2 = vmul.f32 %v4350_v1, %v3256_v21 }
0x1100   : > { %v3298_v35 = vmul.f32 %v3772_v36, %v3288_v2  ;;  %v3779_v2 = vld [vmem:[%s5130_s11] ss:$0 sm:$0xff] }
0x1102   : > { %v3308_v22 = vadd.f32 %v3773_v37, %v3298_v35 }
0x1104   : > { %v3310_v54 = vpack.c.bf16 %v3308_v22, %v3307_v57 }
0x1106   : > { %4212 = vmatmul.mubr.msk.bf16.vlgmr.msra.gmra.mrb[104].mxu0 %vm482_vm0, %v3310_v54 }
0x11d9   : > { %v4213_v8 = vpop.f32.mrb[104].mxu0 }
0x11da   : > { %v3383_v9 = vadd.f32 %v4213_v8, %v3774_v7  ;;  %v3374_v10 = vpop.f32.mrb[105].mxu0 }
0x11db   : > { %v3375_v45 = vadd.f32 %v3774_v7, %v3374_v10  ;;  %v4214_v0 = vpop.f32.mrb[106].mxu0 }
0x11dc   : > { %v3395_v12 = vmul.f32 0.044715, %v3383_v9  ;;  %v3386_v3 = vadd.f32 %v4214_v0, %v3774_v7  ;;  %v3377_v63 = vpop.f32.mrb[107].mxu0  ;;  %v3391_v18 = vmul.f32 0.5, %v3383_v9 }
0x11dd   : > { %v3393_v13 = vmul.f32 0.044715, %v3375_v45  ;;  %v3378_v15 = vadd.f32 %v3774_v7, %v3377_v63  ;;  %v3389_v46 = vmul.f32 0.5, %v3375_v45 }
0x11de   : > { %v3399_v16 = vmul.f32 %v3395_v12, %v3383_v9  ;;  %v3396_v5 = vmul.f32 0.044715, %v3386_v3  ;;  %v3392_v42 = vmul.f32 0.5, %v3386_v3 }
0x11df   : > { %v3397_v17 = vmul.f32 %v3393_v13, %v3375_v45  ;;  %v3394_v31 = vmul.f32 0.044715, %v3378_v15  ;;  %v3390_v47 = vmul.f32 0.5, %v3378_v15 }
0x11e0   : > { %v3403_v19 = vmul.f32 %v3399_v16, %v3383_v9  ;;  %v3400_v20 = vmul.f32 %v3396_v5, %v3386_v3 }
0x11e1   : > { %v3401_v11 = vmul.f32 %v3397_v17, %v3375_v45  ;;  %v3398_v21 = vmul.f32 %v3394_v31, %v3378_v15 }
0x11e2   : > { %v3407_v23 = vadd.f32 %v3403_v19, %v3383_v9  ;;  %v3404_v24 = vmul.f32 %v3400_v20, %v3386_v3 }
0x11e3   : > { %v3402_v50 = vmul.f32 %v3398_v21, %v3378_v15  ;;  %v3405_v26 = vadd.f32 %v3401_v11, %v3375_v45 }
0x11e4   : > { %v3411_v27 = vmul.f32 0.7978846, %v3407_v23  ;;  %v3408_v29 = vadd.f32 %v3404_v24, %v3386_v3 }
0x11e5   : > { %v3406_v30 = vadd.f32 %v3402_v50, %v3378_v15  ;;  %v3409_v36 = vmul.f32 0.7978846, %v3405_v26 }
0x11e6   : > { %4351 = vtanh.f32 %v3411_v27  ;;  %v3412_v43 = vmul.f32 0.7978846, %v3408_v29 }
0x11e7   : > { %v3410_v38 = vmul.f32 0.7978846, %v3406_v30  ;;  %4353 = vtanh.f32 %v3409_v36 }
0x11e8   : > { %4355 = vtanh.f32 %v3412_v43 }
0x11e9   : > { %4357 = vtanh.f32 %v3410_v38 }
0x11f0   : > { %v4352_v39 = vpop.eup %4351 }
0x11f1   : > { %v4354_v37 = vpop.eup %4353  ;;  %v3419_v40 = vadd.f32 1.0, %v4352_v39 }
0x11f2   : > { %v4356_v41 = vpop.eup %4355  ;;  %v3417_v28 = vadd.f32 1.0, %v4354_v37 }
0x11f3   : > { %v4358_v32 = vpop.eup %4357  ;;  %v3420_v44 = vadd.f32 1.0, %v4356_v41  ;;  %v3423_v49 = vmul.f32 %v3419_v40, %v3391_v18 }
0x11f4   : > { %v3418_v48 = vadd.f32 1.0, %v4358_v32  ;;  %v3421_v52 = vmul.f32 %v3417_v28, %v3389_v46  ;;  %v3788_v28 = vld [vmem:[%s5131_s12] ss:$0 sm:$0xff] }
0x11f5   : > { %v3424_v33 = vmul.f32 %v3420_v44, %v3392_v42  ;;  %v3789_v42 = vld [vmem:[%s5132_s13] ss:$0 sm:$0xff] }
0x11f6   : > { %v3422_v34 = vmul.f32 %v3418_v48, %v3390_v47 }
0x11f7   : > { %v3426_v1 = vpack.c.bf16 %v3424_v33, %v3423_v49 }
0x11f8   : > { %v3425_v55 = vpack.c.bf16 %v3422_v34, %v3421_v52 }
0x11fa   : > { %4231 = vmatprep.mubr.bf16.mxu1 %v3425_v55 }
0x11fb   : > { %4232 = vmatmul.mubr.bf16.vlgmr.msra.gmra.mrb[96].mxu1 %v3426_v1 }
0x12ce   : > { %v4233_v35 = vpop.f32.mrb[96].mxu1 }
0x12cf   : > { %v3532_v57 = vpop.f32.mrb[97].mxu1  ;;  %v3541_v22 = vadd.f32 %v4233_v35, %v3779_v2 }
0x12d0   : > { %v3533_v54 = vadd.f32 %v3779_v2, %v3532_v57  ;;  %v4234_v58 = vpop.f32.mrb[98].mxu1 }
0x12d1   : > { %v3535_v56 = vpop.f32.mrb[99].mxu1  ;;  %v3544_v25 = vadd.f32 %v4234_v58, %v3779_v2  ;;  %v3549_v6 = vadd.f32 %v3541_v22, %v4981_v61 }
0x12d2   : > { %v3536_v60 = vadd.f32 %v3779_v2, %v3535_v56  ;;  %v3547_v59 = vadd.f32 %v3533_v54, %v4969_v51 }
0x12d3   : > { %v3550_v8 = vadd.f32 %v3544_v25, %v5040_v14  ;;  %v3559_v9 = vsel %vm482_vm0, %v3549_v6, 0.0 }
0x12d4   : > { %v3553_v62 = vsel %vm482_vm0, %v3547_v59, 0.0  ;;  %v3548_v4 = vadd.f32 %v3536_v60, %v4974_v53 }
0x12d5   : > { %3554 = vadd.xlane.f32.xlu0 %v3553_v62  ;;  %v3562_v10 = vsel %vm482_vm0, %v3550_v8, 0.0 }
0x12d6   : > { %v3556_v7 = vsel %vm482_vm0, %v3548_v4, 0.0 }
0x12d7   : > { %3557 = vadd.xlane.f32.xlu1 %v3556_v7 }
0x12d9   : > { %3560 = vadd.xlane.f32.xlu0 %v3559_v9 }
0x12db   : > { %3563 = vadd.xlane.f32.xlu1 %v3562_v10 }
0x1362   : > { %v3555_v45 = vpop.xlane.xlu0 %3554 }
0x1363   : > { %v3565_v51 = vmul.f32 0.03125, %v3555_v45 }
0x1364   : > { %v3558_v0 = vpop.xlane.xlu1 %3557 }
0x1365   : > { %v3569_v12 = vsub.f32 %v3547_v59, %v3565_v51  ;;  %v3566_v3 = vmul.f32 0.03125, %v3558_v0 }
0x1366   : > { %v3561_v53 = vpop.xlane.xlu0 %3560 }
0x1367   : > { %v3570_v63 = vsub.f32 %v3548_v4, %v3566_v3  ;;  %v3567_v61 = vmul.f32 0.03125, %v3561_v53  ;;  %v3573_v13 = vmul.f32 %v3569_v12, %v3569_v12 }
0x1368   : > { %v3564_v15 = vpop.xlane.xlu1 %3563 }
0x1369   : > { %v3571_v16 = vsub.f32 %v3549_v6, %v3567_v61  ;;  %v3568_v5 = vmul.f32 0.03125, %v3564_v15  ;;  %v3577_v14 = vsel %vm482_vm0, %v3573_v13, 0.0  ;;  %v3574_v17 = vmul.f32 %v3570_v63, %v3570_v63 }
0x136a   : > { %3578 = vadd.xlane.f32.xlu0 %v3577_v14 }
0x136b   : > { %v3572_v31 = vsub.f32 %v3550_v8, %v3568_v5  ;;  %v3580_v19 = vsel %vm482_vm0, %v3574_v17, 0.0  ;;  %v3575_v20 = vmul.f32 %v3571_v16, %v3571_v16 }
0x136c   : > { %3581 = vadd.xlane.f32.xlu1 %v3580_v19 }
0x136d   : > { %v3583_v11 = vsel %vm482_vm0, %v3575_v20, 0.0  ;;  %v3576_v21 = vmul.f32 %v3572_v31, %v3572_v31 }
0x136e   : > { %3584 = vadd.xlane.f32.xlu0 %v3583_v11 }
0x136f   : > { %v3586_v23 = vsel %vm482_vm0, %v3576_v21, 0.0 }
0x1370   : > { %3587 = vadd.xlane.f32.xlu1 %v3586_v23 }
0x13f7   : > { %v3579_v24 = vpop.xlane.xlu0 %3578 }
0x13f8   : > { %v3589_v50 = vmul.f32 0.03125, %v3579_v24 }
0x13f9   : > { %v3582_v26 = vpop.xlane.xlu1 %3581 }
0x13fa   : > { %v3593_v27 = vadd.f32 1e-05, %v3589_v50  ;;  %v3590_v29 = vmul.f32 0.03125, %v3582_v26 }
0x13fb   : > { %v3585_v30 = vpop.xlane.xlu0 %3584 }
0x13fc   : > { %4359 = vrsqrt.f32 %v3593_v27  ;;  %v3594_v36 = vadd.f32 1e-05, %v3590_v29  ;;  %v3591_v43 = vmul.f32 0.03125, %v3585_v30 }
0x13fd   : > { %v3588_v38 = vpop.xlane.xlu1 %3587 }
0x13fe   : > { %4361 = vrsqrt.f32 %v3594_v36  ;;  %v3595_v39 = vadd.f32 1e-05, %v3591_v43  ;;  %v3592_v37 = vmul.f32 0.03125, %v3588_v38 }
0x1400   : > { %4363 = vrsqrt.f32 %v3595_v39  ;;  %v3596_v40 = vadd.f32 1e-05, %v3592_v37 }
0x1402   : > { %4365 = vrsqrt.f32 %v3596_v40 }
0x1406   : > { %v4360_v41 = vpop.eup %4359 }
0x1407   : > { %v3601_v32 = vmul.f32 %v4360_v41, %v3569_v12 }
0x1408   : > { %v4362_v18 = vpop.eup %4361 }
0x1409   : > { %v3611_v44 = vmul.f32 %v3788_v28, %v3601_v32  ;;  %v3602_v46 = vmul.f32 %v4362_v18, %v3570_v63 }
0x140a   : > { %v4364_v47 = vpop.eup %4363 }
0x140b   : > { %v3621_v48 = vadd.f32 %v3789_v42, %v3611_v44  ;;  %v3612_v49 = vmul.f32 %v3788_v28, %v3602_v46  ;;  %v3603_v33 = vmul.f32 %v4364_v47, %v3571_v16 }
0x140c   : > { %v4366_v52 = vpop.eup %4365 }
0x140d   : > { %v3796_v34 = vpack.c.bf16 %v3621_v48, %v3621_v48  ;;  %v3622_v1 = vadd.f32 %v3789_v42, %v3612_v49  ;;  %v3613_v55 = vmul.f32 %v3788_v28, %v3603_v33  ;;  %v3604_v2 = vmul.f32 %v4366_v52, %v3572_v31 }
0x140f   : > { %3642 = vst.msk [vmem:[%s469_s23] sm:$0xf] %vm3641_vm6, %v3796_v34  ;;  %v3797_v35 = vpack.c.bf16 %v3622_v1, %v3622_v1  ;;  %v3623_v57 = vadd.f32 %v3789_v42, %v3613_v55  ;;  %v3614_v22 = vmul.f32 %v3788_v28, %v3604_v2 }
0x1411   : > { %3643 = vst.msk [vmem:[%s469_s23 + $0x4] sm:$0xf] %vm3641_vm6, %v3797_v35  ;;  %v3798_v54 = vpack.c.bf16 %v3623_v57, %v3623_v57  ;;  %v3624_v58 = vadd.f32 %v3789_v42, %v3614_v22 }
0x1413   : > { %3644 = vst.msk [vmem:[%s469_s23 + $0x8] sm:$0xf] %vm3641_vm6, %v3798_v54  ;;  %v3799_v56 = vpack.c.bf16 %v3624_v58, %v3624_v58 }
0x1415   : > { %3645 = vst.msk [vmem:[%s469_s23 + $0xc] sm:$0xf] %vm3641_vm6, %v3799_v56 }
0x1416 PF: > { %s24_s29 = sadd.s32 1, %s4377_s29  }
0x1417   : > { %p21_p4 = scmp.ge.s32.totalorder %s24_s29, 4  }
0x1419   :  { %23 = sbr.rel (!%p21_p4) target bundleno = 1 (0x1), region = 106 }

// kernel: _lambda_.9
= control target key start
LH: loop header
LB: loop body
LE: loop exit
PB: predicated region body
PF: predicated region fallthrough
CT: control target
= control target key end

     0   :  { %vm48_vm0 = vcmask 261120   ;;  %v2106_v19 = vmov 0   ;;  %v2107_v37 = vmov 0.0   ;;  %vm2108_vm1 = vmmov 0   ;;  %s2111_s15 = smov 80   ;;  %s2112_s16 = smov 64   ;;  %s2525_s0 = inlined_call_operand.vmem [shape: bf16[16,32], index: 0, kind: input, shape index: {}]   ;;  %s2526_s3 = inlined_call_operand.vmem [shape: bf16[32,192], index: 3, kind: input, shape index: {}]   ;;  %s2527_s1 = inlined_call_operand.vmem [shape: f32[1,32], index: 1, kind: input, shape index: {}]   ;;  %s2528_s2 = inlined_call_operand.vmem [shape: f32[1,32], index: 2, kind: input, shape index: {}]   ;;  %s2529_s4 = inlined_call_operand.vmem [shape: bf16[4,16,32], index: 4, kind: input, shape index: {}]   ;;  %s2530_s5 = inlined_call_operand.vmem [shape: f32[1,32], index: 5, kind: input, shape index: {}]   ;;  %s2531_s8 = inlined_call_operand.vmem [shape: bf16[32,128], index: 8, kind: input, shape index: {}]   ;;  %s2532_s6 = inlined_call_operand.vmem [shape: f32[1,32], index: 6, kind: input, shape index: {}]   ;;  %s2533_s7 = inlined_call_operand.vmem [shape: f32[1,32], index: 7, kind: input, shape index: {}]   ;;  %s2534_s10 = inlined_call_operand.vmem [shape: bf16[128,32], index: 10, kind: input, shape index: {}]   ;;  %s2535_s9 = inlined_call_operand.vmem [shape: f32[1,128], index: 9, kind: input, shape index: {}]   ;;  %s2536_s11 = inlined_call_operand.vmem [shape: f32[1,32], index: 11, kind: input, shape index: {}]   ;;  %s2537_s12 = inlined_call_operand.vmem [shape: bf16[16,32], index: 12, kind: output, shape index: {}]  }
   0x1   :  { %v1799_v0 = vld [vmem:[%s2525_s0] sm:$0xff]   ;;  %v2045_v17 = vld [vmem:[%s2526_s3 + $0x14] ss:$8 sps:$4 sm:$0xff]   ;;  %v2047_v18 = vld [vmem:[%s2526_s3 + $0x10] ss:$8 sps:$4 sm:$0xff]   ;;  %152 = vmatprep.mubr.bf16.mxu1 %v2106_v19  ;;  %1880 = vmatprep.subr.bf16.mxu0 %v2107_v37  ;;  %vm206_vm2 = vcmask 130048   ;;  %v171_v59 = vlaneseq }
   0x2   :  { %v2182_v1 = vunpack.c.l.bf16 %v1799_v0  ;;  %v2184_v2 = vunpack.c.h.bf16 %v1799_v0  ;;  %v2042_v15 = vld [vmem:[%s2526_s3 + $0x4] ss:$8 sps:$4 sm:$0xff]   ;;  %v2044_v16 = vld [vmem:[%s2526_s3] ss:$8 sps:$4 sm:$0xff]   ;;  %1882 = vmatprep.mubr.msk.bf16.mxu0 %vm2108_vm1, %v2107_v37  ;;  %vm452_vm3 = vcmask 1043456   ;;  %vm400_vm5 = vcmask 64512  }
   0x3   :  { %120 = vmatprep.subr.bf16.mxu1 %v2042_v15  ;;  %v1743_v28 = vld [vmem:[%s2527_s1] ss:$0 sm:$0xff]  ;;  %s2109_s1 = smov 96   ;;  %v172_v60 = vand.u32 127, %v171_v59  ;;  %v2113_v61 = vmov -1e+30  }
   0x4   :  { %v49_v3 = vsel %vm48_vm0, %v2182_v1, 0.0  ;;  %v52_v4 = vsel %vm48_vm0, %v2184_v2, 0.0  ;;  %121 = vmatpush1.bf16.msra.mxu1 %v2044_v16  ;;  %v1744_v32 = vld [vmem:[%s2528_s2] ss:$0 sm:$0xff]  ;;  %s2110_s2 = smov 112   ;;  %vm1736_vm6 = vcmask 257024  }
   0x5   :  { %50 = vadd.xlane.f32.xlu0 %v49_v3  ;;  %122 = vmatprep.subr.bf16.mxu1 %v2045_v17  ;;  %vm173_vm4 = vcmp.lt.s32.totalorder %v172_v60, 5 }
   0x6   :  { %v2256_v62 = vsel %vm173_vm4, 0.0, %v2113_v61 }
   0x8   :  { %123 = vmatpush1.bf16.msra.mxu1 %v2047_v18 }
   0x9   :  { %53 = vadd.xlane.f32.xlu0 %v52_v4  ;;  %1862 = vmatprep.subr.bf16.mxu1 %v2107_v37 }
  0x92   :  { %v51_v5 = vpop.xlane.xlu0 %50 }
  0x93   :  { %v56_v6 = vmul.f32 0.03125, %v51_v5 }
  0x95   :  { %v58_v7 = vsub.f32 %v2182_v1, %v56_v6 }
  0x96   :  { %v54_v8 = vpop.xlane.xlu0 %53 }
  0x97   :  { %v57_v9 = vmul.f32 0.03125, %v54_v8  ;;  %v60_v10 = vmul.f32 %v58_v7, %v58_v7 }
  0x99   :  { %v59_v11 = vsub.f32 %v2184_v2, %v57_v9  ;;  %v62_v12 = vsel %vm48_vm0, %v60_v10, 0.0 }
  0x9a   :  { %63 = vadd.xlane.f32.xlu1 %v62_v12 }
  0x9b   :  { %v61_v13 = vmul.f32 %v59_v11, %v59_v11 }
  0x9d   :  { %v65_v14 = vsel %vm48_vm0, %v61_v13, 0.0 }
  0x9e   :  { %66 = vadd.xlane.f32.xlu1 %v65_v14 }
 0x127   :  { %v64_v20 = vpop.xlane.xlu1 %63 }
 0x128   :  { %v68_v21 = vmul.f32 0.03125, %v64_v20 }
 0x12a   :  { %v70_v22 = vadd.f32 1e-05, %v68_v21 }
 0x12b   :  { %v67_v23 = vpop.xlane.xlu1 %66 }
 0x12c   :  { %2062 = vrsqrt.f32 %v70_v22  ;;  %v69_v24 = vmul.f32 0.03125, %v67_v23 }
 0x12e   :  { %v71_v25 = vadd.f32 1e-05, %v69_v24 }
 0x130   :  { %2064 = vrsqrt.f32 %v71_v25 }
 0x136   :  { %v2063_v26 = vpop.eup %2062 }
 0x137   :  { %v74_v27 = vmul.f32 %v2063_v26, %v58_v7 }
 0x139   :  { %v82_v31 = vmul.f32 %v1743_v28, %v74_v27 }
 0x13a   :  { %v2065_v29 = vpop.eup %2064 }
 0x13b   :  { %v75_v30 = vmul.f32 %v2065_v29, %v59_v11  ;;  %v90_v34 = vadd.f32 %v1744_v32, %v82_v31 }
 0x13d   :  { %v83_v33 = vmul.f32 %v1743_v28, %v75_v30 }
 0x13f   :  { %v91_v35 = vadd.f32 %v1744_v32, %v83_v33 }
 0x141   :  { %v92_v36 = vpack.c.bf16 %v91_v35, %v90_v34 }
 0x143   :  { %1749 = vmatmul.mubr.msk.bf16.vlgmr.msra.gmra.mrb[0].mxu1 %vm48_vm0, %v92_v36 }
 0x144   :  { %1864 = vmatprep.mubr.msk.bf16.mxu1 %vm2108_vm1, %v2107_v37 }
 0x216   :  { %v154_v38 = vpop.f32.mrb[0].mxu1 }
 0x217   :  { %179 = vrot.lane.b32.xlu1 %v154_v38, %s2109_s1  ;;  %176 = vrot.lane.b32.xlu0 %v154_v38, %s2110_s2  ;;  %v2221_v39 = vpop.f32.mrb[1].mxu1  ;;  %v185_v42 = vpack.c.bf16 %v154_v38, %v154_v38 }
 0x218   :  { %v2223_v40 = vpop.f32.mrb[2].mxu1  ;;  %v199_v57 = vpack.c.bf16 %v2221_v39, %v2221_v39 }
 0x219   :  { %v2225_v41 = vpop.f32.mrb[3].mxu1 }
 0x21a   :  { %v454_v58 = vsel %vm452_vm3, %v199_v57, 0 }
 0x21b   :  { %182 = vrot.lane.b32.xlu1 %v154_v38, %s2111_s15 }
 0x21f   :  { %204 = vrot.lane.b32.xlu1 %v185_v42, %s2112_s16 }
 0x289   :  { %v180_v43 = vpop.permute.xlu1 %179  ;;  %v177_v44 = vpop.permute.xlu0 %176 }
 0x28a   :  { %v187_v45 = vpack.c.bf16 %v180_v43, %v180_v43  ;;  %v186_v46 = vpack.c.bf16 %v177_v44, %v177_v44 }
 0x28c   :  { %254 = vrot.lane.b32.xlu0 %v186_v46, %s2112_s16  ;;  %303 = vrot.lane.b32.xlu1 %v187_v45, %s2112_s16 }
 0x28d   :  { %v183_v47 = vpop.permute.xlu1 %182 }
 0x28e   :  { %v188_v48 = vpack.c.bf16 %v183_v47, %v183_v47 }
 0x290   :  { %352 = vrot.lane.b32.xlu0 %v188_v48, %s2112_s16 }
 0x291   :  { %v205_v49 = vpop.permute.xlu1 %204 }
 0x292   :  { %v211_v50 = vsel %vm206_vm2, %v205_v49, 0 }
 0x293   :  { %1863 = vmatpush3.bf16.xpose.msra.mxu1 %v211_v50 }
 0x294   :  { %1868 = vmatprep.subr.bf16.mxu1 %v2107_v37 }
 0x29a   :  { %1865 = vmatmul.mubr.msk.bf16.vlgmr.msra.gmra.mrb[4].mxu1 %vm206_vm2, %v185_v42 }
 0x29b   :  { %1870 = vmatprep.mubr.msk.bf16.mxu1 %vm2108_vm1, %v2107_v37 }
 0x2fe   :  { %v255_v51 = vpop.permute.xlu0 %254  ;;  %v304_v55 = vpop.permute.xlu1 %303 }
 0x2ff   :  { %v260_v52 = vsel %vm206_vm2, %v255_v51, 0  ;;  %v309_v56 = vsel %vm206_vm2, %v304_v55, 0 }
 0x300   :  { %1869 = vmatpush3.bf16.xpose.msra.mxu1 %v260_v52 }
 0x301   :  { %1874 = vmatprep.subr.bf16.mxu1 %v2107_v37 }
 0x302   :  { %v353_v53 = vpop.permute.xlu0 %352 }
 0x303   :  { %v358_v54 = vsel %vm206_vm2, %v353_v53, 0  ;;  %v2284_v53 = vpack.c.bf16 %v2223_v40, %v2223_v40 }
 0x304   :  { %1881 = vmatpush3.bf16.xpose.msra.mxu0 %v358_v54 }
 0x305   :  { %1892 = vmatprep.subr.bf16.mxu0 %v2107_v37 }
 0x307   :  { %1871 = vmatmul.mubr.msk.bf16.vlgmr.msra.gmra.mrb[8].mxu1 %vm206_vm2, %v186_v46 }
 0x308   :  { %1875 = vmatpush3.bf16.xpose.msra.mxu1 %v309_v56  ;;  %1876 = vmatprep.mubr.msk.bf16.mxu1 %vm2108_vm1, %v2107_v37 }
 0x309   :  { %1886 = vmatprep.subr.bf16.mxu1 %v2107_v37 }
 0x30b   :  { %1883 = vmatmul.mubr.msk.bf16.vlgmr.msra.gmra.mrb[0].mxu0 %vm206_vm2, %v188_v48 }
 0x30c   :  { %1894 = vmatprep.mubr.msk.bf16.mxu0 %vm2108_vm1, %v2107_v37 }
 0x30f   :  { %1877 = vmatmul.mubr.msk.bf16.vlgmr.msra.gmra.mrb[12].mxu1 %vm206_vm2, %v187_v45 }
 0x310   :  { %1887 = vmatpush3.bf16.msra.mxu1 %v454_v58  ;;  %1888 = vmatprep.mubr.msk.bf16.mxu1 %vm2108_vm1, %v2107_v37 }
 0x311   :  { %1898 = vmatprep.subr.bf16.mxu1 %v2107_v37 }
 0x36d   :  { %v247_v63 = vpop.f32.mrb[4].mxu1 }
 0x36e   :  { %v248_v0 = vadd.f32 %v247_v63, %v2256_v62  ;;  %v1866_v3 = vpop.f32.mrb[5].mxu1 }
 0x36f   :  { %v250_v4 = vpop.f32.mrb[6].mxu1 }
 0x370   :  { %v1867_v5 = vpop.f32.mrb[7].mxu1  ;;  %v401_v6 = vsel %vm400_vm5, %v248_v0, -inf }
 0x371   :  { %402 = vmax.xlane.f32.xlu1 %v401_v6 }
 0x382   :  { %190 = vrot.lane.b32.xlu1 %v2221_v39, %s2110_s2 }
 0x3da   :  { %v296_v7 = vpop.f32.mrb[8].mxu1 }
 0x3db   :  { %v297_v8 = vadd.f32 %v296_v7, %v2256_v62  ;;  %v1872_v9 = vpop.f32.mrb[9].mxu1 }
 0x3dc   :  { %v299_v10 = vpop.f32.mrb[10].mxu1 }
 0x3dd   :  { %v1873_v11 = vpop.f32.mrb[11].mxu1  ;;  %v404_v12 = vsel %vm400_vm5, %v297_v8, -inf }
 0x3de   :  { %v394_v13 = vpop.f32.mrb[0].mxu0  ;;  %405 = vmax.xlane.f32.xlu0 %v404_v12 }
 0x3df   :  { %v1884_v14 = vpop.f32.mrb[1].mxu0  ;;  %v395_v21 = vadd.f32 %v394_v13, %v2256_v62 }
 0x3e0   :  { %v397_v15 = vpop.f32.mrb[2].mxu0  ;;  %v2311_v14 = vld [vmem:[%s2529_s4] sm:$0xff]  }
 0x3e1   :  { %v1885_v16 = vpop.f32.mrb[3].mxu0  ;;  %v410_v24 = vsel %vm400_vm5, %v395_v21, -inf }
 0x3e2   :  { %v345_v17 = vpop.f32.mrb[12].mxu1 }
 0x3e3   :  { %v346_v18 = vadd.f32 %v345_v17, %v2256_v62  ;;  %v1878_v19 = vpop.f32.mrb[13].mxu1 }
 0x3e4   :  { %v348_v20 = vpop.f32.mrb[14].mxu1  ;;  %v2328_v19 = vld [vmem:[%s2529_s4 + $0x8] sm:$0xff]  }
 0x3e5   :  { %v1879_v22 = vpop.f32.mrb[15].mxu1  ;;  %v407_v23 = vsel %vm400_vm5, %v346_v18, -inf }
 0x3e6   :  { %408 = vmax.xlane.f32.xlu0 %v407_v23 }
 0x3ea   :  { %411 = vmax.xlane.f32.xlu0 %v410_v24 }
 0x3fe   :  { %v403_v25 = vpop.xlane.xlu1 %402 }
 0x3ff   :  { %v413_v26 = vsub.f32 %v248_v0, %v403_v25 }
 0x401   :  { %v417_v27 = vmul.f32 1.442695, %v413_v26 }
 0x402   :  { %v191_v28 = vpop.permute.xlu1 %190 }
 0x403   :  { %2066 = vpow2.f32 %v417_v27  ;;  %v200_v29 = vpack.c.bf16 %v191_v28, %v191_v28  ;;  %v2345_v27 = vld [vmem:[%s2529_s4 + $0x18] sm:$0xff]  }
 0x405   :  { %v500_v30 = vsel %vm452_vm3, %v200_v29, 0 }
 0x406   :  { %1893 = vmatpush3.bf16.msra.mxu0 %v500_v30 }
 0x407   :  { %1904 = vmatprep.subr.bf16.mxu0 %v2107_v37 }
 0x40d   :  { %v2067_v31 = vpop.eup %2066 }
 0x40e   :  { %v425_v32 = vsel %vm400_vm5, %v2067_v31, 0.0 }
 0x40f   :  { %426 = vadd.xlane.f32.xlu1 %v425_v32 }
 0x46b   :  { %v406_v33 = vpop.xlane.xlu0 %405 }
 0x46c   :  { %v414_v34 = vsub.f32 %v297_v8, %v406_v33 }
 0x46e   :  { %v419_v35 = vmul.f32 1.442695, %v414_v34 }
 0x470   :  { %2068 = vpow2.f32 %v419_v35 }
 0x473   :  { %v409_v36 = vpop.xlane.xlu0 %408 }
 0x474   :  { %v415_v38 = vsub.f32 %v346_v18, %v409_v36 }
 0x476   :  { %v421_v42 = vmul.f32 1.442695, %v415_v38 }
 0x477   :  { %v412_v43 = vpop.xlane.xlu0 %411 }
 0x478   :  { %2070 = vpow2.f32 %v421_v42  ;;  %v416_v44 = vsub.f32 %v395_v21, %v412_v43  ;;  %v2335_v21 = vld [vmem:[%s2529_s4 + $0x10] sm:$0xff]  }
 0x47a   :  { %v2069_v45 = vpop.eup %2068  ;;  %v423_v46 = vmul.f32 1.442695, %v416_v44 }
 0x47b   :  { %v428_v47 = vsel %vm400_vm5, %v2069_v45, 0.0 }
 0x47c   :  { %2072 = vpow2.f32 %v423_v46  ;;  %429 = vadd.xlane.f32.xlu0 %v428_v47 }
 0x482   :  { %v2071_v48 = vpop.eup %2070 }
 0x483   :  { %v431_v49 = vsel %vm400_vm5, %v2071_v48, 0.0 }
 0x484   :  { %432 = vadd.xlane.f32.xlu1 %v431_v49 }
 0x486   :  { %v2073_v50 = vpop.eup %2072 }
 0x487   :  { %v434_v51 = vsel %vm400_vm5, %v2073_v50, 0.0 }
 0x488   :  { %435 = vadd.xlane.f32.xlu0 %v434_v51 }
 0x495   :  { %196 = vrot.lane.b32.xlu1 %v2221_v39, %s2111_s15 }
 0x499   :  { %838 = vrot.lane.b32.xlu1 %v2223_v40, %s2110_s2 }
 0x49c   :  { %v427_v52 = vpop.xlane.xlu1 %426 }
 0x49d   :  { %2074 = vrcp.f32 %v427_v52  ;;  %841 = vrot.lane.b32.xlu1 %v2223_v40, %s2109_s1 }
 0x49e   :  { %193 = vrot.lane.b32.xlu0 %v2221_v39, %s2109_s1 }
 0x4a1   :  { %866 = vrot.lane.b32.xlu1 %v2284_v53, %s2112_s16 }
 0x4a2   :  { %844 = vrot.lane.b32.xlu0 %v2223_v40, %s2111_s15 }
 0x4a7   :  { %v2075_v54 = vpop.eup %2074 }
 0x4a8   :  { %v441_v55 = vmul.f32 %v2075_v54, %v2067_v31 }
 0x4aa   :  { %v445_v56 = vpack.c.bf16 %v441_v55, %v441_v55  ;;  %v861_v55 = vpack.c.bf16 %v2225_v41, %v2225_v41 }
 0x4ac   :  { %1889 = vmatmul.mubr.msk.bf16.vlgmr.msra.gmra.mrb[16].mxu1 %vm400_vm5, %v445_v56 }
 0x4ad   :  { %1900 = vmatprep.mubr.msk.bf16.mxu1 %vm2108_vm1, %v2107_v37 }
 0x509   :  { %v430_v57 = vpop.xlane.xlu0 %429 }
 0x50a   :  { %2076 = vrcp.f32 %v430_v57 }
 0x511   :  { %v433_v39 = vpop.xlane.xlu1 %432 }
 0x512   :  { %2078 = vrcp.f32 %v433_v39 }
 0x514   :  { %v2077_v58 = vpop.eup %2076 }
 0x515   :  { %v442_v59 = vmul.f32 %v2077_v58, %v2069_v45  ;;  %v197_v60 = vpop.permute.xlu1 %196  ;;  %v436_v61 = vpop.xlane.xlu0 %435 }
 0x516   :  { %v202_v63 = vpack.c.bf16 %v197_v60, %v197_v60  ;;  %2080 = vrcp.f32 %v436_v61 }
 0x517   :  { %v446_v0 = vpack.c.bf16 %v442_v59, %v442_v59 }
 0x518   :  { %v592_v40 = vsel %vm452_vm3, %v202_v63, 0 }
 0x519   :  { %v839_v3 = vpop.permute.xlu1 %838  ;;  %1895 = vmatmul.mubr.msk.bf16.vlgmr.msra.gmra.mrb[4].mxu0 %vm400_vm5, %v446_v0  ;;  %v194_v4 = vpop.permute.xlu0 %193 }
 0x51a   :  { %v2295_v5 = vpack.c.bf16 %v839_v3, %v839_v3  ;;  %1905 = vmatpush3.bf16.msra.mxu0 %v592_v40  ;;  %v201_v6 = vpack.c.bf16 %v194_v4, %v194_v4  ;;  %1906 = vmatprep.mubr.msk.bf16.mxu0 %vm2108_vm1, %v2107_v37 }
 0x51b   :  { %1916 = vmatprep.subr.bf16.mxu0 %v2107_v37 }
 0x51c   :  { %v2079_v7 = vpop.eup %2078  ;;  %v546_v8 = vsel %vm452_vm3, %v201_v6, 0  ;;  %915 = vrot.lane.b32.xlu0 %v2295_v5, %s2112_s16 }
 0x51d   :  { %v443_v9 = vmul.f32 %v2079_v7, %v2071_v48  ;;  %v842_v10 = vpop.permute.xlu1 %841  ;;  %1899 = vmatpush3.bf16.msra.mxu1 %v546_v8  ;;  %v845_v11 = vpop.permute.xlu0 %844 }
 0x51e   :  { %v2303_v12 = vpack.c.bf16 %v842_v10, %v842_v10  ;;  %v2305_v13 = vpack.c.bf16 %v845_v11, %v845_v11  ;;  %1910 = vmatprep.subr.bf16.mxu1 %v2107_v37 }
 0x51f   :  { %v447_v15 = vpack.c.bf16 %v443_v9, %v443_v9 }
 0x520   :  { %v2081_v16 = vpop.eup %2080  ;;  %964 = vrot.lane.b32.xlu1 %v2303_v12, %s2112_s16  ;;  %1013 = vrot.lane.b32.xlu0 %v2305_v13, %s2112_s16 }
 0x521   :  { %v444_v17 = vmul.f32 %v2081_v16, %v2073_v50  ;;  %1901 = vmatmul.mubr.msk.bf16.vlgmr.msra.gmra.mrb[20].mxu1 %vm400_vm5, %v447_v15  ;;  %v867_v32 = vpop.permute.xlu1 %866 }
 0x522   :  { %1911 = vmatpush3.bf16.msra.mxu1 %v2311_v14  ;;  %1912 = vmatprep.mubr.msk.bf16.mxu1 %vm2108_vm1, %v2107_v37  ;;  %v872_v38 = vsel %vm206_vm2, %v867_v32, 0 }
 0x523   :  { %v448_v18 = vpack.c.bf16 %v444_v17, %v444_v17  ;;  %1922 = vmatprep.subr.bf16.mxu1 %v2107_v37 }
 0x525   :  { %1907 = vmatmul.mubr.msk.bf16.vlgmr.msra.gmra.mrb[8].mxu0 %vm400_vm5, %v448_v18 }
 0x526   :  { %1918 = vmatprep.mubr.msk.bf16.mxu0 %vm2108_vm1, %v2107_v37  ;;  %1917 = vmatpush3.bf16.msra.mxu0 %v2328_v19 }
 0x527   :  { %1928 = vmatprep.subr.bf16.mxu0 %v2107_v37 }
 0x57f   :  { %v490_v20 = vpop.f32.mrb[16].mxu1 }
 0x580   :  { %v634_v22 = vpack.c.bf16 %v490_v20, %v490_v20  ;;  %v1890_v23 = vpop.f32.mrb[17].mxu1 }
 0x581   :  { %v493_v24 = vpop.f32.mrb[18].mxu1 }
 0x582   :  { %v1891_v25 = vpop.f32.mrb[19].mxu1  ;;  %1913 = vmatmul.mubr.msk.bf16.vlgmr.msra.gmra.mrb[24].mxu1 %vm206_vm2, %v634_v22 }
 0x583   :  { %1923 = vmatpush3.bf16.msra.mxu1 %v2335_v21  ;;  %1924 = vmatprep.mubr.msk.bf16.mxu1 %vm2108_vm1, %v2107_v37 }
 0x584   :  { %1934 = vmatprep.subr.bf16.mxu1 %v2107_v37 }
 0x58e   :  { %v916_v43 = vpop.permute.xlu0 %915 }
 0x58f   :  { %v921_v48 = vsel %vm206_vm2, %v916_v43, 0 }
 0x592   :  { %v965_v50 = vpop.permute.xlu1 %964  ;;  %v1014_v52 = vpop.permute.xlu0 %1013 }
 0x593   :  { %v970_v51 = vsel %vm206_vm2, %v965_v50, 0  ;;  %v1019_v54 = vsel %vm206_vm2, %v1014_v52, 0 }
 0x5ec   :  { %v536_v26 = vpop.f32.mrb[4].mxu0 }
 0x5ed   :  { %v635_v28 = vpack.c.bf16 %v536_v26, %v536_v26  ;;  %v1896_v29 = vpop.f32.mrb[5].mxu0 }
 0x5ee   :  { %v539_v30 = vpop.f32.mrb[6].mxu0 }
 0x5ef   :  { %v1897_v31 = vpop.f32.mrb[7].mxu0  ;;  %1919 = vmatmul.mubr.msk.bf16.vlgmr.msra.gmra.mrb[12].mxu0 %vm206_vm2, %v635_v28 }
 0x5f0   :  { %1929 = vmatpush3.bf16.msra.mxu0 %v2345_v27  ;;  %1930 = vmatprep.mubr.msk.bf16.mxu0 %vm2108_vm1, %v2107_v37 }
 0x5f1   :  { %1940 = vmatprep.subr.bf16.mxu0 %v2107_v37 }
 0x5f4   :  { %v582_v33 = vpop.f32.mrb[20].mxu1 }
 0x5f5   :  { %v636_v34 = vpack.c.bf16 %v582_v33, %v582_v33  ;;  %v1902_v35 = vpop.f32.mrb[21].mxu1 }
 0x5f6   :  { %v585_v36 = vpop.f32.mrb[22].mxu1 }
 0x5f7   :  { %v1903_v42 = vpop.f32.mrb[23].mxu1  ;;  %1925 = vmatmul.mubr.msk.bf16.vlgmr.msra.gmra.mrb[28].mxu1 %vm206_vm2, %v636_v34 }
 0x5f8   :  { %1935 = vmatpush3.bf16.xpose.msra.mxu1 %v872_v38  ;;  %v628_v44 = vpop.f32.mrb[8].mxu0  ;;  %1936 = vmatprep.mubr.msk.bf16.mxu1 %vm2108_vm1, %v2107_v37 }
 0x5f9   :  { %v637_v45 = vpack.c.bf16 %v628_v44, %v628_v44  ;;  %v1908_v46 = vpop.f32.mrb[9].mxu0  ;;  %1946 = vmatprep.subr.bf16.mxu1 %v2107_v37 }
 0x5fa   :  { %v631_v47 = vpop.f32.mrb[10].mxu0 }
 0x5fb   :  { %v1909_v49 = vpop.f32.mrb[11].mxu0  ;;  %1931 = vmatmul.mubr.msk.bf16.vlgmr.msra.gmra.mrb[16].mxu0 %vm206_vm2, %v637_v45 }
 0x5fc   :  { %1941 = vmatpush3.bf16.xpose.msra.mxu0 %v921_v48  ;;  %1942 = vmatprep.mubr.msk.bf16.mxu0 %vm2108_vm1, %v2107_v37 }
 0x5fd   :  { %1952 = vmatprep.subr.bf16.mxu0 %v2107_v37 }
 0x5ff   :  { %1937 = vmatmul.mubr.msk.bf16.vlgmr.msra.gmra.mrb[32].mxu1 %vm206_vm2, %v2284_v53  ;;  %v1113_v53 = vsel %vm452_vm3, %v861_v55, 0 }
 0x600   :  { %1947 = vmatpush3.bf16.xpose.msra.mxu1 %v970_v51  ;;  %1948 = vmatprep.mubr.msk.bf16.mxu1 %vm2108_vm1, %v2107_v37 }
 0x601   :  { %1958 = vmatprep.subr.bf16.mxu1 %v2107_v37 }
 0x603   :  { %1943 = vmatmul.mubr.msk.bf16.vlgmr.msra.gmra.mrb[20].mxu0 %vm206_vm2, %v2295_v5 }
 0x604   :  { %1953 = vmatpush3.bf16.xpose.msra.mxu0 %v1019_v54  ;;  %1954 = vmatprep.mubr.msk.bf16.mxu0 %vm2108_vm1, %v2107_v37 }
 0x605   :  { %1964 = vmatprep.subr.bf16.mxu0 %v2107_v37 }
 0x607   :  { %1949 = vmatmul.mubr.msk.bf16.vlgmr.msra.gmra.mrb[36].mxu1 %vm206_vm2, %v2303_v12 }
 0x608   :  { %1959 = vmatpush3.bf16.msra.mxu1 %v1113_v53  ;;  %1960 = vmatprep.mubr.msk.bf16.mxu1 %vm2108_vm1, %v2107_v37 }
 0x609   :  { %1970 = vmatprep.subr.bf16.mxu1 %v2107_v37 }
 0x60b   :  { %1955 = vmatmul.mubr.msk.bf16.vlgmr.msra.gmra.mrb[24].mxu0 %vm206_vm2, %v2305_v13 }
 0x60c   :  { %1966 = vmatprep.mubr.msk.bf16.mxu0 %vm2108_vm1, %v2107_v37 }
 0x655   :  { %v681_v56 = vpop.f32.mrb[24].mxu1 }
 0x656   :  { %v1914_v57 = vpop.f32.mrb[25].mxu1 }
 0x657   :  { %v684_v39 = vpop.f32.mrb[26].mxu1 }
 0x658   :  { %v1915_v58 = vpop.f32.mrb[27].mxu1 }
 0x6c2   :  { %v730_v59 = vpop.f32.mrb[12].mxu0 }
 0x6c3   :  { %v834_v60 = vadd.f32 %v730_v59, %v681_v56  ;;  %v1920_v61 = vpop.f32.mrb[13].mxu0 }
 0x6c4   :  { %v733_v63 = vpop.f32.mrb[14].mxu0 }
 0x6c5   :  { %v1921_v0 = vpop.f32.mrb[15].mxu0 }
 0x6ca   :  { %v779_v40 = vpop.f32.mrb[28].mxu1 }
 0x6cb   :  { %v835_v3 = vadd.f32 %v834_v60, %v779_v40  ;;  %v1926_v4 = vpop.f32.mrb[29].mxu1 }
 0x6cc   :  { %v782_v5 = vpop.f32.mrb[30].mxu1  ;;  %v2413_v4 = vld [vmem:[%s2530_s5] ss:$0 sm:$0xff] }
 0x6cd   :  { %v1927_v6 = vpop.f32.mrb[31].mxu1 }
 0x6ce   :  { %v828_v7 = vpop.f32.mrb[16].mxu0 }
 0x6cf   :  { %v2386_v8 = vadd.f32 %v835_v3, %v828_v7  ;;  %v1932_v9 = vpop.f32.mrb[17].mxu0 }
 0x6d0   :  { %v831_v10 = vpop.f32.mrb[18].mxu0 }
 0x6d1   :  { %v1933_v11 = vpop.f32.mrb[19].mxu0  ;;  %v1472_v3 = vadd.f32 %v2182_v1, %v2386_v8 }
 0x6d2   :  { %v908_v12 = vpop.f32.mrb[32].mxu1 }
 0x6d3   :  { %v909_v13 = vadd.f32 %v908_v12, %v2256_v62  ;;  %v1938_v15 = vpop.f32.mrb[33].mxu1  ;;  %v2416_v5 = vadd.f32 %v2413_v4, %v1472_v3 }
 0x6d4   :  { %v911_v16 = vpop.f32.mrb[34].mxu1 }
 0x6d5   :  { %v1939_v17 = vpop.f32.mrb[35].mxu1  ;;  %v1061_v18 = vsel %vm400_vm5, %v909_v13, -inf  ;;  %v1485_v6 = vsel %vm48_vm0, %v2416_v5, 0.0 }
 0x6d6   :  { %v957_v20 = vpop.f32.mrb[20].mxu0  ;;  %1062 = vmax.xlane.f32.xlu1 %v1061_v18 }
 0x6d7   :  { %v958_v22 = vadd.f32 %v957_v20, %v2256_v62  ;;  %v1944_v23 = vpop.f32.mrb[21].mxu0 }
 0x6d8   :  { %v960_v24 = vpop.f32.mrb[22].mxu0 }
 0x6d9   :  { %v1945_v25 = vpop.f32.mrb[23].mxu0  ;;  %v1064_v26 = vsel %vm400_vm5, %v958_v22, -inf }
 0x6da   :  { %1065 = vmax.xlane.f32.xlu0 %v1064_v26  ;;  %v1006_v28 = vpop.f32.mrb[36].mxu1 }
 0x6db   :  { %v1007_v29 = vadd.f32 %v1006_v28, %v2256_v62  ;;  %v1950_v30 = vpop.f32.mrb[37].mxu1 }
 0x6dc   :  { %v1009_v31 = vpop.f32.mrb[38].mxu1 }
 0x6dd   :  { %v1951_v32 = vpop.f32.mrb[39].mxu1  ;;  %v1067_v33 = vsel %vm400_vm5, %v1007_v29, -inf }
 0x6de   :  { %v1055_v34 = vpop.f32.mrb[24].mxu0  ;;  %1068 = vmax.xlane.f32.xlu0 %v1067_v33 }
 0x6df   :  { %v1056_v35 = vadd.f32 %v1055_v34, %v2256_v62  ;;  %v1956_v36 = vpop.f32.mrb[25].mxu0 }
 0x6e0   :  { %v1058_v38 = vpop.f32.mrb[26].mxu0 }
 0x6e1   :  { %v1957_v42 = vpop.f32.mrb[27].mxu0  ;;  %v1070_v43 = vsel %vm400_vm5, %v1056_v35, -inf }
 0x6e2   :  { %1071 = vmax.xlane.f32.xlu0 %v1070_v43 }
 0x6e7   :  { %852 = vrot.lane.b32.xlu1 %v2225_v41, %s2110_s2 }
 0x763   :  { %v1063_v44 = vpop.xlane.xlu1 %1062 }
 0x764   :  { %v1073_v45 = vsub.f32 %v909_v13, %v1063_v44 }
 0x766   :  { %v1077_v46 = vmul.f32 1.442695, %v1073_v45 }
 0x767   :  { %v1066_v47 = vpop.xlane.xlu0 %1065  ;;  %v853_v48 = vpop.permute.xlu1 %852 }
 0x768   :  { %2082 = vpow2.f32 %v1077_v46  ;;  %v1074_v49 = vsub.f32 %v958_v22, %v1066_v47  ;;  %v862_v50 = vpack.c.bf16 %v853_v48, %v853_v48 }
 0x76a   :  { %v1079_v51 = vmul.f32 1.442695, %v1074_v49  ;;  %v1159_v62 = vsel %vm452_vm3, %v862_v50, 0 }
 0x76b   :  { %1965 = vmatpush3.bf16.msra.mxu0 %v1159_v62  ;;  %v1069_v52 = vpop.xlane.xlu0 %1068 }
 0x76c   :  { %2084 = vpow2.f32 %v1079_v51  ;;  %v1075_v54 = vsub.f32 %v1007_v29, %v1069_v52  ;;  %1976 = vmatprep.subr.bf16.mxu0 %v2107_v37 }
 0x76e   :  { %v1081_v55 = vmul.f32 1.442695, %v1075_v54 }
 0x76f   :  { %v1072_v53 = vpop.xlane.xlu0 %1071 }
 0x770   :  { %2086 = vpow2.f32 %v1081_v55  ;;  %v1076_v56 = vsub.f32 %v1056_v35, %v1072_v53 }
 0x772   :  { %v2083_v57 = vpop.eup %2082  ;;  %v1083_v39 = vmul.f32 1.442695, %v1076_v56 }
 0x773   :  { %v1085_v58 = vsel %vm400_vm5, %v2083_v57, 0.0 }
 0x774   :  { %2088 = vpow2.f32 %v1083_v39  ;;  %1086 = vadd.xlane.f32.xlu1 %v1085_v58 }
 0x776   :  { %v2085_v59 = vpop.eup %2084 }
 0x777   :  { %v1088_v60 = vsel %vm400_vm5, %v2085_v59, 0.0 }
 0x778   :  { %1089 = vadd.xlane.f32.xlu0 %v1088_v60 }
 0x77a   :  { %v2087_v61 = vpop.eup %2086 }
 0x77b   :  { %v1091_v63 = vsel %vm400_vm5, %v2087_v61, 0.0 }
 0x77c   :  { %1092 = vadd.xlane.f32.xlu1 %v1091_v63 }
 0x77e   :  { %v2089_v0 = vpop.eup %2088 }
 0x77f   :  { %v1094_v40 = vsel %vm400_vm5, %v2089_v0, 0.0 }
 0x780   :  { %1095 = vadd.xlane.f32.xlu0 %v1094_v40 }
 0x78d   :  { %858 = vrot.lane.b32.xlu1 %v2225_v41, %s2111_s15 }
 0x796   :  { %855 = vrot.lane.b32.xlu0 %v2225_v41, %s2109_s1 }
 0x7b1   :  { %1486 = vadd.xlane.f32.xlu1 %v1485_v6 }
 0x801   :  { %v1087_v7 = vpop.xlane.xlu1 %1086 }
 0x802   :  { %2090 = vrcp.f32 %v1087_v7 }
 0x805   :  { %v1090_v9 = vpop.xlane.xlu0 %1089 }
 0x806   :  { %2092 = vrcp.f32 %v1090_v9 }
 0x809   :  { %v1093_v41 = vpop.xlane.xlu1 %1092 }
 0x80a   :  { %2094 = vrcp.f32 %v1093_v41 }
 0x80c   :  { %v2091_v10 = vpop.eup %2090 }
 0x80d   :  { %v1101_v1 = vmul.f32 %v2091_v10, %v2083_v57  ;;  %v1096_v8 = vpop.xlane.xlu0 %1095  ;;  %v859_v11 = vpop.permute.xlu1 %858 }
 0x80e   :  { %2096 = vrcp.f32 %v1096_v8  ;;  %v864_v16 = vpack.c.bf16 %v859_v11, %v859_v11 }
 0x80f   :  { %v1105_v12 = vpack.c.bf16 %v1101_v1, %v1101_v1 }
 0x810   :  { %v2093_v13 = vpop.eup %2092  ;;  %v1251_v25 = vsel %vm452_vm3, %v864_v16, 0 }
 0x811   :  { %v1102_v15 = vmul.f32 %v2093_v13, %v2085_v59  ;;  %1961 = vmatmul.mubr.msk.bf16.vlgmr.msra.gmra.mrb[40].mxu1 %vm400_vm5, %v1105_v12  ;;  %v856_v17 = vpop.permute.xlu0 %855 }
 0x812   :  { %v863_v18 = vpack.c.bf16 %v856_v17, %v856_v17  ;;  %1972 = vmatprep.mubr.msk.bf16.mxu1 %vm2108_vm1, %v2107_v37 }
 0x813   :  { %v1106_v20 = vpack.c.bf16 %v1102_v15, %v1102_v15 }
 0x814   :  { %v2095_v22 = vpop.eup %2094  ;;  %v1205_v23 = vsel %vm452_vm3, %v863_v18, 0 }
 0x815   :  { %v1103_v24 = vmul.f32 %v2095_v22, %v2087_v61  ;;  %1967 = vmatmul.mubr.msk.bf16.vlgmr.msra.gmra.mrb[28].mxu0 %vm400_vm5, %v1106_v20  ;;  %1971 = vmatpush3.bf16.msra.mxu1 %v1205_v23 }
 0x816   :  { %1977 = vmatpush3.bf16.msra.mxu0 %v1251_v25  ;;  %1978 = vmatprep.mubr.msk.bf16.mxu0 %vm2108_vm1, %v2107_v37 }
 0x817   :  { %v1107_v26 = vpack.c.bf16 %v1103_v24, %v1103_v24  ;;  %1982 = vmatprep.subr.bf16.mxu1 %v2107_v37  ;;  %1988 = vmatprep.subr.bf16.mxu0 %v2107_v37 }
 0x818   :  { %v2097_v28 = vpop.eup %2096 }
 0x819   :  { %v1104_v29 = vmul.f32 %v2097_v28, %v2089_v0  ;;  %1973 = vmatmul.mubr.msk.bf16.vlgmr.msra.gmra.mrb[44].mxu1 %vm400_vm5, %v1107_v26 }
 0x81a   :  { %1983 = vmatpush3.bf16.msra.mxu1 %v2311_v14  ;;  %1984 = vmatprep.mubr.msk.bf16.mxu1 %vm2108_vm1, %v2107_v37 }
 0x81b   :  { %v1108_v30 = vpack.c.bf16 %v1104_v29, %v1104_v29  ;;  %1994 = vmatprep.subr.bf16.mxu1 %v2107_v37 }
 0x81d   :  { %1979 = vmatmul.mubr.msk.bf16.vlgmr.msra.gmra.mrb[32].mxu0 %vm400_vm5, %v1108_v30 }
 0x81e   :  { %1989 = vmatpush3.bf16.msra.mxu0 %v2328_v19  ;;  %1990 = vmatprep.mubr.msk.bf16.mxu0 %vm2108_vm1, %v2107_v37 }
 0x81f   :  { %2000 = vmatprep.subr.bf16.mxu0 %v2107_v37 }
 0x83e   :  { %v1487_v58 = vpop.xlane.xlu1 %1486 }
 0x83f   :  { %v1491_v0 = vmul.f32 0.03125, %v1487_v58 }
 0x841   :  { %v1493_v41 = vsub.f32 %v2416_v5, %v1491_v0 }
 0x843   :  { %v1495_v12 = vmul.f32 %v1493_v41, %v1493_v41 }
 0x845   :  { %v1497_v13 = vsel %vm48_vm0, %v1495_v12, 0.0 }
 0x8e4   :  { %v1149_v31 = vpop.f32.mrb[40].mxu1 }
 0x8e5   :  { %v1293_v32 = vpack.c.bf16 %v1149_v31, %v1149_v31  ;;  %v1962_v33 = vpop.f32.mrb[41].mxu1  ;;  %v1779_v31 = vld [vmem:[%s2532_s6] ss:$0 sm:$0xff] }
 0x8e6   :  { %v1152_v34 = vpop.f32.mrb[42].mxu1 }
 0x8e7   :  { %v1963_v14 = vpop.f32.mrb[43].mxu1  ;;  %1985 = vmatmul.mubr.msk.bf16.vlgmr.msra.gmra.mrb[48].mxu1 %vm206_vm2, %v1293_v32 }
 0x8e8   :  { %v1195_v35 = vpop.f32.mrb[28].mxu0  ;;  %1995 = vmatpush3.bf16.msra.mxu1 %v2335_v21  ;;  %1996 = vmatprep.mubr.msk.bf16.mxu1 %vm2108_vm1, %v2107_v37  ;;  %v1780_v14 = vld [vmem:[%s2533_s7] ss:$0 sm:$0xff] }
 0x8e9   :  { %v1294_v36 = vpack.c.bf16 %v1195_v35, %v1195_v35  ;;  %v1968_v19 = vpop.f32.mrb[29].mxu0  ;;  %2006 = vmatprep.subr.bf16.mxu1 %v2107_v37 }
 0x8ea   :  { %v1198_v38 = vpop.f32.mrb[30].mxu0 }
 0x8eb   :  { %v1969_v42 = vpop.f32.mrb[31].mxu0  ;;  %1991 = vmatmul.mubr.msk.bf16.vlgmr.msra.gmra.mrb[36].mxu0 %vm206_vm2, %v1294_v36 }
 0x8ec   :  { %v1241_v43 = vpop.f32.mrb[44].mxu1  ;;  %2001 = vmatpush3.bf16.msra.mxu0 %v2345_v27  ;;  %2002 = vmatprep.mubr.msk.bf16.mxu0 %vm2108_vm1, %v2107_v37  ;;  %v2054_v42 = vld [vmem:[%s2534_s10] sm:$0xff]  }
 0x8ed   :  { %v1295_v44 = vpack.c.bf16 %v1241_v43, %v1241_v43  ;;  %v1974_v45 = vpop.f32.mrb[45].mxu1  ;;  %2014 = vmatprep.subr.bf16.mxu0 %v2107_v37  ;;  %v2055_v43 = vld [vmem:[%s2534_s10 + $0x8] sm:$0xff]  }
 0x8ee   :  { %v1244_v21 = vpop.f32.mrb[46].mxu1  ;;  %v2057_v45 = vld [vmem:[%s2534_s10 + $0x18] sm:$0xff]  }
 0x8ef   :  { %v1975_v46 = vpop.f32.mrb[47].mxu1  ;;  %1997 = vmatmul.mubr.msk.bf16.vlgmr.msra.gmra.mrb[52].mxu1 %vm206_vm2, %v1295_v44  ;;  %v2056_v44 = vld [vmem:[%s2534_s10 + $0x10] sm:$0xff]   ;;  %v2058_v21 = vld [vmem:[%s2534_s10 + $0x20] sm:$0xff]  }
 0x8f0   :  { %v1287_v47 = vpop.f32.mrb[32].mxu0  ;;  %2010 = vmatprep.mubr.msk.bf16.mxu1 %vm2108_vm1, %v2107_v37  ;;  %v2059_v46 = vld [vmem:[%s2534_s10 + $0x28] sm:$0xff]  }
 0x8f1   :  { %v1296_v48 = vpack.c.bf16 %v1287_v47, %v1287_v47  ;;  %v1980_v49 = vpop.f32.mrb[33].mxu0  ;;  %v2060_v47 = vld [vmem:[%s2534_s10 + $0x30] sm:$0xff]  }
 0x8f2   :  { %v1290_v50 = vpop.f32.mrb[34].mxu0  ;;  %v1781_v49 = vld [vmem:[%s2535_s9] ss:$0 sm:$0xff] }
 0x8f3   :  { %v1981_v51 = vpop.f32.mrb[35].mxu0  ;;  %2003 = vmatmul.mubr.msk.bf16.vlgmr.msra.gmra.mrb[40].mxu0 %vm206_vm2, %v1296_v48  ;;  %v2061_v48 = vld [vmem:[%s2534_s10 + $0x38] sm:$0xff]  }
 0x8f4   :  { %2030 = vmatprep.mubr.msk.bf16.mxu0 %vm2108_vm1, %v2107_v37  ;;  %2015 = vmatpush3.bf16.msra.mxu0 %v2054_v42 }
 0x8f5   :  { %2016 = vmatprep.subr.bf16.mxu0 %v2107_v37 }
 0x8f8   :  { %2017 = vmatpush3.bf16.msra.mxu0 %v2055_v43 }
 0x8f9   :  { %2018 = vmatprep.subr.bf16.mxu0 %v2107_v37 }
 0x8fc   :  { %2019 = vmatpush3.bf16.msra.mxu0 %v2056_v44 }
 0x8fd   :  { %2020 = vmatprep.subr.bf16.mxu0 %v2107_v37 }
 0x900   :  { %2021 = vmatpush3.bf16.msra.mxu0 %v2057_v45 }
 0x901   :  { %2022 = vmatprep.subr.bf16.mxu0 %v2107_v37 }
 0x904   :  { %2023 = vmatpush3.bf16.msra.mxu0 %v2058_v21 }
 0x905   :  { %2024 = vmatprep.subr.bf16.mxu0 %v2107_v37 }
 0x908   :  { %2025 = vmatpush3.bf16.msra.mxu0 %v2059_v46 }
 0x909   :  { %2026 = vmatprep.subr.bf16.mxu0 %v2107_v37 }
 0x90c   :  { %2027 = vmatpush3.bf16.msra.mxu0 %v2060_v47 }
 0x90d   :  { %2028 = vmatprep.subr.bf16.mxu0 %v2107_v37 }
 0x910   :  { %2029 = vmatpush3.bf16.msra.mxu0 %v2061_v48 }
 0x9ba   :  { %v1334_v27 = vpop.f32.mrb[48].mxu1 }
 0x9bb   :  { %v1986_v62 = vpop.f32.mrb[49].mxu1 }
 0x9bc   :  { %v1337_v52 = vpop.f32.mrb[50].mxu1 }
 0x9bd   :  { %v1987_v54 = vpop.f32.mrb[51].mxu1 }
 0x9be   :  { %v1377_v55 = vpop.f32.mrb[36].mxu0 }
 0x9bf   :  { %v1469_v53 = vadd.f32 %v1377_v55, %v1334_v27  ;;  %v1992_v56 = vpop.f32.mrb[37].mxu0 }
 0x9c0   :  { %v1380_v57 = vpop.f32.mrb[38].mxu0 }
 0x9c1   :  { %v1993_v39 = vpop.f32.mrb[39].mxu0 }
 0x9c2   :  { %v1420_v59 = vpop.f32.mrb[52].mxu1 }
 0x9c3   :  { %v1470_v60 = vadd.f32 %v1469_v53, %v1420_v59  ;;  %v1998_v61 = vpop.f32.mrb[53].mxu1 }
 0x9c4   :  { %v1423_v63 = vpop.f32.mrb[54].mxu1 }
 0x9c5   :  { %v1999_v40 = vpop.f32.mrb[55].mxu1 }
 0x9c6   :  { %v1463_v3 = vpop.f32.mrb[40].mxu0 }
 0x9c7   :  { %v1471_v6 = vadd.f32 %v1470_v60, %v1463_v3  ;;  %v2004_v7 = vpop.f32.mrb[41].mxu0 }
 0x9c8   :  { %v1466_v9 = vpop.f32.mrb[42].mxu0 }
 0x9c9   :  { %v1473_v10 = vadd.f32 %v2184_v2, %v1471_v6  ;;  %v2005_v1 = vpop.f32.mrb[43].mxu0  ;;  %v2052_v2 = vld [vmem:[%s2531_s8] sm:$0xff]  }
 0x9ca   :  { %2007 = vmatpush3.bf16.msra.mxu1 %v2052_v2  ;;  %v1785_v1 = vld [vmem:[%s2536_s11] ss:$0 sm:$0xff] }
 0x9cb   :  { %v2459_v8 = vadd.f32 %v2413_v4, %v1473_v10  ;;  %v2053_v4 = vld [vmem:[%s2531_s8 + $0x8] sm:$0xff]   ;;  %2008 = vmatprep.subr.bf16.mxu1 %v2107_v37 }
 0x9cd   :  { %v1488_v11 = vsel %vm48_vm0, %v2459_v8, 0.0 }
 0x9ce   :  { %1489 = vadd.xlane.f32.xlu0 %v1488_v11  ;;  %2009 = vmatpush3.bf16.msra.mxu1 %v2053_v4 }
 0x9d2   :  { %1498 = vadd.xlane.f32.xlu0 %v1497_v13 }
 0xa5b   :  { %v1490_v15 = vpop.xlane.xlu0 %1489 }
 0xa5c   :  { %v1492_v16 = vmul.f32 0.03125, %v1490_v15 }
 0xa5e   :  { %v1494_v17 = vsub.f32 %v2459_v8, %v1492_v16 }
 0xa5f   :  { %v1499_v22 = vpop.xlane.xlu0 %1498 }
 0xa60   :  { %v1496_v18 = vmul.f32 %v1494_v17, %v1494_v17  ;;  %v1503_v23 = vmul.f32 0.03125, %v1499_v22 }
 0xa62   :  { %v1500_v20 = vsel %vm48_vm0, %v1496_v18, 0.0  ;;  %v1505_v24 = vadd.f32 1e-05, %v1503_v23 }
 0xa63   :  { %1501 = vadd.xlane.f32.xlu1 %v1500_v20 }
 0xa64   :  { %2098 = vrsqrt.f32 %v1505_v24 }
 0xa6e   :  { %v2099_v29 = vpop.eup %2098 }
 0xa6f   :  { %v1509_v30 = vmul.f32 %v2099_v29, %v1493_v41 }
 0xa71   :  { %v1517_v33 = vmul.f32 %v1779_v31, %v1509_v30 }
 0xa73   :  { %v1525_v36 = vadd.f32 %v1780_v14, %v1517_v33 }
 0xaf0   :  { %v1502_v25 = vpop.xlane.xlu1 %1501 }
 0xaf1   :  { %v1504_v26 = vmul.f32 0.03125, %v1502_v25 }
 0xaf3   :  { %v1506_v28 = vadd.f32 1e-05, %v1504_v26 }
 0xaf5   :  { %2100 = vrsqrt.f32 %v1506_v28 }
 0xaff   :  { %v2101_v32 = vpop.eup %2100 }
 0xb00   :  { %v1510_v34 = vmul.f32 %v2101_v32, %v1494_v17 }
 0xb02   :  { %v1518_v35 = vmul.f32 %v1779_v31, %v1510_v34 }
 0xb04   :  { %v1526_v19 = vadd.f32 %v1780_v14, %v1518_v35 }
 0xb06   :  { %v1527_v38 = vpack.c.bf16 %v1526_v19, %v1525_v36 }
 0xb08   :  { %2011 = vmatmul.mubr.msk.bf16.vlgmr.msra.gmra.mrb[56].mxu1 %vm48_vm0, %v1527_v38 }
 0xbdb   :  { %v1588_v50 = vpop.f32.mrb[56].mxu1 }
 0xbdc   :  { %v1589_v51 = vadd.f32 %v1781_v49, %v1588_v50  ;;  %v2012_v27 = vpop.f32.mrb[57].mxu1 }
 0xbdd   :  { %v1591_v62 = vpop.f32.mrb[58].mxu1 }
 0xbde   :  { %v1597_v52 = vmul.f32 0.044715, %v1589_v51  ;;  %v1592_v54 = vadd.f32 %v1781_v49, %v1591_v62  ;;  %v2013_v55 = vpop.f32.mrb[59].mxu1  ;;  %v1595_v3 = vmul.f32 0.5, %v1589_v51 }
 0xbe0   :  { %v1599_v53 = vmul.f32 %v1597_v52, %v1589_v51  ;;  %v1598_v56 = vmul.f32 0.044715, %v1592_v54  ;;  %v1596_v6 = vmul.f32 0.5, %v1592_v54 }
 0xbe2   :  { %v1601_v57 = vmul.f32 %v1599_v53, %v1589_v51  ;;  %v1600_v39 = vmul.f32 %v1598_v56, %v1592_v54 }
 0xbe4   :  { %v1603_v58 = vadd.f32 %v1601_v57, %v1589_v51  ;;  %v1602_v59 = vmul.f32 %v1600_v39, %v1592_v54 }
 0xbe6   :  { %v1605_v60 = vmul.f32 0.7978846, %v1603_v58  ;;  %v1604_v37 = vadd.f32 %v1602_v59, %v1592_v54 }
 0xbe8   :  { %2102 = vtanh.f32 %v1605_v60  ;;  %v1606_v61 = vmul.f32 0.7978846, %v1604_v37 }
 0xbea   :  { %2104 = vtanh.f32 %v1606_v61 }
 0xbf2   :  { %v2103_v63 = vpop.eup %2102 }
 0xbf3   :  { %v1609_v0 = vadd.f32 1.0, %v2103_v63 }
 0xbf4   :  { %v2105_v40 = vpop.eup %2104 }
 0xbf5   :  { %v1610_v7 = vadd.f32 1.0, %v2105_v40  ;;  %v1611_v9 = vmul.f32 %v1609_v0, %v1595_v3 }
 0xbf7   :  { %v1612_v41 = vmul.f32 %v1610_v7, %v1596_v6 }
 0xbf9   :  { %v1613_v10 = vpack.c.bf16 %v1612_v41, %v1611_v9 }
 0xbfb   :  { %2031 = vmatmul.mubr.bf16.vlgmr.msra.gmra.mrb[44].mxu0 %v1613_v10 }
 0xcce   :  { %v1719_v11 = vpop.f32.mrb[44].mxu0 }
 0xccf   :  { %v1720_v12 = vadd.f32 %v1785_v1, %v1719_v11  ;;  %v2032_v13 = vpop.f32.mrb[45].mxu0 }
 0xcd0   :  { %v1722_v15 = vpop.f32.mrb[46].mxu0 }
 0xcd1   :  { %v1726_v16 = vadd.f32 %v1720_v12, %v2416_v5  ;;  %v1723_v17 = vadd.f32 %v1785_v1, %v1722_v15  ;;  %v2033_v18 = vpop.f32.mrb[47].mxu0 }
 0xcd3   :  { %v1796_v20 = vpack.c.bf16 %v1726_v16, %v1726_v16  ;;  %v1727_v2 = vadd.f32 %v1723_v17, %v2459_v8 }
 0xcd5   :  { %1737 = vst.msk [vmem:[%s2537_s12] sm:$0xf] %vm1736_vm6, %v1796_v20  ;;  %v1797_v4 = vpack.c.bf16 %v1727_v2, %v1727_v2 }
 0xcd7   :  { %1738 = vst.msk [vmem:[%s2537_s12 + $0x4] sm:$0xf] %vm1736_vm6, %v1797_v4 }

// kernel: _lambda_.11
= control target key start
LH: loop header
LB: loop body
LE: loop exit
PB: predicated region body
PF: predicated region fallthrough
CT: control target
= control target key end

     0   :  { %vm26_vm0 = vcmask 254976   ;;  %s250_s0 = inlined_call_operand.vmem [shape: bf16[2,32], index: 0, kind: input, shape index: {}]   ;;  %s251_s1 = inlined_call_operand.vmem [shape: f32[1,32], index: 1, kind: input, shape index: {}]   ;;  %s252_s2 = inlined_call_operand.vmem [shape: f32[1,32], index: 2, kind: input, shape index: {}]   ;;  %s253_s3 = inlined_call_operand.vmem [shape: bf16[32,8], index: 3, kind: input, shape index: {}]   ;;  %s254_s4 = inlined_call_operand.vmem [shape: f32[1,8], index: 4, kind: input, shape index: {}]   ;;  %s255_s5 = inlined_call_operand.hbm [shape: f32[2,8], index: 5, kind: output, shape index: {}]  }
   0x1   :  { %v22_v0 = vld [vmem:[%s250_s0] sm:$0x1] }
   0x2   :  { %v23_v1 = vunpack.c.l.bf16 %v22_v0 }
   0x3   :  { %10 = vsyncpa [#allocation3], 0  ;;  %v159_v8 = vld [vmem:[%s253_s3] sm:$0xff]   ;;  %v187_v9 = vmov 0.0   ;;  %v160_v10 = vld [vmem:[%s253_s3 + $0x8] sm:$0xff]   ;;  %vm188_vm1 = vmmov 0  }
   0x4   :  { %v27_v2 = vsel %vm26_vm0, %v23_v1, 0.0  ;;  %148 = vmatprep.subr.bf16.mxu0 %v187_v9  ;;  %152 = vmatprep.mubr.msk.bf16.mxu0 %vm188_vm1, %v187_v9  ;;  %v139_v15 = vld [vmem:[%s251_s1] ss:$0 sm:$0xff]  ;;  %vm79_vm2 = vcmask 261120   ;;  %s189_s28 = smov [#allocation2]   ;;  %vm123_vm3 = vcmask 58368  }
   0x5   :  { %28 = vadd.xlane.f32.xlu0 %v27_v2  ;;  %149 = vmatpush3.bf16.msra.mxu0 %v159_v8  ;;  %v140_v17 = vld [vmem:[%s252_s2] ss:$0 sm:$0xff]  ;;  %s131_s29 = sshll.u32 %s189_s28, 4  ;;  %s132_s29 = int_to_ptr.vmem [resolvable:$true] %s131_s29 }
   0x6   :  { %150 = vmatprep.subr.bf16.mxu0 %v187_v9  ;;  %v141_v21 = vld [vmem:[%s254_s4] ss:$0 sm:$0xff]  ;;  %s163_s1 = scalar_lea.vmem %s132_s29, 32  ;;  %p168_p1 = scmp.lt.s32.totalorder %s132_s29, %s132_s29 }
   0x7   :  { %p164_p0 = scmp.ne.s32.totalorder %s132_s29, %s163_s1  ;;  %p169_p2 = scmp.lt.s32.totalorder %s163_s1, %s163_s1 }
   0x9   :  { %151 = vmatpush3.bf16.msra.mxu0 %v160_v10  ;;  %p170_p3 = por %p169_p2, %p168_p1 }
   0xb   :  { %p171_p4 = pnand %p170_p3, %p164_p0 }
  0x92   :  { %v29_v3 = vpop.xlane.xlu0 %28 }
  0x93   :  { %v31_v4 = vmul.f32 0.03125, %v29_v3 }
  0x95   :  { %v32_v5 = vsub.f32 %v23_v1, %v31_v4 }
  0x97   :  { %v33_v6 = vmul.f32 %v32_v5, %v32_v5 }
  0x99   :  { %v34_v7 = vsel %vm26_vm0, %v33_v6, 0.0 }
  0x9a   :  { %35 = vadd.xlane.f32.xlu0 %v34_v7 }
 0x127   :  { %v36_v11 = vpop.xlane.xlu0 %35 }
 0x128   :  { %v37_v12 = vmul.f32 0.03125, %v36_v11 }
 0x12a   :  { %v38_v13 = vadd.f32 1e-05, %v37_v12 }
 0x12c   :  { %161 = vrsqrt.f32 %v38_v13 }
 0x136   :  { %v162_v14 = vpop.eup %161 }
 0x137   :  { %v40_v16 = vmul.f32 %v162_v14, %v32_v5 }
 0x139   :  { %v47_v18 = vmul.f32 %v139_v15, %v40_v16 }
 0x13b   :  { %v54_v19 = vadd.f32 %v140_v17, %v47_v18 }
 0x13d   :  { %v55_v20 = vpack.c.bf16 %v54_v19, %v54_v19 }
 0x13f   :  { %153 = vmatmul.mubr.msk.bf16.vlgmr.msra.gmra.mrb[0].mxu0 %vm79_vm2, %v55_v20 }
 0x212   :  { %v117_v22 = vpop.f32.mrb[0].mxu0 }
 0x213   :  { %v118_v23 = vadd.f32 %v141_v21, %v117_v22  ;;  %v154_v24 = vpop.f32.mrb[1].mxu0 }
 0x214   :  { %v120_v25 = vpop.f32.mrb[2].mxu0 }
 0x215   :  { %v155_v26 = vpop.f32.mrb[3].mxu0  ;;  %124 = vst.msk [vmem:[#allocation2] sm:$0x3] %vm123_vm3, %v118_v23 }
 0x216   :  { %174 = shalt.err (!%p171_p4)
}
 0x217   :  { %s175_s4 = scalar_lea.hbm %s255_s5, 32 }
 0x218   :  { %p176_p5 = scmp.ne.s32.totalorder %s255_s5, %s175_s4  ;;  %p179_p6 = scmp.lt.u32.totalorder %s175_s4, %s255_s5 }
 0x21a   :  { %p181_p7 = pnand %p179_p6, %p176_p5 }
 0x21c   :  { %184 = shalt.err (!%p181_p7)
}
 0x21d   :  { %134 = dma.vmem_to_hbm [thread:$0]  %s132_s29, 32, %s255_s5, [#allocation3]  }
 0x21e   :  { %185 = dma.done.wait [#allocation3], 32  }
 0x21f   :  { %186 = vsyncadd [#allocation3], 4294967264 }
 0x220   :  { %138 = vsyncpa [#allocation3], 1 }

// kernel: _lambda_.10
= control target key start
LH: loop header
LB: loop body
LE: loop exit
PB: predicated region body
PF: predicated region fallthrough
CT: control target
= control target key end

     0   :  { %vm54_vm0 = vcmask 261120   ;;  %v2162_v19 = vmov 0   ;;  %v2163_v37 = vmov 0.0   ;;  %vm2164_vm1 = vmmov 0   ;;  %s2167_s25 = smov 80   ;;  %s2168_s26 = smov 64   ;;  %s2601_s0 = inlined_call_operand.vmem [shape: bf16[16,32], index: 0, kind: input, shape index: {}]   ;;  %s2602_s3 = inlined_call_operand.vmem [shape: bf16[32,192], index: 3, kind: input, shape index: {}]   ;;  %s2603_s1 = inlined_call_operand.vmem [shape: f32[1,32], index: 1, kind: input, shape index: {}]   ;;  %s2604_s2 = inlined_call_operand.vmem [shape: f32[1,32], index: 2, kind: input, shape index: {}]   ;;  %s2605_s4 = inlined_call_operand.vmem [shape: bf16[4,16,32], index: 4, kind: input, shape index: {}]   ;;  %s2606_s5 = inlined_call_operand.vmem [shape: f32[1,32], index: 5, kind: input, shape index: {}]   ;;  %s2607_s8 = inlined_call_operand.vmem [shape: bf16[32,128], index: 8, kind: input, shape index: {}]   ;;  %s2608_s6 = inlined_call_operand.vmem [shape: f32[1,32], index: 6, kind: input, shape index: {}]   ;;  %s2609_s7 = inlined_call_operand.vmem [shape: f32[1,32], index: 7, kind: input, shape index: {}]   ;;  %s2610_s10 = inlined_call_operand.vmem [shape: bf16[128,32], index: 10, kind: input, shape index: {}]   ;;  %s2611_s9 = inlined_call_operand.vmem [shape: f32[1,128], index: 9, kind: input, shape index: {}]   ;;  %s2612_s11 = inlined_call_operand.vmem [shape: f32[1,32], index: 11, kind: input, shape index: {}]   ;;  %s2613_s12 = inlined_call_operand.vmem [shape: f32[1,32], index: 12, kind: input, shape index: {}]   ;;  %s2614_s13 = inlined_call_operand.vmem [shape: f32[1,32], index: 13, kind: input, shape index: {}]   ;;  %s2615_s14 = inlined_call_operand.vmem [shape: bf16[16,32], index: 14, kind: output, shape index: {}]  }
   0x1   :  { %v1851_v0 = vld [vmem:[%s2601_s0] sm:$0xff]   ;;  %v2097_v17 = vld [vmem:[%s2602_s3 + $0x14] ss:$8 sps:$4 sm:$0xff]   ;;  %v2099_v18 = vld [vmem:[%s2602_s3 + $0x10] ss:$8 sps:$4 sm:$0xff]   ;;  %158 = vmatprep.mubr.bf16.mxu1 %v2162_v19  ;;  %1932 = vmatprep.subr.bf16.mxu0 %v2163_v37  ;;  %vm212_vm2 = vcmask 130048   ;;  %v177_v59 = vlaneseq }
   0x2   :  { %v2248_v1 = vunpack.c.l.bf16 %v1851_v0  ;;  %v2250_v2 = vunpack.c.h.bf16 %v1851_v0  ;;  %v2094_v15 = vld [vmem:[%s2602_s3 + $0x4] ss:$8 sps:$4 sm:$0xff]   ;;  %v2096_v16 = vld [vmem:[%s2602_s3] ss:$8 sps:$4 sm:$0xff]   ;;  %1934 = vmatprep.mubr.msk.bf16.mxu0 %vm2164_vm1, %v2163_v37  ;;  %vm458_vm3 = vcmask 1043456   ;;  %vm406_vm5 = vcmask 64512  }
   0x3   :  { %126 = vmatprep.subr.bf16.mxu1 %v2094_v15  ;;  %v1793_v28 = vld [vmem:[%s2603_s1] ss:$0 sm:$0xff]  ;;  %s2165_s1 = smov 96   ;;  %v178_v60 = vand.u32 127, %v177_v59  ;;  %v2169_v61 = vmov -1e+30  }
   0x4   :  { %v55_v3 = vsel %vm54_vm0, %v2248_v1, 0.0  ;;  %v58_v4 = vsel %vm54_vm0, %v2250_v2, 0.0  ;;  %127 = vmatpush1.bf16.msra.mxu1 %v2096_v16  ;;  %v1794_v32 = vld [vmem:[%s2604_s2] ss:$0 sm:$0xff]  ;;  %s2166_s2 = smov 112   ;;  %vm1786_vm6 = vcmask 257024  }
   0x5   :  { %56 = vadd.xlane.f32.xlu0 %v55_v3  ;;  %128 = vmatprep.subr.bf16.mxu1 %v2097_v17  ;;  %vm179_vm4 = vcmp.lt.s32.totalorder %v178_v60, 5 }
   0x6   :  { %v2322_v62 = vsel %vm179_vm4, 0.0, %v2169_v61 }
   0x8   :  { %129 = vmatpush1.bf16.msra.mxu1 %v2099_v18 }
   0x9   :  { %59 = vadd.xlane.f32.xlu0 %v58_v4  ;;  %1914 = vmatprep.subr.bf16.mxu1 %v2163_v37 }
  0x92   :  { %v57_v5 = vpop.xlane.xlu0 %56 }
  0x93   :  { %v62_v6 = vmul.f32 0.03125, %v57_v5 }
  0x95   :  { %v64_v7 = vsub.f32 %v2248_v1, %v62_v6 }
  0x96   :  { %v60_v8 = vpop.xlane.xlu0 %59 }
  0x97   :  { %v63_v9 = vmul.f32 0.03125, %v60_v8  ;;  %v66_v10 = vmul.f32 %v64_v7, %v64_v7 }
  0x99   :  { %v65_v11 = vsub.f32 %v2250_v2, %v63_v9  ;;  %v68_v12 = vsel %vm54_vm0, %v66_v10, 0.0 }
  0x9a   :  { %69 = vadd.xlane.f32.xlu1 %v68_v12 }
  0x9b   :  { %v67_v13 = vmul.f32 %v65_v11, %v65_v11 }
  0x9d   :  { %v71_v14 = vsel %vm54_vm0, %v67_v13, 0.0 }
  0x9e   :  { %72 = vadd.xlane.f32.xlu1 %v71_v14 }
 0x127   :  { %v70_v20 = vpop.xlane.xlu1 %69 }
 0x128   :  { %v74_v21 = vmul.f32 0.03125, %v70_v20 }
 0x12a   :  { %v76_v22 = vadd.f32 1e-05, %v74_v21 }
 0x12b   :  { %v73_v23 = vpop.xlane.xlu1 %72 }
 0x12c   :  { %2114 = vrsqrt.f32 %v76_v22  ;;  %v75_v24 = vmul.f32 0.03125, %v73_v23 }
 0x12e   :  { %v77_v25 = vadd.f32 1e-05, %v75_v24 }
 0x130   :  { %2116 = vrsqrt.f32 %v77_v25 }
 0x136   :  { %v2115_v26 = vpop.eup %2114 }
 0x137   :  { %v80_v27 = vmul.f32 %v2115_v26, %v64_v7 }
 0x139   :  { %v88_v31 = vmul.f32 %v1793_v28, %v80_v27 }
 0x13a   :  { %v2117_v29 = vpop.eup %2116 }
 0x13b   :  { %v81_v30 = vmul.f32 %v2117_v29, %v65_v11  ;;  %v96_v34 = vadd.f32 %v1794_v32, %v88_v31 }
 0x13d   :  { %v89_v33 = vmul.f32 %v1793_v28, %v81_v30 }
 0x13f   :  { %v97_v35 = vadd.f32 %v1794_v32, %v89_v33 }
 0x141   :  { %v98_v36 = vpack.c.bf16 %v97_v35, %v96_v34 }
 0x143   :  { %1799 = vmatmul.mubr.msk.bf16.vlgmr.msra.gmra.mrb[0].mxu1 %vm54_vm0, %v98_v36 }
 0x144   :  { %1916 = vmatprep.mubr.msk.bf16.mxu1 %vm2164_vm1, %v2163_v37 }
 0x216   :  { %v160_v38 = vpop.f32.mrb[0].mxu1 }
 0x217   :  { %185 = vrot.lane.b32.xlu1 %v160_v38, %s2165_s1  ;;  %182 = vrot.lane.b32.xlu0 %v160_v38, %s2166_s2  ;;  %v2287_v39 = vpop.f32.mrb[1].mxu1  ;;  %v191_v42 = vpack.c.bf16 %v160_v38, %v160_v38 }
 0x218   :  { %v2289_v40 = vpop.f32.mrb[2].mxu1  ;;  %v205_v57 = vpack.c.bf16 %v2287_v39, %v2287_v39 }
 0x219   :  { %v2291_v41 = vpop.f32.mrb[3].mxu1 }
 0x21a   :  { %v460_v58 = vsel %vm458_vm3, %v205_v57, 0 }
 0x21b   :  { %188 = vrot.lane.b32.xlu1 %v160_v38, %s2167_s25 }
 0x21f   :  { %210 = vrot.lane.b32.xlu1 %v191_v42, %s2168_s26 }
 0x289   :  { %v186_v43 = vpop.permute.xlu1 %185  ;;  %v183_v44 = vpop.permute.xlu0 %182 }
 0x28a   :  { %v193_v45 = vpack.c.bf16 %v186_v43, %v186_v43  ;;  %v192_v46 = vpack.c.bf16 %v183_v44, %v183_v44 }
 0x28c   :  { %260 = vrot.lane.b32.xlu0 %v192_v46, %s2168_s26  ;;  %309 = vrot.lane.b32.xlu1 %v193_v45, %s2168_s26 }
 0x28d   :  { %v189_v47 = vpop.permute.xlu1 %188 }
 0x28e   :  { %v194_v48 = vpack.c.bf16 %v189_v47, %v189_v47 }
 0x290   :  { %358 = vrot.lane.b32.xlu0 %v194_v48, %s2168_s26 }
 0x291   :  { %v211_v49 = vpop.permute.xlu1 %210 }
 0x292   :  { %v217_v50 = vsel %vm212_vm2, %v211_v49, 0 }
 0x293   :  { %1915 = vmatpush3.bf16.xpose.msra.mxu1 %v217_v50 }
 0x294   :  { %1920 = vmatprep.subr.bf16.mxu1 %v2163_v37 }
 0x29a   :  { %1917 = vmatmul.mubr.msk.bf16.vlgmr.msra.gmra.mrb[4].mxu1 %vm212_vm2, %v191_v42 }
 0x29b   :  { %1922 = vmatprep.mubr.msk.bf16.mxu1 %vm2164_vm1, %v2163_v37 }
 0x2fe   :  { %v261_v51 = vpop.permute.xlu0 %260  ;;  %v310_v55 = vpop.permute.xlu1 %309 }
 0x2ff   :  { %v266_v52 = vsel %vm212_vm2, %v261_v51, 0  ;;  %v315_v56 = vsel %vm212_vm2, %v310_v55, 0 }
 0x300   :  { %1921 = vmatpush3.bf16.xpose.msra.mxu1 %v266_v52 }
 0x301   :  { %1926 = vmatprep.subr.bf16.mxu1 %v2163_v37 }
 0x302   :  { %v359_v53 = vpop.permute.xlu0 %358 }
 0x303   :  { %v364_v54 = vsel %vm212_vm2, %v359_v53, 0  ;;  %v2350_v53 = vpack.c.bf16 %v2289_v40, %v2289_v40 }
 0x304   :  { %1933 = vmatpush3.bf16.xpose.msra.mxu0 %v364_v54 }
 0x305   :  { %1944 = vmatprep.subr.bf16.mxu0 %v2163_v37 }
 0x307   :  { %1923 = vmatmul.mubr.msk.bf16.vlgmr.msra.gmra.mrb[8].mxu1 %vm212_vm2, %v192_v46 }
 0x308   :  { %1927 = vmatpush3.bf16.xpose.msra.mxu1 %v315_v56  ;;  %1928 = vmatprep.mubr.msk.bf16.mxu1 %vm2164_vm1, %v2163_v37 }
 0x309   :  { %1938 = vmatprep.subr.bf16.mxu1 %v2163_v37 }
 0x30b   :  { %1935 = vmatmul.mubr.msk.bf16.vlgmr.msra.gmra.mrb[0].mxu0 %vm212_vm2, %v194_v48 }
 0x30c   :  { %1946 = vmatprep.mubr.msk.bf16.mxu0 %vm2164_vm1, %v2163_v37 }
 0x30f   :  { %1929 = vmatmul.mubr.msk.bf16.vlgmr.msra.gmra.mrb[12].mxu1 %vm212_vm2, %v193_v45 }
 0x310   :  { %1939 = vmatpush3.bf16.msra.mxu1 %v460_v58  ;;  %1940 = vmatprep.mubr.msk.bf16.mxu1 %vm2164_vm1, %v2163_v37 }
 0x311   :  { %1950 = vmatprep.subr.bf16.mxu1 %v2163_v37 }
 0x36d   :  { %v253_v63 = vpop.f32.mrb[4].mxu1 }
 0x36e   :  { %v254_v0 = vadd.f32 %v253_v63, %v2322_v62  ;;  %v1918_v3 = vpop.f32.mrb[5].mxu1 }
 0x36f   :  { %v256_v4 = vpop.f32.mrb[6].mxu1 }
 0x370   :  { %v1919_v5 = vpop.f32.mrb[7].mxu1  ;;  %v407_v6 = vsel %vm406_vm5, %v254_v0, -inf }
 0x371   :  { %408 = vmax.xlane.f32.xlu1 %v407_v6 }
 0x382   :  { %196 = vrot.lane.b32.xlu1 %v2287_v39, %s2166_s2 }
 0x3da   :  { %v302_v7 = vpop.f32.mrb[8].mxu1 }
 0x3db   :  { %v303_v8 = vadd.f32 %v302_v7, %v2322_v62  ;;  %v1924_v9 = vpop.f32.mrb[9].mxu1 }
 0x3dc   :  { %v305_v10 = vpop.f32.mrb[10].mxu1 }
 0x3dd   :  { %v1925_v11 = vpop.f32.mrb[11].mxu1  ;;  %v410_v12 = vsel %vm406_vm5, %v303_v8, -inf }
 0x3de   :  { %v400_v13 = vpop.f32.mrb[0].mxu0  ;;  %411 = vmax.xlane.f32.xlu0 %v410_v12 }
 0x3df   :  { %v1936_v14 = vpop.f32.mrb[1].mxu0  ;;  %v401_v21 = vadd.f32 %v400_v13, %v2322_v62 }
 0x3e0   :  { %v403_v15 = vpop.f32.mrb[2].mxu0  ;;  %v2377_v14 = vld [vmem:[%s2605_s4] sm:$0xff]  }
 0x3e1   :  { %v1937_v16 = vpop.f32.mrb[3].mxu0  ;;  %v416_v24 = vsel %vm406_vm5, %v401_v21, -inf }
 0x3e2   :  { %v351_v17 = vpop.f32.mrb[12].mxu1 }
 0x3e3   :  { %v352_v18 = vadd.f32 %v351_v17, %v2322_v62  ;;  %v1930_v19 = vpop.f32.mrb[13].mxu1 }
 0x3e4   :  { %v354_v20 = vpop.f32.mrb[14].mxu1  ;;  %v2394_v19 = vld [vmem:[%s2605_s4 + $0x8] sm:$0xff]  }
 0x3e5   :  { %v1931_v22 = vpop.f32.mrb[15].mxu1  ;;  %v413_v23 = vsel %vm406_vm5, %v352_v18, -inf }
 0x3e6   :  { %414 = vmax.xlane.f32.xlu0 %v413_v23 }
 0x3ea   :  { %417 = vmax.xlane.f32.xlu0 %v416_v24 }
 0x3fe   :  { %v409_v25 = vpop.xlane.xlu1 %408 }
 0x3ff   :  { %v419_v26 = vsub.f32 %v254_v0, %v409_v25 }
 0x401   :  { %v423_v27 = vmul.f32 1.442695, %v419_v26 }
 0x402   :  { %v197_v28 = vpop.permute.xlu1 %196 }
 0x403   :  { %2118 = vpow2.f32 %v423_v27  ;;  %v206_v29 = vpack.c.bf16 %v197_v28, %v197_v28  ;;  %v2411_v27 = vld [vmem:[%s2605_s4 + $0x18] sm:$0xff]  }
 0x405   :  { %v506_v30 = vsel %vm458_vm3, %v206_v29, 0 }
 0x406   :  { %1945 = vmatpush3.bf16.msra.mxu0 %v506_v30 }
 0x407   :  { %1956 = vmatprep.subr.bf16.mxu0 %v2163_v37 }
 0x40d   :  { %v2119_v31 = vpop.eup %2118 }
 0x40e   :  { %v431_v32 = vsel %vm406_vm5, %v2119_v31, 0.0 }
 0x40f   :  { %432 = vadd.xlane.f32.xlu1 %v431_v32 }
 0x46b   :  { %v412_v33 = vpop.xlane.xlu0 %411 }
 0x46c   :  { %v420_v34 = vsub.f32 %v303_v8, %v412_v33 }
 0x46e   :  { %v425_v35 = vmul.f32 1.442695, %v420_v34 }
 0x470   :  { %2120 = vpow2.f32 %v425_v35 }
 0x473   :  { %v415_v36 = vpop.xlane.xlu0 %414 }
 0x474   :  { %v421_v38 = vsub.f32 %v352_v18, %v415_v36 }
 0x476   :  { %v427_v42 = vmul.f32 1.442695, %v421_v38 }
 0x477   :  { %v418_v43 = vpop.xlane.xlu0 %417 }
 0x478   :  { %2122 = vpow2.f32 %v427_v42  ;;  %v422_v44 = vsub.f32 %v401_v21, %v418_v43  ;;  %v2401_v21 = vld [vmem:[%s2605_s4 + $0x10] sm:$0xff]  }
 0x47a   :  { %v2121_v45 = vpop.eup %2120  ;;  %v429_v46 = vmul.f32 1.442695, %v422_v44 }
 0x47b   :  { %v434_v47 = vsel %vm406_vm5, %v2121_v45, 0.0 }
 0x47c   :  { %2124 = vpow2.f32 %v429_v46  ;;  %435 = vadd.xlane.f32.xlu0 %v434_v47 }
 0x482   :  { %v2123_v48 = vpop.eup %2122 }
 0x483   :  { %v437_v49 = vsel %vm406_vm5, %v2123_v48, 0.0 }
 0x484   :  { %438 = vadd.xlane.f32.xlu1 %v437_v49 }
 0x486   :  { %v2125_v50 = vpop.eup %2124 }
 0x487   :  { %v440_v51 = vsel %vm406_vm5, %v2125_v50, 0.0 }
 0x488   :  { %441 = vadd.xlane.f32.xlu0 %v440_v51 }
 0x495   :  { %202 = vrot.lane.b32.xlu1 %v2287_v39, %s2167_s25 }
 0x499   :  { %844 = vrot.lane.b32.xlu1 %v2289_v40, %s2166_s2 }
 0x49c   :  { %v433_v52 = vpop.xlane.xlu1 %432 }
 0x49d   :  { %2126 = vrcp.f32 %v433_v52  ;;  %847 = vrot.lane.b32.xlu1 %v2289_v40, %s2165_s1 }
 0x49e   :  { %199 = vrot.lane.b32.xlu0 %v2287_v39, %s2165_s1 }
 0x4a1   :  { %872 = vrot.lane.b32.xlu1 %v2350_v53, %s2168_s26 }
 0x4a2   :  { %850 = vrot.lane.b32.xlu0 %v2289_v40, %s2167_s25 }
 0x4a7   :  { %v2127_v54 = vpop.eup %2126 }
 0x4a8   :  { %v447_v55 = vmul.f32 %v2127_v54, %v2119_v31 }
 0x4aa   :  { %v451_v56 = vpack.c.bf16 %v447_v55, %v447_v55  ;;  %v867_v55 = vpack.c.bf16 %v2291_v41, %v2291_v41 }
 0x4ac   :  { %1941 = vmatmul.mubr.msk.bf16.vlgmr.msra.gmra.mrb[16].mxu1 %vm406_vm5, %v451_v56 }
 0x4ad   :  { %1952 = vmatprep.mubr.msk.bf16.mxu1 %vm2164_vm1, %v2163_v37 }
 0x509   :  { %v436_v57 = vpop.xlane.xlu0 %435 }
 0x50a   :  { %2128 = vrcp.f32 %v436_v57 }
 0x511   :  { %v439_v39 = vpop.xlane.xlu1 %438 }
 0x512   :  { %2130 = vrcp.f32 %v439_v39 }
 0x514   :  { %v2129_v58 = vpop.eup %2128 }
 0x515   :  { %v448_v59 = vmul.f32 %v2129_v58, %v2121_v45  ;;  %v203_v60 = vpop.permute.xlu1 %202  ;;  %v442_v61 = vpop.xlane.xlu0 %441 }
 0x516   :  { %v208_v63 = vpack.c.bf16 %v203_v60, %v203_v60  ;;  %2132 = vrcp.f32 %v442_v61 }
 0x517   :  { %v452_v0 = vpack.c.bf16 %v448_v59, %v448_v59 }
 0x518   :  { %v598_v40 = vsel %vm458_vm3, %v208_v63, 0 }
 0x519   :  { %v845_v3 = vpop.permute.xlu1 %844  ;;  %1947 = vmatmul.mubr.msk.bf16.vlgmr.msra.gmra.mrb[4].mxu0 %vm406_vm5, %v452_v0  ;;  %v200_v4 = vpop.permute.xlu0 %199 }
 0x51a   :  { %v2361_v5 = vpack.c.bf16 %v845_v3, %v845_v3  ;;  %1957 = vmatpush3.bf16.msra.mxu0 %v598_v40  ;;  %v207_v6 = vpack.c.bf16 %v200_v4, %v200_v4  ;;  %1958 = vmatprep.mubr.msk.bf16.mxu0 %vm2164_vm1, %v2163_v37 }
 0x51b   :  { %1968 = vmatprep.subr.bf16.mxu0 %v2163_v37 }
 0x51c   :  { %v2131_v7 = vpop.eup %2130  ;;  %v552_v8 = vsel %vm458_vm3, %v207_v6, 0  ;;  %921 = vrot.lane.b32.xlu0 %v2361_v5, %s2168_s26 }
 0x51d   :  { %v449_v9 = vmul.f32 %v2131_v7, %v2123_v48  ;;  %v848_v10 = vpop.permute.xlu1 %847  ;;  %1951 = vmatpush3.bf16.msra.mxu1 %v552_v8  ;;  %v851_v11 = vpop.permute.xlu0 %850 }
 0x51e   :  { %v2369_v12 = vpack.c.bf16 %v848_v10, %v848_v10  ;;  %v2371_v13 = vpack.c.bf16 %v851_v11, %v851_v11  ;;  %1962 = vmatprep.subr.bf16.mxu1 %v2163_v37 }
 0x51f   :  { %v453_v15 = vpack.c.bf16 %v449_v9, %v449_v9 }
 0x520   :  { %v2133_v16 = vpop.eup %2132  ;;  %970 = vrot.lane.b32.xlu1 %v2369_v12, %s2168_s26  ;;  %1019 = vrot.lane.b32.xlu0 %v2371_v13, %s2168_s26 }
 0x521   :  { %v450_v17 = vmul.f32 %v2133_v16, %v2125_v50  ;;  %1953 = vmatmul.mubr.msk.bf16.vlgmr.msra.gmra.mrb[20].mxu1 %vm406_vm5, %v453_v15  ;;  %v873_v32 = vpop.permute.xlu1 %872 }
 0x522   :  { %1963 = vmatpush3.bf16.msra.mxu1 %v2377_v14  ;;  %1964 = vmatprep.mubr.msk.bf16.mxu1 %vm2164_vm1, %v2163_v37  ;;  %v878_v38 = vsel %vm212_vm2, %v873_v32, 0 }
 0x523   :  { %v454_v18 = vpack.c.bf16 %v450_v17, %v450_v17  ;;  %1974 = vmatprep.subr.bf16.mxu1 %v2163_v37 }
 0x525   :  { %1959 = vmatmul.mubr.msk.bf16.vlgmr.msra.gmra.mrb[8].mxu0 %vm406_vm5, %v454_v18 }
 0x526   :  { %1970 = vmatprep.mubr.msk.bf16.mxu0 %vm2164_vm1, %v2163_v37  ;;  %1969 = vmatpush3.bf16.msra.mxu0 %v2394_v19 }
 0x527   :  { %1980 = vmatprep.subr.bf16.mxu0 %v2163_v37 }
 0x57f   :  { %v496_v20 = vpop.f32.mrb[16].mxu1 }
 0x580   :  { %v640_v22 = vpack.c.bf16 %v496_v20, %v496_v20  ;;  %v1942_v23 = vpop.f32.mrb[17].mxu1 }
 0x581   :  { %v499_v24 = vpop.f32.mrb[18].mxu1 }
 0x582   :  { %v1943_v25 = vpop.f32.mrb[19].mxu1  ;;  %1965 = vmatmul.mubr.msk.bf16.vlgmr.msra.gmra.mrb[24].mxu1 %vm212_vm2, %v640_v22 }
 0x583   :  { %1975 = vmatpush3.bf16.msra.mxu1 %v2401_v21  ;;  %1976 = vmatprep.mubr.msk.bf16.mxu1 %vm2164_vm1, %v2163_v37 }
 0x584   :  { %1986 = vmatprep.subr.bf16.mxu1 %v2163_v37 }
 0x58e   :  { %v922_v43 = vpop.permute.xlu0 %921 }
 0x58f   :  { %v927_v48 = vsel %vm212_vm2, %v922_v43, 0 }
 0x592   :  { %v971_v50 = vpop.permute.xlu1 %970  ;;  %v1020_v52 = vpop.permute.xlu0 %1019 }
 0x593   :  { %v976_v51 = vsel %vm212_vm2, %v971_v50, 0  ;;  %v1025_v54 = vsel %vm212_vm2, %v1020_v52, 0 }
 0x5ec   :  { %v542_v26 = vpop.f32.mrb[4].mxu0 }
 0x5ed   :  { %v641_v28 = vpack.c.bf16 %v542_v26, %v542_v26  ;;  %v1948_v29 = vpop.f32.mrb[5].mxu0 }
 0x5ee   :  { %v545_v30 = vpop.f32.mrb[6].mxu0 }
 0x5ef   :  { %v1949_v31 = vpop.f32.mrb[7].mxu0  ;;  %1971 = vmatmul.mubr.msk.bf16.vlgmr.msra.gmra.mrb[12].mxu0 %vm212_vm2, %v641_v28 }
 0x5f0   :  { %1981 = vmatpush3.bf16.msra.mxu0 %v2411_v27  ;;  %1982 = vmatprep.mubr.msk.bf16.mxu0 %vm2164_vm1, %v2163_v37 }
 0x5f1   :  { %1992 = vmatprep.subr.bf16.mxu0 %v2163_v37 }
 0x5f4   :  { %v588_v33 = vpop.f32.mrb[20].mxu1 }
 0x5f5   :  { %v642_v34 = vpack.c.bf16 %v588_v33, %v588_v33  ;;  %v1954_v35 = vpop.f32.mrb[21].mxu1 }
 0x5f6   :  { %v591_v36 = vpop.f32.mrb[22].mxu1 }
 0x5f7   :  { %v1955_v42 = vpop.f32.mrb[23].mxu1  ;;  %1977 = vmatmul.mubr.msk.bf16.vlgmr.msra.gmra.mrb[28].mxu1 %vm212_vm2, %v642_v34 }
 0x5f8   :  { %1987 = vmatpush3.bf16.xpose.msra.mxu1 %v878_v38  ;;  %v634_v44 = vpop.f32.mrb[8].mxu0  ;;  %1988 = vmatprep.mubr.msk.bf16.mxu1 %vm2164_vm1, %v2163_v37 }
 0x5f9   :  { %v643_v45 = vpack.c.bf16 %v634_v44, %v634_v44  ;;  %v1960_v46 = vpop.f32.mrb[9].mxu0  ;;  %1998 = vmatprep.subr.bf16.mxu1 %v2163_v37 }
 0x5fa   :  { %v637_v47 = vpop.f32.mrb[10].mxu0 }
 0x5fb   :  { %v1961_v49 = vpop.f32.mrb[11].mxu0  ;;  %1983 = vmatmul.mubr.msk.bf16.vlgmr.msra.gmra.mrb[16].mxu0 %vm212_vm2, %v643_v45 }
 0x5fc   :  { %1993 = vmatpush3.bf16.xpose.msra.mxu0 %v927_v48  ;;  %1994 = vmatprep.mubr.msk.bf16.mxu0 %vm2164_vm1, %v2163_v37 }
 0x5fd   :  { %2004 = vmatprep.subr.bf16.mxu0 %v2163_v37 }
 0x5ff   :  { %1989 = vmatmul.mubr.msk.bf16.vlgmr.msra.gmra.mrb[32].mxu1 %vm212_vm2, %v2350_v53  ;;  %v1119_v53 = vsel %vm458_vm3, %v867_v55, 0 }
 0x600   :  { %1999 = vmatpush3.bf16.xpose.msra.mxu1 %v976_v51  ;;  %2000 = vmatprep.mubr.msk.bf16.mxu1 %vm2164_vm1, %v2163_v37 }
 0x601   :  { %2010 = vmatprep.subr.bf16.mxu1 %v2163_v37 }
 0x603   :  { %1995 = vmatmul.mubr.msk.bf16.vlgmr.msra.gmra.mrb[20].mxu0 %vm212_vm2, %v2361_v5 }
 0x604   :  { %2005 = vmatpush3.bf16.xpose.msra.mxu0 %v1025_v54  ;;  %2006 = vmatprep.mubr.msk.bf16.mxu0 %vm2164_vm1, %v2163_v37 }
 0x605   :  { %2016 = vmatprep.subr.bf16.mxu0 %v2163_v37 }
 0x607   :  { %2001 = vmatmul.mubr.msk.bf16.vlgmr.msra.gmra.mrb[36].mxu1 %vm212_vm2, %v2369_v12 }
 0x608   :  { %2011 = vmatpush3.bf16.msra.mxu1 %v1119_v53  ;;  %2012 = vmatprep.mubr.msk.bf16.mxu1 %vm2164_vm1, %v2163_v37 }
 0x609   :  { %2022 = vmatprep.subr.bf16.mxu1 %v2163_v37 }
 0x60b   :  { %2007 = vmatmul.mubr.msk.bf16.vlgmr.msra.gmra.mrb[24].mxu0 %vm212_vm2, %v2371_v13 }
 0x60c   :  { %2018 = vmatprep.mubr.msk.bf16.mxu0 %vm2164_vm1, %v2163_v37 }
 0x655   :  { %v687_v56 = vpop.f32.mrb[24].mxu1 }
 0x656   :  { %v1966_v57 = vpop.f32.mrb[25].mxu1 }
 0x657   :  { %v690_v39 = vpop.f32.mrb[26].mxu1 }
 0x658   :  { %v1967_v58 = vpop.f32.mrb[27].mxu1 }
 0x6c2   :  { %v736_v59 = vpop.f32.mrb[12].mxu0 }
 0x6c3   :  { %v840_v60 = vadd.f32 %v736_v59, %v687_v56  ;;  %v1972_v61 = vpop.f32.mrb[13].mxu0 }
 0x6c4   :  { %v739_v63 = vpop.f32.mrb[14].mxu0 }
 0x6c5   :  { %v1973_v0 = vpop.f32.mrb[15].mxu0 }
 0x6ca   :  { %v785_v40 = vpop.f32.mrb[28].mxu1 }
 0x6cb   :  { %v841_v3 = vadd.f32 %v840_v60, %v785_v40  ;;  %v1978_v4 = vpop.f32.mrb[29].mxu1 }
 0x6cc   :  { %v788_v5 = vpop.f32.mrb[30].mxu1  ;;  %v2479_v4 = vld [vmem:[%s2606_s5] ss:$0 sm:$0xff] }
 0x6cd   :  { %v1979_v6 = vpop.f32.mrb[31].mxu1 }
 0x6ce   :  { %v834_v7 = vpop.f32.mrb[16].mxu0 }
 0x6cf   :  { %v2452_v8 = vadd.f32 %v841_v3, %v834_v7  ;;  %v1984_v9 = vpop.f32.mrb[17].mxu0 }
 0x6d0   :  { %v837_v10 = vpop.f32.mrb[18].mxu0 }
 0x6d1   :  { %v1985_v11 = vpop.f32.mrb[19].mxu0  ;;  %v1478_v3 = vadd.f32 %v2248_v1, %v2452_v8 }
 0x6d2   :  { %v914_v12 = vpop.f32.mrb[32].mxu1 }
 0x6d3   :  { %v915_v13 = vadd.f32 %v914_v12, %v2322_v62  ;;  %v1990_v15 = vpop.f32.mrb[33].mxu1  ;;  %v2482_v5 = vadd.f32 %v2479_v4, %v1478_v3 }
 0x6d4   :  { %v917_v16 = vpop.f32.mrb[34].mxu1 }
 0x6d5   :  { %v1991_v17 = vpop.f32.mrb[35].mxu1  ;;  %v1067_v18 = vsel %vm406_vm5, %v915_v13, -inf  ;;  %v1491_v6 = vsel %vm54_vm0, %v2482_v5, 0.0 }
 0x6d6   :  { %v963_v20 = vpop.f32.mrb[20].mxu0  ;;  %1068 = vmax.xlane.f32.xlu1 %v1067_v18 }
 0x6d7   :  { %v964_v22 = vadd.f32 %v963_v20, %v2322_v62  ;;  %v1996_v23 = vpop.f32.mrb[21].mxu0 }
 0x6d8   :  { %v966_v24 = vpop.f32.mrb[22].mxu0 }
 0x6d9   :  { %v1997_v25 = vpop.f32.mrb[23].mxu0  ;;  %v1070_v26 = vsel %vm406_vm5, %v964_v22, -inf }
 0x6da   :  { %1071 = vmax.xlane.f32.xlu0 %v1070_v26  ;;  %v1012_v28 = vpop.f32.mrb[36].mxu1 }
 0x6db   :  { %v1013_v29 = vadd.f32 %v1012_v28, %v2322_v62  ;;  %v2002_v30 = vpop.f32.mrb[37].mxu1 }
 0x6dc   :  { %v1015_v31 = vpop.f32.mrb[38].mxu1 }
 0x6dd   :  { %v2003_v32 = vpop.f32.mrb[39].mxu1  ;;  %v1073_v33 = vsel %vm406_vm5, %v1013_v29, -inf }
 0x6de   :  { %v1061_v34 = vpop.f32.mrb[24].mxu0  ;;  %1074 = vmax.xlane.f32.xlu0 %v1073_v33 }
 0x6df   :  { %v1062_v35 = vadd.f32 %v1061_v34, %v2322_v62  ;;  %v2008_v36 = vpop.f32.mrb[25].mxu0 }
 0x6e0   :  { %v1064_v38 = vpop.f32.mrb[26].mxu0 }
 0x6e1   :  { %v2009_v42 = vpop.f32.mrb[27].mxu0  ;;  %v1076_v43 = vsel %vm406_vm5, %v1062_v35, -inf }
 0x6e2   :  { %1077 = vmax.xlane.f32.xlu0 %v1076_v43 }
 0x6e7   :  { %858 = vrot.lane.b32.xlu1 %v2291_v41, %s2166_s2 }
 0x763   :  { %v1069_v44 = vpop.xlane.xlu1 %1068 }
 0x764   :  { %v1079_v45 = vsub.f32 %v915_v13, %v1069_v44 }
 0x766   :  { %v1083_v46 = vmul.f32 1.442695, %v1079_v45 }
 0x767   :  { %v1072_v47 = vpop.xlane.xlu0 %1071  ;;  %v859_v48 = vpop.permute.xlu1 %858 }
 0x768   :  { %2134 = vpow2.f32 %v1083_v46  ;;  %v1080_v49 = vsub.f32 %v964_v22, %v1072_v47  ;;  %v868_v50 = vpack.c.bf16 %v859_v48, %v859_v48 }
 0x76a   :  { %v1085_v51 = vmul.f32 1.442695, %v1080_v49  ;;  %v1165_v62 = vsel %vm458_vm3, %v868_v50, 0 }
 0x76b   :  { %2017 = vmatpush3.bf16.msra.mxu0 %v1165_v62  ;;  %v1075_v52 = vpop.xlane.xlu0 %1074 }
 0x76c   :  { %2136 = vpow2.f32 %v1085_v51  ;;  %v1081_v54 = vsub.f32 %v1013_v29, %v1075_v52  ;;  %2028 = vmatprep.subr.bf16.mxu0 %v2163_v37 }
 0x76e   :  { %v1087_v55 = vmul.f32 1.442695, %v1081_v54 }
 0x76f   :  { %v1078_v53 = vpop.xlane.xlu0 %1077 }
 0x770   :  { %2138 = vpow2.f32 %v1087_v55  ;;  %v1082_v56 = vsub.f32 %v1062_v35, %v1078_v53 }
 0x772   :  { %v2135_v57 = vpop.eup %2134  ;;  %v1089_v39 = vmul.f32 1.442695, %v1082_v56 }
 0x773   :  { %v1091_v58 = vsel %vm406_vm5, %v2135_v57, 0.0 }
 0x774   :  { %2140 = vpow2.f32 %v1089_v39  ;;  %1092 = vadd.xlane.f32.xlu1 %v1091_v58 }
 0x776   :  { %v2137_v59 = vpop.eup %2136 }
 0x777   :  { %v1094_v60 = vsel %vm406_vm5, %v2137_v59, 0.0 }
 0x778   :  { %1095 = vadd.xlane.f32.xlu0 %v1094_v60 }
 0x77a   :  { %v2139_v61 = vpop.eup %2138 }
 0x77b   :  { %v1097_v63 = vsel %vm406_vm5, %v2139_v61, 0.0 }
 0x77c   :  { %1098 = vadd.xlane.f32.xlu1 %v1097_v63 }
 0x77e   :  { %v2141_v0 = vpop.eup %2140 }
 0x77f   :  { %v1100_v40 = vsel %vm406_vm5, %v2141_v0, 0.0 }
 0x780   :  { %1101 = vadd.xlane.f32.xlu0 %v1100_v40 }
 0x78d   :  { %864 = vrot.lane.b32.xlu1 %v2291_v41, %s2167_s25 }
 0x796   :  { %861 = vrot.lane.b32.xlu0 %v2291_v41, %s2165_s1 }
 0x7b1   :  { %1492 = vadd.xlane.f32.xlu1 %v1491_v6 }
 0x801   :  { %v1093_v7 = vpop.xlane.xlu1 %1092 }
 0x802   :  { %2142 = vrcp.f32 %v1093_v7 }
 0x805   :  { %v1096_v9 = vpop.xlane.xlu0 %1095 }
 0x806   :  { %2144 = vrcp.f32 %v1096_v9 }
 0x809   :  { %v1099_v41 = vpop.xlane.xlu1 %1098 }
 0x80a   :  { %2146 = vrcp.f32 %v1099_v41 }
 0x80c   :  { %v2143_v10 = vpop.eup %2142 }
 0x80d   :  { %v1107_v1 = vmul.f32 %v2143_v10, %v2135_v57  ;;  %v1102_v8 = vpop.xlane.xlu0 %1101  ;;  %v865_v11 = vpop.permute.xlu1 %864 }
 0x80e   :  { %2148 = vrcp.f32 %v1102_v8  ;;  %v870_v16 = vpack.c.bf16 %v865_v11, %v865_v11 }
 0x80f   :  { %v1111_v12 = vpack.c.bf16 %v1107_v1, %v1107_v1 }
 0x810   :  { %v2145_v13 = vpop.eup %2144  ;;  %v1257_v25 = vsel %vm458_vm3, %v870_v16, 0 }
 0x811   :  { %v1108_v15 = vmul.f32 %v2145_v13, %v2137_v59  ;;  %2013 = vmatmul.mubr.msk.bf16.vlgmr.msra.gmra.mrb[40].mxu1 %vm406_vm5, %v1111_v12  ;;  %v862_v17 = vpop.permute.xlu0 %861 }
 0x812   :  { %v869_v18 = vpack.c.bf16 %v862_v17, %v862_v17  ;;  %2024 = vmatprep.mubr.msk.bf16.mxu1 %vm2164_vm1, %v2163_v37 }
 0x813   :  { %v1112_v20 = vpack.c.bf16 %v1108_v15, %v1108_v15 }
 0x814   :  { %v2147_v22 = vpop.eup %2146  ;;  %v1211_v23 = vsel %vm458_vm3, %v869_v18, 0 }
 0x815   :  { %v1109_v24 = vmul.f32 %v2147_v22, %v2139_v61  ;;  %2019 = vmatmul.mubr.msk.bf16.vlgmr.msra.gmra.mrb[28].mxu0 %vm406_vm5, %v1112_v20  ;;  %2023 = vmatpush3.bf16.msra.mxu1 %v1211_v23 }
 0x816   :  { %2029 = vmatpush3.bf16.msra.mxu0 %v1257_v25  ;;  %2030 = vmatprep.mubr.msk.bf16.mxu0 %vm2164_vm1, %v2163_v37 }
 0x817   :  { %v1113_v26 = vpack.c.bf16 %v1109_v24, %v1109_v24  ;;  %2034 = vmatprep.subr.bf16.mxu1 %v2163_v37  ;;  %2040 = vmatprep.subr.bf16.mxu0 %v2163_v37 }
 0x818   :  { %v2149_v28 = vpop.eup %2148 }
 0x819   :  { %v1110_v29 = vmul.f32 %v2149_v28, %v2141_v0  ;;  %2025 = vmatmul.mubr.msk.bf16.vlgmr.msra.gmra.mrb[44].mxu1 %vm406_vm5, %v1113_v26 }
 0x81a   :  { %2035 = vmatpush3.bf16.msra.mxu1 %v2377_v14  ;;  %2036 = vmatprep.mubr.msk.bf16.mxu1 %vm2164_vm1, %v2163_v37 }
 0x81b   :  { %v1114_v30 = vpack.c.bf16 %v1110_v29, %v1110_v29  ;;  %2046 = vmatprep.subr.bf16.mxu1 %v2163_v37 }
 0x81d   :  { %2031 = vmatmul.mubr.msk.bf16.vlgmr.msra.gmra.mrb[32].mxu0 %vm406_vm5, %v1114_v30 }
 0x81e   :  { %2041 = vmatpush3.bf16.msra.mxu0 %v2394_v19  ;;  %2042 = vmatprep.mubr.msk.bf16.mxu0 %vm2164_vm1, %v2163_v37 }
 0x81f   :  { %2052 = vmatprep.subr.bf16.mxu0 %v2163_v37 }
 0x83e   :  { %v1493_v58 = vpop.xlane.xlu1 %1492 }
 0x83f   :  { %v1497_v0 = vmul.f32 0.03125, %v1493_v58 }
 0x841   :  { %v1499_v41 = vsub.f32 %v2482_v5, %v1497_v0 }
 0x843   :  { %v1501_v12 = vmul.f32 %v1499_v41, %v1499_v41 }
 0x845   :  { %v1503_v13 = vsel %vm54_vm0, %v1501_v12, 0.0 }
 0x8e4   :  { %v1155_v31 = vpop.f32.mrb[40].mxu1 }
 0x8e5   :  { %v1299_v32 = vpack.c.bf16 %v1155_v31, %v1155_v31  ;;  %v2014_v33 = vpop.f32.mrb[41].mxu1  ;;  %v1829_v31 = vld [vmem:[%s2608_s6] ss:$0 sm:$0xff] }
 0x8e6   :  { %v1158_v34 = vpop.f32.mrb[42].mxu1 }
 0x8e7   :  { %v2015_v14 = vpop.f32.mrb[43].mxu1  ;;  %2037 = vmatmul.mubr.msk.bf16.vlgmr.msra.gmra.mrb[48].mxu1 %vm212_vm2, %v1299_v32 }
 0x8e8   :  { %v1201_v35 = vpop.f32.mrb[28].mxu0  ;;  %2047 = vmatpush3.bf16.msra.mxu1 %v2401_v21  ;;  %2048 = vmatprep.mubr.msk.bf16.mxu1 %vm2164_vm1, %v2163_v37  ;;  %v1830_v14 = vld [vmem:[%s2609_s7] ss:$0 sm:$0xff] }
 0x8e9   :  { %v1300_v36 = vpack.c.bf16 %v1201_v35, %v1201_v35  ;;  %v2020_v19 = vpop.f32.mrb[29].mxu0  ;;  %2058 = vmatprep.subr.bf16.mxu1 %v2163_v37 }
 0x8ea   :  { %v1204_v38 = vpop.f32.mrb[30].mxu0 }
 0x8eb   :  { %v2021_v42 = vpop.f32.mrb[31].mxu0  ;;  %2043 = vmatmul.mubr.msk.bf16.vlgmr.msra.gmra.mrb[36].mxu0 %vm212_vm2, %v1300_v36 }
 0x8ec   :  { %v1247_v43 = vpop.f32.mrb[44].mxu1  ;;  %2053 = vmatpush3.bf16.msra.mxu0 %v2411_v27  ;;  %2054 = vmatprep.mubr.msk.bf16.mxu0 %vm2164_vm1, %v2163_v37  ;;  %v2106_v42 = vld [vmem:[%s2610_s10] sm:$0xff]  }
 0x8ed   :  { %v1301_v44 = vpack.c.bf16 %v1247_v43, %v1247_v43  ;;  %v2026_v45 = vpop.f32.mrb[45].mxu1  ;;  %2066 = vmatprep.subr.bf16.mxu0 %v2163_v37  ;;  %v2107_v43 = vld [vmem:[%s2610_s10 + $0x8] sm:$0xff]  }
 0x8ee   :  { %v1250_v21 = vpop.f32.mrb[46].mxu1  ;;  %v2109_v45 = vld [vmem:[%s2610_s10 + $0x18] sm:$0xff]  }
 0x8ef   :  { %v2027_v46 = vpop.f32.mrb[47].mxu1  ;;  %2049 = vmatmul.mubr.msk.bf16.vlgmr.msra.gmra.mrb[52].mxu1 %vm212_vm2, %v1301_v44  ;;  %v2108_v44 = vld [vmem:[%s2610_s10 + $0x10] sm:$0xff]   ;;  %v2110_v21 = vld [vmem:[%s2610_s10 + $0x20] sm:$0xff]  }
 0x8f0   :  { %v1293_v47 = vpop.f32.mrb[32].mxu0  ;;  %2062 = vmatprep.mubr.msk.bf16.mxu1 %vm2164_vm1, %v2163_v37  ;;  %v2111_v46 = vld [vmem:[%s2610_s10 + $0x28] sm:$0xff]  }
 0x8f1   :  { %v1302_v48 = vpack.c.bf16 %v1293_v47, %v1293_v47  ;;  %v2032_v49 = vpop.f32.mrb[33].mxu0  ;;  %v2112_v47 = vld [vmem:[%s2610_s10 + $0x30] sm:$0xff]  }
 0x8f2   :  { %v1296_v50 = vpop.f32.mrb[34].mxu0  ;;  %v1831_v49 = vld [vmem:[%s2611_s9] ss:$0 sm:$0xff] }
 0x8f3   :  { %v2033_v51 = vpop.f32.mrb[35].mxu0  ;;  %2055 = vmatmul.mubr.msk.bf16.vlgmr.msra.gmra.mrb[40].mxu0 %vm212_vm2, %v1302_v48  ;;  %v2113_v48 = vld [vmem:[%s2610_s10 + $0x38] sm:$0xff]  }
 0x8f4   :  { %2082 = vmatprep.mubr.msk.bf16.mxu0 %vm2164_vm1, %v2163_v37  ;;  %2067 = vmatpush3.bf16.msra.mxu0 %v2106_v42 }
 0x8f5   :  { %2068 = vmatprep.subr.bf16.mxu0 %v2163_v37 }
 0x8f8   :  { %2069 = vmatpush3.bf16.msra.mxu0 %v2107_v43  ;;  %v1845_v43 = vld [vmem:[%s2614_s13] ss:$0 sm:$0xff] }
 0x8f9   :  { %2070 = vmatprep.subr.bf16.mxu0 %v2163_v37 }
 0x8fc   :  { %2071 = vmatpush3.bf16.msra.mxu0 %v2108_v44 }
 0x8fd   :  { %2072 = vmatprep.subr.bf16.mxu0 %v2163_v37 }
 0x900   :  { %2073 = vmatpush3.bf16.msra.mxu0 %v2109_v45 }
 0x901   :  { %2074 = vmatprep.subr.bf16.mxu0 %v2163_v37 }
 0x904   :  { %2075 = vmatpush3.bf16.msra.mxu0 %v2110_v21 }
 0x905   :  { %2076 = vmatprep.subr.bf16.mxu0 %v2163_v37 }
 0x908   :  { %2077 = vmatpush3.bf16.msra.mxu0 %v2111_v46 }
 0x909   :  { %2078 = vmatprep.subr.bf16.mxu0 %v2163_v37 }
 0x90c   :  { %2079 = vmatpush3.bf16.msra.mxu0 %v2112_v47 }
 0x90d   :  { %2080 = vmatprep.subr.bf16.mxu0 %v2163_v37 }
 0x910   :  { %2081 = vmatpush3.bf16.msra.mxu0 %v2113_v48 }
 0x9ba   :  { %v1340_v27 = vpop.f32.mrb[48].mxu1 }
 0x9bb   :  { %v2038_v62 = vpop.f32.mrb[49].mxu1 }
 0x9bc   :  { %v1343_v52 = vpop.f32.mrb[50].mxu1 }
 0x9bd   :  { %v2039_v54 = vpop.f32.mrb[51].mxu1 }
 0x9be   :  { %v1383_v55 = vpop.f32.mrb[36].mxu0 }
 0x9bf   :  { %v1475_v53 = vadd.f32 %v1383_v55, %v1340_v27  ;;  %v2044_v56 = vpop.f32.mrb[37].mxu0 }
 0x9c0   :  { %v1386_v57 = vpop.f32.mrb[38].mxu0 }
 0x9c1   :  { %v2045_v39 = vpop.f32.mrb[39].mxu0 }
 0x9c2   :  { %v1426_v59 = vpop.f32.mrb[52].mxu1 }
 0x9c3   :  { %v1476_v60 = vadd.f32 %v1475_v53, %v1426_v59  ;;  %v2050_v61 = vpop.f32.mrb[53].mxu1 }
 0x9c4   :  { %v1429_v63 = vpop.f32.mrb[54].mxu1 }
 0x9c5   :  { %v2051_v40 = vpop.f32.mrb[55].mxu1 }
 0x9c6   :  { %v1469_v3 = vpop.f32.mrb[40].mxu0 }
 0x9c7   :  { %v1477_v6 = vadd.f32 %v1476_v60, %v1469_v3  ;;  %v2056_v7 = vpop.f32.mrb[41].mxu0 }
 0x9c8   :  { %v1472_v9 = vpop.f32.mrb[42].mxu0 }
 0x9c9   :  { %v1479_v10 = vadd.f32 %v2250_v2, %v1477_v6  ;;  %v2057_v1 = vpop.f32.mrb[43].mxu0  ;;  %v2104_v2 = vld [vmem:[%s2607_s8] sm:$0xff]  }
 0x9ca   :  { %2059 = vmatpush3.bf16.msra.mxu1 %v2104_v2  ;;  %v1835_v1 = vld [vmem:[%s2612_s11] ss:$0 sm:$0xff] }
 0x9cb   :  { %v2525_v8 = vadd.f32 %v2479_v4, %v1479_v10  ;;  %v2105_v4 = vld [vmem:[%s2607_s8 + $0x8] sm:$0xff]   ;;  %2060 = vmatprep.subr.bf16.mxu1 %v2163_v37 }
 0x9cd   :  { %v1494_v11 = vsel %vm54_vm0, %v2525_v8, 0.0 }
 0x9ce   :  { %1495 = vadd.xlane.f32.xlu0 %v1494_v11  ;;  %2061 = vmatpush3.bf16.msra.mxu1 %v2105_v4 }
 0x9d2   :  { %1504 = vadd.xlane.f32.xlu0 %v1503_v13 }
 0xa5b   :  { %v1496_v15 = vpop.xlane.xlu0 %1495 }
 0xa5c   :  { %v1498_v16 = vmul.f32 0.03125, %v1496_v15 }
 0xa5e   :  { %v1500_v17 = vsub.f32 %v2525_v8, %v1498_v16 }
 0xa5f   :  { %v1505_v22 = vpop.xlane.xlu0 %1504 }
 0xa60   :  { %v1502_v18 = vmul.f32 %v1500_v17, %v1500_v17  ;;  %v1509_v23 = vmul.f32 0.03125, %v1505_v22 }
 0xa62   :  { %v1506_v20 = vsel %vm54_vm0, %v1502_v18, 0.0  ;;  %v1511_v24 = vadd.f32 1e-05, %v1509_v23 }
 0xa63   :  { %1507 = vadd.xlane.f32.xlu1 %v1506_v20 }
 0xa64   :  { %2150 = vrsqrt.f32 %v1511_v24 }
 0xa6e   :  { %v2151_v29 = vpop.eup %2150 }
 0xa6f   :  { %v1515_v30 = vmul.f32 %v2151_v29, %v1499_v41 }
 0xa71   :  { %v1523_v33 = vmul.f32 %v1829_v31, %v1515_v30 }
 0xa73   :  { %v1531_v36 = vadd.f32 %v1830_v14, %v1523_v33 }
 0xaf0   :  { %v1508_v25 = vpop.xlane.xlu1 %1507 }
 0xaf1   :  { %v1510_v26 = vmul.f32 0.03125, %v1508_v25 }
 0xaf3   :  { %v1512_v28 = vadd.f32 1e-05, %v1510_v26 }
 0xaf5   :  { %2152 = vrsqrt.f32 %v1512_v28 }
 0xaff   :  { %v2153_v32 = vpop.eup %2152 }
 0xb00   :  { %v1516_v34 = vmul.f32 %v2153_v32, %v1500_v17 }
 0xb02   :  { %v1524_v35 = vmul.f32 %v1829_v31, %v1516_v34 }
 0xb04   :  { %v1532_v19 = vadd.f32 %v1830_v14, %v1524_v35 }
 0xb06   :  { %v1533_v38 = vpack.c.bf16 %v1532_v19, %v1531_v36  ;;  %v1844_v19 = vld [vmem:[%s2613_s12] ss:$0 sm:$0xff] }
 0xb08   :  { %2063 = vmatmul.mubr.msk.bf16.vlgmr.msra.gmra.mrb[56].mxu1 %vm54_vm0, %v1533_v38 }
 0xbdb   :  { %v1594_v50 = vpop.f32.mrb[56].mxu1 }
 0xbdc   :  { %v1595_v51 = vadd.f32 %v1831_v49, %v1594_v50  ;;  %v2064_v27 = vpop.f32.mrb[57].mxu1 }
 0xbdd   :  { %v1597_v62 = vpop.f32.mrb[58].mxu1 }
 0xbde   :  { %v1603_v52 = vmul.f32 0.044715, %v1595_v51  ;;  %v1598_v54 = vadd.f32 %v1831_v49, %v1597_v62  ;;  %v2065_v55 = vpop.f32.mrb[59].mxu1  ;;  %v1601_v3 = vmul.f32 0.5, %v1595_v51 }
 0xbe0   :  { %v1605_v53 = vmul.f32 %v1603_v52, %v1595_v51  ;;  %v1604_v56 = vmul.f32 0.044715, %v1598_v54  ;;  %v1602_v6 = vmul.f32 0.5, %v1598_v54 }
 0xbe2   :  { %v1607_v57 = vmul.f32 %v1605_v53, %v1595_v51  ;;  %v1606_v39 = vmul.f32 %v1604_v56, %v1598_v54 }
 0xbe4   :  { %v1609_v58 = vadd.f32 %v1607_v57, %v1595_v51  ;;  %v1608_v59 = vmul.f32 %v1606_v39, %v1598_v54 }
 0xbe6   :  { %v1611_v60 = vmul.f32 0.7978846, %v1609_v58  ;;  %v1610_v37 = vadd.f32 %v1608_v59, %v1598_v54 }
 0xbe8   :  { %2154 = vtanh.f32 %v1611_v60  ;;  %v1612_v61 = vmul.f32 0.7978846, %v1610_v37 }
 0xbea   :  { %2156 = vtanh.f32 %v1612_v61 }
 0xbf2   :  { %v2155_v63 = vpop.eup %2154 }
 0xbf3   :  { %v1615_v0 = vadd.f32 1.0, %v2155_v63 }
 0xbf4   :  { %v2157_v40 = vpop.eup %2156 }
 0xbf5   :  { %v1616_v7 = vadd.f32 1.0, %v2157_v40  ;;  %v1617_v9 = vmul.f32 %v1615_v0, %v1601_v3 }
 0xbf7   :  { %v1618_v41 = vmul.f32 %v1616_v7, %v1602_v6 }
 0xbf9   :  { %v1619_v10 = vpack.c.bf16 %v1618_v41, %v1617_v9 }
 0xbfb   :  { %2083 = vmatmul.mubr.bf16.vlgmr.msra.gmra.mrb[44].mxu0 %v1619_v10 }
 0xcce   :  { %v1725_v11 = vpop.f32.mrb[44].mxu0 }
 0xccf   :  { %v1726_v12 = vadd.f32 %v1835_v1, %v1725_v11  ;;  %v2084_v13 = vpop.f32.mrb[45].mxu0 }
 0xcd0   :  { %v1728_v15 = vpop.f32.mrb[46].mxu0 }
 0xcd1   :  { %v1729_v16 = vadd.f32 %v1835_v1, %v1728_v15  ;;  %v2085_v17 = vpop.f32.mrb[47].mxu0  ;;  %v1732_v18 = vadd.f32 %v1726_v12, %v2482_v5 }
 0xcd3   :  { %v1736_v20 = vsel %vm54_vm0, %v1732_v18, 0.0  ;;  %v1733_v2 = vadd.f32 %v1729_v16, %v2525_v8 }
 0xcd4   :  { %1737 = vadd.xlane.f32.xlu0 %v1736_v20 }
 0xcd5   :  { %v1739_v4 = vsel %vm54_vm0, %v1733_v2, 0.0 }
 0xcd6   :  { %1740 = vadd.xlane.f32.xlu1 %v1739_v4 }
 0xd61   :  { %v1738_v22 = vpop.xlane.xlu0 %1737 }
 0xd62   :  { %v1742_v23 = vmul.f32 0.03125, %v1738_v22 }
 0xd63   :  { %v1741_v24 = vpop.xlane.xlu1 %1740 }
 0xd64   :  { %v1744_v25 = vsub.f32 %v1732_v18, %v1742_v23  ;;  %v1743_v26 = vmul.f32 0.03125, %v1741_v24 }
 0xd66   :  { %v1745_v28 = vsub.f32 %v1733_v2, %v1743_v26  ;;  %v1746_v29 = vmul.f32 %v1744_v25, %v1744_v25 }
 0xd68   :  { %v1748_v30 = vsel %vm54_vm0, %v1746_v29, 0.0  ;;  %v1747_v31 = vmul.f32 %v1745_v28, %v1745_v28 }
 0xd69   :  { %1749 = vadd.xlane.f32.xlu0 %v1748_v30 }
 0xd6a   :  { %v1751_v5 = vsel %vm54_vm0, %v1747_v31, 0.0 }
 0xd6b   :  { %1752 = vadd.xlane.f32.xlu1 %v1751_v5 }
 0xdf6   :  { %v1750_v32 = vpop.xlane.xlu0 %1749 }
 0xdf7   :  { %v1754_v8 = vmul.f32 0.03125, %v1750_v32 }
 0xdf8   :  { %v1753_v33 = vpop.xlane.xlu1 %1752 }
 0xdf9   :  { %v1756_v34 = vadd.f32 1e-05, %v1754_v8  ;;  %v1755_v14 = vmul.f32 0.03125, %v1753_v33 }
 0xdfb   :  { %2158 = vrsqrt.f32 %v1756_v34  ;;  %v1757_v35 = vadd.f32 1e-05, %v1755_v14 }
 0xdfd   :  { %2160 = vrsqrt.f32 %v1757_v35 }
 0xe05   :  { %v2159_v36 = vpop.eup %2158 }
 0xe06   :  { %v1760_v38 = vmul.f32 %v2159_v36, %v1744_v25 }
 0xe07   :  { %v2161_v42 = vpop.eup %2160 }
 0xe08   :  { %v1768_v44 = vmul.f32 %v1844_v19, %v1760_v38  ;;  %v1761_v45 = vmul.f32 %v2161_v42, %v1745_v28 }
 0xe0a   :  { %v1776_v21 = vadd.f32 %v1845_v43, %v1768_v44  ;;  %v1769_v46 = vmul.f32 %v1844_v19, %v1761_v45 }
 0xe0c   :  { %v1848_v47 = vpack.c.bf16 %v1776_v21, %v1776_v21  ;;  %v1777_v48 = vadd.f32 %v1845_v43, %v1769_v46 }
 0xe0e   :  { %1787 = vst.msk [vmem:[%s2615_s14] sm:$0xf] %vm1786_vm6, %v1848_v47  ;;  %v1849_v49 = vpack.c.bf16 %v1777_v48, %v1777_v48 }
 0xe10   :  { %1788 = vst.msk [vmem:[%s2615_s14 + $0x4] sm:$0xf] %vm1786_vm6, %v1849_v49 }

</bundles_post_ra>
